<compile_context>
chip_gen: v7x
topology: tpu7x:2x2x1
jax: 0.10.0
libtpu: 0.0.40
codegen_flags: <defaults>
</compile_context>

<pallas_src>
import functools
import numpy as np

import jax
import jax.numpy as jnp
from jax.experimental import pallas as pl
from jax.experimental.pallas import tpu as pltpu


# ----------------------------- small helpers (plain JAX / numpy) -----------------------------

def _round_up(a, b):
    return ((a + b - 1) // b) * b


def _pad_last(a, n):
    pad = n - a.shape[-1]
    if pad == 0:
        return a
    return jnp.pad(a, [(0, 0)] * (a.ndim - 1) + [(0, pad)])


def _pad_first(a, n):
    pad = n - a.shape[0]
    if pad == 0:
        return a
    return jnp.pad(a, [(0, pad)] + [(0, 0)] * (a.ndim - 1))


def _window_partition(x, ws):
    B, H, W, C = x.shape
    x = x.reshape(B, H // ws, ws, W // ws, ws, C)
    return x.transpose(0, 1, 3, 2, 4, 5).reshape(-1, ws, ws, C)


def _window_reverse(windows, ws, H, W):
    B = windows.shape[0] // (H * W // ws // ws)
    x = windows.reshape(B, H // ws, W // ws, ws, ws, -1)
    return x.transpose(0, 1, 3, 2, 4, 5).reshape(B, H, W, -1)


def _np_window_partition(x, ws):
    B, H, W, C = x.shape
    x = x.reshape(B, H // ws, ws, W // ws, ws, C)
    return x.transpose(0, 1, 3, 2, 4, 5).reshape(-1, ws, ws, C)


def _calculate_mask(H, W, ws, shift):
    """Same semantics as SwinTransformerBlock.calculate_mask (numpy, static)."""
    img_mask = np.zeros((1, H, W, 1), np.float32)
    h_slices = (slice(0, -ws), slice(-ws, -shift), slice(-shift, None))
    w_slices = (slice(0, -ws), slice(-ws, -shift), slice(-shift, None))
    cnt = 0
    for h in h_slices:
        for w in w_slices:
            img_mask[:, h, w, :] = cnt
            cnt += 1
    mask_windows = _np_window_partition(img_mask, ws).reshape(-1, ws * ws)
    attn_mask = mask_windows[:, None, :] - mask_windows[:, :, None]
    return np.where(attn_mask != 0, -100.0, 0.0).astype(np.float32)  # (nW, N, N)


def _relative_position_index(ws):
    coords = np.stack(np.meshgrid(np.arange(ws), np.arange(ws), indexing="ij"))
    coords_flatten = coords.reshape(2, -1)
    rel = coords_flatten[:, :, None] - coords_flatten[:, None, :]
    rel = rel.transpose(1, 2, 0).astype(np.int64)
    rel[:, :, 0] += ws - 1
    rel[:, :, 1] += ws - 1
    rel[:, :, 0] *= 2 * ws - 1
    return rel.sum(-1)  # (N, N)


def _hw_budgets():
    """Generation-aware tile / VMEM budgets (v5e/v6e: 128 MiB VMEM, v7x: 64 MiB)."""
    vmem_phys = 64 * 1024 * 1024
    try:
        vmem_phys = int(pltpu.get_tpu_info().vmem_capacity_bytes)
    except Exception:
        pass
    if vmem_phys >= 100 * 1024 * 1024:          # v5e / v6e
        return {"vmem_limit": 64 * 1024 * 1024, "attn_tokens": 4096, "mlp_tm": 1024}
    return {"vmem_limit": 48 * 1024 * 1024, "attn_tokens": 2048, "mlp_tm": 512}


def _pick_window_batch(B, N, token_budget):
    """Largest divisor of B such that bb*N tokens fit the per-step budget."""
    best = 1
    for bb in range(1, B + 1):
        if B % bb == 0 and bb * N <= token_budget:
            best = bb
    return best


def _pick_mlp_tile(M, tm_target):
    """Row tile: multiple of 8, <= target, and >= 2 grid steps when possible."""
    tm = min(tm_target, _round_up(M, 8))
    if M >= 16:
        tm = min(tm, _round_up((M + 1) // 2, 8))
    return max(tm, 8)


# ----------------------------- Pallas kernels -----------------------------

def _attn_kernel(num_heads, head_dim, C, has_mask, *refs):
    """One window position, bb images: LN1 + QKV + W-MSA (+bias/mask) + proj."""
    if has_mask:
        (x_ref, lnw_ref, lnb_ref, wqkv_ref, bqkv_ref,
         wproj_ref, bproj_ref, bias_ref, mask_ref, o_ref) = refs
    else:
        (x_ref, lnw_ref, lnb_ref, wqkv_ref, bqkv_ref,
         wproj_ref, bproj_ref, bias_ref, o_ref) = refs
        mask_ref = None

    bb, wsh, wsw, Cp = x_ref.shape
    N = wsh * wsw
    R = bb * N
    inv_c = 1.0 / C

    x = x_ref[...].astype(jnp.float32).reshape(R, Cp)

    # LayerNorm1 over the real C channels only (pad channels are zero), eps=1e-5.
    mu = jnp.sum(x, axis=-1, keepdims=True) * inv_c
    ex2 = jnp.sum(x * x, axis=-1, keepdims=True) * inv_c
    var = jnp.maximum(ex2 - mu * mu, 0.0)
    xn = (x - mu) * jax.lax.rsqrt(var + 1e-5)
    xn = xn * lnw_ref[...] + lnb_ref[...]          # pad channels -> 0 again

    # QKV projection for every window in the block (bf16 MXU inputs, f32 acc).
    mxu = wqkv_ref.dtype
    qkv = jnp.dot(xn.astype(mxu), wqkv_ref[...],
                  preferred_element_type=jnp.float32) + bqkv_ref[...]      # (R, 3C)
    qkv = qkv.reshape(bb, N, 3 * C)

    bias = bias_ref[...].astype(jnp.float32)       # (heads, N, N) rel-pos bias
    if mask_ref is not None:
        bias = bias + mask_ref[...].astype(jnp.float32)  # + (1, N, N) shift mask

    # TODO(synk): head-batched einsum needs multi-batch-dim dot_general or an
    # in-kernel (0,2,1,3) transpose; keep a short static per-head loop instead.
    head_outs = []
    for h in range(num_heads):
        lo = h * head_dim
        q = qkv[:, :, lo:lo + head_dim]            # qk scale folded into Wq / bq
        k = qkv[:, :, C + lo:C + lo + head_dim]
        v = qkv[:, :, 2 * C + lo:2 * C + lo + head_dim]

        s = jnp.einsum("bqd,bkd->bqk", q.astype(mxu), k.astype(mxu),
                       preferred_element_type=jnp.float32)                 # (bb, N, N)
        s = s + bias[h]
        s = s - jnp.max(s, axis=-1, keepdims=True)
        e = jnp.exp(s)
        p = e * pl.reciprocal(jnp.sum(e, axis=-1, keepdims=True), approx=True)
        head_outs.append(jnp.einsum("bqk,bkd->bqd", p.astype(mxu), v.astype(mxu),
                                    preferred_element_type=jnp.float32))
    out = jnp.concatenate(head_outs, axis=-1).reshape(R, C)

    y = jnp.dot(out.astype(mxu), wproj_ref[...],
                preferred_element_type=jnp.float32) + bproj_ref[...]        # (R, Cp)
    o_ref[...] = y.reshape(bb, wsh, wsw, Cp).astype(o_ref.dtype)


def _mlp_kernel(C, sc_ref, at_ref, lnw_ref, lnb_ref, w1_ref, b1_ref, w2_ref, b2_ref, o_ref):
    """x = shortcut + attn;  out = x + fc2(GELU(fc1(LN2(x))))  on a (TM, Cp) row tile."""
    x = sc_ref[...].astype(jnp.float32) + at_ref[...].astype(jnp.float32)
    inv_c = 1.0 / C

    mu = jnp.sum(x, axis=-1, keepdims=True) * inv_c
    ex2 = jnp.sum(x * x, axis=-1, keepdims=True) * inv_c
    var = jnp.maximum(ex2 - mu * mu, 0.0)
    xn = (x - mu) * jax.lax.rsqrt(var + 1e-5)
    xn = xn * lnw_ref[...] + lnb_ref[...]

    mxu = w1_ref.dtype
    h = jnp.dot(xn.astype(mxu), w1_ref[...],
                preferred_element_type=jnp.float32) + b1_ref[...]
    # exact (erf-based) GELU in f32, matching nn.GELU default
    h = 0.5 * h * (1.0 + jax.lax.erf(h * 0.7071067811865476))
    y = jnp.dot(h.astype(mxu), w2_ref[...],
                preferred_element_type=jnp.float32) + b2_ref[...]
    o_ref[...] = (x + y).astype(o_ref.dtype)


# ----------------------------- pallas_call wrappers -----------------------------

def _window_attention_call(xv, blk, *, num_heads, C, ws, bb, nWw, shift, vmem_limit):
    B, H, W, Cp = xv.shape
    N = ws * ws
    nWh = H // ws
    head_dim = C // num_heads
    has_mask = shift > 0
    kernel = functools.partial(_attn_kernel, num_heads, head_dim, C, has_mask)

    in_specs = [
        pl.BlockSpec((bb, ws, ws, Cp), lambda b, i, j: (b, i, j, 0)),   # window block
        pl.BlockSpec((1, Cp), lambda b, i, j: (0, 0)),                  # ln1 weight
        pl.BlockSpec((1, Cp), lambda b, i, j: (0, 0)),                  # ln1 bias
        pl.BlockSpec((Cp, 3 * C), lambda b, i, j: (0, 0)),              # Wqkv^T (bf16)
        pl.BlockSpec((1, 3 * C), lambda b, i, j: (0, 0)),               # bqkv
        pl.BlockSpec((C, Cp), lambda b, i, j: (0, 0)),                  # Wproj^T (bf16)
        pl.BlockSpec((1, Cp), lambda b, i, j: (0, 0)),                  # bproj
        pl.BlockSpec((num_heads, N, N), lambda b, i, j: (0, 0, 0)),     # rel-pos bias (bf16)
    ]
    args = [xv, blk["ln1_w"], blk["ln1_b"], blk["wqkv_t"], blk["bqkv"],
            blk["wproj_t"], blk["bproj"], blk["rel_bias"]]
    if has_mask:
        # shift mask sliced per window position (image-major window ordering)
        in_specs.append(pl.BlockSpec((1, N, N), lambda b, i, j: (i * nWw + j, 0, 0)))
        args.append(blk["mask"])

    tokens = B * H * W
    w_bytes = (blk["wqkv_t"].size + blk["wproj_t"].size) * 2
    bias_bytes = blk["rel_bias"].size * 2 + (blk["mask"].size * 2 if has_mask else 0)
    cost = pl.CostEstimate(
        flops=int(2 * tokens * Cp * 3 * C            # QKV projection
                  + 4 * tokens * N * C               # q@k^T + p@v
                  + 2 * tokens * C * Cp),            # output projection
        transcendentals=int(tokens * num_heads * (N + 1)),
        bytes_accessed=int(2 * tokens * Cp * 4 + w_bytes + bias_bytes),
    )
    return pl.pallas_call(
        kernel,
        out_shape=jax.ShapeDtypeStruct((B, H, W, Cp), xv.dtype),
        grid=(B // bb, nWh, nWw),
        in_specs=in_specs,
        out_specs=pl.BlockSpec((bb, ws, ws, Cp), lambda b, i, j: (b, i, j, 0)),
        compiler_params=pltpu.CompilerParams(
            dimension_semantics=("parallel", "parallel", "parallel"),
            vmem_limit_bytes=vmem_limit),
        cost_estimate=cost,
    )(*args)


def _mlp_call(shortcut, attn, blk, *, C, tm, vmem_limit):
    M, Cp = shortcut.shape
    Hp = blk["w1_t"].shape[1]
    w_bytes = (blk["w1_t"].size + blk["w2_t"].size) * 2
    cost = pl.CostEstimate(
        flops=int(4 * M * Cp * Hp),
        transcendentals=int(M * Hp),
        bytes_accessed=int(3 * M * Cp * 4 + w_bytes),
    )
    return pl.pallas_call(
        functools.partial(_mlp_kernel, C),
        out_shape=jax.ShapeDtypeStruct((M, Cp), shortcut.dtype),
        grid=(M // tm,),
        in_specs=[
            pl.BlockSpec((tm, Cp), lambda i: (i, 0)),     # shortcut rows
            pl.BlockSpec((tm, Cp), lambda i: (i, 0)),     # attention-output rows
            pl.BlockSpec((1, Cp), lambda i: (0, 0)),      # ln2 weight
            pl.BlockSpec((1, Cp), lambda i: (0, 0)),      # ln2 bias
            pl.BlockSpec((Cp, Hp), lambda i: (0, 0)),     # W1^T (bf16)
            pl.BlockSpec((1, Hp), lambda i: (0, 0)),      # b1
            pl.BlockSpec((Hp, Cp), lambda i: (0, 0)),     # W2^T (bf16)
            pl.BlockSpec((1, Cp), lambda i: (0, 0)),      # b2
        ],
        out_specs=pl.BlockSpec((tm, Cp), lambda i: (i, 0)),
        compiler_params=pltpu.CompilerParams(
            dimension_semantics=("parallel",),
            vmem_limit_bytes=vmem_limit),
        cost_estimate=cost,
    )(shortcut, attn, blk["ln2_w"], blk["ln2_b"],
      blk["w1_t"], blk["b1"], blk["w2_t"], blk["b2"])


# ----------------------------- parameters -----------------------------

def init_basic_layer_params(key, dim, depth, num_heads, window_size, mlp_ratio,
                            input_resolution):
    """Raw (unpadded, f32) parameters in the PyTorch module's layout semantics."""
    if min(input_resolution) <= window_size:        # same adjustment as the module
        ws = min(input_resolution)
        forced_no_shift = True
    else:
        ws = window_size
        forced_no_shift = False

    hidden = int(dim * mlp_ratio)
    n_rel = (2 * ws - 1) * (2 * ws - 1)
    params, shifts = [], []
    for i in range(depth):
        key, *ks = jax.random.split(key, 11)
        shifts.append(0 if (i % 2 == 0 or forced_no_shift) else ws // 2)
        params.append({
            "ln1_w": jnp.ones((1, dim), jnp.float32),
            "ln1_b": jnp.zeros((1, dim), jnp.float32),
            # (in_features, out_features) layout; q/k/v column order = [3, heads, hd].
            "wqkv_t": (jax.random.normal(ks[0], (dim, 3 * dim)) * 0.02).astype(jnp.float32),
            "bqkv": (jax.random.normal(ks[1], (1, 3 * dim)) * 0.02).astype(jnp.float32),
            "wproj_t": (jax.random.normal(ks[2], (dim, dim)) * 0.02).astype(jnp.float32),
            "bproj": (jax.random.normal(ks[3], (1, dim)) * 0.02).astype(jnp.float32),
            "rel_table": (jax.random.normal(ks[4], (n_rel, num_heads)) * 0.02).astype(jnp.float32),
            "ln2_w": jnp.ones((1, dim), jnp.float32),
            "ln2_b": jnp.zeros((1, dim), jnp.float32),
            "w1_t": (jax.random.normal(ks[5], (dim, hidden)) * 0.02).astype(jnp.float32),
            "b1": (jax.random.normal(ks[6], (1, hidden)) * 0.02).astype(jnp.float32),
            "w2_t": (jax.random.normal(ks[7], (hidden, dim)) * 0.02).astype(jnp.float32),
            "b2": (jax.random.normal(ks[8], (1, dim)) * 0.02).astype(jnp.float32),
        })
    return params, ws, tuple(shifts)


def prepare_layer_params(raw_params, *, x_size, ws, num_heads, shifts,
                         mxu_dtype=jnp.bfloat16):
    """Kernel-layout params: lane-padded (C->Cp, hidden->Hp), qk scale folded into
    the q-columns of Wqkv/bqkv, matmul weights bf16, bias/mask bf16."""
    H, W = x_size
    C = raw_params[0]["ln1_w"].shape[-1]
    hidden = raw_params[0]["w1_t"].shape[-1]
    N = ws * ws
    Cp = _round_up(C, 128)
    Hp = _round_up(hidden, 128)
    head_dim = C // num_heads
    scale = head_dim ** (-0.5)
    rpi = _relative_position_index(ws).reshape(-1)
    col_scale = np.concatenate(
        [np.full(C, scale, np.float32), np.ones(2 * C, np.float32)])[None, :]

    prepped = []
    for blk, shift in zip(raw_params, shifts):
        rel = blk["rel_table"][rpi].reshape(N, N, num_heads).transpose(2, 0, 1)
        p = {
            "ln1_w": _pad_last(blk["ln1_w"], Cp),
            "ln1_b": _pad_last(blk["ln1_b"], Cp),
            "wqkv_t": _pad_first(blk["wqkv_t"] * col_scale, Cp).astype(mxu_dtype),
            "bqkv": (blk["bqkv"] * col_scale).astype(jnp.float32),
            "wproj_t": _pad_last(blk["wproj_t"], Cp).astype(mxu_dtype),
            "bproj": _pad_last(blk["bproj"], Cp),
            "rel_bias": rel.astype(jnp.bfloat16),
            "ln2_w": _pad_last(blk["ln2_w"], Cp),
            "ln2_b": _pad_last(blk["ln2_b"], Cp),
            "w1_t": _pad_first(_pad_last(blk["w1_t"], Hp), Cp).astype(mxu_dtype),
            "b1": _pad_last(blk["b1"], Hp),
            "w2_t": _pad_first(_pad_last(blk["w2_t"], Cp), Hp).astype(mxu_dtype),
            "b2": _pad_last(blk["b2"], Cp),
        }
        if shift > 0:
            p["mask"] = jnp.asarray(_calculate_mask(H, W, ws, shift)).astype(jnp.bfloat16)
        prepped.append(p)
    return prepped


# ----------------------------- forward -----------------------------

@functools.partial(jax.jit, static_argnames=("x_size", "ws", "num_heads", "shifts"))
def basic_layer_forward(x, kparams, *, x_size, ws, num_heads, shifts):
    """BasicLayer.forward (downsample=None, use_checkpoint=False, eval mode)."""
    H, W = x_size
    B, L, C = x.shape
    N = ws * ws
    nWw = W // ws
    Cp = kparams[0]["ln1_w"].shape[-1]

    budgets = _hw_budgets()
    bb = _pick_window_batch(B, N, budgets["attn_tokens"])
    M = B * L
    tm = _pick_mlp_tile(M, budgets["mlp_tm"])
    Mp = _round_up(M, tm)

    # Pad channels once at layer entry; pads stay exactly zero through every block.
    xp = jnp.pad(x, ((0, 0), (0, 0), (0, Cp - C))) if Cp > C else x        # (B, L, Cp)

    for blk, shift in zip(kparams, shifts):
        shortcut2d = xp.reshape(M, Cp)
        xv = xp.reshape(B, H, W, Cp)
        if shift > 0:
            xv = jnp.roll(xv, shift=(-shift, -shift), axis=(1, 2))

        # LN1 + W-MSA + proj fused; window partition/reverse folded into BlockSpecs.
        attn4 = _window_attention_call(
            xv, blk, num_heads=num_heads, C=C, ws=ws, bb=bb, nWw=nWw,
            shift=shift, vmem_limit=budgets["vmem_limit"])

        if shift > 0:
            attn4 = jnp.roll(attn4, shift=(shift, shift), axis=(1, 2))
        at2d = attn4.reshape(M, Cp)

        sc, at = shortcut2d, at2d
        if Mp > M:
            sc = jnp.pad(sc, ((0, Mp - M), (0, 0)))
            at = jnp.pad(at, ((0, Mp - M), (0, 0)))
        # Both residual adds + LN2 + MLP fused in one tiled, pipelined kernel.
        y = _mlp_call(sc, at, blk, C=C, tm=tm, vmem_limit=budgets["vmem_limit"])
        xp = y[:M].reshape(B, L, Cp)
    return xp[:, :, :C]


# ----------------------------- pure-JAX reference (PyTorch semantics) -----------------------------

def _reference_forward(x, raw_params, *, x_size, ws, num_heads, shifts):
    H, W = x_size
    B, L, C = x.shape
    N = ws * ws
    nW = (H // ws) * (W // ws)
    hd = C // num_heads
    scale = hd ** (-0.5)
    rpi = _relative_position_index(ws).reshape(-1)

    def ln(v, w, b):
        mu = jnp.mean(v, -1, keepdims=True)
        var = jnp.mean(jnp.square(v - mu), -1, keepdims=True)
        return (v - mu) / jnp.sqrt(var + 1e-5) * w + b

    bf = lambda a: a.astype(jnp.bfloat16).astype(jnp.float32)  # match kernel bf16 weights

    for blk, shift in zip(raw_params, shifts):
        shortcut = x
        xn = ln(x, blk["ln1_w"], blk["ln1_b"])
        xv = xn.reshape(B, H, W, C)
        if shift > 0:
            xv = jnp.roll(xv, shift=(-shift, -shift), axis=(1, 2))
        xw = _window_partition(xv, ws).reshape(-1, N, C)
        B_ = xw.shape[0]
        qkv = xw @ bf(blk["wqkv_t"]) + blk["bqkv"]
        qkv = qkv.reshape(B_, N, 3, num_heads, hd).transpose(2, 0, 3, 1, 4)
        q, k, v = qkv[0] * scale, qkv[1], qkv[2]
        attn = q @ jnp.swapaxes(k, -1, -2)
        rel = blk["rel_table"][rpi].reshape(N, N, num_heads).transpose(2, 0, 1)
        attn = attn + rel[None]
        if shift > 0:
            mask = jnp.asarray(_calculate_mask(H, W, ws, shift))
            attn = attn.reshape(B_ // nW, nW, num_heads, N, N) + mask[None, :, None]
            attn = attn.reshape(B_, num_heads, N, N)
        attn = jax.nn.softmax(attn, axis=-1)
        out = (attn @ v).transpose(0, 2, 1, 3).reshape(B_, N, C)
        out = out @ bf(blk["wproj_t"]) + blk["bproj"]
        xv = _window_reverse(out.reshape(-1, ws, ws, C), ws, H, W)
        if shift > 0:
            xv = jnp.roll(xv, shift=(shift, shift), axis=(1, 2))
        x = shortcut + xv.reshape(B, L, C)
        xn2 = ln(x, blk["ln2_w"], blk["ln2_b"])
        h1 = xn2 @ bf(blk["w1_t"]) + blk["b1"]
        h1 = 0.5 * h1 * (1.0 + jax.lax.erf(h1 * 0.7071067811865476))
        x = x + (h1 @ bf(blk["w2_t"]) + blk["b2"])
    return x


# ----------------------------- main -----------------------------

if __name__ == "__main__":
    # Small BasicLayer: dim=32, input_resolution=(16,16), depth=2, heads=4,
    # window_size=8 (2nd block is a shifted-window block), mlp_ratio=2.0.
    dim = 32
    depth = 2
    num_heads = 4
    window_size = 8
    input_resolution = (16, 16)
    mlp_ratio = 2.0
    B = 2

    key = jax.random.PRNGKey(0)
    kx, kp = jax.random.split(key)
    H, W = input_resolution
    x = jax.random.normal(kx, (B, H * W, dim), dtype=jnp.float32)

    raw_params, ws, shifts = init_basic_layer_params(
        kp, dim, depth, num_heads, window_size, mlp_ratio, input_resolution)
    kparams = prepare_layer_params(raw_params, x_size=input_resolution, ws=ws,
                                   num_heads=num_heads, shifts=shifts)

    out = basic_layer_forward(x, kparams, x_size=input_resolution, ws=ws,
                              num_heads=num_heads, shifts=shifts)
    out = jax.block_until_ready(out)

    ref = _reference_forward(x, raw_params, x_size=input_resolution, ws=ws,
                             num_heads=num_heads, shifts=shifts)
    ref = jax.block_until_ready(ref)

    assert out.shape == (B, H * W, dim)
    assert bool(jnp.all(jnp.isfinite(out)))
    max_err = float(jnp.max(jnp.abs(out - ref)))
    assert max_err < 5e-2, f"mismatch vs reference: max abs err {max_err}"
    print("KERNEL_OK")
</pallas_src>

<mosaic_0001>
module attributes {stable_mosaic.version = 11 : i64} {
  func.func @_attn_kernel(%arg0: i32, %arg1: i32, %arg2: i32, %arg3: memref<2x8x8x128xf32, #tpu.memory_space<vmem>>, %arg4: memref<1x128xf32, #tpu.memory_space<vmem>>, %arg5: memref<1x128xf32, #tpu.memory_space<vmem>>, %arg6: memref<128x96xbf16, #tpu.memory_space<vmem>>, %arg7: memref<1x96xf32, #tpu.memory_space<vmem>>, %arg8: memref<32x128xbf16, #tpu.memory_space<vmem>>, %arg9: memref<1x128xf32, #tpu.memory_space<vmem>>, %arg10: memref<4x64x64xbf16, #tpu.memory_space<vmem>>, %arg11: memref<2x8x8x128xf32, #tpu.memory_space<vmem>>) attributes {dimension_semantics = [#tpu.dimension_semantics<parallel>, #tpu.dimension_semantics<parallel>, #tpu.dimension_semantics<parallel>], iteration_bounds = array<i64: 1, 2, 2>, scalar_prefetch = 0 : i64, scratch_operands = 0 : i64, tpu.core_type = #tpu.core_type<tc>, window_params = [{transform_indices = @transform_0, window_bounds = array<i64: 2, 8, 8, 128>}, {pipeline_mode = #tpu.pipeline_mode<synchronous>, transform_indices = @transform_1, window_bounds = array<i64: 1, 128>}, {pipeline_mode = #tpu.pipeline_mode<synchronous>, transform_indices = @transform_2, window_bounds = array<i64: 1, 128>}, {pipeline_mode = #tpu.pipeline_mode<synchronous>, transform_indices = @transform_3, window_bounds = array<i64: 128, 96>}, {pipeline_mode = #tpu.pipeline_mode<synchronous>, transform_indices = @transform_4, window_bounds = array<i64: 1, 96>}, {pipeline_mode = #tpu.pipeline_mode<synchronous>, transform_indices = @transform_5, window_bounds = array<i64: 32, 128>}, {pipeline_mode = #tpu.pipeline_mode<synchronous>, transform_indices = @transform_6, window_bounds = array<i64: 1, 128>}, {pipeline_mode = #tpu.pipeline_mode<synchronous>, transform_indices = @transform_7, window_bounds = array<i64: 4, 64, 64>}, {transform_indices = @transform_8, window_bounds = array<i64: 2, 8, 8, 128>}]} {
    %c0 = arith.constant 0 : index
    %c0_0 = arith.constant 0 : index
    %c0_1 = arith.constant 0 : index
    %c0_2 = arith.constant 0 : index
    %0 = vector.load %arg3[%c0, %c0_0, %c0_1, %c0_2] : memref<2x8x8x128xf32, #tpu.memory_space<vmem>>, vector<2x8x8x128xf32>
    %1 = vector.shape_cast %0 : vector<2x8x8x128xf32> to vector<128x128xf32>
    %cst = arith.constant dense<0.000000e+00> : vector<128xf32>
    %2 = vector.multi_reduction <add>, %1, %cst [1] : vector<128x128xf32> to vector<128xf32>
    %3 = vector.shape_cast %2 : vector<128xf32> to vector<128x1xf32>
    %cst_3 = arith.constant 3.125000e-02 : f32
    %4 = vector.broadcast %cst_3 : f32 to vector<128x1xf32>
    %5 = arith.mulf %3, %4 : vector<128x1xf32>
    %6 = arith.mulf %1, %1 : vector<128x128xf32>
    %cst_4 = arith.constant dense<0.000000e+00> : vector<128xf32>
    %7 = vector.multi_reduction <add>, %6, %cst_4 [1] : vector<128x128xf32> to vector<128xf32>
    %8 = vector.shape_cast %7 : vector<128xf32> to vector<128x1xf32>
    %cst_5 = arith.constant 3.125000e-02 : f32
    %9 = vector.broadcast %cst_5 : f32 to vector<128x1xf32>
    %10 = arith.mulf %8, %9 : vector<128x1xf32>
    %11 = arith.mulf %5, %5 : vector<128x1xf32>
    %12 = arith.subf %10, %11 : vector<128x1xf32>
    %cst_6 = arith.constant 0.000000e+00 : f32
    %13 = vector.broadcast %cst_6 : f32 to vector<128x1xf32>
    %14 = arith.maximumf %12, %13 : vector<128x1xf32>
    %15 = vector.broadcast %5 : vector<128x1xf32> to vector<128x128xf32>
    %16 = arith.subf %1, %15 : vector<128x128xf32>
    %cst_7 = arith.constant 9.99999974E-6 : f32
    %17 = vector.broadcast %cst_7 : f32 to vector<128x1xf32>
    %18 = arith.addf %14, %17 : vector<128x1xf32>
    %19 = math.rsqrt %18 : vector<128x1xf32>
    %20 = vector.broadcast %19 : vector<128x1xf32> to vector<128x128xf32>
    %21 = arith.mulf %16, %20 : vector<128x128xf32>
    %c0_8 = arith.constant 0 : index
    %c0_9 = arith.constant 0 : index
    %22 = vector.load %arg4[%c0_8, %c0_9] : memref<1x128xf32, #tpu.memory_space<vmem>>, vector<1x128xf32>
    %23 = vector.broadcast %22 : vector<1x128xf32> to vector<128x128xf32>
    %24 = arith.mulf %21, %23 : vector<128x128xf32>
    %c0_10 = arith.constant 0 : index
    %c0_11 = arith.constant 0 : index
    %25 = vector.load %arg5[%c0_10, %c0_11] : memref<1x128xf32, #tpu.memory_space<vmem>>, vector<1x128xf32>
    %26 = vector.broadcast %25 : vector<1x128xf32> to vector<128x128xf32>
    %27 = arith.addf %24, %26 : vector<128x128xf32>
    %28 = arith.truncf %27 : vector<128x128xf32> to vector<128x128xbf16>
    %c0_12 = arith.constant 0 : index
    %c0_13 = arith.constant 0 : index
    %29 = vector.load %arg6[%c0_12, %c0_13] : memref<128x96xbf16, #tpu.memory_space<vmem>>, vector<128x96xbf16>
    %cst_14 = arith.constant dense<0.000000e+00> : vector<128x96xf32>
    %30 = tpu.matmul %28, %29, %cst_14 {dimension_numbers = #tpu.dot_dimension_numbers<[1], [0], [0], [1], [0, 0, 1, 1], [], []>} : vector<128x128xbf16>, vector<128x96xbf16>, vector<128x96xf32> -> vector<128x96xf32>
    %c0_15 = arith.constant 0 : index
    %c0_16 = arith.constant 0 : index
    %31 = vector.load %arg7[%c0_15, %c0_16] : memref<1x96xf32, #tpu.memory_space<vmem>>, vector<1x96xf32>
    %32 = vector.broadcast %31 : vector<1x96xf32> to vector<128x96xf32>
    %33 = arith.addf %30, %32 : vector<128x96xf32>
    %34 = vector.shape_cast %33 : vector<128x96xf32> to vector<2x64x96xf32>
    %c0_17 = arith.constant 0 : index
    %c0_18 = arith.constant 0 : index
    %c0_19 = arith.constant 0 : index
    %35 = vector.load %arg10[%c0_17, %c0_18, %c0_19] : memref<4x64x64xbf16, #tpu.memory_space<vmem>>, vector<4x64x64xbf16>
    %36 = arith.extf %35 : vector<4x64x64xbf16> to vector<4x64x64xf32>
    %37 = vector.extract_strided_slice %34 {offsets = [0, 0, 0], sizes = [2, 64, 8], strides = [1, 1, 1]} : vector<2x64x96xf32> to vector<2x64x8xf32>
    %38 = vector.extract_strided_slice %34 {offsets = [0, 0, 32], sizes = [2, 64, 8], strides = [1, 1, 1]} : vector<2x64x96xf32> to vector<2x64x8xf32>
    %39 = vector.extract_strided_slice %34 {offsets = [0, 0, 64], sizes = [2, 64, 8], strides = [1, 1, 1]} : vector<2x64x96xf32> to vector<2x64x8xf32>
    %40 = arith.truncf %37 : vector<2x64x8xf32> to vector<2x64x8xbf16>
    %41 = arith.truncf %38 : vector<2x64x8xf32> to vector<2x64x8xbf16>
    "tpu.trace_start"() <{level = 10 : i32, message = "bqd,bkd->bqk"}> : () -> ()
    %cst_20 = arith.constant dense<0.000000e+00> : vector<2x64x64xf32>
    %42 = tpu.matmul %40, %41, %cst_20 {dimension_numbers = #tpu.dot_dimension_numbers<[2], [2], [1], [1], [0, 0, 0, 1, 1, 1], [0], [0]>} : vector<2x64x8xbf16>, vector<2x64x8xbf16>, vector<2x64x64xf32> -> vector<2x64x64xf32>
    "tpu.trace_stop"() : () -> ()
    %43 = vector.extract_strided_slice %36 {offsets = [0, 0, 0], sizes = [1, 64, 64], strides = [1, 1, 1]} : vector<4x64x64xf32> to vector<1x64x64xf32>
    %44 = vector.shape_cast %43 : vector<1x64x64xf32> to vector<64x64xf32>
    %45 = vector.shape_cast %44 : vector<64x64xf32> to vector<1x64x64xf32>
    %46 = vector.broadcast %45 : vector<1x64x64xf32> to vector<2x64x64xf32>
    %47 = arith.addf %42, %46 : vector<2x64x64xf32>
    %cst_21 = arith.constant dense<0xFF800000> : vector<2x64xf32>
    %48 = vector.multi_reduction <maximumf>, %47, %cst_21 [2] : vector<2x64x64xf32> to vector<2x64xf32>
    %49 = vector.shape_cast %48 : vector<2x64xf32> to vector<2x64x1xf32>
    %50 = vector.broadcast %49 : vector<2x64x1xf32> to vector<2x64x64xf32>
    %51 = arith.subf %47, %50 : vector<2x64x64xf32>
    %52 = math.exp %51 : vector<2x64x64xf32>
    %cst_22 = arith.constant dense<0.000000e+00> : vector<2x64xf32>
    %53 = vector.multi_reduction <add>, %52, %cst_22 [2] : vector<2x64x64xf32> to vector<2x64xf32>
    %54 = vector.shape_cast %53 : vector<2x64xf32> to vector<2x64x1xf32>
    %55 = tpu.reciprocal %54 {approx = true} : vector<2x64x1xf32> -> vector<2x64x1xf32>
    %56 = vector.broadcast %55 : vector<2x64x1xf32> to vector<2x64x64xf32>
    %57 = arith.mulf %52, %56 : vector<2x64x64xf32>
    %58 = arith.truncf %57 : vector<2x64x64xf32> to vector<2x64x64xbf16>
    %59 = arith.truncf %39 : vector<2x64x8xf32> to vector<2x64x8xbf16>
    "tpu.trace_start"() <{level = 10 : i32, message = "bqk,bkd->bqd"}> : () -> ()
    %cst_23 = arith.constant dense<0.000000e+00> : vector<2x64x8xf32>
    %60 = tpu.matmul %58, %59, %cst_23 {dimension_numbers = #tpu.dot_dimension_numbers<[2], [1], [1], [2], [0, 0, 0, 1, 1, 2], [0], [0]>} : vector<2x64x64xbf16>, vector<2x64x8xbf16>, vector<2x64x8xf32> -> vector<2x64x8xf32>
    "tpu.trace_stop"() : () -> ()
    %61 = vector.extract_strided_slice %34 {offsets = [0, 0, 8], sizes = [2, 64, 8], strides = [1, 1, 1]} : vector<2x64x96xf32> to vector<2x64x8xf32>
    %62 = vector.extract_strided_slice %34 {offsets = [0, 0, 40], sizes = [2, 64, 8], strides = [1, 1, 1]} : vector<2x64x96xf32> to vector<2x64x8xf32>
    %63 = vector.extract_strided_slice %34 {offsets = [0, 0, 72], sizes = [2, 64, 8], strides = [1, 1, 1]} : vector<2x64x96xf32> to vector<2x64x8xf32>
    %64 = arith.truncf %61 : vector<2x64x8xf32> to vector<2x64x8xbf16>
    %65 = arith.truncf %62 : vector<2x64x8xf32> to vector<2x64x8xbf16>
    "tpu.trace_start"() <{level = 10 : i32, message = "bqd,bkd->bqk"}> : () -> ()
    %cst_24 = arith.constant dense<0.000000e+00> : vector<2x64x64xf32>
    %66 = tpu.matmul %64, %65, %cst_24 {dimension_numbers = #tpu.dot_dimension_numbers<[2], [2], [1], [1], [0, 0, 0, 1, 1, 1], [0], [0]>} : vector<2x64x8xbf16>, vector<2x64x8xbf16>, vector<2x64x64xf32> -> vector<2x64x64xf32>
    "tpu.trace_stop"() : () -> ()
    %67 = vector.extract_strided_slice %36 {offsets = [1, 0, 0], sizes = [1, 64, 64], strides = [1, 1, 1]} : vector<4x64x64xf32> to vector<1x64x64xf32>
    %68 = vector.shape_cast %67 : vector<1x64x64xf32> to vector<64x64xf32>
    %69 = vector.shape_cast %68 : vector<64x64xf32> to vector<1x64x64xf32>
    %70 = vector.broadcast %69 : vector<1x64x64xf32> to vector<2x64x64xf32>
    %71 = arith.addf %66, %70 : vector<2x64x64xf32>
    %cst_25 = arith.constant dense<0xFF800000> : vector<2x64xf32>
    %72 = vector.multi_reduction <maximumf>, %71, %cst_25 [2] : vector<2x64x64xf32> to vector<2x64xf32>
    %73 = vector.shape_cast %72 : vector<2x64xf32> to vector<2x64x1xf32>
    %74 = vector.broadcast %73 : vector<2x64x1xf32> to vector<2x64x64xf32>
    %75 = arith.subf %71, %74 : vector<2x64x64xf32>
    %76 = math.exp %75 : vector<2x64x64xf32>
    %cst_26 = arith.constant dense<0.000000e+00> : vector<2x64xf32>
    %77 = vector.multi_reduction <add>, %76, %cst_26 [2] : vector<2x64x64xf32> to vector<2x64xf32>
    %78 = vector.shape_cast %77 : vector<2x64xf32> to vector<2x64x1xf32>
    %79 = tpu.reciprocal %78 {approx = true} : vector<2x64x1xf32> -> vector<2x64x1xf32>
    %80 = vector.broadcast %79 : vector<2x64x1xf32> to vector<2x64x64xf32>
    %81 = arith.mulf %76, %80 : vector<2x64x64xf32>
    %82 = arith.truncf %81 : vector<2x64x64xf32> to vector<2x64x64xbf16>
    %83 = arith.truncf %63 : vector<2x64x8xf32> to vector<2x64x8xbf16>
    "tpu.trace_start"() <{level = 10 : i32, message = "bqk,bkd->bqd"}> : () -> ()
    %cst_27 = arith.constant dense<0.000000e+00> : vector<2x64x8xf32>
    %84 = tpu.matmul %82, %83, %cst_27 {dimension_numbers = #tpu.dot_dimension_numbers<[2], [1], [1], [2], [0, 0, 0, 1, 1, 2], [0], [0]>} : vector<2x64x64xbf16>, vector<2x64x8xbf16>, vector<2x64x8xf32> -> vector<2x64x8xf32>
    "tpu.trace_stop"() : () -> ()
    %85 = vector.extract_strided_slice %34 {offsets = [0, 0, 16], sizes = [2, 64, 8], strides = [1, 1, 1]} : vector<2x64x96xf32> to vector<2x64x8xf32>
    %86 = vector.extract_strided_slice %34 {offsets = [0, 0, 48], sizes = [2, 64, 8], strides = [1, 1, 1]} : vector<2x64x96xf32> to vector<2x64x8xf32>
    %87 = vector.extract_strided_slice %34 {offsets = [0, 0, 80], sizes = [2, 64, 8], strides = [1, 1, 1]} : vector<2x64x96xf32> to vector<2x64x8xf32>
    %88 = arith.truncf %85 : vector<2x64x8xf32> to vector<2x64x8xbf16>
    %89 = arith.truncf %86 : vector<2x64x8xf32> to vector<2x64x8xbf16>
    "tpu.trace_start"() <{level = 10 : i32, message = "bqd,bkd->bqk"}> : () -> ()
    %cst_28 = arith.constant dense<0.000000e+00> : vector<2x64x64xf32>
    %90 = tpu.matmul %88, %89, %cst_28 {dimension_numbers = #tpu.dot_dimension_numbers<[2], [2], [1], [1], [0, 0, 0, 1, 1, 1], [0], [0]>} : vector<2x64x8xbf16>, vector<2x64x8xbf16>, vector<2x64x64xf32> -> vector<2x64x64xf32>
    "tpu.trace_stop"() : () -> ()
    %91 = vector.extract_strided_slice %36 {offsets = [2, 0, 0], sizes = [1, 64, 64], strides = [1, 1, 1]} : vector<4x64x64xf32> to vector<1x64x64xf32>
    %92 = vector.shape_cast %91 : vector<1x64x64xf32> to vector<64x64xf32>
    %93 = vector.shape_cast %92 : vector<64x64xf32> to vector<1x64x64xf32>
    %94 = vector.broadcast %93 : vector<1x64x64xf32> to vector<2x64x64xf32>
    %95 = arith.addf %90, %94 : vector<2x64x64xf32>
    %cst_29 = arith.constant dense<0xFF800000> : vector<2x64xf32>
    %96 = vector.multi_reduction <maximumf>, %95, %cst_29 [2] : vector<2x64x64xf32> to vector<2x64xf32>
    %97 = vector.shape_cast %96 : vector<2x64xf32> to vector<2x64x1xf32>
    %98 = vector.broadcast %97 : vector<2x64x1xf32> to vector<2x64x64xf32>
    %99 = arith.subf %95, %98 : vector<2x64x64xf32>
    %100 = math.exp %99 : vector<2x64x64xf32>
    %cst_30 = arith.constant dense<0.000000e+00> : vector<2x64xf32>
    %101 = vector.multi_reduction <add>, %100, %cst_30 [2] : vector<2x64x64xf32> to vector<2x64xf32>
    %102 = vector.shape_cast %101 : vector<2x64xf32> to vector<2x64x1xf32>
    %103 = tpu.reciprocal %102 {approx = true} : vector<2x64x1xf32> -> vector<2x64x1xf32>
    %104 = vector.broadcast %103 : vector<2x64x1xf32> to vector<2x64x64xf32>
    %105 = arith.mulf %100, %104 : vector<2x64x64xf32>
    %106 = arith.truncf %105 : vector<2x64x64xf32> to vector<2x64x64xbf16>
    %107 = arith.truncf %87 : vector<2x64x8xf32> to vector<2x64x8xbf16>
    "tpu.trace_start"() <{level = 10 : i32, message = "bqk,bkd->bqd"}> : () -> ()
    %cst_31 = arith.constant dense<0.000000e+00> : vector<2x64x8xf32>
    %108 = tpu.matmul %106, %107, %cst_31 {dimension_numbers = #tpu.dot_dimension_numbers<[2], [1], [1], [2], [0, 0, 0, 1, 1, 2], [0], [0]>} : vector<2x64x64xbf16>, vector<2x64x8xbf16>, vector<2x64x8xf32> -> vector<2x64x8xf32>
    "tpu.trace_stop"() : () -> ()
    %109 = vector.extract_strided_slice %34 {offsets = [0, 0, 24], sizes = [2, 64, 8], strides = [1, 1, 1]} : vector<2x64x96xf32> to vector<2x64x8xf32>
    %110 = vector.extract_strided_slice %34 {offsets = [0, 0, 56], sizes = [2, 64, 8], strides = [1, 1, 1]} : vector<2x64x96xf32> to vector<2x64x8xf32>
    %111 = vector.extract_strided_slice %34 {offsets = [0, 0, 88], sizes = [2, 64, 8], strides = [1, 1, 1]} : vector<2x64x96xf32> to vector<2x64x8xf32>
    %112 = arith.truncf %109 : vector<2x64x8xf32> to vector<2x64x8xbf16>
    %113 = arith.truncf %110 : vector<2x64x8xf32> to vector<2x64x8xbf16>
    "tpu.trace_start"() <{level = 10 : i32, message = "bqd,bkd->bqk"}> : () -> ()
    %cst_32 = arith.constant dense<0.000000e+00> : vector<2x64x64xf32>
    %114 = tpu.matmul %112, %113, %cst_32 {dimension_numbers = #tpu.dot_dimension_numbers<[2], [2], [1], [1], [0, 0, 0, 1, 1, 1], [0], [0]>} : vector<2x64x8xbf16>, vector<2x64x8xbf16>, vector<2x64x64xf32> -> vector<2x64x64xf32>
    "tpu.trace_stop"() : () -> ()
    %115 = vector.extract_strided_slice %36 {offsets = [3, 0, 0], sizes = [1, 64, 64], strides = [1, 1, 1]} : vector<4x64x64xf32> to vector<1x64x64xf32>
    %116 = vector.shape_cast %115 : vector<1x64x64xf32> to vector<64x64xf32>
    %117 = vector.shape_cast %116 : vector<64x64xf32> to vector<1x64x64xf32>
    %118 = vector.broadcast %117 : vector<1x64x64xf32> to vector<2x64x64xf32>
    %119 = arith.addf %114, %118 : vector<2x64x64xf32>
    %cst_33 = arith.constant dense<0xFF800000> : vector<2x64xf32>
    %120 = vector.multi_reduction <maximumf>, %119, %cst_33 [2] : vector<2x64x64xf32> to vector<2x64xf32>
    %121 = vector.shape_cast %120 : vector<2x64xf32> to vector<2x64x1xf32>
    %122 = vector.broadcast %121 : vector<2x64x1xf32> to vector<2x64x64xf32>
    %123 = arith.subf %119, %122 : vector<2x64x64xf32>
    %124 = math.exp %123 : vector<2x64x64xf32>
    %cst_34 = arith.constant dense<0.000000e+00> : vector<2x64xf32>
    %125 = vector.multi_reduction <add>, %124, %cst_34 [2] : vector<2x64x64xf32> to vector<2x64xf32>
    %126 = vector.shape_cast %125 : vector<2x64xf32> to vector<2x64x1xf32>
    %127 = tpu.reciprocal %126 {approx = true} : vector<2x64x1xf32> -> vector<2x64x1xf32>
    %128 = vector.broadcast %127 : vector<2x64x1xf32> to vector<2x64x64xf32>
    %129 = arith.mulf %124, %128 : vector<2x64x64xf32>
    %130 = arith.truncf %129 : vector<2x64x64xf32> to vector<2x64x64xbf16>
    %131 = arith.truncf %111 : vector<2x64x8xf32> to vector<2x64x8xbf16>
    "tpu.trace_start"() <{level = 10 : i32, message = "bqk,bkd->bqd"}> : () -> ()
    %cst_35 = arith.constant dense<0.000000e+00> : vector<2x64x8xf32>
    %132 = tpu.matmul %130, %131, %cst_35 {dimension_numbers = #tpu.dot_dimension_numbers<[2], [1], [1], [2], [0, 0, 0, 1, 1, 2], [0], [0]>} : vector<2x64x64xbf16>, vector<2x64x8xbf16>, vector<2x64x8xf32> -> vector<2x64x8xf32>
    "tpu.trace_stop"() : () -> ()
    %133 = tpu.concatenate %60, %84, %108, %132 in 2 : vector<2x64x8xf32>, vector<2x64x8xf32>, vector<2x64x8xf32>, vector<2x64x8xf32> -> vector<2x64x32xf32>
    %134 = vector.shape_cast %133 : vector<2x64x32xf32> to vector<128x32xf32>
    %135 = arith.truncf %134 : vector<128x32xf32> to vector<128x32xbf16>
    %c0_36 = arith.constant 0 : index
    %c0_37 = arith.constant 0 : index
    %136 = vector.load %arg8[%c0_36, %c0_37] : memref<32x128xbf16, #tpu.memory_space<vmem>>, vector<32x128xbf16>
    %cst_38 = arith.constant dense<0.000000e+00> : vector<128x128xf32>
    %137 = tpu.matmul %135, %136, %cst_38 {dimension_numbers = #tpu.dot_dimension_numbers<[1], [0], [0], [1], [0, 0, 1, 1], [], []>} : vector<128x32xbf16>, vector<32x128xbf16>, vector<128x128xf32> -> vector<128x128xf32>
    %c0_39 = arith.constant 0 : index
    %c0_40 = arith.constant 0 : index
    %138 = vector.load %arg9[%c0_39, %c0_40] : memref<1x128xf32, #tpu.memory_space<vmem>>, vector<1x128xf32>
    %139 = vector.broadcast %138 : vector<1x128xf32> to vector<128x128xf32>
    %140 = arith.addf %137, %139 : vector<128x128xf32>
    %141 = vector.shape_cast %140 : vector<128x128xf32> to vector<2x8x8x128xf32>
    %c0_41 = arith.constant 0 : index
    %c0_42 = arith.constant 0 : index
    %c0_43 = arith.constant 0 : index
    %c0_44 = arith.constant 0 : index
    %142 = vector.load %arg11[%c0_41, %c0_42, %c0_43, %c0_44] : memref<2x8x8x128xf32, #tpu.memory_space<vmem>>, vector<2x8x8x128xf32>
    tpu.vector_store %arg11[%c0_41, %c0_42, %c0_43, %c0_44], %141 {strides = array<i32>} : memref<2x8x8x128xf32, #tpu.memory_space<vmem>>, vector<2x8x8x128xf32>,
    return
  }
  func.func @transform_0(%arg0: i32, %arg1: i32, %arg2: i32) -> (i32, i32, i32, i32) {
    %c0_i32 = arith.constant 0 : i32
    %c0_i32_0 = arith.constant 0 : i32
    return %arg0, %arg1, %arg2, %c0_i32 : i32, i32, i32, i32
  }
  func.func @transform_1(%arg0: i32, %arg1: i32, %arg2: i32) -> (i32, i32) {
    %c0_i32 = arith.constant 0 : i32
    %c0_i32_0 = arith.constant 0 : i32
    %c0_i32_1 = arith.constant 0 : i32
    return %c0_i32, %c0_i32_0 : i32, i32
  }
  func.func @transform_2(%arg0: i32, %arg1: i32, %arg2: i32) -> (i32, i32) {
    %c0_i32 = arith.constant 0 : i32
    %c0_i32_0 = arith.constant 0 : i32
    %c0_i32_1 = arith.constant 0 : i32
    return %c0_i32, %c0_i32_0 : i32, i32
  }
  func.func @transform_3(%arg0: i32, %arg1: i32, %arg2: i32) -> (i32, i32) {
    %c0_i32 = arith.constant 0 : i32
    %c0_i32_0 = arith.constant 0 : i32
    %c0_i32_1 = arith.constant 0 : i32
    return %c0_i32, %c0_i32_0 : i32, i32
  }
  func.func @transform_4(%arg0: i32, %arg1: i32, %arg2: i32) -> (i32, i32) {
    %c0_i32 = arith.constant 0 : i32
    %c0_i32_0 = arith.constant 0 : i32
    %c0_i32_1 = arith.constant 0 : i32
    return %c0_i32, %c0_i32_0 : i32, i32
  }
  func.func @transform_5(%arg0: i32, %arg1: i32, %arg2: i32) -> (i32, i32) {
    %c0_i32 = arith.constant 0 : i32
    %c0_i32_0 = arith.constant 0 : i32
    %c0_i32_1 = arith.constant 0 : i32
    return %c0_i32, %c0_i32_0 : i32, i32
  }
  func.func @transform_6(%arg0: i32, %arg1: i32, %arg2: i32) -> (i32, i32) {
    %c0_i32 = arith.constant 0 : i32
    %c0_i32_0 = arith.constant 0 : i32
    %c0_i32_1 = arith.constant 0 : i32
    return %c0_i32, %c0_i32_0 : i32, i32
  }
  func.func @transform_7(%arg0: i32, %arg1: i32, %arg2: i32) -> (i32, i32, i32) {
    %c0_i32 = arith.constant 0 : i32
    %c0_i32_0 = arith.constant 0 : i32
    %c0_i32_1 = arith.constant 0 : i32
    %c0_i32_2 = arith.constant 0 : i32
    return %c0_i32, %c0_i32_0, %c0_i32_1 : i32, i32, i32
  }
  func.func @transform_8(%arg0: i32, %arg1: i32, %arg2: i32) -> (i32, i32, i32, i32) {
    %c0_i32 = arith.constant 0 : i32
    %c0_i32_0 = arith.constant 0 : i32
    return %arg0, %arg1, %arg2, %c0_i32 : i32, i32, i32, i32
  }
}

module attributes {stable_mosaic.version = 11 : i64} {
  func.func @_mlp_kernel(%arg0: i32, %arg1: memref<256x128xf32, #tpu.memory_space<vmem>>, %arg2: memref<256x128xf32, #tpu.memory_space<vmem>>, %arg3: memref<1x128xf32, #tpu.memory_space<vmem>>, %arg4: memref<1x128xf32, #tpu.memory_space<vmem>>, %arg5: memref<128x128xbf16, #tpu.memory_space<vmem>>, %arg6: memref<1x128xf32, #tpu.memory_space<vmem>>, %arg7: memref<128x128xbf16, #tpu.memory_space<vmem>>, %arg8: memref<1x128xf32, #tpu.memory_space<vmem>>, %arg9: memref<256x128xf32, #tpu.memory_space<vmem>>) attributes {dimension_semantics = [#tpu.dimension_semantics<parallel>], iteration_bounds = array<i64: 2>, scalar_prefetch = 0 : i64, scratch_operands = 0 : i64, tpu.core_type = #tpu.core_type<tc>, window_params = [{transform_indices = @transform_0, window_bounds = array<i64: 256, 128>}, {transform_indices = @transform_1, window_bounds = array<i64: 256, 128>}, {pipeline_mode = #tpu.pipeline_mode<synchronous>, transform_indices = @transform_2, window_bounds = array<i64: 1, 128>}, {pipeline_mode = #tpu.pipeline_mode<synchronous>, transform_indices = @transform_3, window_bounds = array<i64: 1, 128>}, {pipeline_mode = #tpu.pipeline_mode<synchronous>, transform_indices = @transform_4, window_bounds = array<i64: 128, 128>}, {pipeline_mode = #tpu.pipeline_mode<synchronous>, transform_indices = @transform_5, window_bounds = array<i64: 1, 128>}, {pipeline_mode = #tpu.pipeline_mode<synchronous>, transform_indices = @transform_6, window_bounds = array<i64: 128, 128>}, {pipeline_mode = #tpu.pipeline_mode<synchronous>, transform_indices = @transform_7, window_bounds = array<i64: 1, 128>}, {transform_indices = @transform_8, window_bounds = array<i64: 256, 128>}]} {
    %c0 = arith.constant 0 : index
    %c0_0 = arith.constant 0 : index
    %0 = vector.load %arg1[%c0, %c0_0] : memref<256x128xf32, #tpu.memory_space<vmem>>, vector<256x128xf32>
    %c0_1 = arith.constant 0 : index
    %c0_2 = arith.constant 0 : index
    %1 = vector.load %arg2[%c0_1, %c0_2] : memref<256x128xf32, #tpu.memory_space<vmem>>, vector<256x128xf32>
    %2 = arith.addf %0, %1 : vector<256x128xf32>
    %cst = arith.constant dense<0.000000e+00> : vector<256xf32>
    %3 = vector.multi_reduction <add>, %2, %cst [1] : vector<256x128xf32> to vector<256xf32>
    %4 = vector.shape_cast %3 : vector<256xf32> to vector<256x1xf32>
    %cst_3 = arith.constant 3.125000e-02 : f32
    %5 = vector.broadcast %cst_3 : f32 to vector<256x1xf32>
    %6 = arith.mulf %4, %5 : vector<256x1xf32>
    %7 = arith.mulf %2, %2 : vector<256x128xf32>
    %cst_4 = arith.constant dense<0.000000e+00> : vector<256xf32>
    %8 = vector.multi_reduction <add>, %7, %cst_4 [1] : vector<256x128xf32> to vector<256xf32>
    %9 = vector.shape_cast %8 : vector<256xf32> to vector<256x1xf32>
    %cst_5 = arith.constant 3.125000e-02 : f32
    %10 = vector.broadcast %cst_5 : f32 to vector<256x1xf32>
    %11 = arith.mulf %9, %10 : vector<256x1xf32>
    %12 = arith.mulf %6, %6 : vector<256x1xf32>
    %13 = arith.subf %11, %12 : vector<256x1xf32>
    %cst_6 = arith.constant 0.000000e+00 : f32
    %14 = vector.broadcast %cst_6 : f32 to vector<256x1xf32>
    %15 = arith.maximumf %13, %14 : vector<256x1xf32>
    %16 = vector.broadcast %6 : vector<256x1xf32> to vector<256x128xf32>
    %17 = arith.subf %2, %16 : vector<256x128xf32>
    %cst_7 = arith.constant 9.99999974E-6 : f32
    %18 = vector.broadcast %cst_7 : f32 to vector<256x1xf32>
    %19 = arith.addf %15, %18 : vector<256x1xf32>
    %20 = math.rsqrt %19 : vector<256x1xf32>
    %21 = vector.broadcast %20 : vector<256x1xf32> to vector<256x128xf32>
    %22 = arith.mulf %17, %21 : vector<256x128xf32>
    %c0_8 = arith.constant 0 : index
    %c0_9 = arith.constant 0 : index
    %23 = vector.load %arg3[%c0_8, %c0_9] : memref<1x128xf32, #tpu.memory_space<vmem>>, vector<1x128xf32>
    %24 = vector.broadcast %23 : vector<1x128xf32> to vector<256x128xf32>
    %25 = arith.mulf %22, %24 : vector<256x128xf32>
    %c0_10 = arith.constant 0 : index
    %c0_11 = arith.constant 0 : index
    %26 = vector.load %arg4[%c0_10, %c0_11] : memref<1x128xf32, #tpu.memory_space<vmem>>, vector<1x128xf32>
    %27 = vector.broadcast %26 : vector<1x128xf32> to vector<256x128xf32>
    %28 = arith.addf %25, %27 : vector<256x128xf32>
    %29 = arith.truncf %28 : vector<256x128xf32> to vector<256x128xbf16>
    %c0_12 = arith.constant 0 : index
    %c0_13 = arith.constant 0 : index
    %30 = vector.load %arg5[%c0_12, %c0_13] : memref<128x128xbf16, #tpu.memory_space<vmem>>, vector<128x128xbf16>
    %cst_14 = arith.constant dense<0.000000e+00> : vector<256x128xf32>
    %31 = tpu.matmul %29, %30, %cst_14 {dimension_numbers = #tpu.dot_dimension_numbers<[1], [0], [0], [1], [0, 0, 1, 1], [], []>} : vector<256x128xbf16>, vector<128x128xbf16>, vector<256x128xf32> -> vector<256x128xf32>
    %c0_15 = arith.constant 0 : index
    %c0_16 = arith.constant 0 : index
    %32 = vector.load %arg6[%c0_15, %c0_16] : memref<1x128xf32, #tpu.memory_space<vmem>>, vector<1x128xf32>
    %33 = vector.broadcast %32 : vector<1x128xf32> to vector<256x128xf32>
    %34 = arith.addf %31, %33 : vector<256x128xf32>
    %cst_17 = arith.constant 5.000000e-01 : f32
    %35 = vector.broadcast %cst_17 : f32 to vector<256x128xf32>
    %36 = arith.mulf %35, %34 : vector<256x128xf32>
    %cst_18 = arith.constant 0.707106769 : f32
    %37 = vector.broadcast %cst_18 : f32 to vector<256x128xf32>
    %38 = arith.mulf %34, %37 : vector<256x128xf32>
    %39 = math.erf %38 : vector<256x128xf32>
    %cst_19 = arith.constant 1.000000e+00 : f32
    %40 = vector.broadcast %cst_19 : f32 to vector<256x128xf32>
    %41 = arith.addf %40, %39 : vector<256x128xf32>
    %42 = arith.mulf %36, %41 : vector<256x128xf32>
    %43 = arith.truncf %42 : vector<256x128xf32> to vector<256x128xbf16>
    %c0_20 = arith.constant 0 : index
    %c0_21 = arith.constant 0 : index
    %44 = vector.load %arg7[%c0_20, %c0_21] : memref<128x128xbf16, #tpu.memory_space<vmem>>, vector<128x128xbf16>
    %cst_22 = arith.constant dense<0.000000e+00> : vector<256x128xf32>
    %45 = tpu.matmul %43, %44, %cst_22 {dimension_numbers = #tpu.dot_dimension_numbers<[1], [0], [0], [1], [0, 0, 1, 1], [], []>} : vector<256x128xbf16>, vector<128x128xbf16>, vector<256x128xf32> -> vector<256x128xf32>
    %c0_23 = arith.constant 0 : index
    %c0_24 = arith.constant 0 : index
    %46 = vector.load %arg8[%c0_23, %c0_24] : memref<1x128xf32, #tpu.memory_space<vmem>>, vector<1x128xf32>
    %47 = vector.broadcast %46 : vector<1x128xf32> to vector<256x128xf32>
    %48 = arith.addf %45, %47 : vector<256x128xf32>
    %49 = arith.addf %2, %48 : vector<256x128xf32>
    %c0_25 = arith.constant 0 : index
    %c0_26 = arith.constant 0 : index
    %50 = vector.load %arg9[%c0_25, %c0_26] : memref<256x128xf32, #tpu.memory_space<vmem>>, vector<256x128xf32>
    tpu.vector_store %arg9[%c0_25, %c0_26], %49 {strides = array<i32>} : memref<256x128xf32, #tpu.memory_space<vmem>>, vector<256x128xf32>,
    return
  }
  func.func @transform_0(%arg0: i32) -> (i32, i32) {
    %c0_i32 = arith.constant 0 : i32
    %c0_i32_0 = arith.constant 0 : i32
    return %arg0, %c0_i32 : i32, i32
  }
  func.func @transform_1(%arg0: i32) -> (i32, i32) {
    %c0_i32 = arith.constant 0 : i32
    %c0_i32_0 = arith.constant 0 : i32
    return %arg0, %c0_i32 : i32, i32
  }
  func.func @transform_2(%arg0: i32) -> (i32, i32) {
    %c0_i32 = arith.constant 0 : i32
    %c0_i32_0 = arith.constant 0 : i32
    %c0_i32_1 = arith.constant 0 : i32
    return %c0_i32, %c0_i32_0 : i32, i32
  }
  func.func @transform_3(%arg0: i32) -> (i32, i32) {
    %c0_i32 = arith.constant 0 : i32
    %c0_i32_0 = arith.constant 0 : i32
    %c0_i32_1 = arith.constant 0 : i32
    return %c0_i32, %c0_i32_0 : i32, i32
  }
  func.func @transform_4(%arg0: i32) -> (i32, i32) {
    %c0_i32 = arith.constant 0 : i32
    %c0_i32_0 = arith.constant 0 : i32
    %c0_i32_1 = arith.constant 0 : i32
    return %c0_i32, %c0_i32_0 : i32, i32
  }
  func.func @transform_5(%arg0: i32) -> (i32, i32) {
    %c0_i32 = arith.constant 0 : i32
    %c0_i32_0 = arith.constant 0 : i32
    %c0_i32_1 = arith.constant 0 : i32
    return %c0_i32, %c0_i32_0 : i32, i32
  }
  func.func @transform_6(%arg0: i32) -> (i32, i32) {
    %c0_i32 = arith.constant 0 : i32
    %c0_i32_0 = arith.constant 0 : i32
    %c0_i32_1 = arith.constant 0 : i32
    return %c0_i32, %c0_i32_0 : i32, i32
  }
  func.func @transform_7(%arg0: i32) -> (i32, i32) {
    %c0_i32 = arith.constant 0 : i32
    %c0_i32_0 = arith.constant 0 : i32
    %c0_i32_1 = arith.constant 0 : i32
    return %c0_i32, %c0_i32_0 : i32, i32
  }
  func.func @transform_8(%arg0: i32) -> (i32, i32) {
    %c0_i32 = arith.constant 0 : i32
    %c0_i32_0 = arith.constant 0 : i32
    return %arg0, %c0_i32 : i32, i32
  }
}

module attributes {stable_mosaic.version = 11 : i64} {
  func.func @_attn_kernel(%arg0: i32, %arg1: i32, %arg2: i32, %arg3: memref<2x8x8x128xf32, #tpu.memory_space<vmem>>, %arg4: memref<1x128xf32, #tpu.memory_space<vmem>>, %arg5: memref<1x128xf32, #tpu.memory_space<vmem>>, %arg6: memref<128x96xbf16, #tpu.memory_space<vmem>>, %arg7: memref<1x96xf32, #tpu.memory_space<vmem>>, %arg8: memref<32x128xbf16, #tpu.memory_space<vmem>>, %arg9: memref<1x128xf32, #tpu.memory_space<vmem>>, %arg10: memref<4x64x64xbf16, #tpu.memory_space<vmem>>, %arg11: memref<1x64x64xbf16, #tpu.memory_space<vmem>>, %arg12: memref<2x8x8x128xf32, #tpu.memory_space<vmem>>) attributes {dimension_semantics = [#tpu.dimension_semantics<parallel>, #tpu.dimension_semantics<parallel>, #tpu.dimension_semantics<parallel>], iteration_bounds = array<i64: 1, 2, 2>, scalar_prefetch = 0 : i64, scratch_operands = 0 : i64, tpu.core_type = #tpu.core_type<tc>, window_params = [{transform_indices = @transform_0, window_bounds = array<i64: 2, 8, 8, 128>}, {pipeline_mode = #tpu.pipeline_mode<synchronous>, transform_indices = @transform_1, window_bounds = array<i64: 1, 128>}, {pipeline_mode = #tpu.pipeline_mode<synchronous>, transform_indices = @transform_2, window_bounds = array<i64: 1, 128>}, {pipeline_mode = #tpu.pipeline_mode<synchronous>, transform_indices = @transform_3, window_bounds = array<i64: 128, 96>}, {pipeline_mode = #tpu.pipeline_mode<synchronous>, transform_indices = @transform_4, window_bounds = array<i64: 1, 96>}, {pipeline_mode = #tpu.pipeline_mode<synchronous>, transform_indices = @transform_5, window_bounds = array<i64: 32, 128>}, {pipeline_mode = #tpu.pipeline_mode<synchronous>, transform_indices = @transform_6, window_bounds = array<i64: 1, 128>}, {pipeline_mode = #tpu.pipeline_mode<synchronous>, transform_indices = @transform_7, window_bounds = array<i64: 4, 64, 64>}, {transform_indices = @transform_8, window_bounds = array<i64: 1, 64, 64>}, {transform_indices = @transform_9, window_bounds = array<i64: 2, 8, 8, 128>}]} {
    %c0 = arith.constant 0 : index
    %c0_0 = arith.constant 0 : index
    %c0_1 = arith.constant 0 : index
    %c0_2 = arith.constant 0 : index
    %0 = vector.load %arg3[%c0, %c0_0, %c0_1, %c0_2] : memref<2x8x8x128xf32, #tpu.memory_space<vmem>>, vector<2x8x8x128xf32>
    %1 = vector.shape_cast %0 : vector<2x8x8x128xf32> to vector<128x128xf32>
    %cst = arith.constant dense<0.000000e+00> : vector<128xf32>
    %2 = vector.multi_reduction <add>, %1, %cst [1] : vector<128x128xf32> to vector<128xf32>
    %3 = vector.shape_cast %2 : vector<128xf32> to vector<128x1xf32>
    %cst_3 = arith.constant 3.125000e-02 : f32
    %4 = vector.broadcast %cst_3 : f32 to vector<128x1xf32>
    %5 = arith.mulf %3, %4 : vector<128x1xf32>
    %6 = arith.mulf %1, %1 : vector<128x128xf32>
    %cst_4 = arith.constant dense<0.000000e+00> : vector<128xf32>
    %7 = vector.multi_reduction <add>, %6, %cst_4 [1] : vector<128x128xf32> to vector<128xf32>
    %8 = vector.shape_cast %7 : vector<128xf32> to vector<128x1xf32>
    %cst_5 = arith.constant 3.125000e-02 : f32
    %9 = vector.broadcast %cst_5 : f32 to vector<128x1xf32>
    %10 = arith.mulf %8, %9 : vector<128x1xf32>
    %11 = arith.mulf %5, %5 : vector<128x1xf32>
    %12 = arith.subf %10, %11 : vector<128x1xf32>
    %cst_6 = arith.constant 0.000000e+00 : f32
    %13 = vector.broadcast %cst_6 : f32 to vector<128x1xf32>
    %14 = arith.maximumf %12, %13 : vector<128x1xf32>
    %15 = vector.broadcast %5 : vector<128x1xf32> to vector<128x128xf32>
    %16 = arith.subf %1, %15 : vector<128x128xf32>
    %cst_7 = arith.constant 9.99999974E-6 : f32
    %17 = vector.broadcast %cst_7 : f32 to vector<128x1xf32>
    %18 = arith.addf %14, %17 : vector<128x1xf32>
    %19 = math.rsqrt %18 : vector<128x1xf32>
    %20 = vector.broadcast %19 : vector<128x1xf32> to vector<128x128xf32>
    %21 = arith.mulf %16, %20 : vector<128x128xf32>
    %c0_8 = arith.constant 0 : index
    %c0_9 = arith.constant 0 : index
    %22 = vector.load %arg4[%c0_8, %c0_9] : memref<1x128xf32, #tpu.memory_space<vmem>>, vector<1x128xf32>
    %23 = vector.broadcast %22 : vector<1x128xf32> to vector<128x128xf32>
    %24 = arith.mulf %21, %23 : vector<128x128xf32>
    %c0_10 = arith.constant 0 : index
    %c0_11 = arith.constant 0 : index
    %25 = vector.load %arg5[%c0_10, %c0_11] : memref<1x128xf32, #tpu.memory_space<vmem>>, vector<1x128xf32>
    %26 = vector.broadcast %25 : vector<1x128xf32> to vector<128x128xf32>
    %27 = arith.addf %24, %26 : vector<128x128xf32>
    %28 = arith.truncf %27 : vector<128x128xf32> to vector<128x128xbf16>
    %c0_12 = arith.constant 0 : index
    %c0_13 = arith.constant 0 : index
    %29 = vector.load %arg6[%c0_12, %c0_13] : memref<128x96xbf16, #tpu.memory_space<vmem>>, vector<128x96xbf16>
    %cst_14 = arith.constant dense<0.000000e+00> : vector<128x96xf32>
    %30 = tpu.matmul %28, %29, %cst_14 {dimension_numbers = #tpu.dot_dimension_numbers<[1], [0], [0], [1], [0, 0, 1, 1], [], []>} : vector<128x128xbf16>, vector<128x96xbf16>, vector<128x96xf32> -> vector<128x96xf32>
    %c0_15 = arith.constant 0 : index
    %c0_16 = arith.constant 0 : index
    %31 = vector.load %arg7[%c0_15, %c0_16] : memref<1x96xf32, #tpu.memory_space<vmem>>, vector<1x96xf32>
    %32 = vector.broadcast %31 : vector<1x96xf32> to vector<128x96xf32>
    %33 = arith.addf %30, %32 : vector<128x96xf32>
    %34 = vector.shape_cast %33 : vector<128x96xf32> to vector<2x64x96xf32>
    %c0_17 = arith.constant 0 : index
    %c0_18 = arith.constant 0 : index
    %c0_19 = arith.constant 0 : index
    %35 = vector.load %arg10[%c0_17, %c0_18, %c0_19] : memref<4x64x64xbf16, #tpu.memory_space<vmem>>, vector<4x64x64xbf16>
    %36 = arith.extf %35 : vector<4x64x64xbf16> to vector<4x64x64xf32>
    %c0_20 = arith.constant 0 : index
    %c0_21 = arith.constant 0 : index
    %c0_22 = arith.constant 0 : index
    %37 = vector.load %arg11[%c0_20, %c0_21, %c0_22] : memref<1x64x64xbf16, #tpu.memory_space<vmem>>, vector<1x64x64xbf16>
    %38 = arith.extf %37 : vector<1x64x64xbf16> to vector<1x64x64xf32>
    %39 = vector.broadcast %38 : vector<1x64x64xf32> to vector<4x64x64xf32>
    %40 = arith.addf %36, %39 : vector<4x64x64xf32>
    %41 = vector.extract_strided_slice %34 {offsets = [0, 0, 0], sizes = [2, 64, 8], strides = [1, 1, 1]} : vector<2x64x96xf32> to vector<2x64x8xf32>
    %42 = vector.extract_strided_slice %34 {offsets = [0, 0, 32], sizes = [2, 64, 8], strides = [1, 1, 1]} : vector<2x64x96xf32> to vector<2x64x8xf32>
    %43 = vector.extract_strided_slice %34 {offsets = [0, 0, 64], sizes = [2, 64, 8], strides = [1, 1, 1]} : vector<2x64x96xf32> to vector<2x64x8xf32>
    %44 = arith.truncf %41 : vector<2x64x8xf32> to vector<2x64x8xbf16>
    %45 = arith.truncf %42 : vector<2x64x8xf32> to vector<2x64x8xbf16>
    "tpu.trace_start"() <{level = 10 : i32, message = "bqd,bkd->bqk"}> : () -> ()
    %cst_23 = arith.constant dense<0.000000e+00> : vector<2x64x64xf32>
    %46 = tpu.matmul %44, %45, %cst_23 {dimension_numbers = #tpu.dot_dimension_numbers<[2], [2], [1], [1], [0, 0, 0, 1, 1, 1], [0], [0]>} : vector<2x64x8xbf16>, vector<2x64x8xbf16>, vector<2x64x64xf32> -> vector<2x64x64xf32>
    "tpu.trace_stop"() : () -> ()
    %47 = vector.extract_strided_slice %40 {offsets = [0, 0, 0], sizes = [1, 64, 64], strides = [1, 1, 1]} : vector<4x64x64xf32> to vector<1x64x64xf32>
    %48 = vector.shape_cast %47 : vector<1x64x64xf32> to vector<64x64xf32>
    %49 = vector.shape_cast %48 : vector<64x64xf32> to vector<1x64x64xf32>
    %50 = vector.broadcast %49 : vector<1x64x64xf32> to vector<2x64x64xf32>
    %51 = arith.addf %46, %50 : vector<2x64x64xf32>
    %cst_24 = arith.constant dense<0xFF800000> : vector<2x64xf32>
    %52 = vector.multi_reduction <maximumf>, %51, %cst_24 [2] : vector<2x64x64xf32> to vector<2x64xf32>
    %53 = vector.shape_cast %52 : vector<2x64xf32> to vector<2x64x1xf32>
    %54 = vector.broadcast %53 : vector<2x64x1xf32> to vector<2x64x64xf32>
    %55 = arith.subf %51, %54 : vector<2x64x64xf32>
    %56 = math.exp %55 : vector<2x64x64xf32>
    %cst_25 = arith.constant dense<0.000000e+00> : vector<2x64xf32>
    %57 = vector.multi_reduction <add>, %56, %cst_25 [2] : vector<2x64x64xf32> to vector<2x64xf32>
    %58 = vector.shape_cast %57 : vector<2x64xf32> to vector<2x64x1xf32>
    %59 = tpu.reciprocal %58 {approx = true} : vector<2x64x1xf32> -> vector<2x64x1xf32>
    %60 = vector.broadcast %59 : vector<2x64x1xf32> to vector<2x64x64xf32>
    %61 = arith.mulf %56, %60 : vector<2x64x64xf32>
    %62 = arith.truncf %61 : vector<2x64x64xf32> to vector<2x64x64xbf16>
    %63 = arith.truncf %43 : vector<2x64x8xf32> to vector<2x64x8xbf16>
    "tpu.trace_start"() <{level = 10 : i32, message = "bqk,bkd->bqd"}> : () -> ()
    %cst_26 = arith.constant dense<0.000000e+00> : vector<2x64x8xf32>
    %64 = tpu.matmul %62, %63, %cst_26 {dimension_numbers = #tpu.dot_dimension_numbers<[2], [1], [1], [2], [0, 0, 0, 1, 1, 2], [0], [0]>} : vector<2x64x64xbf16>, vector<2x64x8xbf16>, vector<2x64x8xf32> -> vector<2x64x8xf32>
    "tpu.trace_stop"() : () -> ()
    %65 = vector.extract_strided_slice %34 {offsets = [0, 0, 8], sizes = [2, 64, 8], strides = [1, 1, 1]} : vector<2x64x96xf32> to vector<2x64x8xf32>
    %66 = vector.extract_strided_slice %34 {offsets = [0, 0, 40], sizes = [2, 64, 8], strides = [1, 1, 1]} : vector<2x64x96xf32> to vector<2x64x8xf32>
    %67 = vector.extract_strided_slice %34 {offsets = [0, 0, 72], sizes = [2, 64, 8], strides = [1, 1, 1]} : vector<2x64x96xf32> to vector<2x64x8xf32>
    %68 = arith.truncf %65 : vector<2x64x8xf32> to vector<2x64x8xbf16>
    %69 = arith.truncf %66 : vector<2x64x8xf32> to vector<2x64x8xbf16>
    "tpu.trace_start"() <{level = 10 : i32, message = "bqd,bkd->bqk"}> : () -> ()
    %cst_27 = arith.constant dense<0.000000e+00> : vector<2x64x64xf32>
    %70 = tpu.matmul %68, %69, %cst_27 {dimension_numbers = #tpu.dot_dimension_numbers<[2], [2], [1], [1], [0, 0, 0, 1, 1, 1], [0], [0]>} : vector<2x64x8xbf16>, vector<2x64x8xbf16>, vector<2x64x64xf32> -> vector<2x64x64xf32>
    "tpu.trace_stop"() : () -> ()
    %71 = vector.extract_strided_slice %40 {offsets = [1, 0, 0], sizes = [1, 64, 64], strides = [1, 1, 1]} : vector<4x64x64xf32> to vector<1x64x64xf32>
    %72 = vector.shape_cast %71 : vector<1x64x64xf32> to vector<64x64xf32>
    %73 = vector.shape_cast %72 : vector<64x64xf32> to vector<1x64x64xf32>
    %74 = vector.broadcast %73 : vector<1x64x64xf32> to vector<2x64x64xf32>
    %75 = arith.addf %70, %74 : vector<2x64x64xf32>
    %cst_28 = arith.constant dense<0xFF800000> : vector<2x64xf32>
    %76 = vector.multi_reduction <maximumf>, %75, %cst_28 [2] : vector<2x64x64xf32> to vector<2x64xf32>
    %77 = vector.shape_cast %76 : vector<2x64xf32> to vector<2x64x1xf32>
    %78 = vector.broadcast %77 : vector<2x64x1xf32> to vector<2x64x64xf32>
    %79 = arith.subf %75, %78 : vector<2x64x64xf32>
    %80 = math.exp %79 : vector<2x64x64xf32>
    %cst_29 = arith.constant dense<0.000000e+00> : vector<2x64xf32>
    %81 = vector.multi_reduction <add>, %80, %cst_29 [2] : vector<2x64x64xf32> to vector<2x64xf32>
    %82 = vector.shape_cast %81 : vector<2x64xf32> to vector<2x64x1xf32>
    %83 = tpu.reciprocal %82 {approx = true} : vector<2x64x1xf32> -> vector<2x64x1xf32>
    %84 = vector.broadcast %83 : vector<2x64x1xf32> to vector<2x64x64xf32>
    %85 = arith.mulf %80, %84 : vector<2x64x64xf32>
    %86 = arith.truncf %85 : vector<2x64x64xf32> to vector<2x64x64xbf16>
    %87 = arith.truncf %67 : vector<2x64x8xf32> to vector<2x64x8xbf16>
    "tpu.trace_start"() <{level = 10 : i32, message = "bqk,bkd->bqd"}> : () -> ()
    %cst_30 = arith.constant dense<0.000000e+00> : vector<2x64x8xf32>
    %88 = tpu.matmul %86, %87, %cst_30 {dimension_numbers = #tpu.dot_dimension_numbers<[2], [1], [1], [2], [0, 0, 0, 1, 1, 2], [0], [0]>} : vector<2x64x64xbf16>, vector<2x64x8xbf16>, vector<2x64x8xf32> -> vector<2x64x8xf32>
    "tpu.trace_stop"() : () -> ()
    %89 = vector.extract_strided_slice %34 {offsets = [0, 0, 16], sizes = [2, 64, 8], strides = [1, 1, 1]} : vector<2x64x96xf32> to vector<2x64x8xf32>
    %90 = vector.extract_strided_slice %34 {offsets = [0, 0, 48], sizes = [2, 64, 8], strides = [1, 1, 1]} : vector<2x64x96xf32> to vector<2x64x8xf32>
    %91 = vector.extract_strided_slice %34 {offsets = [0, 0, 80], sizes = [2, 64, 8], strides = [1, 1, 1]} : vector<2x64x96xf32> to vector<2x64x8xf32>
    %92 = arith.truncf %89 : vector<2x64x8xf32> to vector<2x64x8xbf16>
    %93 = arith.truncf %90 : vector<2x64x8xf32> to vector<2x64x8xbf16>
    "tpu.trace_start"() <{level = 10 : i32, message = "bqd,bkd->bqk"}> : () -> ()
    %cst_31 = arith.constant dense<0.000000e+00> : vector<2x64x64xf32>
    %94 = tpu.matmul %92, %93, %cst_31 {dimension_numbers = #tpu.dot_dimension_numbers<[2], [2], [1], [1], [0, 0, 0, 1, 1, 1], [0], [0]>} : vector<2x64x8xbf16>, vector<2x64x8xbf16>, vector<2x64x64xf32> -> vector<2x64x64xf32>
    "tpu.trace_stop"() : () -> ()
    %95 = vector.extract_strided_slice %40 {offsets = [2, 0, 0], sizes = [1, 64, 64], strides = [1, 1, 1]} : vector<4x64x64xf32> to vector<1x64x64xf32>
    %96 = vector.shape_cast %95 : vector<1x64x64xf32> to vector<64x64xf32>
    %97 = vector.shape_cast %96 : vector<64x64xf32> to vector<1x64x64xf32>
    %98 = vector.broadcast %97 : vector<1x64x64xf32> to vector<2x64x64xf32>
    %99 = arith.addf %94, %98 : vector<2x64x64xf32>
    %cst_32 = arith.constant dense<0xFF800000> : vector<2x64xf32>
    %100 = vector.multi_reduction <maximumf>, %99, %cst_32 [2] : vector<2x64x64xf32> to vector<2x64xf32>
    %101 = vector.shape_cast %100 : vector<2x64xf32> to vector<2x64x1xf32>
    %102 = vector.broadcast %101 : vector<2x64x1xf32> to vector<2x64x64xf32>
    %103 = arith.subf %99, %102 : vector<2x64x64xf32>
    %104 = math.exp %103 : vector<2x64x64xf32>
    %cst_33 = arith.constant dense<0.000000e+00> : vector<2x64xf32>
    %105 = vector.multi_reduction <add>, %104, %cst_33 [2] : vector<2x64x64xf32> to vector<2x64xf32>
    %106 = vector.shape_cast %105 : vector<2x64xf32> to vector<2x64x1xf32>
    %107 = tpu.reciprocal %106 {approx = true} : vector<2x64x1xf32> -> vector<2x64x1xf32>
    %108 = vector.broadcast %107 : vector<2x64x1xf32> to vector<2x64x64xf32>
    %109 = arith.mulf %104, %108 : vector<2x64x64xf32>
    %110 = arith.truncf %109 : vector<2x64x64xf32> to vector<2x64x64xbf16>
    %111 = arith.truncf %91 : vector<2x64x8xf32> to vector<2x64x8xbf16>
    "tpu.trace_start"() <{level = 10 : i32, message = "bqk,bkd->bqd"}> : () -> ()
    %cst_34 = arith.constant dense<0.000000e+00> : vector<2x64x8xf32>
    %112 = tpu.matmul %110, %111, %cst_34 {dimension_numbers = #tpu.dot_dimension_numbers<[2], [1], [1], [2], [0, 0, 0, 1, 1, 2], [0], [0]>} : vector<2x64x64xbf16>, vector<2x64x8xbf16>, vector<2x64x8xf32> -> vector<2x64x8xf32>
    "tpu.trace_stop"() : () -> ()
    %113 = vector.extract_strided_slice %34 {offsets = [0, 0, 24], sizes = [2, 64, 8], strides = [1, 1, 1]} : vector<2x64x96xf32> to vector<2x64x8xf32>
    %114 = vector.extract_strided_slice %34 {offsets = [0, 0, 56], sizes = [2, 64, 8], strides = [1, 1, 1]} : vector<2x64x96xf32> to vector<2x64x8xf32>
    %115 = vector.extract_strided_slice %34 {offsets = [0, 0, 88], sizes = [2, 64, 8], strides = [1, 1, 1]} : vector<2x64x96xf32> to vector<2x64x8xf32>
    %116 = arith.truncf %113 : vector<2x64x8xf32> to vector<2x64x8xbf16>
    %117 = arith.truncf %114 : vector<2x64x8xf32> to vector<2x64x8xbf16>
    "tpu.trace_start"() <{level = 10 : i32, message = "bqd,bkd->bqk"}> : () -> ()
    %cst_35 = arith.constant dense<0.000000e+00> : vector<2x64x64xf32>
    %118 = tpu.matmul %116, %117, %cst_35 {dimension_numbers = #tpu.dot_dimension_numbers<[2], [2], [1], [1], [0, 0, 0, 1, 1, 1], [0], [0]>} : vector<2x64x8xbf16>, vector<2x64x8xbf16>, vector<2x64x64xf32> -> vector<2x64x64xf32>
    "tpu.trace_stop"() : () -> ()
    %119 = vector.extract_strided_slice %40 {offsets = [3, 0, 0], sizes = [1, 64, 64], strides = [1, 1, 1]} : vector<4x64x64xf32> to vector<1x64x64xf32>
    %120 = vector.shape_cast %119 : vector<1x64x64xf32> to vector<64x64xf32>
    %121 = vector.shape_cast %120 : vector<64x64xf32> to vector<1x64x64xf32>
    %122 = vector.broadcast %121 : vector<1x64x64xf32> to vector<2x64x64xf32>
    %123 = arith.addf %118, %122 : vector<2x64x64xf32>
    %cst_36 = arith.constant dense<0xFF800000> : vector<2x64xf32>
    %124 = vector.multi_reduction <maximumf>, %123, %cst_36 [2] : vector<2x64x64xf32> to vector<2x64xf32>
    %125 = vector.shape_cast %124 : vector<2x64xf32> to vector<2x64x1xf32>
    %126 = vector.broadcast %125 : vector<2x64x1xf32> to vector<2x64x64xf32>
    %127 = arith.subf %123, %126 : vector<2x64x64xf32>
    %128 = math.exp %127 : vector<2x64x64xf32>
    %cst_37 = arith.constant dense<0.000000e+00> : vector<2x64xf32>
    %129 = vector.multi_reduction <add>, %128, %cst_37 [2] : vector<2x64x64xf32> to vector<2x64xf32>
    %130 = vector.shape_cast %129 : vector<2x64xf32> to vector<2x64x1xf32>
    %131 = tpu.reciprocal %130 {approx = true} : vector<2x64x1xf32> -> vector<2x64x1xf32>
    %132 = vector.broadcast %131 : vector<2x64x1xf32> to vector<2x64x64xf32>
    %133 = arith.mulf %128, %132 : vector<2x64x64xf32>
    %134 = arith.truncf %133 : vector<2x64x64xf32> to vector<2x64x64xbf16>
    %135 = arith.truncf %115 : vector<2x64x8xf32> to vector<2x64x8xbf16>
    "tpu.trace_start"() <{level = 10 : i32, message = "bqk,bkd->bqd"}> : () -> ()
    %cst_38 = arith.constant dense<0.000000e+00> : vector<2x64x8xf32>
    %136 = tpu.matmul %134, %135, %cst_38 {dimension_numbers = #tpu.dot_dimension_numbers<[2], [1], [1], [2], [0, 0, 0, 1, 1, 2], [0], [0]>} : vector<2x64x64xbf16>, vector<2x64x8xbf16>, vector<2x64x8xf32> -> vector<2x64x8xf32>
    "tpu.trace_stop"() : () -> ()
    %137 = tpu.concatenate %64, %88, %112, %136 in 2 : vector<2x64x8xf32>, vector<2x64x8xf32>, vector<2x64x8xf32>, vector<2x64x8xf32> -> vector<2x64x32xf32>
    %138 = vector.shape_cast %137 : vector<2x64x32xf32> to vector<128x32xf32>
    %139 = arith.truncf %138 : vector<128x32xf32> to vector<128x32xbf16>
    %c0_39 = arith.constant 0 : index
    %c0_40 = arith.constant 0 : index
    %140 = vector.load %arg8[%c0_39, %c0_40] : memref<32x128xbf16, #tpu.memory_space<vmem>>, vector<32x128xbf16>
    %cst_41 = arith.constant dense<0.000000e+00> : vector<128x128xf32>
    %141 = tpu.matmul %139, %140, %cst_41 {dimension_numbers = #tpu.dot_dimension_numbers<[1], [0], [0], [1], [0, 0, 1, 1], [], []>} : vector<128x32xbf16>, vector<32x128xbf16>, vector<128x128xf32> -> vector<128x128xf32>
    %c0_42 = arith.constant 0 : index
    %c0_43 = arith.constant 0 : index
    %142 = vector.load %arg9[%c0_42, %c0_43] : memref<1x128xf32, #tpu.memory_space<vmem>>, vector<1x128xf32>
    %143 = vector.broadcast %142 : vector<1x128xf32> to vector<128x128xf32>
    %144 = arith.addf %141, %143 : vector<128x128xf32>
    %145 = vector.shape_cast %144 : vector<128x128xf32> to vector<2x8x8x128xf32>
    %c0_44 = arith.constant 0 : index
    %c0_45 = arith.constant 0 : index
    %c0_46 = arith.constant 0 : index
    %c0_47 = arith.constant 0 : index
    %146 = vector.load %arg12[%c0_44, %c0_45, %c0_46, %c0_47] : memref<2x8x8x128xf32, #tpu.memory_space<vmem>>, vector<2x8x8x128xf32>
    tpu.vector_store %arg12[%c0_44, %c0_45, %c0_46, %c0_47], %145 {strides = array<i32>} : memref<2x8x8x128xf32, #tpu.memory_space<vmem>>, vector<2x8x8x128xf32>,
    return
  }
  func.func @transform_0(%arg0: i32, %arg1: i32, %arg2: i32) -> (i32, i32, i32, i32) {
    %c0_i32 = arith.constant 0 : i32
    %c0_i32_0 = arith.constant 0 : i32
    return %arg0, %arg1, %arg2, %c0_i32 : i32, i32, i32, i32
  }
  func.func @transform_1(%arg0: i32, %arg1: i32, %arg2: i32) -> (i32, i32) {
    %c0_i32 = arith.constant 0 : i32
    %c0_i32_0 = arith.constant 0 : i32
    %c0_i32_1 = arith.constant 0 : i32
    return %c0_i32, %c0_i32_0 : i32, i32
  }
  func.func @transform_2(%arg0: i32, %arg1: i32, %arg2: i32) -> (i32, i32) {
    %c0_i32 = arith.constant 0 : i32
    %c0_i32_0 = arith.constant 0 : i32
    %c0_i32_1 = arith.constant 0 : i32
    return %c0_i32, %c0_i32_0 : i32, i32
  }
  func.func @transform_3(%arg0: i32, %arg1: i32, %arg2: i32) -> (i32, i32) {
    %c0_i32 = arith.constant 0 : i32
    %c0_i32_0 = arith.constant 0 : i32
    %c0_i32_1 = arith.constant 0 : i32
    return %c0_i32, %c0_i32_0 : i32, i32
  }
  func.func @transform_4(%arg0: i32, %arg1: i32, %arg2: i32) -> (i32, i32) {
    %c0_i32 = arith.constant 0 : i32
    %c0_i32_0 = arith.constant 0 : i32
    %c0_i32_1 = arith.constant 0 : i32
    return %c0_i32, %c0_i32_0 : i32, i32
  }
  func.func @transform_5(%arg0: i32, %arg1: i32, %arg2: i32) -> (i32, i32) {
    %c0_i32 = arith.constant 0 : i32
    %c0_i32_0 = arith.constant 0 : i32
    %c0_i32_1 = arith.constant 0 : i32
    return %c0_i32, %c0_i32_0 : i32, i32
  }
  func.func @transform_6(%arg0: i32, %arg1: i32, %arg2: i32) -> (i32, i32) {
    %c0_i32 = arith.constant 0 : i32
    %c0_i32_0 = arith.constant 0 : i32
    %c0_i32_1 = arith.constant 0 : i32
    return %c0_i32, %c0_i32_0 : i32, i32
  }
  func.func @transform_7(%arg0: i32, %arg1: i32, %arg2: i32) -> (i32, i32, i32) {
    %c0_i32 = arith.constant 0 : i32
    %c0_i32_0 = arith.constant 0 : i32
    %c0_i32_1 = arith.constant 0 : i32
    %c0_i32_2 = arith.constant 0 : i32
    return %c0_i32, %c0_i32_0, %c0_i32_1 : i32, i32, i32
  }
  func.func @transform_8(%arg0: i32, %arg1: i32, %arg2: i32) -> (i32, i32, i32) {
    %c2_i32 = arith.constant 2 : i32
    %0 = arith.muli %arg1, %c2_i32 : i32
    %1 = arith.addi %0, %arg2 : i32
    %c0_i32 = arith.constant 0 : i32
    %c0_i32_0 = arith.constant 0 : i32
    %c0_i32_1 = arith.constant 0 : i32
    return %1, %c0_i32, %c0_i32_0 : i32, i32, i32
  }
  func.func @transform_9(%arg0: i32, %arg1: i32, %arg2: i32) -> (i32, i32, i32, i32) {
    %c0_i32 = arith.constant 0 : i32
    %c0_i32_0 = arith.constant 0 : i32
    return %arg0, %arg1, %arg2, %c0_i32 : i32, i32, i32, i32
  }
}

</mosaic_0001>

<bundles_post_ra>
// kernel: basic_layer_forward.5
= control target key start
LH: loop header
LB: loop body
LE: loop exit
PB: predicated region body
PF: predicated region fallthrough
CT: control target
= control target key end

     0   :  { %s2124_s27 = smov 0   ;;  %s2826_s0 = inlined_call_operand.vmem [shape: f32[512,128], index: 0, kind: input, shape index: {}]   ;;  %s2827_s1 = inlined_call_operand.vmem [shape: f32[512,128], index: 1, kind: input, shape index: {}]   ;;  %s2828_s2 = inlined_call_operand.vmem [shape: f32[1,128], index: 2, kind: input, shape index: {}]   ;;  %s2829_s3 = inlined_call_operand.vmem [shape: f32[1,128], index: 3, kind: input, shape index: {}]   ;;  %s2830_s4 = inlined_call_operand.vmem [shape: bf16[128,128], index: 4, kind: input, shape index: {}]   ;;  %s2831_s5 = inlined_call_operand.vmem [shape: f32[1,128], index: 5, kind: input, shape index: {}]   ;;  %s2832_s6 = inlined_call_operand.vmem [shape: bf16[128,128], index: 6, kind: input, shape index: {}]   ;;  %s2833_s7 = inlined_call_operand.vmem [shape: f32[1,128], index: 7, kind: input, shape index: {}]   ;;  %s2834_s8 = inlined_call_operand.vmem [shape: f32[512,128], index: 8, kind: output, shape index: {}]  }
   0x1 LB: > { %s1742_s28 = sadd.s32 4294967295, %s2077_s27   ;;  %p1746_p0 = scmp.ge.s32.totalorder %s2077_s27, 1  ;;  %s2077_s27 = sphi %s2124_s27, %s18_s27  }
   0x2   : > { %p274_p1 = scmp.lt.s32.totalorder %s2077_s27, 3 }
   0x4   : > { %p275_p2 = pnand %p1746_p0, %p274_p1 }
   0x6   : > { %278 = sbr.rel (%p275_p2) target bundleno = 774 (0x306), region = 52 }
   0xd   : > { %s1747_s29 = sshll.u32 %s1742_s28, 5 }
   0xe   : > { %p314_p3 = scmp.lt.s32.totalorder %s1747_s29, 63 }
  0x10   : > { %s2839_s29 = smov (!%p314_p3, %s1747_s29), 63 }
  0x11   : > { %s2132_s30 = sshll.u32 %s2839_s29, 3 }
  0x12   : > { %s2138_s11 = scalar_lea.vmem %s2826_s0, %s2132_s30  ;;  %s2144_s14 = scalar_lea.vmem %s2827_s1, %s2132_s30 }
  0x13   : > { %v334_v0 = vld [vmem:[%s2138_s11 + $0x10] sm:$0xff]  ;;  %v332_v2 = vld [vmem:[%s2138_s11] sm:$0xff]  ;;  %v335_v5 = vld [vmem:[%s2138_s11 + $0x18] sm:$0xff]  ;;  %s2726_s17 = scalar_lea.vmem %s2834_s8, %s2132_s30 }
  0x14   : > { %v366_v1 = vld [vmem:[%s2144_s14 + $0x10] sm:$0xff]  ;;  %v364_v4 = vld [vmem:[%s2144_s14] sm:$0xff]  ;;  %v367_v6 = vld [vmem:[%s2144_s14 + $0x18] sm:$0xff] }
  0x15   : > { %v2149_v3 = vadd.f32 %v366_v1, %v334_v0  ;;  %v2154_v7 = vadd.f32 %v364_v4, %v332_v2  ;;  %v333_v8 = vld [vmem:[%s2138_s11 + $0x8] sm:$0xff]  ;;  %v2159_v10 = vadd.f32 %v367_v6, %v335_v5  ;;  %v336_v18 = vld [vmem:[%s2138_s11 + $0x20] sm:$0xff]  ;;  %v351_v26 = vld [vmem:[%s2138_s11 + $0x98] sm:$0xff] }
  0x16   : > { %v365_v9 = vld [vmem:[%s2144_s14 + $0x8] sm:$0xff]  ;;  %v368_v19 = vld [vmem:[%s2144_s14 + $0x20] sm:$0xff]  ;;  %v383_v27 = vld [vmem:[%s2144_s14 + $0x98] sm:$0xff] }
  0x17   : > { %432 = vadd.xlane.f32.xlu1 %v2149_v3  ;;  %428 = vadd.xlane.f32.xlu0 %v2154_v7  ;;  %v2162_v11 = vadd.f32 %v365_v9, %v333_v8  ;;  %v524_v13 = vmul.f32 %v2154_v7, %v2154_v7  ;;  %v337_v14 = vld [vmem:[%s2138_s11 + $0x28] sm:$0xff]  ;;  %v527_v17 = vmul.f32 %v2159_v10, %v2159_v10  ;;  %v348_v21 = vld [vmem:[%s2138_s11 + $0x80] sm:$0xff]  ;;  %v350_v28 = vld [vmem:[%s2138_s11 + $0x90] sm:$0xff] }
  0x18   : > { %v369_v15 = vld [vmem:[%s2144_s14 + $0x28] sm:$0xff]  ;;  %v380_v22 = vld [vmem:[%s2144_s14 + $0x80] sm:$0xff]  ;;  %v526_v23 = vmul.f32 %v2149_v3, %v2149_v3  ;;  %v2189_v29 = vadd.f32 %v383_v27, %v351_v26  ;;  %v382_v30 = vld [vmem:[%s2144_s14 + $0x90] sm:$0xff]  ;;  %v2212_v47 = vadd.f32 %v368_v19, %v336_v18 }
  0x19   : > { %2836 = vst [vmem:[#allocation2_spill] sm:$0xff] %v2162_v11  ;;  %v525_v12 = vmul.f32 %v2162_v11, %v2162_v11  ;;  %v349_v16 = vld [vmem:[%s2138_s11 + $0x88] sm:$0xff]  ;;  %v2184_v25 = vadd.f32 %v380_v22, %v348_v21  ;;  %v339_v33 = vld [vmem:[%s2138_s11 + $0x38] sm:$0xff]  ;;  %v2196_v35 = vadd.f32 %v382_v30, %v350_v28  ;;  %v352_v37 = vld [vmem:[%s2138_s11 + $0xa0] sm:$0xff]  ;;  %v2203_v40 = vadd.f32 %v369_v15, %v337_v14 }
  0x1a   : > { %v381_v20 = vld [vmem:[%s2144_s14 + $0x88] sm:$0xff]  ;;  %v371_v34 = vld [vmem:[%s2144_s14 + $0x38] sm:$0xff]  ;;  %v384_v38 = vld [vmem:[%s2144_s14 + $0xa0] sm:$0xff]  ;;  %v528_v18 = vmul.f32 %v2212_v47, %v2212_v47 }
  0x1b   : > { %434 = vadd.xlane.f32.xlu1 %v2159_v10  ;;  %430 = vadd.xlane.f32.xlu0 %v2162_v11  ;;  %v2182_v24 = vadd.f32 %v381_v20, %v349_v16  ;;  %v353_v31 = vld [vmem:[%s2138_s11 + $0xa8] sm:$0xff]  ;;  %v355_v39 = vld [vmem:[%s2138_s11 + $0xb8] sm:$0xff]  ;;  %v338_v41 = vld [vmem:[%s2138_s11 + $0x30] sm:$0xff]  ;;  %v2207_v43 = vadd.f32 %v384_v38, %v352_v37  ;;  %v2234_v62 = vadd.f32 %v371_v34, %v339_v33 }
  0x1c   : > { %v385_v32 = vld [vmem:[%s2144_s14 + $0xa8] sm:$0xff]  ;;  %v370_v42 = vld [vmem:[%s2144_s14 + $0x30] sm:$0xff]  ;;  %v387_v44 = vld [vmem:[%s2144_s14 + $0xb8] sm:$0xff]  ;;  %v529_v16 = vmul.f32 %v2203_v40, %v2203_v40 }
  0x1d   : > { %v2198_v36 = vadd.f32 %v385_v32, %v353_v31  ;;  %v354_v45 = vld [vmem:[%s2138_s11 + $0xb0] sm:$0xff]  ;;  %v2214_v48 = vadd.f32 %v387_v44, %v355_v39  ;;  %v357_v50 = vld [vmem:[%s2138_s11 + $0xc8] sm:$0xff]  ;;  %v356_v52 = vld [vmem:[%s2138_s11 + $0xc0] sm:$0xff]  ;;  %v2242_v4 = vadd.f32 %v370_v42, %v338_v41  ;;  %v531_v19 = vmul.f32 %v2234_v62, %v2234_v62 }
  0x1e   : > { %v386_v46 = vld [vmem:[%s2144_s14 + $0xb0] sm:$0xff]  ;;  %v389_v51 = vld [vmem:[%s2144_s14 + $0xc8] sm:$0xff]  ;;  %v388_v54 = vld [vmem:[%s2144_s14 + $0xc0] sm:$0xff] }
  0x1f   : > { %558 = vadd.xlane.f32.xlu1 %v525_v12  ;;  %556 = vadd.xlane.f32.xlu0 %v524_v13  ;;  %v2216_v49 = vadd.f32 %v386_v46, %v354_v45  ;;  %v2221_v53 = vadd.f32 %v389_v51, %v357_v50  ;;  %v359_v55 = vld [vmem:[%s2138_s11 + $0xd8] sm:$0xff]  ;;  %v2226_v57 = vadd.f32 %v388_v54, %v356_v52  ;;  %v358_v59 = vld [vmem:[%s2138_s11 + $0xd0] sm:$0xff]  ;;  %v361_v61 = vld [vmem:[%s2138_s11 + $0xe8] sm:$0xff] }
  0x20   : > { %v391_v56 = vld [vmem:[%s2144_s14 + $0xd8] sm:$0xff]  ;;  %v390_v60 = vld [vmem:[%s2144_s14 + $0xd0] sm:$0xff]  ;;  %v393_v0 = vld [vmem:[%s2144_s14 + $0xe8] sm:$0xff]  ;;  %v530_v21 = vmul.f32 %v2242_v4, %v2242_v4 }
  0x21   : > { %v2228_v58 = vadd.f32 %v391_v56, %v359_v55  ;;  %v2236_v63 = vadd.f32 %v390_v60, %v358_v59  ;;  %v360_v1 = vld [vmem:[%s2138_s11 + $0xe0] sm:$0xff]  ;;  %v2244_v5 = vadd.f32 %v393_v0, %v361_v61  ;;  %v363_v8 = vld [vmem:[%s2138_s11 + $0xf8] sm:$0xff]  ;;  %v362_v12 = vld [vmem:[%s2138_s11 + $0xf0] sm:$0xff] }
  0x22   : > { %v392_v2 = vld [vmem:[%s2144_s14 + $0xe0] sm:$0xff]  ;;  %v395_v9 = vld [vmem:[%s2144_s14 + $0xf8] sm:$0xff]  ;;  %v394_v14 = vld [vmem:[%s2144_s14 + $0xf0] sm:$0xff] }
  0x23   : > { %562 = vadd.xlane.f32.xlu1 %v527_v17  ;;  %560 = vadd.xlane.f32.xlu0 %v526_v23  ;;  %v2246_v6 = vadd.f32 %v392_v2, %v360_v1  ;;  %v2251_v13 = vadd.f32 %v395_v9, %v363_v8  ;;  %v2254_v15 = vadd.f32 %v394_v14, %v362_v12  ;;  %v1927_v17 = vld [vmem:[%s2830_s4] sm:$0xff]   ;;  %v1928_v20 = vld [vmem:[%s2830_s4 + $0x8] sm:$0xff]   ;;  %v1929_v30 = vld [vmem:[%s2830_s4 + $0x10] sm:$0xff]  }
  0x24   : > { %1823 = vmatprep.subr.bf16.mxu0 %v1927_v17  ;;  %v341_v22 = vld [vmem:[%s2138_s11 + $0x48] sm:$0xff]  ;;  %v340_v26 = vld [vmem:[%s2138_s11 + $0x40] sm:$0xff]  ;;  %v343_v32 = vld [vmem:[%s2138_s11 + $0x58] sm:$0xff] }
  0x25   : > { %1824 = vmatpush3.bf16.msra.mxu0 %v1927_v17  ;;  %v373_v23 = vld [vmem:[%s2144_s14 + $0x48] sm:$0xff]  ;;  %v372_v27 = vld [vmem:[%s2144_s14 + $0x40] sm:$0xff]  ;;  %v375_v33 = vld [vmem:[%s2144_s14 + $0x58] sm:$0xff] }
  0x26   : > { %1825 = vmatprep.subr.bf16.mxu0 %v1928_v20  ;;  %v2276_v28 = vadd.f32 %v373_v23, %v341_v22  ;;  %v2281_v31 = vadd.f32 %v372_v27, %v340_v26  ;;  %v342_v34 = vld [vmem:[%s2138_s11 + $0x50] sm:$0xff]  ;;  %v2288_v38 = vadd.f32 %v375_v33, %v343_v32  ;;  %v1930_v39 = vld [vmem:[%s2830_s4 + $0x18] sm:$0xff]   ;;  %v1931_v44 = vld [vmem:[%s2830_s4 + $0x20] sm:$0xff]   ;;  %v543_v22 = vmul.f32 %v2189_v29, %v2189_v29 }
  0x27   : > { %438 = vadd.xlane.f32.xlu1 %v2203_v40  ;;  %436 = vadd.xlane.f32.xlu0 %v2212_v47  ;;  %v374_v37 = vld [vmem:[%s2144_s14 + $0x50] sm:$0xff]  ;;  %v1932_v50 = vld [vmem:[%s2830_s4 + $0x28] sm:$0xff]   ;;  %v344_v55 = vld [vmem:[%s2138_s11 + $0x60] sm:$0xff]  ;;  %v542_v23 = vmul.f32 %v2196_v35, %v2196_v35  ;;  %v545_v26 = vmul.f32 %v2198_v36, %v2198_v36  ;;  %v544_v27 = vmul.f32 %v2207_v43, %v2207_v43 }
  0x28   : > { %v2294_v41 = vadd.f32 %v374_v37, %v342_v34  ;;  %v533_v42 = vmul.f32 %v2276_v28, %v2276_v28  ;;  %v532_v45 = vmul.f32 %v2281_v31, %v2281_v31  ;;  %v535_v46 = vmul.f32 %v2288_v38, %v2288_v38  ;;  %v345_v52 = vld [vmem:[%s2138_s11 + $0x68] sm:$0xff]  ;;  %v376_v56 = vld [vmem:[%s2144_s14 + $0x60] sm:$0xff]  ;;  %v1933_v60 = vld [vmem:[%s2830_s4 + $0x30] sm:$0xff]  }
  0x29   : > { %1826 = vmatpush3.bf16.msra.mxu0 %v1928_v20  ;;  %v377_v54 = vld [vmem:[%s2144_s14 + $0x68] sm:$0xff]  ;;  %v2321_v61 = vadd.f32 %v376_v56, %v344_v55  ;;  %v347_v0 = vld [vmem:[%s2138_s11 + $0x78] sm:$0xff]  ;;  %v346_v2 = vld [vmem:[%s2138_s11 + $0x70] sm:$0xff]  ;;  %v541_v20 = vmul.f32 %v2182_v24, %v2182_v24  ;;  %v546_v32 = vmul.f32 %v2216_v49, %v2216_v49  ;;  %v549_v33 = vmul.f32 %v2221_v53, %v2221_v53 }
  0x2a   : > { %1827 = vmatprep.subr.bf16.mxu0 %v1929_v30  ;;  %v534_v51 = vmul.f32 %v2294_v41, %v2294_v41  ;;  %v2316_v59 = vadd.f32 %v377_v54, %v345_v52  ;;  %v379_v1 = vld [vmem:[%s2144_s14 + $0x78] sm:$0xff]  ;;  %v378_v8 = vld [vmem:[%s2144_s14 + $0x70] sm:$0xff]  ;;  %v548_v34 = vmul.f32 %v2226_v57, %v2226_v57  ;;  %v551_v37 = vmul.f32 %v2228_v58, %v2228_v58 }
  0x2b   : > { %442 = vadd.xlane.f32.xlu1 %v2234_v62  ;;  %440 = vadd.xlane.f32.xlu0 %v2242_v4  ;;  %v2328_v9 = vadd.f32 %v379_v1, %v347_v0  ;;  %v1934_v12 = vld [vmem:[%s2830_s4 + $0x38] sm:$0xff]   ;;  %v2334_v14 = vadd.f32 %v378_v8, %v346_v2  ;;  %v536_v17 = vmul.f32 %v2321_v61, %v2321_v61 }
  0x2d   : > { %1828 = vmatpush3.bf16.msra.mxu0 %v1929_v30  ;;  %v547_v30 = vmul.f32 %v2214_v48, %v2214_v48 }
  0x2e   : > { %1829 = vmatprep.subr.bf16.mxu0 %v1930_v39 }
  0x2f   : > { %566 = vadd.xlane.f32.xlu1 %v529_v16  ;;  %564 = vadd.xlane.f32.xlu0 %v528_v18  ;;  %v537_v16 = vmul.f32 %v2316_v59, %v2316_v59  ;;  %v539_v18 = vmul.f32 %v2328_v9, %v2328_v9 }
  0x31   : > { %1830 = vmatpush3.bf16.msra.mxu0 %v1930_v39  ;;  %v550_v39 = vmul.f32 %v2236_v63, %v2236_v63 }
  0x32   : > { %1831 = vmatprep.subr.bf16.mxu0 %v1931_v44 }
  0x33   : > { %570 = vadd.xlane.f32.xlu1 %v531_v19  ;;  %568 = vadd.xlane.f32.xlu0 %v530_v21  ;;  %v538_v19 = vmul.f32 %v2334_v14, %v2334_v14  ;;  %v540_v21 = vmul.f32 %v2184_v25, %v2184_v25 }
  0x35   : > { %1832 = vmatpush3.bf16.msra.mxu0 %v1931_v44  ;;  %v552_v44 = vmul.f32 %v2246_v6, %v2246_v6 }
  0x36   : > { %1833 = vmatprep.subr.bf16.mxu0 %v1932_v50 }
  0x37   : > { %446 = vadd.xlane.f32.xlu1 %v2276_v28  ;;  %444 = vadd.xlane.f32.xlu0 %v2281_v31 }
  0x39   : > { %1834 = vmatpush3.bf16.msra.mxu0 %v1932_v50 }
  0x3a   : > { %1835 = vmatprep.subr.bf16.mxu0 %v1933_v60 }
  0x3b   : > { %450 = vadd.xlane.f32.xlu1 %v2288_v38  ;;  %448 = vadd.xlane.f32.xlu0 %v2294_v41 }
  0x3d   : > { %1836 = vmatpush3.bf16.msra.mxu0 %v1933_v60 }
  0x3e   : > { %1837 = vmatprep.subr.bf16.mxu0 %v1934_v12 }
  0x3f   : > { %574 = vadd.xlane.f32.xlu1 %v533_v42  ;;  %572 = vadd.xlane.f32.xlu0 %v532_v45  ;;  %v553_v42 = vmul.f32 %v2244_v5, %v2244_v5  ;;  %v555_v45 = vmul.f32 %v2251_v13, %v2251_v13 }
  0x41   : > { %1838 = vmatpush3.bf16.msra.mxu0 %v1934_v12 }
  0x43   : > { %578 = vadd.xlane.f32.xlu1 %v535_v46  ;;  %576 = vadd.xlane.f32.xlu0 %v534_v51  ;;  %v554_v46 = vmul.f32 %v2254_v15, %v2254_v15 }
  0x47   : > { %454 = vadd.xlane.f32.xlu1 %v2316_v59  ;;  %452 = vadd.xlane.f32.xlu0 %v2321_v61 }
  0x4b   : > { %458 = vadd.xlane.f32.xlu1 %v2328_v9  ;;  %456 = vadd.xlane.f32.xlu0 %v2334_v14 }
  0x4f   : > { %582 = vadd.xlane.f32.xlu1 %v537_v16  ;;  %580 = vadd.xlane.f32.xlu0 %v536_v17 }
  0x53   : > { %586 = vadd.xlane.f32.xlu1 %v539_v18  ;;  %584 = vadd.xlane.f32.xlu0 %v538_v19 }
  0x57   : > { %462 = vadd.xlane.f32.xlu1 %v2182_v24  ;;  %460 = vadd.xlane.f32.xlu0 %v2184_v25 }
  0x5b   : > { %466 = vadd.xlane.f32.xlu1 %v2189_v29  ;;  %464 = vadd.xlane.f32.xlu0 %v2196_v35 }
  0x5f   : > { %590 = vadd.xlane.f32.xlu1 %v541_v20  ;;  %588 = vadd.xlane.f32.xlu0 %v540_v21 }
  0x63   : > { %594 = vadd.xlane.f32.xlu1 %v543_v22  ;;  %592 = vadd.xlane.f32.xlu0 %v542_v23 }
  0x67   : > { %470 = vadd.xlane.f32.xlu1 %v2198_v36  ;;  %468 = vadd.xlane.f32.xlu0 %v2207_v43 }
  0x6b   : > { %474 = vadd.xlane.f32.xlu1 %v2214_v48  ;;  %472 = vadd.xlane.f32.xlu0 %v2216_v49 }
  0x6f   : > { %598 = vadd.xlane.f32.xlu1 %v545_v26  ;;  %596 = vadd.xlane.f32.xlu0 %v544_v27 }
  0x73   : > { %602 = vadd.xlane.f32.xlu1 %v547_v30  ;;  %600 = vadd.xlane.f32.xlu0 %v546_v32 }
  0x77   : > { %478 = vadd.xlane.f32.xlu1 %v2221_v53  ;;  %476 = vadd.xlane.f32.xlu0 %v2226_v57 }
  0x7b   : > { %482 = vadd.xlane.f32.xlu1 %v2228_v58  ;;  %480 = vadd.xlane.f32.xlu0 %v2236_v63 }
  0x7f   : > { %606 = vadd.xlane.f32.xlu1 %v549_v33  ;;  %604 = vadd.xlane.f32.xlu0 %v548_v34 }
  0x83   : > { %610 = vadd.xlane.f32.xlu1 %v551_v37  ;;  %608 = vadd.xlane.f32.xlu0 %v550_v39 }
  0x87   : > { %486 = vadd.xlane.f32.xlu1 %v2244_v5  ;;  %484 = vadd.xlane.f32.xlu0 %v2246_v6 }
  0x8b   : > { %490 = vadd.xlane.f32.xlu1 %v2251_v13  ;;  %488 = vadd.xlane.f32.xlu0 %v2254_v15 }
  0x8f   : > { %614 = vadd.xlane.f32.xlu1 %v553_v42  ;;  %612 = vadd.xlane.f32.xlu0 %v552_v44 }
  0x93   : > { %618 = vadd.xlane.f32.xlu1 %v555_v45  ;;  %616 = vadd.xlane.f32.xlu0 %v554_v46 }
  0xa4   : > { %v433_v50 = vpop.xlane.xlu1 %432  ;;  %v429_v51 = vpop.xlane.xlu0 %428 }
  0xa5   : > { %v2394_v55 = vmul.f32 0.03125, %v429_v51  ;;  %v2398_v12 = vmul.f32 0.03125, %v433_v50 }
  0xa7   : > { %v652_v16 = vmul.f32 %v2394_v55, %v2394_v55  ;;  %v654_v27 = vmul.f32 %v2398_v12, %v2398_v12 }
  0xa8   : > { %v435_v52 = vpop.xlane.xlu1 %434  ;;  %v431_v54 = vpop.xlane.xlu0 %430 }
  0xa9   : > { %v493_v56 = vmul.f32 0.03125, %v431_v54  ;;  %v2396_v0 = vmul.f32 0.03125, %v435_v52 }
  0xab   : > { %v653_v1 = vmul.f32 %v493_v56, %v493_v56  ;;  %v655_v21 = vmul.f32 %v2396_v0, %v2396_v0 }
  0xac   : > { %v559_v60 = vpop.xlane.xlu1 %558  ;;  %v557_v8 = vpop.xlane.xlu0 %556 }
  0xad   : > { %v621_v2 = vmul.f32 0.03125, %v559_v60  ;;  %v620_v17 = vmul.f32 0.03125, %v557_v8 }
  0xaf   : > { %v685_v18 = vsub.f32 %v621_v2, %v653_v1  ;;  %v684_v19 = vsub.f32 %v620_v17, %v652_v16 }
  0xb0   : > { %v563_v20 = vpop.xlane.xlu1 %562  ;;  %v561_v26 = vpop.xlane.xlu0 %560 }
  0xb1   : > { %v717_v22 = vmax.f32 %v685_v18, 0.0  ;;  %v623_v23 = vmul.f32 0.03125, %v563_v20  ;;  %v716_v30 = vmax.f32 %v684_v19, 0.0  ;;  %v622_v32 = vmul.f32 0.03125, %v561_v26  ;;  %v1935_v19 = vld [vmem:[%s2832_s6] sm:$0xff]   ;;  %v1936_v20 = vld [vmem:[%s2832_s6 + $0x8] sm:$0xff]  }
  0xb2   : > { %1871 = vmatprep.subr.bf16.mxu1 %v1935_v19 }
  0xb3   : > { %v781_v33 = vadd.f32 1e-05, %v717_v22  ;;  %v687_v34 = vsub.f32 %v623_v23, %v655_v21  ;;  %v780_v37 = vadd.f32 1e-05, %v716_v30  ;;  %v686_v39 = vsub.f32 %v622_v32, %v654_v27  ;;  %1872 = vmatpush3.bf16.msra.mxu1 %v1935_v19 }
  0xb4   : > { %v439_v42 = vpop.xlane.xlu1 %438  ;;  %v437_v45 = vpop.xlane.xlu0 %436  ;;  %v749_v21 = vsub.f32 %v2162_v11, %v493_v56  ;;  %v748_v30 = vsub.f32 %v2154_v7, %v2394_v55  ;;  %v2437_v55 = vld [vmem:[%s2829_s3] ss:$0 sm:$0xff]  ;;  %1873 = vmatprep.subr.bf16.mxu1 %v1936_v20 }
  0xb5   : > { %1943 = vrsqrt.f32 %v781_v33  ;;  %v719_v44 = vmax.f32 %v687_v34, 0.0  ;;  %v718_v46 = vmax.f32 %v686_v39, 0.0  ;;  %v2406_v54 = vmul.f32 0.03125, %v439_v42  ;;  %v2430_v33 = vld [vmem:[%s2828_s2] ss:$0 sm:$0xff] }
  0xb6   : > { %1945 = vrsqrt.f32 %v780_v37  ;;  %v2408_v1 = vmul.f32 0.03125, %v437_v45 }
  0xb7   : > { %v783_v50 = vadd.f32 1e-05, %v719_v44  ;;  %v782_v51 = vadd.f32 1e-05, %v718_v46  ;;  %v657_v8 = vmul.f32 %v2406_v54, %v2406_v54  ;;  %1874 = vmatpush3.bf16.msra.mxu1 %v1936_v20 }
  0xb8   : > { %v443_v52 = vpop.xlane.xlu1 %442  ;;  %v441_v60 = vpop.xlane.xlu0 %440  ;;  %v656_v22 = vmul.f32 %v2408_v1, %v2408_v1 }
  0xb9   : > { %1947 = vrsqrt.f32 %v783_v50  ;;  %v2412_v16 = vmul.f32 0.03125, %v443_v52  ;;  %v2423_v23 = vmul.f32 0.03125, %v441_v60 }
  0xba   : > { %1949 = vrsqrt.f32 %v782_v51 }
  0xbb   : > { %v659_v42 = vmul.f32 %v2412_v16, %v2412_v16  ;;  %v658_v51 = vmul.f32 %v2423_v23, %v2423_v23 }
  0xbc   : > { %v567_v2 = vpop.xlane.xlu1 %566  ;;  %v565_v18 = vpop.xlane.xlu0 %564 }
  0xbd   : > { %v625_v17 = vmul.f32 0.03125, %v567_v2  ;;  %v624_v26 = vmul.f32 0.03125, %v565_v18 }
  0xbf   : > { %v1944_v27 = vpop.eup %1943  ;;  %v689_v32 = vsub.f32 %v625_v17, %v657_v8  ;;  %v688_v37 = vsub.f32 %v624_v26, %v656_v22  ;;  %v751_v17 = vsub.f32 %v2159_v10, %v2396_v0  ;;  %v750_v26 = vsub.f32 %v2149_v3, %v2398_v12 }
  0xc0   : > { %v1946_v34 = vpop.eup %1945  ;;  %v571_v56 = vpop.xlane.xlu1 %570  ;;  %v845_v39 = vmul.f32 %v1944_v27, %v749_v21 }
  0xc1   : > { %v721_v44 = vmax.f32 %v689_v32, 0.0  ;;  %v627_v45 = vmul.f32 0.03125, %v571_v56  ;;  %v569_v46 = vpop.xlane.xlu0 %568  ;;  %v844_v50 = vmul.f32 %v1946_v34, %v748_v30  ;;  %v720_v52 = vmax.f32 %v688_v37, 0.0 }
  0xc2   : > { %v626_v60 = vmul.f32 0.03125, %v569_v46  ;;  %v884_v2 = vmul.f32 %v2430_v33, %v845_v39 }
  0xc3   : > { %v1948_v8 = vpop.eup %1947  ;;  %v785_v18 = vadd.f32 1e-05, %v721_v44  ;;  %v691_v19 = vsub.f32 %v627_v45, %v659_v42  ;;  %v883_v21 = vmul.f32 %v2430_v33, %v844_v50  ;;  %v784_v27 = vadd.f32 1e-05, %v720_v52 }
  0xc4   : > { %v1950_v22 = vpop.eup %1949  ;;  %v690_v30 = vsub.f32 %v626_v60, %v658_v51  ;;  %v447_v32 = vpop.xlane.xlu1 %446  ;;  %v923_v34 = vadd.f32 %v2437_v55, %v884_v2  ;;  %v847_v0 = vmul.f32 %v1948_v8, %v751_v17 }
  0xc5   : > { %1951 = vrsqrt.f32 %v785_v18  ;;  %v723_v37 = vmax.f32 %v691_v19, 0.0  ;;  %v445_v56 = vpop.xlane.xlu0 %444  ;;  %v922_v39 = vadd.f32 %v2437_v55, %v883_v21  ;;  %v846_v44 = vmul.f32 %v1950_v22, %v750_v26 }
  0xc6   : > { %1953 = vrsqrt.f32 %v784_v27  ;;  %v722_v42 = vmax.f32 %v690_v30, 0.0  ;;  %v2450_v51 = vmul.f32 0.03125, %v447_v32  ;;  %v886_v52 = vmul.f32 %v2430_v33, %v847_v0 }
  0xc7   : > { %v787_v45 = vadd.f32 1e-05, %v723_v37  ;;  %v954_v46 = vpack.c.bf16 %v923_v34, %v922_v39  ;;  %v885_v12 = vmul.f32 %v2430_v33, %v846_v44  ;;  %v2453_v60 = vmul.f32 0.03125, %v445_v56 }
  0xc8   : > { %v786_v50 = vadd.f32 1e-05, %v722_v42  ;;  %v451_v11 = vpop.xlane.xlu1 %450  ;;  %v925_v8 = vadd.f32 %v2437_v55, %v886_v52  ;;  %v661_v18 = vmul.f32 %v2450_v51, %v2450_v51  ;;  %v753_v27 = vsub.f32 %v2203_v40, %v2406_v54 }
  0xc9   : > { %1955 = vrsqrt.f32 %v787_v45  ;;  %1839 = vmatprep.mubr.bf16.mxu0 %v954_v46  ;;  %v449_v20 = vpop.xlane.xlu0 %448  ;;  %v924_v2 = vadd.f32 %v2437_v55, %v885_v12  ;;  %v2459_v19 = vmul.f32 0.03125, %v451_v11  ;;  %v660_v30 = vmul.f32 %v2453_v60, %v2453_v60 }
  0xca   : > { %1957 = vrsqrt.f32 %v786_v50  ;;  %v2465_v32 = vmul.f32 0.03125, %v449_v20  ;;  %v752_v56 = vsub.f32 %v2212_v47, %v2408_v1 }
  0xcb   : > { %v955_v22 = vpack.c.bf16 %v925_v8, %v924_v2  ;;  %v663_v45 = vmul.f32 %v2459_v19, %v2459_v19 }
  0xcc   : > { %v575_v17 = vpop.xlane.xlu1 %574  ;;  %v662_v20 = vmul.f32 %v2465_v32, %v2465_v32 }
  0xcd   : > { %v629_v21 = vmul.f32 0.03125, %v575_v17  ;;  %v573_v26 = vpop.xlane.xlu0 %572  ;;  %1840 = vmatmul.mubr.bf16.vlgmr.msra.gmra.mrb[0].mxu0 %v955_v22  ;;  %v755_v17 = vsub.f32 %v2234_v62, %v2412_v16 }
  0xce   : > { %v628_v34 = vmul.f32 0.03125, %v573_v26 }
  0xcf   : > { %v1952_v37 = vpop.eup %1951  ;;  %v693_v39 = vsub.f32 %v629_v21, %v661_v18 }
  0xd0   : > { %v1954_v11 = vpop.eup %1953  ;;  %v692_v0 = vsub.f32 %v628_v34, %v660_v30  ;;  %v579_v42 = vpop.xlane.xlu1 %578  ;;  %v849_v44 = vmul.f32 %v1952_v37, %v753_v27  ;;  %v754_v27 = vsub.f32 %v2242_v4, %v2423_v23 }
  0xd1   : > { %v725_v54 = vmax.f32 %v693_v39, 0.0  ;;  %v631_v46 = vmul.f32 0.03125, %v579_v42  ;;  %v577_v50 = vpop.xlane.xlu0 %576  ;;  %v848_v12 = vmul.f32 %v1954_v11, %v752_v56 }
  0xd2   : > { %v724_v52 = vmax.f32 %v692_v0, 0.0  ;;  %v630_v2 = vmul.f32 0.03125, %v577_v50  ;;  %v888_v1 = vmul.f32 %v2430_v33, %v849_v44 }
  0xd3   : > { %v1956_v8 = vpop.eup %1955  ;;  %v789_v18 = vadd.f32 1e-05, %v725_v54  ;;  %v695_v21 = vsub.f32 %v631_v46, %v663_v45  ;;  %v887_v22 = vmul.f32 %v2430_v33, %v848_v12 }
  0xd4   : > { %v1958_v26 = vpop.eup %1957  ;;  %v788_v30 = vadd.f32 1e-05, %v724_v52  ;;  %v694_v34 = vsub.f32 %v630_v2, %v662_v20  ;;  %v455_v37 = vpop.xlane.xlu1 %454  ;;  %v927_v56 = vadd.f32 %v2437_v55, %v888_v1  ;;  %v851_v42 = vmul.f32 %v1956_v8, %v755_v17 }
  0xd5   : > { %1959 = vrsqrt.f32 %v789_v18  ;;  %v727_v39 = vmax.f32 %v695_v21, 0.0  ;;  %v453_v11 = vpop.xlane.xlu0 %452  ;;  %v926_v0 = vadd.f32 %v2437_v55, %v887_v22  ;;  %v850_v44 = vmul.f32 %v1958_v26, %v754_v27 }
  0xd6   : > { %1961 = vrsqrt.f32 %v788_v30  ;;  %v726_v16 = vmax.f32 %v694_v34, 0.0  ;;  %v2482_v12 = vmul.f32 0.03125, %v455_v37  ;;  %v890_v52 = vmul.f32 %v2430_v33, %v851_v42 }
  0xd7   : > { %v791_v45 = vadd.f32 1e-05, %v727_v39  ;;  %v956_v54 = vpack.c.bf16 %v927_v56, %v926_v0  ;;  %v889_v23 = vmul.f32 %v2430_v33, %v850_v44  ;;  %v2485_v2 = vmul.f32 0.03125, %v453_v11 }
  0xd8   : > { %v790_v46 = vadd.f32 1e-05, %v726_v16  ;;  %v459_v50 = vpop.xlane.xlu1 %458  ;;  %v929_v8 = vadd.f32 %v2437_v55, %v890_v52  ;;  %v665_v18 = vmul.f32 %v2482_v12, %v2482_v12  ;;  %v757_v30 = vsub.f32 %v2276_v28, %v2450_v51 }
  0xd9   : > { %1963 = vrsqrt.f32 %v791_v45  ;;  %1843 = vmatprep.mubr.bf16.mxu0 %v956_v54  ;;  %v457_v20 = vpop.xlane.xlu0 %456  ;;  %v928_v1 = vadd.f32 %v2437_v55, %v889_v23  ;;  %v2491_v21 = vmul.f32 0.03125, %v459_v50  ;;  %v664_v34 = vmul.f32 %v2485_v2, %v2485_v2 }
  0xda   : > { %1965 = vrsqrt.f32 %v790_v46  ;;  %v2497_v37 = vmul.f32 0.03125, %v457_v20  ;;  %v756_v11 = vsub.f32 %v2281_v31, %v2453_v60 }
  0xdb   : > { %v957_v26 = vpack.c.bf16 %v929_v8, %v928_v1  ;;  %v667_v54 = vmul.f32 %v2491_v21, %v2491_v21 }
  0xdc   : > { %v583_v17 = vpop.xlane.xlu1 %582  ;;  %v666_v20 = vmul.f32 %v2497_v37, %v2497_v37 }
  0xdd   : > { %v633_v22 = vmul.f32 0.03125, %v583_v17  ;;  %v581_v27 = vpop.xlane.xlu0 %580  ;;  %1844 = vmatmul.mubr.bf16.gmra.mrb[4].mxu0 %v957_v26  ;;  %v759_v17 = vsub.f32 %v2288_v38, %v2459_v19 }
  0xde   : > { %v632_v56 = vmul.f32 0.03125, %v581_v27 }
  0xdf   : > { %v1960_v39 = vpop.eup %1959  ;;  %v697_v0 = vsub.f32 %v633_v22, %v665_v18 }
  0xe0   : > { %v1962_v42 = vpop.eup %1961  ;;  %v696_v16 = vsub.f32 %v632_v56, %v664_v34  ;;  %v587_v44 = vpop.xlane.xlu1 %586  ;;  %v853_v45 = vmul.f32 %v1960_v39, %v757_v30  ;;  %v758_v30 = vsub.f32 %v2294_v41, %v2465_v32 }
  0xe1   : > { %v729_v51 = vmax.f32 %v697_v0, 0.0  ;;  %v635_v46 = vmul.f32 0.03125, %v587_v44  ;;  %v585_v50 = vpop.xlane.xlu0 %584  ;;  %v852_v23 = vmul.f32 %v1962_v42, %v756_v11 }
  0xe2   : > { %v728_v52 = vmax.f32 %v696_v16, 0.0  ;;  %v634_v1 = vmul.f32 0.03125, %v585_v50  ;;  %v892_v60 = vmul.f32 %v2430_v33, %v853_v45 }
  0xe3   : > { %v1964_v8 = vpop.eup %1963  ;;  %v793_v18 = vadd.f32 1e-05, %v729_v51  ;;  %v699_v22 = vsub.f32 %v635_v46, %v667_v54  ;;  %v891_v26 = vmul.f32 %v2430_v33, %v852_v23 }
  0xe4   : > { %v1966_v27 = vpop.eup %1965  ;;  %v792_v34 = vadd.f32 1e-05, %v728_v52  ;;  %v698_v56 = vsub.f32 %v634_v1, %v666_v20  ;;  %v463_v39 = vpop.xlane.xlu1 %462  ;;  %v931_v11 = vadd.f32 %v2437_v55, %v892_v60  ;;  %v855_v44 = vmul.f32 %v1964_v8, %v759_v17 }
  0xe5   : > { %1967 = vrsqrt.f32 %v793_v18  ;;  %v731_v0 = vmax.f32 %v699_v22, 0.0  ;;  %v461_v42 = vpop.xlane.xlu0 %460  ;;  %v930_v16 = vadd.f32 %v2437_v55, %v891_v26  ;;  %v854_v45 = vmul.f32 %v1966_v27, %v758_v30 }
  0xe6   : > { %1969 = vrsqrt.f32 %v792_v34  ;;  %v730_v19 = vmax.f32 %v698_v56, 0.0  ;;  %v2514_v23 = vmul.f32 0.03125, %v463_v39  ;;  %v894_v52 = vmul.f32 %v2430_v33, %v855_v44 }
  0xe7   : > { %v795_v54 = vadd.f32 1e-05, %v731_v0  ;;  %v958_v51 = vpack.c.bf16 %v931_v11, %v930_v16  ;;  %v893_v32 = vmul.f32 %v2430_v33, %v854_v45  ;;  %v2517_v1 = vmul.f32 0.03125, %v461_v42 }
  0xe8   : > { %v794_v46 = vadd.f32 1e-05, %v730_v19  ;;  %v467_v50 = vpop.xlane.xlu1 %466  ;;  %v933_v8 = vadd.f32 %v2437_v55, %v894_v52  ;;  %v669_v18 = vmul.f32 %v2514_v23, %v2514_v23  ;;  %v761_v34 = vsub.f32 %v2316_v59, %v2482_v12 }
  0xe9   : > { %1971 = vrsqrt.f32 %v795_v54  ;;  %1847 = vmatprep.mubr.bf16.mxu0 %v958_v51  ;;  %v465_v20 = vpop.xlane.xlu0 %464  ;;  %v932_v60 = vadd.f32 %v2437_v55, %v893_v32  ;;  %v2523_v22 = vmul.f32 0.03125, %v467_v50  ;;  %v668_v56 = vmul.f32 %v2517_v1, %v2517_v1 }
  0xea   : > { %1973 = vrsqrt.f32 %v794_v46  ;;  %v2529_v39 = vmul.f32 0.03125, %v465_v20  ;;  %v760_v42 = vsub.f32 %v2321_v61, %v2485_v2 }
  0xeb   : > { %v959_v27 = vpack.c.bf16 %v933_v8, %v932_v60  ;;  %v671_v51 = vmul.f32 %v2523_v22, %v2523_v22 }
  0xec   : > { %v591_v17 = vpop.xlane.xlu1 %590  ;;  %v670_v20 = vmul.f32 %v2529_v39, %v2529_v39 }
  0xed   : > { %v637_v26 = vmul.f32 0.03125, %v591_v17  ;;  %v589_v30 = vpop.xlane.xlu0 %588  ;;  %1848 = vmatmul.mubr.bf16.gmra.mrb[8].mxu0 %v959_v27  ;;  %v763_v17 = vsub.f32 %v2328_v9, %v2491_v21 }
  0xee   : > { %v636_v11 = vmul.f32 0.03125, %v589_v30 }
  0xef   : > { %v1968_v0 = vpop.eup %1967  ;;  %v701_v16 = vsub.f32 %v637_v26, %v669_v18 }
  0xf0   : > { %v1970_v44 = vpop.eup %1969  ;;  %v700_v19 = vsub.f32 %v636_v11, %v668_v56  ;;  %v595_v45 = vpop.xlane.xlu1 %594  ;;  %v857_v54 = vmul.f32 %v1968_v0, %v761_v34  ;;  %v762_v34 = vsub.f32 %v2334_v14, %v2497_v37 }
  0xf1   : > { %v733_v12 = vmax.f32 %v701_v16, 0.0  ;;  %v639_v46 = vmul.f32 0.03125, %v595_v45  ;;  %v593_v50 = vpop.xlane.xlu0 %592  ;;  %v856_v32 = vmul.f32 %v1970_v44, %v760_v42 }
  0xf2   : > { %v732_v52 = vmax.f32 %v700_v19, 0.0  ;;  %v638_v60 = vmul.f32 0.03125, %v593_v50  ;;  %v896_v2 = vmul.f32 %v2430_v33, %v857_v54 }
  0xf3   : > { %v1972_v8 = vpop.eup %1971  ;;  %v797_v18 = vadd.f32 1e-05, %v733_v12  ;;  %v703_v26 = vsub.f32 %v639_v46, %v671_v51  ;;  %v895_v27 = vmul.f32 %v2430_v33, %v856_v32 }
  0xf4   : > { %v1974_v30 = vpop.eup %1973  ;;  %v796_v56 = vadd.f32 1e-05, %v732_v52  ;;  %v702_v11 = vsub.f32 %v638_v60, %v670_v20  ;;  %v471_v0 = vpop.xlane.xlu1 %470  ;;  %v935_v42 = vadd.f32 %v2437_v55, %v896_v2  ;;  %v859_v45 = vmul.f32 %v1972_v8, %v763_v17 }
  0xf5   : > { %1975 = vrsqrt.f32 %v797_v18  ;;  %v735_v16 = vmax.f32 %v703_v26, 0.0  ;;  %v469_v44 = vpop.xlane.xlu0 %468  ;;  %v934_v19 = vadd.f32 %v2437_v55, %v895_v27  ;;  %v858_v54 = vmul.f32 %v1974_v30, %v762_v34 }
  0xf6   : > { %1977 = vrsqrt.f32 %v796_v56  ;;  %v734_v21 = vmax.f32 %v702_v11, 0.0  ;;  %v2546_v32 = vmul.f32 0.03125, %v471_v0  ;;  %v898_v52 = vmul.f32 %v2430_v33, %v859_v45 }
  0xf7   : > { %v799_v51 = vadd.f32 1e-05, %v735_v16  ;;  %v960_v12 = vpack.c.bf16 %v935_v42, %v934_v19  ;;  %v897_v37 = vmul.f32 %v2430_v33, %v858_v54  ;;  %v2549_v60 = vmul.f32 0.03125, %v469_v44 }
  0xf8   : > { %v798_v46 = vadd.f32 1e-05, %v734_v21  ;;  %v475_v50 = vpop.xlane.xlu1 %474  ;;  %v937_v8 = vadd.f32 %v2437_v55, %v898_v52  ;;  %v673_v18 = vmul.f32 %v2546_v32, %v2546_v32  ;;  %v765_v56 = vsub.f32 %v2182_v24, %v2514_v23 }
  0xf9   : > { %1979 = vrsqrt.f32 %v799_v51  ;;  %1851 = vmatprep.mubr.bf16.mxu0 %v960_v12  ;;  %v473_v20 = vpop.xlane.xlu0 %472  ;;  %v936_v2 = vadd.f32 %v2437_v55, %v897_v37  ;;  %v2555_v26 = vmul.f32 0.03125, %v475_v50  ;;  %v672_v11 = vmul.f32 %v2549_v60, %v2549_v60 }
  0xfa   : > { %1981 = vrsqrt.f32 %v798_v46  ;;  %v2561_v0 = vmul.f32 0.03125, %v473_v20  ;;  %v764_v44 = vsub.f32 %v2184_v25, %v2517_v1 }
  0xfb   : > { %v961_v30 = vpack.c.bf16 %v937_v8, %v936_v2  ;;  %v675_v12 = vmul.f32 %v2555_v26, %v2555_v26 }
  0xfc   : > { %v599_v17 = vpop.xlane.xlu1 %598  ;;  %v674_v20 = vmul.f32 %v2561_v0, %v2561_v0 }
  0xfd   : > { %v641_v27 = vmul.f32 0.03125, %v599_v17  ;;  %v597_v34 = vpop.xlane.xlu0 %596  ;;  %1852 = vmatmul.mubr.bf16.gmra.mrb[12].mxu0 %v961_v30  ;;  %v767_v17 = vsub.f32 %v2189_v29, %v2523_v22 }
  0xfe   : > { %v640_v42 = vmul.f32 0.03125, %v597_v34 }
  0xff   : > { %v1976_v16 = vpop.eup %1975  ;;  %v705_v19 = vsub.f32 %v641_v27, %v673_v18 }
 0x100   : > { %v1978_v45 = vpop.eup %1977  ;;  %v704_v21 = vsub.f32 %v640_v42, %v672_v11  ;;  %v603_v54 = vpop.xlane.xlu1 %602  ;;  %v861_v51 = vmul.f32 %v1976_v16, %v765_v56  ;;  %v766_v56 = vsub.f32 %v2196_v35, %v2529_v39 }
 0x101   : > { %v737_v23 = vmax.f32 %v705_v19, 0.0  ;;  %v643_v46 = vmul.f32 0.03125, %v603_v54  ;;  %v601_v50 = vpop.xlane.xlu0 %600  ;;  %v860_v37 = vmul.f32 %v1978_v45, %v764_v44 }
 0x102   : > { %v736_v52 = vmax.f32 %v704_v21, 0.0  ;;  %v642_v2 = vmul.f32 0.03125, %v601_v50  ;;  %v900_v1 = vmul.f32 %v2430_v33, %v861_v51 }
 0x103   : > { %v1980_v8 = vpop.eup %1979  ;;  %v801_v18 = vadd.f32 1e-05, %v737_v23  ;;  %v707_v27 = vsub.f32 %v643_v46, %v675_v12  ;;  %v899_v30 = vmul.f32 %v2430_v33, %v860_v37 }
 0x104   : > { %v1982_v34 = vpop.eup %1981  ;;  %v800_v11 = vadd.f32 1e-05, %v736_v52  ;;  %v706_v42 = vsub.f32 %v642_v2, %v674_v20  ;;  %v479_v16 = vpop.xlane.xlu1 %478  ;;  %v939_v44 = vadd.f32 %v2437_v55, %v900_v1  ;;  %v863_v54 = vmul.f32 %v1980_v8, %v767_v17 }
 0x105   : > { %1983 = vrsqrt.f32 %v801_v18  ;;  %v739_v19 = vmax.f32 %v707_v27, 0.0  ;;  %v477_v45 = vpop.xlane.xlu0 %476  ;;  %v938_v21 = vadd.f32 %v2437_v55, %v899_v30  ;;  %v862_v51 = vmul.f32 %v1982_v34, %v766_v56 }
 0x106   : > { %1985 = vrsqrt.f32 %v800_v11  ;;  %v738_v22 = vmax.f32 %v706_v42, 0.0  ;;  %v2578_v37 = vmul.f32 0.03125, %v479_v16  ;;  %v902_v52 = vmul.f32 %v2430_v33, %v863_v54 }
 0x107   : > { %v803_v12 = vadd.f32 1e-05, %v739_v19  ;;  %v962_v23 = vpack.c.bf16 %v939_v44, %v938_v21  ;;  %v901_v39 = vmul.f32 %v2430_v33, %v862_v51  ;;  %v2581_v2 = vmul.f32 0.03125, %v477_v45 }
 0x108   : > { %v802_v46 = vadd.f32 1e-05, %v738_v22  ;;  %v483_v50 = vpop.xlane.xlu1 %482  ;;  %v941_v8 = vadd.f32 %v2437_v55, %v902_v52  ;;  %v677_v18 = vmul.f32 %v2578_v37, %v2578_v37  ;;  %v769_v11 = vsub.f32 %v2198_v36, %v2546_v32 }
 0x109   : > { %1987 = vrsqrt.f32 %v803_v12  ;;  %1855 = vmatprep.mubr.bf16.mxu0 %v962_v23  ;;  %v481_v20 = vpop.xlane.xlu0 %480  ;;  %v940_v1 = vadd.f32 %v2437_v55, %v901_v39  ;;  %v2587_v27 = vmul.f32 0.03125, %v483_v50  ;;  %v676_v42 = vmul.f32 %v2581_v2, %v2581_v2 }
 0x10a   : > { %1989 = vrsqrt.f32 %v802_v46  ;;  %v2593_v16 = vmul.f32 0.03125, %v481_v20  ;;  %v768_v45 = vsub.f32 %v2207_v43, %v2549_v60 }
 0x10b   : > { %v963_v34 = vpack.c.bf16 %v941_v8, %v940_v1  ;;  %v679_v23 = vmul.f32 %v2587_v27, %v2587_v27 }
 0x10c   : > { %v607_v17 = vpop.xlane.xlu1 %606  ;;  %v678_v20 = vmul.f32 %v2593_v16, %v2593_v16 }
 0x10d   : > { %v645_v30 = vmul.f32 0.03125, %v607_v17  ;;  %v605_v56 = vpop.xlane.xlu0 %604  ;;  %1856 = vmatmul.mubr.bf16.gmra.mrb[16].mxu0 %v963_v34  ;;  %v771_v17 = vsub.f32 %v2214_v48, %v2555_v26 }
 0x10e   : > { %v644_v44 = vmul.f32 0.03125, %v605_v56 }
 0x10f   : > { %v1984_v19 = vpop.eup %1983  ;;  %v709_v21 = vsub.f32 %v645_v30, %v677_v18 }
 0x110   : > { %v1986_v54 = vpop.eup %1985  ;;  %v708_v22 = vsub.f32 %v644_v44, %v676_v42  ;;  %v611_v51 = vpop.xlane.xlu1 %610  ;;  %v865_v12 = vmul.f32 %v1984_v19, %v769_v11  ;;  %v770_v11 = vsub.f32 %v2216_v49, %v2561_v0 }
 0x111   : > { %v741_v32 = vmax.f32 %v709_v21, 0.0  ;;  %v647_v46 = vmul.f32 0.03125, %v611_v51  ;;  %v609_v50 = vpop.xlane.xlu0 %608  ;;  %v864_v39 = vmul.f32 %v1986_v54, %v768_v45 }
 0x112   : > { %v740_v52 = vmax.f32 %v708_v22, 0.0  ;;  %v646_v1 = vmul.f32 0.03125, %v609_v50  ;;  %v904_v60 = vmul.f32 %v2430_v33, %v865_v12 }
 0x113   : > { %v1988_v8 = vpop.eup %1987  ;;  %v805_v18 = vadd.f32 1e-05, %v741_v32  ;;  %v711_v30 = vsub.f32 %v647_v46, %v679_v23  ;;  %v903_v34 = vmul.f32 %v2430_v33, %v864_v39 }
 0x114   : > { %v1990_v56 = vpop.eup %1989  ;;  %v804_v42 = vadd.f32 1e-05, %v740_v52  ;;  %v710_v44 = vsub.f32 %v646_v1, %v678_v20  ;;  %v487_v19 = vpop.xlane.xlu1 %486  ;;  %v943_v45 = vadd.f32 %v2437_v55, %v904_v60  ;;  %v867_v51 = vmul.f32 %v1988_v8, %v771_v17 }
 0x115   : > { %1991 = vrsqrt.f32 %v805_v18  ;;  %v743_v21 = vmax.f32 %v711_v30, 0.0  ;;  %v485_v54 = vpop.xlane.xlu0 %484  ;;  %v942_v22 = vadd.f32 %v2437_v55, %v903_v34  ;;  %v866_v12 = vmul.f32 %v1990_v56, %v770_v11 }
 0x116   : > { %1993 = vrsqrt.f32 %v804_v42  ;;  %v742_v26 = vmax.f32 %v710_v44, 0.0  ;;  %v2610_v39 = vmul.f32 0.03125, %v487_v19  ;;  %v906_v52 = vmul.f32 %v2430_v33, %v867_v51 }
 0x117   : > { %v807_v23 = vadd.f32 1e-05, %v743_v21  ;;  %v964_v32 = vpack.c.bf16 %v943_v45, %v942_v22  ;;  %v905_v0 = vmul.f32 %v2430_v33, %v866_v12  ;;  %v2613_v1 = vmul.f32 0.03125, %v485_v54 }
 0x118   : > { %v806_v46 = vadd.f32 1e-05, %v742_v26  ;;  %v491_v50 = vpop.xlane.xlu1 %490  ;;  %v945_v8 = vadd.f32 %v2437_v55, %v906_v52  ;;  %v681_v18 = vmul.f32 %v2610_v39, %v2610_v39  ;;  %v773_v42 = vsub.f32 %v2221_v53, %v2578_v37 }
 0x119   : > { %1995 = vrsqrt.f32 %v807_v23  ;;  %1859 = vmatprep.mubr.bf16.mxu0 %v964_v32  ;;  %v489_v20 = vpop.xlane.xlu0 %488  ;;  %v944_v60 = vadd.f32 %v2437_v55, %v905_v0  ;;  %v2619_v30 = vmul.f32 0.03125, %v491_v50  ;;  %v680_v44 = vmul.f32 %v2613_v1, %v2613_v1 }
 0x11a   : > { %1997 = vrsqrt.f32 %v806_v46  ;;  %v2625_v19 = vmul.f32 0.03125, %v489_v20  ;;  %v772_v54 = vsub.f32 %v2226_v57, %v2581_v2  ;;  %v775_v26 = vsub.f32 %v2228_v58, %v2587_v27  ;;  %v1937_v27 = vld [vmem:[%s2832_s6 + $0x10] sm:$0xff]  }
 0x11b   : > { %v965_v56 = vpack.c.bf16 %v945_v8, %v944_v60  ;;  %v683_v37 = vmul.f32 %v2619_v30, %v2619_v30  ;;  %1875 = vmatprep.subr.bf16.mxu1 %v1937_v27 }
 0x11c   : > { %v615_v17 = vpop.xlane.xlu1 %614  ;;  %v682_v52 = vmul.f32 %v2625_v19, %v2625_v19  ;;  %1876 = vmatpush3.bf16.msra.mxu1 %v1937_v27 }
 0x11d   : > { %v649_v34 = vmul.f32 0.03125, %v615_v17  ;;  %v613_v11 = vpop.xlane.xlu0 %612  ;;  %1860 = vmatmul.mubr.bf16.gmra.mrb[20].mxu0 %v965_v56 }
 0x11e   : > { %v648_v45 = vmul.f32 0.03125, %v613_v11 }
 0x11f   : > { %v1992_v21 = vpop.eup %1991  ;;  %v713_v22 = vsub.f32 %v649_v34, %v681_v18  ;;  %v774_v18 = vsub.f32 %v2236_v63, %v2593_v16 }
 0x120   : > { %v1994_v51 = vpop.eup %1993  ;;  %v712_v12 = vsub.f32 %v648_v45, %v680_v44  ;;  %v619_v23 = vpop.xlane.xlu1 %618  ;;  %v869_v32 = vmul.f32 %v1992_v21, %v773_v42 }
 0x121   : > { %v745_v46 = vmax.f32 %v713_v22, 0.0  ;;  %v651_v50 = vmul.f32 0.03125, %v619_v23  ;;  %v617_v0 = vpop.xlane.xlu0 %616  ;;  %v868_v20 = vmul.f32 %v1994_v51, %v772_v54 }
 0x122   : > { %v744_v2 = vmax.f32 %v712_v12, 0.0  ;;  %v650_v60 = vmul.f32 0.03125, %v617_v0  ;;  %v908_v8 = vmul.f32 %v2430_v33, %v869_v32  ;;  %v1938_v32 = vld [vmem:[%s2832_s6 + $0x18] sm:$0xff]  }
 0x123   : > { %v1996_v17 = vpop.eup %1995  ;;  %v809_v34 = vadd.f32 1e-05, %v745_v46  ;;  %v715_v56 = vsub.f32 %v651_v50, %v683_v37  ;;  %v907_v11 = vmul.f32 %v2430_v33, %v868_v20  ;;  %1877 = vmatprep.subr.bf16.mxu1 %v1938_v32 }
 0x124   : > { %v1998_v42 = vpop.eup %1997  ;;  %v808_v44 = vadd.f32 1e-05, %v744_v2  ;;  %v714_v45 = vsub.f32 %v650_v60, %v682_v52  ;;  %v947_v21 = vadd.f32 %v2437_v55, %v908_v8  ;;  %v871_v54 = vmul.f32 %v1996_v17, %v775_v26  ;;  %1878 = vmatpush3.bf16.msra.mxu1 %v1938_v32  ;;  %v1939_v52 = vld [vmem:[%s2832_s6 + $0x20] sm:$0xff]   ;;  %v1940_v8 = vld [vmem:[%s2832_s6 + $0x28] sm:$0xff]  }
 0x125   : > { %1999 = vrsqrt.f32 %v809_v34  ;;  %v747_v22 = vmax.f32 %v715_v56, 0.0  ;;  %v946_v51 = vadd.f32 %v2437_v55, %v907_v11  ;;  %v870_v12 = vmul.f32 %v1998_v42, %v774_v18  ;;  %1879 = vmatprep.subr.bf16.mxu1 %v1939_v52 }
 0x126   : > { %2001 = vrsqrt.f32 %v808_v44  ;;  %v746_v23 = vmax.f32 %v714_v45, 0.0  ;;  %v910_v16 = vmul.f32 %v2430_v33, %v871_v54  ;;  %v777_v60 = vsub.f32 %v2244_v5, %v2610_v39  ;;  %v1941_v39 = vld [vmem:[%s2832_s6 + $0x30] sm:$0xff]  }
 0x127   : > { %v811_v37 = vadd.f32 1e-05, %v747_v22  ;;  %v966_v46 = vpack.c.bf16 %v947_v21, %v946_v51  ;;  %v909_v50 = vmul.f32 %v2430_v33, %v870_v12  ;;  %v776_v17 = vsub.f32 %v2246_v6, %v2613_v1 }
 0x128   : > { %v810_v26 = vadd.f32 1e-05, %v746_v23  ;;  %v949_v0 = vadd.f32 %v2437_v55, %v910_v16  ;;  %1880 = vmatpush3.bf16.msra.mxu1 %v1939_v52  ;;  %v779_v11 = vsub.f32 %v2251_v13, %v2619_v30  ;;  %v778_v45 = vsub.f32 %v2254_v15, %v2625_v19  ;;  %v1942_v23 = vld [vmem:[%s2832_s6 + $0x38] sm:$0xff]  }
 0x129   : > { %2003 = vrsqrt.f32 %v811_v37  ;;  %1863 = vmatprep.mubr.bf16.mxu0 %v966_v46  ;;  %v948_v20 = vadd.f32 %v2437_v55, %v909_v50  ;;  %1881 = vmatprep.subr.bf16.mxu1 %v1940_v8  ;;  %v2682_v50 = vld [vmem:[%s2831_s5] ss:$0 sm:$0xff] }
 0x12a   : > { %2005 = vrsqrt.f32 %v810_v26 }
 0x12b   : > { %v967_v2 = vpack.c.bf16 %v949_v0, %v948_v20 }
 0x12c   : > { %1882 = vmatpush3.bf16.msra.mxu1 %v1940_v8 }
 0x12d   : > { %1864 = vmatmul.mubr.bf16.gmra.mrb[24].mxu0 %v967_v2  ;;  %1883 = vmatprep.subr.bf16.mxu1 %v1941_v39 }
 0x12f   : > { %v2000_v27 = vpop.eup %1999 }
 0x130   : > { %v2002_v18 = vpop.eup %2001  ;;  %v873_v34 = vmul.f32 %v2000_v27, %v777_v60  ;;  %1884 = vmatpush3.bf16.msra.mxu1 %v1941_v39 }
 0x131   : > { %v872_v56 = vmul.f32 %v2002_v18, %v776_v17  ;;  %1885 = vmatprep.subr.bf16.mxu1 %v1942_v23 }
 0x132   : > { %v912_v42 = vmul.f32 %v2430_v33, %v873_v34 }
 0x133   : > { %v2004_v44 = vpop.eup %2003  ;;  %v911_v1 = vmul.f32 %v2430_v33, %v872_v56 }
 0x134   : > { %v2006_v21 = vpop.eup %2005  ;;  %v951_v54 = vadd.f32 %v2437_v55, %v912_v42  ;;  %v875_v22 = vmul.f32 %v2004_v44, %v779_v11  ;;  %1886 = vmatpush3.bf16.msra.mxu1 %v1942_v23 }
 0x135   : > { %v950_v51 = vadd.f32 %v2437_v55, %v911_v1  ;;  %v874_v30 = vmul.f32 %v2006_v21, %v778_v45 }
 0x136   : > { %v914_v12 = vmul.f32 %v2430_v33, %v875_v22 }
 0x137   : > { %v968_v16 = vpack.c.bf16 %v951_v54, %v950_v51  ;;  %v913_v19 = vmul.f32 %v2430_v33, %v874_v30 }
 0x138   : > { %v953_v32 = vadd.f32 %v2437_v55, %v914_v12 }
 0x139   : > { %1867 = vmatprep.mubr.bf16.mxu0 %v968_v16  ;;  %v952_v37 = vadd.f32 %v2437_v55, %v913_v19 }
 0x13b   : > { %v969_v46 = vpack.c.bf16 %v953_v32, %v952_v37 }
 0x13d   : > { %1868 = vmatmul.mubr.bf16.gmra.mrb[28].mxu0 %v969_v46 }
 0x1a0   : > { %v1841_v26 = vpop.f32.mrb[0].mxu0 }
 0x1a1   : > { %v1084_v0 = vadd.f32 %v1841_v26, %v2682_v50  ;;  %v1075_v20 = vpop.f32.mrb[1].mxu0 }
 0x1a2   : > { %v1076_v33 = vadd.f32 %v2682_v50, %v1075_v20  ;;  %v1842_v52 = vpop.f32.mrb[2].mxu0 }
 0x1a3   : > { %v1236_v2 = vmul.f32 0.70710677, %v1084_v0  ;;  %v1087_v60 = vadd.f32 %v1842_v52, %v2682_v50  ;;  %v1078_v8 = vpop.f32.mrb[3].mxu0  ;;  %v1204_v39 = vmul.f32 0.5, %v1084_v0 }
 0x1a4   : > { %v1234_v55 = vmul.f32 0.70710677, %v1076_v33  ;;  %v1079_v27 = vadd.f32 %v2682_v50, %v1078_v8  ;;  %v1202_v23 = vmul.f32 0.5, %v1076_v33 }
 0x1a5   : > { %2007 = verf.f32 %v1236_v2  ;;  %v1237_v17 = vmul.f32 0.70710677, %v1087_v60  ;;  %v1205_v54 = vmul.f32 0.5, %v1087_v60 }
 0x1a6   : > { %2009 = verf.f32 %v1234_v55  ;;  %v1235_v18 = vmul.f32 0.70710677, %v1079_v27  ;;  %v1203_v26 = vmul.f32 0.5, %v1079_v27 }
 0x1a7   : > { %2011 = verf.f32 %v1237_v17 }
 0x1a8   : > { %2013 = verf.f32 %v1235_v18 }
 0x1af   : > { %v2008_v34 = vpop.eup %2007 }
 0x1b0   : > { %v2010_v56 = vpop.eup %2009  ;;  %v1845_v11 = vpop.f32.mrb[4].mxu0  ;;  %v1300_v44 = vadd.f32 1.0, %v2008_v34 }
 0x1b1   : > { %v2012_v42 = vpop.eup %2011  ;;  %v1100_v45 = vadd.f32 %v1845_v11, %v2682_v50  ;;  %v1091_v1 = vpop.f32.mrb[5].mxu0  ;;  %v1298_v12 = vadd.f32 1.0, %v2010_v56 }
 0x1b2   : > { %v2014_v21 = vpop.eup %2013  ;;  %v1301_v22 = vadd.f32 1.0, %v2012_v42  ;;  %v1092_v51 = vadd.f32 %v2682_v50, %v1091_v1  ;;  %v1846_v30 = vpop.f32.mrb[6].mxu0  ;;  %v1332_v52 = vmul.f32 %v1300_v44, %v1204_v39 }
 0x1b3   : > { %v1240_v16 = vmul.f32 0.70710677, %v1100_v45  ;;  %v1103_v19 = vadd.f32 %v1846_v30, %v2682_v50  ;;  %v1094_v32 = vpop.f32.mrb[7].mxu0  ;;  %v1299_v37 = vadd.f32 1.0, %v2014_v21  ;;  %v1330_v8 = vmul.f32 %v1298_v12, %v1202_v23 }
 0x1b4   : > { %v1333_v46 = vmul.f32 %v1301_v22, %v1205_v54  ;;  %v1238_v0 = vmul.f32 0.70710677, %v1092_v51  ;;  %v1095_v20 = vadd.f32 %v2682_v50, %v1094_v32  ;;  %v1208_v21 = vmul.f32 0.5, %v1100_v45 }
 0x1b5   : > { %2015 = verf.f32 %v1240_v16  ;;  %v1241_v2 = vmul.f32 0.70710677, %v1103_v19  ;;  %v1331_v55 = vmul.f32 %v1299_v37, %v1203_v26  ;;  %v1209_v54 = vmul.f32 0.5, %v1103_v19 }
 0x1b6   : > { %2017 = verf.f32 %v1238_v0  ;;  %v1239_v60 = vmul.f32 0.70710677, %v1095_v20  ;;  %v1363_v17 = vpack.c.bf16 %v1333_v46, %v1332_v52  ;;  %v1206_v23 = vmul.f32 0.5, %v1092_v51 }
 0x1b7   : > { %2019 = verf.f32 %v1241_v2  ;;  %v1362_v33 = vpack.c.bf16 %v1331_v55, %v1330_v8  ;;  %v1207_v16 = vmul.f32 0.5, %v1095_v20 }
 0x1b8   : > { %2021 = verf.f32 %v1239_v60 }
 0x1b9   : > { %1887 = vmatprep.mubr.bf16.mxu1 %v1362_v33 }
 0x1ba   : > { %1888 = vmatmul.mubr.bf16.vlgmr.msra.gmra.mrb[0].mxu1 %v1363_v17 }
 0x1bf   : > { %v2016_v18 = vpop.eup %2015 }
 0x1c0   : > { %v2018_v34 = vpop.eup %2017  ;;  %v1304_v56 = vadd.f32 1.0, %v2016_v18  ;;  %v1849_v27 = vpop.f32.mrb[8].mxu0 }
 0x1c1   : > { %v2020_v11 = vpop.eup %2019  ;;  %v1302_v42 = vadd.f32 1.0, %v2018_v34  ;;  %v1116_v39 = vadd.f32 %v1849_v27, %v2682_v50  ;;  %v1107_v44 = vpop.f32.mrb[9].mxu0 }
 0x1c2   : > { %v2022_v1 = vpop.eup %2021  ;;  %v1305_v22 = vadd.f32 1.0, %v2020_v11  ;;  %v1108_v30 = vadd.f32 %v2682_v50, %v1107_v44  ;;  %v1850_v12 = vpop.f32.mrb[10].mxu0  ;;  %v1336_v26 = vmul.f32 %v1304_v56, %v1208_v21 }
 0x1c3   : > { %v1303_v32 = vadd.f32 1.0, %v2022_v1  ;;  %v1244_v37 = vmul.f32 0.70710677, %v1116_v39  ;;  %v1110_v46 = vpop.f32.mrb[11].mxu0  ;;  %v1119_v2 = vadd.f32 %v1850_v12, %v2682_v50  ;;  %v1334_v60 = vmul.f32 %v1302_v42, %v1206_v23 }
 0x1c4   : > { %v1337_v0 = vmul.f32 %v1305_v22, %v1209_v54  ;;  %v1242_v52 = vmul.f32 0.70710677, %v1108_v30  ;;  %v1111_v45 = vadd.f32 %v2682_v50, %v1110_v46  ;;  %v1212_v42 = vmul.f32 0.5, %v1116_v39 }
 0x1c5   : > { %v1335_v8 = vmul.f32 %v1303_v32, %v1207_v16  ;;  %2023 = verf.f32 %v1244_v37  ;;  %v1245_v19 = vmul.f32 0.70710677, %v1119_v2  ;;  %v1210_v22 = vmul.f32 0.5, %v1108_v30 }
 0x1c6   : > { %2025 = verf.f32 %v1242_v52  ;;  %v1365_v55 = vpack.c.bf16 %v1337_v0, %v1336_v26  ;;  %v1243_v17 = vmul.f32 0.70710677, %v1111_v45  ;;  %v1213_v12 = vmul.f32 0.5, %v1119_v2 }
 0x1c7   : > { %v1364_v33 = vpack.c.bf16 %v1335_v8, %v1334_v60  ;;  %2027 = verf.f32 %v1245_v19  ;;  %v1211_v37 = vmul.f32 0.5, %v1111_v45 }
 0x1c8   : > { %2029 = verf.f32 %v1243_v17 }
 0x1c9   : > { %1891 = vmatprep.mubr.bf16.mxu1 %v1364_v33 }
 0x1ca   : > { %1892 = vmatmul.mubr.bf16.gmra.mrb[4].mxu1 %v1365_v55 }
 0x1cf   : > { %v2024_v51 = vpop.eup %2023 }
 0x1d0   : > { %v2026_v20 = vpop.eup %2025  ;;  %v1853_v18 = vpop.f32.mrb[12].mxu0  ;;  %v1308_v34 = vadd.f32 1.0, %v2024_v51 }
 0x1d1   : > { %v1132_v56 = vadd.f32 %v1853_v18, %v2682_v50  ;;  %v1123_v27 = vpop.f32.mrb[13].mxu0  ;;  %v2028_v11 = vpop.eup %2027  ;;  %v1306_v44 = vadd.f32 1.0, %v2026_v20 }
 0x1d2   : > { %v1124_v1 = vadd.f32 %v2682_v50, %v1123_v27  ;;  %v1854_v21 = vpop.f32.mrb[14].mxu0  ;;  %v2030_v54 = vpop.eup %2029  ;;  %v1309_v23 = vadd.f32 1.0, %v2028_v11  ;;  %v1340_v52 = vmul.f32 %v1308_v34, %v1212_v42 }
 0x1d3   : > { %v1248_v16 = vmul.f32 0.70710677, %v1132_v56  ;;  %v1126_v32 = vpop.f32.mrb[15].mxu0  ;;  %v1307_v46 = vadd.f32 1.0, %v2030_v54  ;;  %v1135_v0 = vadd.f32 %v1854_v21, %v2682_v50  ;;  %v1338_v8 = vmul.f32 %v1306_v44, %v1210_v22 }
 0x1d4   : > { %v1246_v26 = vmul.f32 0.70710677, %v1124_v1  ;;  %v1341_v60 = vmul.f32 %v1309_v23, %v1213_v12  ;;  %v1127_v39 = vadd.f32 %v2682_v50, %v1126_v32  ;;  %v1216_v11 = vmul.f32 0.5, %v1132_v56 }
 0x1d5   : > { %2031 = verf.f32 %v1248_v16  ;;  %v1339_v19 = vmul.f32 %v1307_v46, %v1211_v37  ;;  %v1249_v55 = vmul.f32 0.70710677, %v1135_v0  ;;  %v1214_v22 = vmul.f32 0.5, %v1124_v1 }
 0x1d6   : > { %2033 = verf.f32 %v1246_v26  ;;  %v1247_v17 = vmul.f32 0.70710677, %v1127_v39  ;;  %v1367_v30 = vpack.c.bf16 %v1341_v60, %v1340_v52  ;;  %v1217_v12 = vmul.f32 0.5, %v1135_v0 }
 0x1d7   : > { %2035 = verf.f32 %v1249_v55  ;;  %v1366_v2 = vpack.c.bf16 %v1339_v19, %v1338_v8  ;;  %v1215_v37 = vmul.f32 0.5, %v1127_v39 }
 0x1d8   : > { %2037 = verf.f32 %v1247_v17 }
 0x1d9   : > { %1895 = vmatprep.mubr.bf16.mxu1 %v1366_v2 }
 0x1da   : > { %1896 = vmatmul.mubr.bf16.gmra.mrb[8].mxu1 %v1367_v30 }
 0x1df   : > { %v2032_v45 = vpop.eup %2031 }
 0x1e0   : > { %v2034_v33 = vpop.eup %2033  ;;  %v1857_v51 = vpop.f32.mrb[16].mxu0  ;;  %v1312_v20 = vadd.f32 1.0, %v2032_v45 }
 0x1e1   : > { %v1148_v18 = vadd.f32 %v1857_v51, %v2682_v50  ;;  %v1139_v34 = vpop.f32.mrb[17].mxu0  ;;  %v2036_v27 = vpop.eup %2035  ;;  %v1310_v42 = vadd.f32 1.0, %v2034_v33 }
 0x1e2   : > { %v1140_v44 = vadd.f32 %v2682_v50, %v1139_v34  ;;  %v1858_v21 = vpop.f32.mrb[18].mxu0  ;;  %v2038_v54 = vpop.eup %2037  ;;  %v1313_v23 = vadd.f32 1.0, %v2036_v27  ;;  %v1344_v60 = vmul.f32 %v1312_v20, %v1216_v11 }
 0x1e3   : > { %v1252_v16 = vmul.f32 0.70710677, %v1148_v18  ;;  %v1142_v32 = vpop.f32.mrb[19].mxu0  ;;  %v1311_v46 = vadd.f32 1.0, %v2038_v54  ;;  %v1151_v52 = vadd.f32 %v1858_v21, %v2682_v50  ;;  %v1342_v19 = vmul.f32 %v1310_v42, %v1214_v22 }
 0x1e4   : > { %v1250_v26 = vmul.f32 0.70710677, %v1140_v44  ;;  %v1345_v8 = vmul.f32 %v1313_v23, %v1217_v12  ;;  %v1143_v56 = vadd.f32 %v2682_v50, %v1142_v32  ;;  %v1220_v27 = vmul.f32 0.5, %v1148_v18 }
 0x1e5   : > { %2039 = verf.f32 %v1252_v16  ;;  %v1343_v55 = vmul.f32 %v1311_v46, %v1215_v37  ;;  %v1253_v17 = vmul.f32 0.70710677, %v1151_v52  ;;  %v1218_v22 = vmul.f32 0.5, %v1140_v44 }
 0x1e6   : > { %2041 = verf.f32 %v1250_v26  ;;  %v1251_v30 = vmul.f32 0.70710677, %v1143_v56  ;;  %v1369_v1 = vpack.c.bf16 %v1345_v8, %v1344_v60  ;;  %v1221_v12 = vmul.f32 0.5, %v1151_v52 }
 0x1e7   : > { %2043 = verf.f32 %v1253_v17  ;;  %v1368_v0 = vpack.c.bf16 %v1343_v55, %v1342_v19  ;;  %v1219_v37 = vmul.f32 0.5, %v1143_v56 }
 0x1e8   : > { %2045 = verf.f32 %v1251_v30 }
 0x1e9   : > { %1899 = vmatprep.mubr.bf16.mxu1 %v1368_v0 }
 0x1ea   : > { %1900 = vmatmul.mubr.bf16.gmra.mrb[12].mxu1 %v1369_v1 }
 0x1ef   : > { %v2040_v39 = vpop.eup %2039 }
 0x1f0   : > { %v2042_v2 = vpop.eup %2041  ;;  %v1861_v45 = vpop.f32.mrb[20].mxu0  ;;  %v1316_v33 = vadd.f32 1.0, %v2040_v39 }
 0x1f1   : > { %v1164_v51 = vadd.f32 %v1861_v45, %v2682_v50  ;;  %v1155_v20 = vpop.f32.mrb[21].mxu0  ;;  %v2044_v34 = vpop.eup %2043  ;;  %v1314_v11 = vadd.f32 1.0, %v2042_v2 }
 0x1f2   : > { %v1156_v42 = vadd.f32 %v2682_v50, %v1155_v20  ;;  %v1862_v21 = vpop.f32.mrb[22].mxu0  ;;  %v2046_v54 = vpop.eup %2045  ;;  %v1317_v23 = vadd.f32 1.0, %v2044_v34  ;;  %v1348_v8 = vmul.f32 %v1316_v33, %v1220_v27 }
 0x1f3   : > { %v1256_v16 = vmul.f32 0.70710677, %v1164_v51  ;;  %v1158_v32 = vpop.f32.mrb[23].mxu0  ;;  %v1315_v46 = vadd.f32 1.0, %v2046_v54  ;;  %v1167_v60 = vadd.f32 %v1862_v21, %v2682_v50  ;;  %v1346_v55 = vmul.f32 %v1314_v11, %v1218_v22 }
 0x1f4   : > { %v1254_v26 = vmul.f32 0.70710677, %v1156_v42  ;;  %v1349_v19 = vmul.f32 %v1317_v23, %v1221_v12  ;;  %v1159_v18 = vadd.f32 %v2682_v50, %v1158_v32  ;;  %v1224_v22 = vmul.f32 0.5, %v1164_v51 }
 0x1f5   : > { %2047 = verf.f32 %v1256_v16  ;;  %v1347_v17 = vmul.f32 %v1315_v46, %v1219_v37  ;;  %v1257_v30 = vmul.f32 0.70710677, %v1167_v60  ;;  %v1222_v37 = vmul.f32 0.5, %v1156_v42 }
 0x1f6   : > { %2049 = verf.f32 %v1254_v26  ;;  %v1255_v1 = vmul.f32 0.70710677, %v1159_v18  ;;  %v1371_v44 = vpack.c.bf16 %v1349_v19, %v1348_v8  ;;  %v1225_v46 = vmul.f32 0.5, %v1167_v60 }
 0x1f7   : > { %2051 = verf.f32 %v1257_v30  ;;  %v1370_v52 = vpack.c.bf16 %v1347_v17, %v1346_v55  ;;  %v1223_v8 = vmul.f32 0.5, %v1159_v18 }
 0x1f8   : > { %2053 = verf.f32 %v1255_v1 }
 0x1f9   : > { %1903 = vmatprep.mubr.bf16.mxu1 %v1370_v52 }
 0x1fa   : > { %1904 = vmatmul.mubr.bf16.gmra.mrb[16].mxu1 %v1371_v44 }
 0x1ff   : > { %v2048_v0 = vpop.eup %2047 }
 0x200   : > { %v1865_v56 = vpop.f32.mrb[24].mxu0  ;;  %v2050_v45 = vpop.eup %2049  ;;  %v1320_v34 = vadd.f32 1.0, %v2048_v0 }
 0x201   : > { %v1180_v39 = vadd.f32 %v1865_v56, %v2682_v50  ;;  %v1171_v2 = vpop.f32.mrb[25].mxu0  ;;  %v2052_v54 = vpop.eup %2051  ;;  %v1318_v12 = vadd.f32 1.0, %v2050_v45 }
 0x202   : > { %v1172_v33 = vadd.f32 %v2682_v50, %v1171_v2  ;;  %v1866_v20 = vpop.f32.mrb[26].mxu0  ;;  %v2054_v32 = vpop.eup %2053  ;;  %v1321_v26 = vadd.f32 1.0, %v2052_v54  ;;  %v1352_v17 = vmul.f32 %v1320_v34, %v1224_v22 }
 0x203   : > { %v1260_v27 = vmul.f32 0.70710677, %v1180_v39  ;;  %v1183_v11 = vadd.f32 %v1866_v20, %v2682_v50  ;;  %v1174_v21 = vpop.f32.mrb[27].mxu0  ;;  %v1319_v19 = vadd.f32 1.0, %v2054_v32  ;;  %v1350_v44 = vmul.f32 %v1318_v12, %v1222_v37 }
 0x204   : > { %v1258_v23 = vmul.f32 0.70710677, %v1172_v33  ;;  %v1175_v16 = vadd.f32 %v2682_v50, %v1174_v21  ;;  %v1353_v30 = vmul.f32 %v1321_v26, %v1225_v46  ;;  %v1226_v12 = vmul.f32 0.5, %v1172_v33 }
 0x205   : > { %2055 = verf.f32 %v1260_v27  ;;  %v1261_v55 = vmul.f32 0.70710677, %v1183_v11  ;;  %v1351_v52 = vmul.f32 %v1319_v19, %v1223_v8  ;;  %v1228_v27 = vmul.f32 0.5, %v1180_v39 }
 0x206   : > { %2057 = verf.f32 %v1258_v23  ;;  %v1259_v1 = vmul.f32 0.70710677, %v1175_v16  ;;  %v1373_v51 = vpack.c.bf16 %v1353_v30, %v1352_v17  ;;  %v1229_v23 = vmul.f32 0.5, %v1183_v11 }
 0x207   : > { %2059 = verf.f32 %v1261_v55  ;;  %v1372_v56 = vpack.c.bf16 %v1351_v52, %v1350_v44  ;;  %v1227_v26 = vmul.f32 0.5, %v1175_v16 }
 0x208   : > { %2061 = verf.f32 %v1259_v1 }
 0x209   : > { %1907 = vmatprep.mubr.bf16.mxu1 %v1372_v56 }
 0x20a   : > { %1908 = vmatmul.mubr.bf16.gmra.mrb[20].mxu1 %v1373_v51 }
 0x20f   : > { %v2056_v0 = vpop.eup %2055 }
 0x210   : > { %v2058_v42 = vpop.eup %2057  ;;  %v1869_v60 = vpop.f32.mrb[28].mxu0  ;;  %v1324_v2 = vadd.f32 1.0, %v2056_v0 }
 0x211   : > { %v1196_v18 = vadd.f32 %v1869_v60, %v2682_v50  ;;  %v1187_v45 = vpop.f32.mrb[29].mxu0  ;;  %v2060_v20 = vpop.eup %2059  ;;  %v1322_v34 = vadd.f32 1.0, %v2058_v42 }
 0x212   : > { %v1188_v21 = vadd.f32 %v2682_v50, %v1187_v45  ;;  %v1870_v54 = vpop.f32.mrb[30].mxu0  ;;  %v2062_v22 = vpop.eup %2061  ;;  %v1325_v32 = vadd.f32 1.0, %v2060_v20  ;;  %v1356_v17 = vmul.f32 %v1324_v2, %v1228_v27 }
 0x213   : > { %v1264_v37 = vmul.f32 0.70710677, %v1196_v18  ;;  %v1190_v46 = vpop.f32.mrb[31].mxu0  ;;  %v1323_v8 = vadd.f32 1.0, %v2062_v22  ;;  %v1199_v55 = vadd.f32 %v1870_v54, %v2682_v50  ;;  %v1354_v1 = vmul.f32 %v1322_v34, %v1226_v12 }
 0x214   : > { %v1262_v19 = vmul.f32 0.70710677, %v1188_v21  ;;  %v1357_v30 = vmul.f32 %v1325_v32, %v1229_v23  ;;  %v1191_v39 = vadd.f32 %v2682_v50, %v1190_v46  ;;  %v1232_v45 = vmul.f32 0.5, %v1196_v18 }
 0x215   : > { %2063 = verf.f32 %v1264_v37  ;;  %v1355_v44 = vmul.f32 %v1323_v8, %v1227_v26  ;;  %v1265_v52 = vmul.f32 0.70710677, %v1199_v55  ;;  %v1233_v20 = vmul.f32 0.5, %v1199_v55  ;;  %v2719_v26 = vld [vmem:[%s2833_s7] ss:$0 sm:$0xff] }
 0x216   : > { %2065 = verf.f32 %v1262_v19  ;;  %v1263_v51 = vmul.f32 0.70710677, %v1191_v39  ;;  %v1375_v33 = vpack.c.bf16 %v1357_v30, %v1356_v17  ;;  %v1230_v27 = vmul.f32 0.5, %v1188_v21 }
 0x217   : > { %2067 = verf.f32 %v1265_v52  ;;  %v1374_v11 = vpack.c.bf16 %v1355_v44, %v1354_v1  ;;  %v1231_v34 = vmul.f32 0.5, %v1191_v39 }
 0x218   : > { %2069 = verf.f32 %v1263_v51  ;;  %v2837_v51 = vld [vmem:[#allocation2_spill] sm:$0xff] }
 0x219   : > { %1911 = vmatprep.mubr.bf16.mxu1 %v1374_v11 }
 0x21a   : > { %1912 = vmatmul.mubr.bf16.gmra.mrb[24].mxu1 %v1375_v33 }
 0x21f   : > { %v2064_v16 = vpop.eup %2063 }
 0x220   : > { %v2066_v56 = vpop.eup %2065  ;;  %v1328_v0 = vadd.f32 1.0, %v2064_v16 }
 0x221   : > { %v2068_v42 = vpop.eup %2067  ;;  %v1326_v60 = vadd.f32 1.0, %v2066_v56 }
 0x222   : > { %v2070_v2 = vpop.eup %2069  ;;  %v1329_v50 = vadd.f32 1.0, %v2068_v42  ;;  %v1360_v22 = vmul.f32 %v1328_v0, %v1232_v45 }
 0x223   : > { %v1327_v54 = vadd.f32 1.0, %v2070_v2  ;;  %v1358_v23 = vmul.f32 %v1326_v60, %v1230_v27 }
 0x224   : > { %v1361_v12 = vmul.f32 %v1329_v50, %v1233_v20 }
 0x225   : > { %v1359_v32 = vmul.f32 %v1327_v54, %v1231_v34 }
 0x226   : > { %v1377_v37 = vpack.c.bf16 %v1361_v12, %v1360_v22 }
 0x227   : > { %v1376_v46 = vpack.c.bf16 %v1359_v32, %v1358_v23 }
 0x229   : > { %1915 = vmatprep.mubr.bf16.mxu1 %v1376_v46 }
 0x22a   : > { %1916 = vmatmul.mubr.bf16.gmra.mrb[28].mxu1 %v1377_v37 }
 0x28d   : > { %v1889_v18 = vpop.f32.mrb[0].mxu1 }
 0x28e   : > { %v1492_v8 = vadd.f32 %v1889_v18, %v2719_v26  ;;  %v1483_v19 = vpop.f32.mrb[1].mxu1 }
 0x28f   : > { %v1484_v21 = vadd.f32 %v2719_v26, %v1483_v19  ;;  %v1890_v55 = vpop.f32.mrb[2].mxu1 }
 0x290   : > { %v1612_v17 = vadd.f32 %v1492_v8, %v2149_v3  ;;  %v1495_v30 = vadd.f32 %v1890_v55, %v2719_v26  ;;  %v1486_v39 = vpop.f32.mrb[3].mxu1 }
 0x291   : > { %v1610_v1 = vadd.f32 %v1484_v21, %v2154_v7  ;;  %v1487_v44 = vadd.f32 %v2719_v26, %v1486_v39 }
 0x292   : > { %1644 = vst [vmem:[%s2726_s17 + $0x10] sm:$0xff] %v1612_v17  ;;  %v1613_v52 = vadd.f32 %v1495_v30, %v2159_v10 }
 0x293   : > { %1642 = vst [vmem:[%s2726_s17] sm:$0xff] %v1610_v1  ;;  %v1611_v33 = vadd.f32 %v1487_v44, %v2837_v51 }
 0x294   : > { %1645 = vst [vmem:[%s2726_s17 + $0x18] sm:$0xff] %v1613_v52 }
 0x295   : > { %1643 = vst [vmem:[%s2726_s17 + $0x8] sm:$0xff] %v1611_v33 }
 0x29d   : > { %v1893_v3 = vpop.f32.mrb[4].mxu1 }
 0x29e   : > { %v1508_v11 = vadd.f32 %v1893_v3, %v2719_v26  ;;  %v1499_v16 = vpop.f32.mrb[5].mxu1 }
 0x29f   : > { %v1500_v7 = vadd.f32 %v2719_v26, %v1499_v16  ;;  %v1894_v56 = vpop.f32.mrb[6].mxu1 }
 0x2a0   : > { %v1616_v0 = vadd.f32 %v1508_v11, %v2242_v4  ;;  %v1511_v42 = vadd.f32 %v1894_v56, %v2719_v26  ;;  %v1502_v10 = vpop.f32.mrb[7].mxu1 }
 0x2a1   : > { %v1614_v60 = vadd.f32 %v1500_v7, %v2212_v47  ;;  %v1503_v2 = vadd.f32 %v2719_v26, %v1502_v10 }
 0x2a2   : > { %1648 = vst [vmem:[%s2726_s17 + $0x30] sm:$0xff] %v1616_v0  ;;  %v1617_v45 = vadd.f32 %v1511_v42, %v2234_v62 }
 0x2a3   : > { %1646 = vst [vmem:[%s2726_s17 + $0x20] sm:$0xff] %v1614_v60  ;;  %v1615_v20 = vadd.f32 %v1503_v2, %v2203_v40 }
 0x2a4   : > { %1649 = vst [vmem:[%s2726_s17 + $0x38] sm:$0xff] %v1617_v45 }
 0x2a5   : > { %1647 = vst [vmem:[%s2726_s17 + $0x28] sm:$0xff] %v1615_v20 }
 0x2ad   : > { %v1897_v4 = vpop.f32.mrb[8].mxu1 }
 0x2ae   : > { %v1524_v50 = vadd.f32 %v1897_v4, %v2719_v26  ;;  %v1515_v27 = vpop.f32.mrb[9].mxu1 }
 0x2af   : > { %v1516_v47 = vadd.f32 %v2719_v26, %v1515_v27  ;;  %v1898_v34 = vpop.f32.mrb[10].mxu1 }
 0x2b0   : > { %v1620_v54 = vadd.f32 %v1524_v50, %v2294_v41  ;;  %v1527_v22 = vadd.f32 %v1898_v34, %v2719_v26  ;;  %v1518_v62 = vpop.f32.mrb[11].mxu1 }
 0x2b1   : > { %v1618_v12 = vadd.f32 %v1516_v47, %v2281_v31  ;;  %v1519_v40 = vadd.f32 %v2719_v26, %v1518_v62 }
 0x2b2   : > { %1652 = vst [vmem:[%s2726_s17 + $0x50] sm:$0xff] %v1620_v54  ;;  %v1621_v23 = vadd.f32 %v1527_v22, %v2288_v38 }
 0x2b3   : > { %1650 = vst [vmem:[%s2726_s17 + $0x40] sm:$0xff] %v1618_v12  ;;  %v1619_v32 = vadd.f32 %v1519_v40, %v2276_v28 }
 0x2b4   : > { %1653 = vst [vmem:[%s2726_s17 + $0x58] sm:$0xff] %v1621_v23 }
 0x2b5   : > { %1651 = vst [vmem:[%s2726_s17 + $0x48] sm:$0xff] %v1619_v32 }
 0x2bd   : > { %v1901_v41 = vpop.f32.mrb[12].mxu1 }
 0x2be   : > { %v1540_v37 = vadd.f32 %v1901_v41, %v2719_v26  ;;  %v1531_v46 = vpop.f32.mrb[13].mxu1 }
 0x2bf   : > { %v1532_v31 = vadd.f32 %v2719_v26, %v1531_v46  ;;  %v1902_v18 = vpop.f32.mrb[14].mxu1 }
 0x2c0   : > { %v1624_v8 = vadd.f32 %v1540_v37, %v2334_v14  ;;  %v1543_v19 = vadd.f32 %v1902_v18, %v2719_v26  ;;  %v1534_v38 = vpop.f32.mrb[15].mxu1 }
 0x2c1   : > { %v1622_v21 = vadd.f32 %v1532_v31, %v2321_v61  ;;  %v1535_v28 = vadd.f32 %v2719_v26, %v1534_v38 }
 0x2c2   : > { %1656 = vst [vmem:[%s2726_s17 + $0x70] sm:$0xff] %v1624_v8  ;;  %v1625_v55 = vadd.f32 %v1543_v19, %v2328_v9 }
 0x2c3   : > { %1654 = vst [vmem:[%s2726_s17 + $0x60] sm:$0xff] %v1622_v21  ;;  %v1623_v17 = vadd.f32 %v1535_v28, %v2316_v59 }
 0x2c4   : > { %1657 = vst [vmem:[%s2726_s17 + $0x78] sm:$0xff] %v1625_v55 }
 0x2c5   : > { %1655 = vst [vmem:[%s2726_s17 + $0x68] sm:$0xff] %v1623_v17 }
 0x2cd   : > { %v1905_v14 = vpop.f32.mrb[16].mxu1 }
 0x2ce   : > { %v1556_v30 = vadd.f32 %v1905_v14, %v2719_v26  ;;  %v1547_v39 = vpop.f32.mrb[17].mxu1 }
 0x2cf   : > { %v1548_v61 = vadd.f32 %v2719_v26, %v1547_v39  ;;  %v1906_v1 = vpop.f32.mrb[18].mxu1 }
 0x2d0   : > { %v1628_v44 = vadd.f32 %v1556_v30, %v2196_v35  ;;  %v1559_v52 = vadd.f32 %v1906_v1, %v2719_v26  ;;  %v1550_v9 = vpop.f32.mrb[19].mxu1 }
 0x2d1   : > { %v1626_v51 = vadd.f32 %v1548_v61, %v2184_v25  ;;  %v1551_v59 = vadd.f32 %v2719_v26, %v1550_v9 }
 0x2d2   : > { %1660 = vst [vmem:[%s2726_s17 + $0x90] sm:$0xff] %v1628_v44  ;;  %v1629_v33 = vadd.f32 %v1559_v52, %v2189_v29 }
 0x2d3   : > { %1658 = vst [vmem:[%s2726_s17 + $0x80] sm:$0xff] %v1626_v51  ;;  %v1627_v3 = vadd.f32 %v1551_v59, %v2182_v24 }
 0x2d4   : > { %1661 = vst [vmem:[%s2726_s17 + $0x98] sm:$0xff] %v1629_v33 }
 0x2d5   : > { %1659 = vst [vmem:[%s2726_s17 + $0x88] sm:$0xff] %v1627_v3 }
 0x2dd   : > { %v1909_v35 = vpop.f32.mrb[20].mxu1 }
 0x2de   : > { %v1572_v11 = vadd.f32 %v1909_v35, %v2719_v26  ;;  %v1563_v16 = vpop.f32.mrb[21].mxu1 }
 0x2df   : > { %v1564_v25 = vadd.f32 %v2719_v26, %v1563_v16  ;;  %v1910_v7 = vpop.f32.mrb[22].mxu1 }
 0x2e0   : > { %v1632_v56 = vadd.f32 %v1572_v11, %v2216_v49  ;;  %v1575_v0 = vadd.f32 %v1910_v7, %v2719_v26  ;;  %v1566_v29 = vpop.f32.mrb[23].mxu1 }
 0x2e1   : > { %v1630_v42 = vadd.f32 %v1564_v25, %v2207_v43  ;;  %v1567_v24 = vadd.f32 %v2719_v26, %v1566_v29 }
 0x2e2   : > { %1664 = vst [vmem:[%s2726_s17 + $0xb0] sm:$0xff] %v1632_v56  ;;  %v1633_v10 = vadd.f32 %v1575_v0, %v2214_v48 }
 0x2e3   : > { %1662 = vst [vmem:[%s2726_s17 + $0xa0] sm:$0xff] %v1630_v42  ;;  %v1631_v60 = vadd.f32 %v1567_v24, %v2198_v36 }
 0x2e4   : > { %1665 = vst [vmem:[%s2726_s17 + $0xb8] sm:$0xff] %v1633_v10 }
 0x2e5   : > { %1663 = vst [vmem:[%s2726_s17 + $0xa8] sm:$0xff] %v1631_v60 }
 0x2ed   : > { %v1913_v49 = vpop.f32.mrb[24].mxu1 }
 0x2ee   : > { %v1588_v2 = vadd.f32 %v1913_v49, %v2719_v26  ;;  %v1579_v45 = vpop.f32.mrb[25].mxu1 }
 0x2ef   : > { %v1580_v43 = vadd.f32 %v2719_v26, %v1579_v45  ;;  %v1914_v20 = vpop.f32.mrb[26].mxu1 }
 0x2f0   : > { %v1636_v4 = vadd.f32 %v1588_v2, %v2236_v63  ;;  %v1591_v50 = vadd.f32 %v1914_v20, %v2719_v26  ;;  %v1582_v48 = vpop.f32.mrb[27].mxu1 }
 0x2f1   : > { %v1634_v27 = vadd.f32 %v1580_v43, %v2226_v57  ;;  %v1583_v36 = vadd.f32 %v2719_v26, %v1582_v48 }
 0x2f2   : > { %1668 = vst [vmem:[%s2726_s17 + $0xd0] sm:$0xff] %v1636_v4  ;;  %v1637_v47 = vadd.f32 %v1591_v50, %v2228_v58 }
 0x2f3   : > { %1666 = vst [vmem:[%s2726_s17 + $0xc0] sm:$0xff] %v1634_v27  ;;  %v1635_v34 = vadd.f32 %v1583_v36, %v2221_v53 }
 0x2f4   : > { %1669 = vst [vmem:[%s2726_s17 + $0xd8] sm:$0xff] %v1637_v47 }
 0x2f5   : > { %1667 = vst [vmem:[%s2726_s17 + $0xc8] sm:$0xff] %v1635_v34 }
 0x2fd   : > { %v1917_v63 = vpop.f32.mrb[28].mxu1 }
 0x2fe   : > { %v1604_v54 = vadd.f32 %v1917_v63, %v2719_v26  ;;  %v1595_v22 = vpop.f32.mrb[29].mxu1 }
 0x2ff   : > { %v1596_v57 = vadd.f32 %v2719_v26, %v1595_v22  ;;  %v1918_v62 = vpop.f32.mrb[30].mxu1 }
 0x300   : > { %v1640_v12 = vadd.f32 %v1604_v54, %v2254_v15  ;;  %v1607_v40 = vadd.f32 %v1918_v62, %v2719_v26  ;;  %v1598_v58 = vpop.f32.mrb[31].mxu1 }
 0x301   : > { %v1638_v23 = vadd.f32 %v1596_v57, %v2246_v6  ;;  %v1599_v53 = vadd.f32 %v2719_v26, %v1598_v58 }
 0x302   : > { %1672 = vst [vmem:[%s2726_s17 + $0xf0] sm:$0xff] %v1640_v12  ;;  %v1641_v32 = vadd.f32 %v1607_v40, %v2251_v13 }
 0x303   : > { %1670 = vst [vmem:[%s2726_s17 + $0xe0] sm:$0xff] %v1638_v23  ;;  %v1639_v41 = vadd.f32 %v1599_v53, %v2244_v5 }
 0x304   : > { %1673 = vst [vmem:[%s2726_s17 + $0xf8] sm:$0xff] %v1641_v32 }
 0x305   : > { %1671 = vst [vmem:[%s2726_s17 + $0xe8] sm:$0xff] %v1639_v41 }
 0x306 PF: > { %s18_s27 = sadd.s32 1, %s2077_s27  }
 0x307   : > { %p15_p4 = scmp.ge.s32.totalorder %s18_s27, 4  }
 0x309   :  { %17 = sbr.rel (!%p15_p4) target bundleno = 1 (0x1), region = 85 }

// kernel: basic_layer_forward.4
= control target key start
LH: loop header
LB: loop body
LE: loop exit
PB: predicated region body
PF: predicated region fallthrough
CT: control target
= control target key end

     0   :  { %s5126_s27 = smov 0   ;;  %s5128_s28 = smov 0   ;;  %s6905_s0 = inlined_call_operand.vmem [shape: f32[2,16,16,128], index: 0, kind: input, shape index: {}]   ;;  %s6906_s1 = inlined_call_operand.vmem [shape: f32[1,128], index: 1, kind: input, shape index: {}]   ;;  %s6907_s2 = inlined_call_operand.vmem [shape: f32[1,128], index: 2, kind: input, shape index: {}]   ;;  %s6908_s3 = inlined_call_operand.vmem [shape: bf16[128,96], index: 3, kind: input, shape index: {}]   ;;  %s6909_s4 = inlined_call_operand.vmem [shape: f32[1,96], index: 4, kind: input, shape index: {}]   ;;  %s6910_s5 = inlined_call_operand.vmem [shape: bf16[32,128], index: 5, kind: input, shape index: {}]   ;;  %s6911_s6 = inlined_call_operand.vmem [shape: f32[1,128], index: 6, kind: input, shape index: {}]   ;;  %s6912_s7 = inlined_call_operand.vmem [shape: bf16[4,64,64], index: 7, kind: input, shape index: {}]   ;;  %s6913_s8 = inlined_call_operand.vmem [shape: f32[2,16,16,128], index: 8, kind: output, shape index: {}]  }
   0x1   :  { %s5130_s29 = smov 0   ;;  %s5132_s30 = smov 0  }
   0x2   :  { %s5134_s9 = smov 0   ;;  %s5136_s10 = smov 0  }
   0x3   :  { %s5138_s11 = smov 0  }
   0x4 LB: > { %s30_s12 = sadd.s32 1, %s5057_s9  ;;  %s33_s13 = sadd.s32 1, %s5061_s10  ;;  %s5065_s11 = sphi %s5138_s11, %s18_s11   ;;  %s5061_s10 = sphi %s5136_s10, %s7014_s10   ;;  %s5057_s9 = sphi %s5134_s9, %s7013_s9   ;;  %s5053_s30 = sphi %s5132_s30, %s7012_s30   ;;  %s5049_s29 = sphi %s5130_s29, %s7011_s29   ;;  %s5045_s28 = sphi %s5128_s28, %s7010_s28   ;;  %s5041_s27 = sphi %s5126_s27, %s7009_s27  }
   0x5   : > { %p31_p0 = scmp.ge.s32.totalorder %s30_s12, 2  ;;  %s3845_s14 = sadd.s32 4294967295, %s5065_s11  }
   0x6   : > { %p55_p1 = scmp.ne.s32.totalorder %s5045_s28, %s5041_s27  ;;  %p56_p2 = scmp.eq.s32.totalorder %s5065_s11, 0 }
   0x7   : > { %s7016_s12 = smov (%p31_p0, %s30_s12), 0  ;;  %s7018_s13 = smov (!%p31_p0, %s33_s13), %s5061_s10 }
   0x8   : > { %p35_p3 = scmp.ge.s32.totalorder %s7018_s13, 2  ;;  %p236_p4 = scmp.eq.s32.totalorder %s3845_s14, 3 }
   0x9   : > { %s44_s15 = ssub.s32 %s5057_s9, %s7016_s12  ;;  %p57_p5 = por %p56_p2, %p55_p1 }
   0xa   : > { %s7020_s13 = smov (%p35_p3, %s7018_s13), 0  ;;  %p5174_p6 = por %p236_p4, %p55_p1 }
   0xb   : > { %s42_s17 = ssub.s32 %s5061_s10, %s7020_s13  ;;  %s48_s19 = sadd.s32 1, %s5045_s28 }
   0xc   : > { %s45_s18 = sor.u32 %s44_s15, %s42_s17  ;;  %p3848_p8 = scmp.ge.s32.totalorder %s5065_s11, 4 }
   0xd   : > { %p46_p7 = scmp.eq.s32.totalorder %s45_s18, 0 }
   0xe   : > { %279 = sbr.rel (%p3848_p8) target bundleno = 35 (0x23), region = 44 }
   0xf   : > { %s5182_s20 = scalar_select %p46_p7, %s5045_s28, %s48_s19  }
  0x15   : > { %282 = sbr.rel (!%p57_p5) target bundleno = 35 (0x23), region = 48  ;;  %s284_s21 = sand.u32 (%p57_p5), 1, %s5045_s28  }
  0x16   : > { %s3948_s22 = sshll.u32 (%p57_p5), %s5061_s10, 4  ;;  %s3849_s23 = sshll.u32 (%p57_p5), %s284_s21, 7 }
  0x17   : > { %s290_s24 = sadd.s32 (%p57_p5), %s5057_s9, %s3948_s22  ;;  %s286_s17 = scalar_lea.vmem (%p57_p5), [#allocation2], %s3849_s23 }
  0x18   : > { %s3852_s25 = sshll.u32 (%p57_p5), %s290_s24, 3 }
  0x19   : > { %s5191_s15 = scalar_lea.vmem (%p57_p5), %s6905_s0, %s3852_s25 }
  0x1a   : > { %v352_v0 = vld [vmem:[%s5191_s15] sm:$0xff] (%p57_p5)  ;;  %v354_v1 = vld [vmem:[%s5191_s15 + $0x10] sm:$0xff] (%p57_p5) }
  0x1b   : > { %v356_v2 = vld [vmem:[%s5191_s15 + $0x20] sm:$0xff] (%p57_p5)  ;;  %353 = vst [vmem:[%s286_s17] sm:$0xff] (%p57_p5), %v352_v0  ;;  %355 = vst [vmem:[%s286_s17 + $0x8] sm:$0xff] (%p57_p5), %v354_v1  ;;  %v358_v3 = vld [vmem:[%s5191_s15 + $0x30] sm:$0xff] (%p57_p5) }
  0x1c   : > { %357 = vst [vmem:[%s286_s17 + $0x10] sm:$0xff] %v356_v2  ;;  %v360_v4 = vld [vmem:[%s5191_s15 + $0x40] sm:$0xff]  ;;  %v362_v5 = vld [vmem:[%s5191_s15 + $0x50] sm:$0xff]  ;;  %359 = vst [vmem:[%s286_s17 + $0x18] sm:$0xff] %v358_v3 }
  0x1d   : > { %361 = vst [vmem:[%s286_s17 + $0x20] sm:$0xff] %v360_v4  ;;  %363 = vst [vmem:[%s286_s17 + $0x28] sm:$0xff] %v362_v5  ;;  %v364_v6 = vld [vmem:[%s5191_s15 + $0x60] sm:$0xff]  ;;  %v366_v7 = vld [vmem:[%s5191_s15 + $0x70] sm:$0xff] }
  0x1e   : > { %v368_v8 = vld [vmem:[%s5191_s15 + $0x100] sm:$0xff]  ;;  %365 = vst [vmem:[%s286_s17 + $0x30] sm:$0xff] %v364_v6  ;;  %367 = vst [vmem:[%s286_s17 + $0x38] sm:$0xff] %v366_v7  ;;  %v370_v9 = vld [vmem:[%s5191_s15 + $0x110] sm:$0xff] }
  0x1f   : > { %369 = vst [vmem:[%s286_s17 + $0x40] sm:$0xff] %v368_v8  ;;  %v372_v10 = vld [vmem:[%s5191_s15 + $0x120] sm:$0xff]  ;;  %v374_v11 = vld [vmem:[%s5191_s15 + $0x130] sm:$0xff]  ;;  %371 = vst [vmem:[%s286_s17 + $0x48] sm:$0xff] %v370_v9 }
  0x20   : > { %373 = vst [vmem:[%s286_s17 + $0x50] sm:$0xff] %v372_v10  ;;  %375 = vst [vmem:[%s286_s17 + $0x58] sm:$0xff] %v374_v11  ;;  %v376_v12 = vld [vmem:[%s5191_s15 + $0x140] sm:$0xff]  ;;  %v378_v13 = vld [vmem:[%s5191_s15 + $0x150] sm:$0xff] }
  0x21   : > { %v380_v14 = vld [vmem:[%s5191_s15 + $0x160] sm:$0xff]  ;;  %377 = vst [vmem:[%s286_s17 + $0x60] sm:$0xff] %v376_v12  ;;  %379 = vst [vmem:[%s286_s17 + $0x68] sm:$0xff] %v378_v13  ;;  %v382_v15 = vld [vmem:[%s5191_s15 + $0x170] sm:$0xff] }
  0x22   : > { %381 = vst [vmem:[%s286_s17 + $0x70] sm:$0xff] %v380_v14  ;;  %383 = vst [vmem:[%s286_s17 + $0x78] sm:$0xff] %v382_v15 }
  0x23 PF: > { %p3853_p9 = scmp.ge.s32.totalorder %s5065_s11, 1  ;;  %p388_p10 = scmp.lt.s32.totalorder %s5065_s11, 5 }
  0x25   : > { %p389_p11 = pnand %p3853_p9, %p388_p10 }
  0x27   : > { %392 = sbr.rel (%p389_p11) target bundleno = 4128 (0x1020), region = 86 }
  0x2e   : > { %s395_s18 = sand.u32 1, %s5041_s27   ;;  %v4713_v28 = vld [vmem:[%s6908_s3] sm:$0xff]   ;;  %v4714_v33 = vld [vmem:[%s6908_s3 + $0x8] sm:$0xff]   ;;  %v4715_v34 = vld [vmem:[%s6908_s3 + $0x10] sm:$0xff]   ;;  %vm978_vm0 = vcmask 64512   ;;  %s5067_s22 = smov 96  }
  0x2f   : > { %s5212_s19 = sshll.u32 %s395_s18, 7  ;;  %4183 = vmatprep.subr.bf16.mxu0 %v4713_v28  ;;  %v4716_v37 = vld [vmem:[%s6908_s3 + $0x18] sm:$0xff]   ;;  %v4717_v42 = vld [vmem:[%s6908_s3 + $0x20] sm:$0xff]   ;;  %v4718_v45 = vld [vmem:[%s6908_s3 + $0x28] sm:$0xff]   ;;  %s5068_s23 = smov 64   ;;  %vm1169_vm1 = vcmask 523264  }
  0x30   : > { %s5215_s21 = scalar_lea.vmem [#allocation2], %s5212_s19  ;;  %4184 = vmatpush3.bf16.msra.mxu0 %v4713_v28  ;;  %v4719_v46 = vld [vmem:[%s6908_s3 + $0x30] sm:$0xff]   ;;  %v4720_v49 = vld [vmem:[%s6908_s3 + $0x38] sm:$0xff]   ;;  %s5069_s24 = smov 88   ;;  %vm3456_vm2 = vcmask 130048   ;;  %vm3473_vm3 = vcmask 195584  }
  0x31   : > { %v5218_v16 = vld [vmem:[%s5215_s21 + $0x10] sm:$0xff]  ;;  %v5221_v17 = vld [vmem:[%s5215_s21] sm:$0xff]  ;;  %v5226_v18 = vld [vmem:[%s5215_s21 + $0x18] sm:$0xff]  ;;  %4185 = vmatprep.subr.bf16.mxu0 %v4714_v33  ;;  %s5071_s18 = smov 56   ;;  %s5072_s27 = smov 80   ;;  %vm3521_vm4 = vcmask 261120  }
  0x32   : > { %452 = vadd.xlane.f32.xlu1 %v5218_v16  ;;  %448 = vadd.xlane.f32.xlu0 %v5221_v17  ;;  %v5229_v19 = vld [vmem:[%s5215_s21 + $0x8] sm:$0xff]  ;;  %v496_v21 = vmul.f32 %v5221_v17, %v5221_v17  ;;  %v499_v22 = vmul.f32 %v5226_v18, %v5226_v18  ;;  %v498_v23 = vmul.f32 %v5218_v16, %v5218_v16  ;;  %v5245_v25 = vld [vmem:[%s5215_s21 + $0x20] sm:$0xff]  ;;  %v5250_v26 = vld [vmem:[%s5215_s21 + $0x38] sm:$0xff]  ;;  %s6843_s17 = scalar_lea.vmem [#allocation3], %s5212_s19  ;;  %s3949_s19 = sshll.u32 (%p5174_p6), %s5053_s30, 4 }
  0x33   : > { %v497_v20 = vmul.f32 %v5229_v19, %v5229_v19  ;;  %v5242_v24 = vld [vmem:[%s5215_s21 + $0x28] sm:$0xff]  ;;  %v5253_v27 = vld [vmem:[%s5215_s21 + $0x30] sm:$0xff]  ;;  %v500_v30 = vmul.f32 %v5245_v25, %v5245_v25  ;;  %v503_v31 = vmul.f32 %v5250_v26, %v5250_v26  ;;  %v5278_v36 = vld [vmem:[%s5215_s21 + $0x40] sm:$0xff]  ;;  %s3669_s16 = sadd.s32 (%p5174_p6), %s5049_s29, %s3949_s19 }
  0x34   : > { %v501_v29 = vmul.f32 %v5242_v24, %v5242_v24  ;;  %v502_v32 = vmul.f32 %v5253_v27, %v5253_v27  ;;  %4186 = vmatpush3.bf16.msra.mxu0 %v4714_v33  ;;  %v5275_v35 = vld [vmem:[%s5215_s21 + $0x48] sm:$0xff]  ;;  %v5286_v38 = vld [vmem:[%s5215_s21 + $0x58] sm:$0xff]  ;;  %v5289_v39 = vld [vmem:[%s5215_s21 + $0x50] sm:$0xff]  ;;  %v504_v41 = vmul.f32 %v5278_v36, %v5278_v36 }
  0x35   : > { %4187 = vmatprep.subr.bf16.mxu0 %v4715_v34  ;;  %v505_v40 = vmul.f32 %v5275_v35, %v5275_v35  ;;  %v507_v43 = vmul.f32 %v5286_v38, %v5286_v38  ;;  %v506_v44 = vmul.f32 %v5289_v39, %v5289_v39  ;;  %v5311_v47 = vld [vmem:[%s5215_s21 + $0x68] sm:$0xff]  ;;  %v5314_v48 = vld [vmem:[%s5215_s21 + $0x60] sm:$0xff]  ;;  %v5322_v50 = vld [vmem:[%s5215_s21 + $0x78] sm:$0xff] }
  0x36   : > { %454 = vadd.xlane.f32.xlu1 %v5226_v18  ;;  %450 = vadd.xlane.f32.xlu0 %v5229_v19  ;;  %v5325_v51 = vld [vmem:[%s5215_s21 + $0x70] sm:$0xff]  ;;  %v509_v52 = vmul.f32 %v5311_v47, %v5311_v47  ;;  %v508_v53 = vmul.f32 %v5314_v48, %v5314_v48  ;;  %v511_v54 = vmul.f32 %v5322_v50, %v5322_v50  ;;  %s5080_s21 = smov 24  }
  0x37   : > { %v510_v55 = vmul.f32 %v5325_v51, %v5325_v51 }
  0x38   : > { %4188 = vmatpush3.bf16.msra.mxu0 %v4715_v34 }
  0x39   : > { %4189 = vmatprep.subr.bf16.mxu0 %v4716_v37 }
  0x3a   : > { %514 = vadd.xlane.f32.xlu1 %v497_v20  ;;  %512 = vadd.xlane.f32.xlu0 %v496_v21 }
  0x3c   : > { %4190 = vmatpush3.bf16.msra.mxu0 %v4716_v37 }
  0x3d   : > { %4191 = vmatprep.subr.bf16.mxu0 %v4717_v42 }
  0x3e   : > { %518 = vadd.xlane.f32.xlu1 %v499_v22  ;;  %516 = vadd.xlane.f32.xlu0 %v498_v23 }
  0x40   : > { %4192 = vmatpush3.bf16.msra.mxu0 %v4717_v42 }
  0x41   : > { %4193 = vmatprep.subr.bf16.mxu0 %v4718_v45 }
  0x42   : > { %458 = vadd.xlane.f32.xlu1 %v5242_v24  ;;  %456 = vadd.xlane.f32.xlu0 %v5245_v25 }
  0x44   : > { %4194 = vmatpush3.bf16.msra.mxu0 %v4718_v45 }
  0x45   : > { %4195 = vmatprep.subr.bf16.mxu0 %v4719_v46 }
  0x46   : > { %462 = vadd.xlane.f32.xlu1 %v5250_v26  ;;  %460 = vadd.xlane.f32.xlu0 %v5253_v27 }
  0x48   : > { %4196 = vmatpush3.bf16.msra.mxu0 %v4719_v46 }
  0x49   : > { %4197 = vmatprep.subr.bf16.mxu0 %v4720_v49 }
  0x4a   : > { %522 = vadd.xlane.f32.xlu1 %v501_v29  ;;  %520 = vadd.xlane.f32.xlu0 %v500_v30 }
  0x4c   : > { %4198 = vmatpush3.bf16.msra.mxu0 %v4720_v49 }
  0x4e   : > { %526 = vadd.xlane.f32.xlu1 %v503_v31  ;;  %524 = vadd.xlane.f32.xlu0 %v502_v32 }
  0x52   : > { %466 = vadd.xlane.f32.xlu1 %v5275_v35  ;;  %464 = vadd.xlane.f32.xlu0 %v5278_v36 }
  0x56   : > { %470 = vadd.xlane.f32.xlu1 %v5286_v38  ;;  %468 = vadd.xlane.f32.xlu0 %v5289_v39 }
  0x5a   : > { %530 = vadd.xlane.f32.xlu1 %v505_v40  ;;  %528 = vadd.xlane.f32.xlu0 %v504_v41 }
  0x5e   : > { %534 = vadd.xlane.f32.xlu1 %v507_v43  ;;  %532 = vadd.xlane.f32.xlu0 %v506_v44 }
  0x62   : > { %474 = vadd.xlane.f32.xlu1 %v5311_v47  ;;  %472 = vadd.xlane.f32.xlu0 %v5314_v48 }
  0x66   : > { %478 = vadd.xlane.f32.xlu1 %v5322_v50  ;;  %476 = vadd.xlane.f32.xlu0 %v5325_v51 }
  0x6a   : > { %538 = vadd.xlane.f32.xlu1 %v509_v52  ;;  %536 = vadd.xlane.f32.xlu0 %v508_v53 }
  0x6e   : > { %542 = vadd.xlane.f32.xlu1 %v511_v54  ;;  %540 = vadd.xlane.f32.xlu0 %v510_v55 }
  0xbf   : > { %v453_v56 = vpop.xlane.xlu1 %452  ;;  %v449_v57 = vpop.xlane.xlu0 %448 }
  0xc0   : > { %v5337_v60 = vmul.f32 0.03125, %v449_v57  ;;  %v5339_v62 = vmul.f32 0.03125, %v453_v56 }
  0xc2   : > { %v560_v2 = vmul.f32 %v5337_v60, %v5337_v60  ;;  %v562_v8 = vmul.f32 %v5339_v62, %v5339_v62 }
  0xc3   : > { %v455_v58 = vpop.xlane.xlu1 %454  ;;  %v451_v59 = vpop.xlane.xlu0 %450 }
  0xc4   : > { %v481_v61 = vmul.f32 0.03125, %v451_v59  ;;  %v5341_v63 = vmul.f32 0.03125, %v455_v58  ;;  %v5365_v58 = vld [vmem:[%s6906_s1] ss:$0 sm:$0xff] }
  0xc6   : > { %v561_v3 = vmul.f32 %v481_v61, %v481_v61  ;;  %v563_v9 = vmul.f32 %v5341_v63, %v5341_v63  ;;  %v609_v54 = vsub.f32 %v5229_v19, %v481_v61 }
  0xc7   : > { %v515_v0 = vpop.xlane.xlu1 %514  ;;  %v513_v1 = vpop.xlane.xlu0 %512 }
  0xc8   : > { %v545_v4 = vmul.f32 0.03125, %v515_v0  ;;  %v544_v5 = vmul.f32 0.03125, %v513_v1  ;;  %v608_v0 = vsub.f32 %v5221_v17, %v5337_v60  ;;  %v611_v17 = vsub.f32 %v5226_v18, %v5341_v63 }
  0xca   : > { %v577_v6 = vsub.f32 %v545_v4, %v561_v3  ;;  %v576_v7 = vsub.f32 %v544_v5, %v560_v2 }
  0xcb   : > { %v519_v10 = vpop.xlane.xlu1 %518  ;;  %v517_v11 = vpop.xlane.xlu0 %516 }
  0xcc   : > { %v593_v12 = vmax.f32 %v577_v6, 0.0  ;;  %v592_v13 = vmax.f32 %v576_v7, 0.0  ;;  %v547_v14 = vmul.f32 0.03125, %v519_v10  ;;  %v546_v15 = vmul.f32 0.03125, %v517_v11 }
  0xce   : > { %v625_v20 = vadd.f32 1e-05, %v593_v12  ;;  %v624_v21 = vadd.f32 1e-05, %v592_v13  ;;  %v579_v22 = vsub.f32 %v547_v14, %v563_v9  ;;  %v578_v23 = vsub.f32 %v546_v15, %v562_v8  ;;  %v5376_v8 = vld [vmem:[%s6907_s2] ss:$0 sm:$0xff] }
  0xcf   : > { %v459_v28 = vpop.xlane.xlu1 %458  ;;  %v457_v29 = vpop.xlane.xlu0 %456 }
  0xd0   : > { %4723 = vrsqrt.f32 %v625_v20  ;;  %v595_v30 = vmax.f32 %v579_v22, 0.0  ;;  %v594_v31 = vmax.f32 %v578_v23, 0.0  ;;  %v5349_v40 = vmul.f32 0.03125, %v459_v28 }
  0xd1   : > { %4725 = vrsqrt.f32 %v624_v21  ;;  %v5351_v41 = vmul.f32 0.03125, %v457_v29  ;;  %v610_v20 = vsub.f32 %v5218_v16, %v5339_v62 }
  0xd2   : > { %v627_v32 = vadd.f32 1e-05, %v595_v30  ;;  %v626_v33 = vadd.f32 1e-05, %v594_v31  ;;  %v565_v46 = vmul.f32 %v5349_v40, %v5349_v40 }
  0xd3   : > { %v463_v34 = vpop.xlane.xlu1 %462  ;;  %v461_v37 = vpop.xlane.xlu0 %460  ;;  %v564_v49 = vmul.f32 %v5351_v41, %v5351_v41 }
  0xd4   : > { %4727 = vrsqrt.f32 %v627_v32  ;;  %v5353_v42 = vmul.f32 0.03125, %v463_v34  ;;  %v5355_v43 = vmul.f32 0.03125, %v461_v37 }
  0xd5   : > { %4729 = vrsqrt.f32 %v626_v33 }
  0xd6   : > { %v567_v1 = vmul.f32 %v5353_v42, %v5353_v42  ;;  %v566_v2 = vmul.f32 %v5355_v43, %v5355_v43 }
  0xd7   : > { %v523_v44 = vpop.xlane.xlu1 %522  ;;  %v521_v45 = vpop.xlane.xlu0 %520 }
  0xd8   : > { %v549_v52 = vmul.f32 0.03125, %v523_v44  ;;  %v548_v53 = vmul.f32 0.03125, %v521_v45 }
  0xda   : > { %v4724_v55 = vpop.eup %4723  ;;  %v581_v56 = vsub.f32 %v549_v52, %v565_v46  ;;  %v580_v57 = vsub.f32 %v548_v53, %v564_v49 }
  0xdb   : > { %v4726_v59 = vpop.eup %4725  ;;  %v527_v3 = vpop.xlane.xlu1 %526  ;;  %v657_v61 = vmul.f32 %v4724_v55, %v609_v54 }
  0xdc   : > { %v525_v19 = vpop.xlane.xlu0 %524  ;;  %v597_v4 = vmax.f32 %v581_v56, 0.0  ;;  %v596_v5 = vmax.f32 %v580_v57, 0.0  ;;  %v551_v6 = vmul.f32 0.03125, %v527_v3  ;;  %v656_v60 = vmul.f32 %v4726_v59, %v608_v0 }
  0xdd   : > { %v550_v7 = vmul.f32 0.03125, %v525_v19  ;;  %v680_v9 = vmul.f32 %v5365_v58, %v657_v61 }
  0xde   : > { %v4728_v10 = vpop.eup %4727  ;;  %v629_v11 = vadd.f32 1e-05, %v597_v4  ;;  %v628_v12 = vadd.f32 1e-05, %v596_v5  ;;  %v583_v13 = vsub.f32 %v551_v6, %v567_v1  ;;  %v679_v23 = vmul.f32 %v5365_v58, %v656_v60 }
  0xdf   : > { %v582_v14 = vsub.f32 %v550_v7, %v566_v2  ;;  %v4730_v15 = vpop.eup %4729  ;;  %v467_v21 = vpop.xlane.xlu1 %466  ;;  %v703_v28 = vadd.f32 %v5376_v8, %v680_v9  ;;  %v659_v29 = vmul.f32 %v4728_v10, %v611_v17  ;;  %v613_v2 = vsub.f32 %v5242_v24, %v5349_v40 }
  0xe0   : > { %v465_v22 = vpop.xlane.xlu0 %464  ;;  %4731 = vrsqrt.f32 %v629_v11  ;;  %v599_v18 = vmax.f32 %v583_v13, 0.0  ;;  %v702_v30 = vadd.f32 %v5376_v8, %v679_v23  ;;  %v658_v31 = vmul.f32 %v4730_v15, %v610_v20 }
  0xe1   : > { %v598_v63 = vmax.f32 %v582_v14, 0.0  ;;  %4733 = vrsqrt.f32 %v628_v12  ;;  %v5387_v62 = vmul.f32 0.03125, %v467_v21  ;;  %v5389_v45 = vmul.f32 0.03125, %v465_v22 }
  0xe2   : > { %v631_v32 = vadd.f32 1e-05, %v599_v18  ;;  %v718_v37 = vpack.c.bf16 %v703_v28, %v702_v30  ;;  %v681_v16 = vmul.f32 %v5365_v58, %v658_v31  ;;  %v682_v46 = vmul.f32 %v5365_v58, %v659_v29 }
  0xe3   : > { %v630_v33 = vadd.f32 1e-05, %v598_v63  ;;  %v471_v34 = vpop.xlane.xlu1 %470  ;;  %v569_v57 = vmul.f32 %v5387_v62, %v5387_v62  ;;  %v568_v59 = vmul.f32 %v5389_v45, %v5389_v45  ;;  %v612_v6 = vsub.f32 %v5245_v25, %v5351_v41 }
  0xe4   : > { %v469_v44 = vpop.xlane.xlu0 %468  ;;  %4735 = vrsqrt.f32 %v631_v32  ;;  %4199 = vmatprep.mubr.bf16.mxu0 %v718_v37  ;;  %v704_v49 = vadd.f32 %v5376_v8, %v681_v16  ;;  %v5393_v52 = vmul.f32 0.03125, %v471_v34  ;;  %v705_v55 = vadd.f32 %v5376_v8, %v682_v46 }
  0xe5   : > { %4737 = vrsqrt.f32 %v630_v33  ;;  %v5395_v53 = vmul.f32 0.03125, %v469_v44  ;;  %v615_v13 = vsub.f32 %v5250_v26, %v5353_v42  ;;  %v614_v28 = vsub.f32 %v5253_v27, %v5355_v43 }
  0xe6   : > { %v719_v3 = vpack.c.bf16 %v705_v55, %v704_v49  ;;  %v571_v7 = vmul.f32 %v5393_v52, %v5393_v52 }
  0xe7   : > { %v531_v54 = vpop.xlane.xlu1 %530  ;;  %v570_v17 = vmul.f32 %v5395_v53, %v5395_v53 }
  0xe8   : > { %v529_v56 = vpop.xlane.xlu0 %528  ;;  %v553_v0 = vmul.f32 0.03125, %v531_v54  ;;  %4200 = vmatmul.mubr.bf16.vlgmr.msra.gmra.mrb[0].mxu0 %v719_v3 }
  0xe9   : > { %v552_v1 = vmul.f32 0.03125, %v529_v56 }
  0xea   : > { %v4732_v19 = vpop.eup %4731  ;;  %v585_v61 = vsub.f32 %v553_v0, %v569_v57 }
  0xeb   : > { %v584_v4 = vsub.f32 %v552_v1, %v568_v59  ;;  %v4734_v5 = vpop.eup %4733  ;;  %v535_v60 = vpop.xlane.xlu1 %534  ;;  %v661_v10 = vmul.f32 %v4732_v19, %v613_v2 }
  0xec   : > { %v533_v9 = vpop.xlane.xlu0 %532  ;;  %v601_v11 = vmax.f32 %v585_v61, 0.0  ;;  %v555_v40 = vmul.f32 0.03125, %v535_v60  ;;  %v660_v14 = vmul.f32 %v4734_v5, %v612_v6 }
  0xed   : > { %v600_v24 = vmax.f32 %v584_v4, 0.0  ;;  %v554_v12 = vmul.f32 0.03125, %v533_v9  ;;  %v684_v25 = vmul.f32 %v5365_v58, %v661_v10  ;;  %v617_v4 = vsub.f32 %v5275_v35, %v5387_v62 }
  0xee   : > { %v4736_v41 = vpop.eup %4735  ;;  %v633_v15 = vadd.f32 1e-05, %v601_v11  ;;  %v587_v21 = vsub.f32 %v555_v40, %v571_v7  ;;  %v683_v29 = vmul.f32 %v5365_v58, %v660_v14  ;;  %v616_v9 = vsub.f32 %v5278_v36, %v5389_v45 }
  0xef   : > { %v632_v20 = vadd.f32 1e-05, %v600_v24  ;;  %v586_v22 = vsub.f32 %v554_v12, %v570_v17  ;;  %v4738_v23 = vpop.eup %4737  ;;  %v475_v18 = vpop.xlane.xlu1 %474  ;;  %v707_v30 = vadd.f32 %v5376_v8, %v684_v25  ;;  %v663_v31 = vmul.f32 %v4736_v41, %v615_v13 }
  0xf0   : > { %v473_v63 = vpop.xlane.xlu0 %472  ;;  %4739 = vrsqrt.f32 %v633_v15  ;;  %v603_v26 = vmax.f32 %v587_v21, 0.0  ;;  %v706_v32 = vadd.f32 %v5376_v8, %v683_v29  ;;  %v662_v33 = vmul.f32 %v4738_v23, %v614_v28 }
  0xf1   : > { %v602_v42 = vmax.f32 %v586_v22, 0.0  ;;  %4741 = vrsqrt.f32 %v632_v20  ;;  %v5419_v43 = vmul.f32 0.03125, %v475_v18  ;;  %v5421_v49 = vmul.f32 0.03125, %v473_v63 }
  0xf2   : > { %v635_v34 = vadd.f32 1e-05, %v603_v26  ;;  %v720_v16 = vpack.c.bf16 %v707_v30, %v706_v32  ;;  %v685_v27 = vmul.f32 %v5365_v58, %v662_v33  ;;  %v686_v54 = vmul.f32 %v5365_v58, %v663_v31 }
  0xf3   : > { %v634_v37 = vadd.f32 1e-05, %v602_v42  ;;  %v479_v44 = vpop.xlane.xlu1 %478  ;;  %v573_v2 = vmul.f32 %v5419_v43, %v5419_v43  ;;  %v572_v3 = vmul.f32 %v5421_v49, %v5421_v49  ;;  %v619_v25 = vsub.f32 %v5286_v38, %v5393_v52 }
  0xf4   : > { %v477_v46 = vpop.xlane.xlu0 %476  ;;  %4743 = vrsqrt.f32 %v635_v34  ;;  %4203 = vmatprep.mubr.bf16.mxu0 %v720_v16  ;;  %v708_v55 = vadd.f32 %v5376_v8, %v685_v27  ;;  %v5425_v56 = vmul.f32 0.03125, %v479_v44  ;;  %v709_v0 = vadd.f32 %v5376_v8, %v686_v54 }
  0xf5   : > { %4745 = vrsqrt.f32 %v634_v37  ;;  %v5427_v57 = vmul.f32 0.03125, %v477_v46  ;;  %v618_v36 = vsub.f32 %v5289_v39, %v5395_v53  ;;  %v621_v44 = vsub.f32 %v5311_v47, %v5419_v43 }
  0xf6   : > { %v721_v5 = vpack.c.bf16 %v709_v0, %v708_v55  ;;  %v575_v10 = vmul.f32 %v5425_v56, %v5425_v56  ;;  %v620_v46 = vsub.f32 %v5314_v48, %v5421_v49 }
  0xf7   : > { %v539_v59 = vpop.xlane.xlu1 %538  ;;  %v574_v11 = vmul.f32 %v5427_v57, %v5427_v57 }
  0xf8   : > { %v537_v1 = vpop.xlane.xlu0 %536  ;;  %v557_v19 = vmul.f32 0.03125, %v539_v59  ;;  %4204 = vmatmul.mubr.bf16.gmra.mrb[4].mxu0 %v721_v5  ;;  %v623_v59 = vsub.f32 %v5322_v50, %v5425_v56 }
  0xf9   : > { %v556_v61 = vmul.f32 0.03125, %v537_v1 }
  0xfa   : > { %v4740_v6 = vpop.eup %4739  ;;  %v589_v7 = vsub.f32 %v557_v19, %v573_v2  ;;  %v622_v2 = vsub.f32 %v5325_v51, %v5427_v57 }
  0xfb   : > { %v588_v17 = vsub.f32 %v556_v61, %v572_v3  ;;  %v4742_v60 = vpop.eup %4741  ;;  %v543_v24 = vpop.xlane.xlu1 %542  ;;  %v665_v12 = vmul.f32 %v4740_v6, %v617_v4  ;;  %v3858_v6 = vld [vmem:[%s6909_s4] ss:$0 sm:$0xff] }
  0xfc   : > { %v541_v40 = vpop.xlane.xlu0 %540  ;;  %v605_v13 = vmax.f32 %v589_v7, 0.0  ;;  %v559_v62 = vmul.f32 0.03125, %v543_v24  ;;  %v664_v45 = vmul.f32 %v4742_v60, %v616_v9 }
  0xfd   : > { %v604_v35 = vmax.f32 %v588_v17, 0.0  ;;  %v558_v14 = vmul.f32 0.03125, %v541_v40  ;;  %v688_v41 = vmul.f32 %v5365_v58, %v665_v12 }
  0xfe   : > { %v4744_v15 = vpop.eup %4743  ;;  %v637_v20 = vadd.f32 1e-05, %v605_v13  ;;  %v591_v22 = vsub.f32 %v559_v62, %v575_v10  ;;  %v687_v18 = vmul.f32 %v5365_v58, %v664_v45 }
  0xff   : > { %v636_v21 = vadd.f32 1e-05, %v604_v35  ;;  %v590_v23 = vsub.f32 %v558_v14, %v574_v11  ;;  %v4746_v28 = vpop.eup %4745  ;;  %v711_v63 = vadd.f32 %v5376_v8, %v688_v41  ;;  %v667_v29 = vmul.f32 %v4744_v15, %v619_v25 }
 0x100   : > { %4747 = vrsqrt.f32 %v637_v20  ;;  %v607_v30 = vmax.f32 %v591_v22, 0.0  ;;  %v666_v52 = vmul.f32 %v4746_v28, %v618_v36  ;;  %v710_v39 = vadd.f32 %v5376_v8, %v687_v18 }
 0x101   : > { %v606_v38 = vmax.f32 %v590_v23, 0.0  ;;  %4749 = vrsqrt.f32 %v636_v21  ;;  %v690_v53 = vmul.f32 %v5365_v58, %v667_v29 }
 0x102   : > { %v639_v26 = vadd.f32 1e-05, %v607_v30  ;;  %v689_v31 = vmul.f32 %v5365_v58, %v666_v52  ;;  %v722_v32 = vpack.c.bf16 %v711_v63, %v710_v39 }
 0x103   : > { %v638_v42 = vadd.f32 1e-05, %v606_v38  ;;  %v713_v33 = vadd.f32 %v5376_v8, %v690_v53 }
 0x104   : > { %4751 = vrsqrt.f32 %v639_v26  ;;  %v712_v34 = vadd.f32 %v5376_v8, %v689_v31  ;;  %4207 = vmatprep.mubr.bf16.mxu0 %v722_v32 }
 0x105   : > { %4753 = vrsqrt.f32 %v638_v42 }
 0x106   : > { %v723_v37 = vpack.c.bf16 %v713_v33, %v712_v34 }
 0x108   : > { %4208 = vmatmul.mubr.bf16.gmra.mrb[8].mxu0 %v723_v37 }
 0x10a   : > { %v4748_v16 = vpop.eup %4747 }
 0x10b   : > { %v4750_v27 = vpop.eup %4749  ;;  %v669_v54 = vmul.f32 %v4748_v16, %v621_v44 }
 0x10c   : > { %v668_v55 = vmul.f32 %v4750_v27, %v620_v46 }
 0x10d   : > { %v692_v0 = vmul.f32 %v5365_v58, %v669_v54 }
 0x10e   : > { %v4752_v1 = vpop.eup %4751  ;;  %v691_v3 = vmul.f32 %v5365_v58, %v668_v55 }
 0x10f   : > { %v4754_v19 = vpop.eup %4753  ;;  %v715_v47 = vadd.f32 %v5376_v8, %v692_v0  ;;  %v671_v43 = vmul.f32 %v4752_v1, %v623_v59 }
 0x110   : > { %v714_v48 = vadd.f32 %v5376_v8, %v691_v3  ;;  %v670_v49 = vmul.f32 %v4754_v19, %v622_v2 }
 0x111   : > { %v694_v61 = vmul.f32 %v5365_v58, %v671_v43 }
 0x112   : > { %v724_v4 = vpack.c.bf16 %v715_v47, %v714_v48  ;;  %v693_v50 = vmul.f32 %v5365_v58, %v670_v49 }
 0x113   : > { %v717_v56 = vadd.f32 %v5376_v8, %v694_v61 }
 0x114   : > { %4211 = vmatprep.mubr.bf16.mxu0 %v724_v4  ;;  %v716_v5 = vadd.f32 %v5376_v8, %v693_v50 }
 0x116   : > { %v725_v51 = vpack.c.bf16 %v717_v56, %v716_v5 }
 0x118   : > { %4212 = vmatmul.mubr.bf16.gmra.mrb[12].mxu0 %v725_v51 }
 0x1bb   : > { %v4201_v57 = vpop.f32.mrb[0].mxu0 }
 0x1bc   : > { %v831_v7 = vpop.f32.mrb[1].mxu0  ;;  %v840_v60 = vadd.f32 %v4201_v57, %v3858_v6 }
 0x1bd   : > { %v4202_v17 = vpop.f32.mrb[2].mxu0  ;;  %v832_v11 = vadd.f32 %v3858_v6, %v831_v7 }
 0x1be   : > { %v843_v9 = vadd.f32 %v4202_v17, %v3858_v6  ;;  %v834_v10 = vpop.f32.mrb[3].mxu0 }
 0x1bf   : > { %v835_v24 = vadd.f32 %v3858_v6, %v834_v10 }
 0x1c0   : > { %v5473_v58 = vpack.c.bf16 %v843_v9, %v840_v60 }
 0x1c1   : > { %v5475_v40 = vpack.c.bf16 %v835_v24, %v832_v11 }
 0x1c2   : > { %972 = vrot.lane.b32.xlu1 %v5473_v58, %s5067_s22 }
 0x1c3   : > { %970 = vrot.lane.b32.xlu0 %v5475_v40, %s5067_s22  ;;  %4223 = vmatprep.mubr.msk.bf16.mxu1 %vm978_vm0, %v5475_v40 }
 0x1cb   : > { %v4205_v8 = vpop.f32.mrb[4].mxu0 }
 0x1cc   : > { %v847_v12 = vpop.f32.mrb[5].mxu0  ;;  %v856_v35 = vadd.f32 %v4205_v8, %v3858_v6  ;;  %v4014_v8 = vld [vmem:[%s6912_s7 + $0x8] sm:$0xff]  }
 0x1cd   : > { %v4206_v13 = vpop.f32.mrb[6].mxu0  ;;  %v848_v25 = vadd.f32 %v3858_v6, %v847_v12  ;;  %v3951_v12 = vld [vmem:[%s6912_s7] sm:$0xff]  }
 0x1ce   : > { %v859_v62 = vadd.f32 %v4206_v13, %v3858_v6  ;;  %v850_v14 = vpop.f32.mrb[7].mxu0  ;;  %v3956_v13 = vunpack.c.l.bf16 %v4014_v8 }
 0x1cf   : > { %v851_v36 = vadd.f32 %v3858_v6, %v850_v14  ;;  %v3953_v14 = vunpack.c.h.bf16 %v3951_v12 }
 0x1d0   : > { %v5483_v45 = vpack.c.bf16 %v859_v62, %v856_v35  ;;  %v3952_v35 = vunpack.c.l.bf16 %v3951_v12 }
 0x1d1   : > { %v5485_v41 = vpack.c.bf16 %v851_v36, %v848_v25 }
 0x1d2   : > { %976 = vrot.lane.b32.xlu0 %v5483_v45, %s5067_s22 }
 0x1d3   : > { %974 = vrot.lane.b32.xlu1 %v5485_v41, %s5067_s22 }
 0x1db   : > { %v4209_v15 = vpop.f32.mrb[8].mxu0 }
 0x1dc   : > { %v863_v20 = vpop.f32.mrb[9].mxu0  ;;  %v872_v22 = vadd.f32 %v4209_v15, %v3858_v6 }
 0x1dd   : > { %v4210_v21 = vpop.f32.mrb[10].mxu0  ;;  %v864_v18 = vadd.f32 %v3858_v6, %v863_v20 }
 0x1de   : > { %v875_v23 = vadd.f32 %v4210_v21, %v3858_v6  ;;  %v866_v28 = vpop.f32.mrb[11].mxu0  ;;  %v3957_v21 = vunpack.c.h.bf16 %v4014_v8 }
 0x1df   : > { %v867_v63 = vadd.f32 %v3858_v6, %v866_v28 }
 0x1e0   : > { %v5491_v29 = vpack.c.bf16 %v875_v23, %v872_v22 }
 0x1e1   : > { %v5493_v30 = vpack.c.bf16 %v867_v63, %v864_v18  ;;  %v4016_v18 = vld [vmem:[%s6912_s7 + $0x18] sm:$0xff]  }
 0x1e3   : > { %1072 = vrot.lane.b32.xlu1 %v5493_v30, %s5067_s22  ;;  %4239 = vmatprep.mubr.msk.bf16.mxu0 %vm978_vm0, %v5493_v30 }
 0x1e7   : > { %1074 = vrot.lane.b32.xlu1 %v5491_v29, %s5067_s22 }
 0x1eb   : > { %v4213_v38 = vpop.f32.mrb[12].mxu0 }
 0x1ec   : > { %v879_v52 = vpop.f32.mrb[13].mxu0  ;;  %v888_v53 = vadd.f32 %v4213_v38, %v3858_v6 }
 0x1ed   : > { %v4214_v39 = vpop.f32.mrb[14].mxu0  ;;  %v880_v31 = vadd.f32 %v3858_v6, %v879_v52  ;;  %v3964_v52 = vunpack.c.l.bf16 %v4016_v18 }
 0x1ee   : > { %v891_v26 = vadd.f32 %v4214_v39, %v3858_v6  ;;  %v882_v42 = vpop.f32.mrb[15].mxu0 }
 0x1ef   : > { %v883_v32 = vadd.f32 %v3858_v6, %v882_v42  ;;  %v4015_v42 = vld [vmem:[%s6912_s7 + $0x10] sm:$0xff]  }
 0x1f0   : > { %v5501_v33 = vpack.c.bf16 %v891_v26, %v888_v53  ;;  %v3965_v53 = vunpack.c.h.bf16 %v4016_v18 }
 0x1f1   : > { %v5503_v34 = vpack.c.bf16 %v883_v32, %v880_v31  ;;  %v3961_v32 = vunpack.c.h.bf16 %v4015_v42 }
 0x1f2   : > { %1078 = vrot.lane.b32.xlu1 %v5501_v33, %s5067_s22 }
 0x1f3   : > { %1076 = vrot.lane.b32.xlu0 %v5503_v34, %s5067_s22  ;;  %s5070_s22 = smov 120  }
 0x1f6   : > { %1356 = vrot.lane.b32.xlu1 %v5473_v58, %s5068_s23 }
 0x1f7   : > { %1354 = vrot.lane.b32.xlu0 %v5475_v40, %s5068_s23 }
 0x1fa   : > { %1360 = vrot.lane.b32.xlu1 %v5483_v45, %s5068_s23 }
 0x1fb   : > { %1358 = vrot.lane.b32.xlu0 %v5485_v41, %s5068_s23 }
 0x1fe   : > { %1449 = vrot.lane.b32.xlu1 %v5501_v33, %s5068_s23 }
 0x1ff   : > { %1443 = vrot.lane.b32.xlu0 %v5493_v30, %s5068_s23 }
 0x202   : > { %1645 = vrot.lane.b32.xlu1 %v5493_v30, %s5069_s24 }
 0x203   : > { %1540 = vrot.lane.b32.xlu0 %v5475_v40, %s5069_s24 }
 0x206   : > { %1546 = vrot.lane.b32.xlu1 %v5483_v45, %s5069_s24 }
 0x207   : > { %1445 = vrot.lane.b32.xlu0 %v5491_v29, %s5068_s23 }
 0x20a   : > { %1647 = vrot.lane.b32.xlu1 %v5491_v29, %s5069_s24 }
 0x20b   : > { %1542 = vrot.lane.b32.xlu0 %v5473_v58, %s5069_s24 }
 0x20e   : > { %1447 = vrot.lane.b32.xlu1 %v5503_v34, %s5068_s23 }
 0x20f   : > { %1544 = vrot.lane.b32.xlu0 %v5485_v41, %s5069_s24 }
 0x234   : > { %v973_v16 = vpop.permute.xlu1 %972 }
 0x235   : > { %v971_v37 = vpop.permute.xlu0 %970  ;;  %v995_v46 = vsel %vm978_vm0, %v973_v16, 0 }
 0x236   : > { %4491 = vmatprep.subr.msk.bf16.mxu1 %vm978_vm0, %v971_v37  ;;  %v992_v44 = vsel %vm978_vm0, %v971_v37, 0 }
 0x237   : > { %4216 = vmatpush3.bf16.xpose.msra.mxu1 %v992_v44 }
 0x238   : > { %4492 = vmatprep.subr.msk.bf16.mxu1 %vm978_vm0, %v973_v16  ;;  %v3960_v16 = vunpack.c.l.bf16 %v4015_v42 }
 0x23f   : > { %4218 = vmatpush3.bf16.xpose.msra.mxu1 %v995_v46 }
 0x244   : > { %v977_v55 = vpop.permute.xlu0 %976 }
 0x245   : > { %v975_v27 = vpop.permute.xlu1 %974  ;;  %v1001_v59 = vsel %vm978_vm0, %v977_v55, 0 }
 0x246   : > { %4493 = vmatprep.subr.msk.bf16.mxu1 %vm978_vm0, %v975_v27  ;;  %v998_v54 = vsel %vm978_vm0, %v975_v27, 0 }
 0x247   : > { %4220 = vmatpush3.bf16.xpose.msra.mxu1 %v998_v54 }
 0x248   : > { %4494 = vmatprep.subr.msk.bf16.mxu1 %vm978_vm0, %v977_v55 }
 0x24f   : > { %4222 = vmatpush3.bf16.xpose.msra.mxu1 %v1001_v59 }
 0x255   : > { %v1073_v0 = vpop.permute.xlu1 %1072 }
 0x256   : > { %4495 = vmatprep.subr.msk.bf16.mxu0 %vm978_vm0, %v1073_v0  ;;  %v1093_v1 = vsel %vm978_vm0, %v1073_v0, 0  ;;  %4224 = vmatmul.mubr.msk.bf16.vlgmr.msra.gmra.mrb[0].mxu1 %vm978_vm0, %v5473_v58 }
 0x257   : > { %4232 = vmatpush3.bf16.xpose.msra.mxu0 %v1093_v1  ;;  %4227 = vmatprep.mubr.msk.bf16.mxu1 %vm978_vm0, %v5485_v41 }
 0x259   : > { %v1075_v2 = vpop.permute.xlu1 %1074 }
 0x25a   : > { %4496 = vmatprep.subr.msk.bf16.mxu0 %vm978_vm0, %v1075_v2  ;;  %v1096_v3 = vsel %vm978_vm0, %v1075_v2, 0 }
 0x25e   : > { %4228 = vmatmul.mubr.msk.bf16.gmra.mrb[4].mxu1 %vm978_vm0, %v5483_v45 }
 0x25f   : > { %4234 = vmatpush3.bf16.xpose.msra.mxu0 %v1096_v3 }
 0x264   : > { %v1079_v19 = vpop.permute.xlu1 %1078 }
 0x265   : > { %v1077_v47 = vpop.permute.xlu0 %1076  ;;  %v1102_v4 = vsel %vm978_vm0, %v1079_v19, 0 }
 0x266   : > { %4497 = vmatprep.subr.msk.bf16.mxu0 %vm978_vm0, %v1077_v47  ;;  %v1099_v43 = vsel %vm978_vm0, %v1077_v47, 0 }
 0x267   : > { %4236 = vmatpush3.bf16.xpose.msra.mxu0 %v1099_v43 }
 0x268   : > { %4498 = vmatprep.subr.msk.bf16.mxu0 %vm978_vm0, %v1079_v19  ;;  %v1357_v49 = vpop.permute.xlu1 %1356 }
 0x269   : > { %v1355_v48 = vpop.permute.xlu0 %1354 }
 0x26a   : > { %4247 = vmatprep.subr.bf16.mxu1 %v1355_v48 }
 0x26b   : > { %4248 = vmatpush3.bf16.msra.mxu1 %v1355_v48 }
 0x26c   : > { %4249 = vmatprep.subr.bf16.mxu1 %v1357_v49  ;;  %v1361_v56 = vpop.permute.xlu1 %1360 }
 0x26d   : > { %v1359_v61 = vpop.permute.xlu0 %1358 }
 0x26f   : > { %4238 = vmatpush3.bf16.xpose.msra.mxu0 %v1102_v4  ;;  %4250 = vmatpush3.bf16.msra.mxu1 %v1357_v49 }
 0x270   : > { %4251 = vmatprep.subr.bf16.mxu1 %v1359_v61  ;;  %v5562_v6 = vpop.permute.xlu1 %1449 }
 0x271   : > { %v5551_v50 = vpop.permute.xlu0 %1443 }
 0x273   : > { %4252 = vmatpush3.bf16.msra.mxu1 %v1359_v61 }
 0x274   : > { %4253 = vmatprep.subr.bf16.mxu1 %v1361_v56  ;;  %v5568_v9 = vpop.permute.xlu1 %1645 }
 0x275   : > { %v1541_v5 = vpop.permute.xlu0 %1540 }
 0x276   : > { %4240 = vmatmul.mubr.msk.bf16.vlgmr.msra.gmra.mrb[16].mxu0 %vm978_vm0, %v5491_v29  ;;  %4499 = vmatprep.subr.msk.bf16.mxu0 %vm978_vm0, %v1541_v5  ;;  %v1561_v51 = vsel %vm978_vm0, %v1541_v5, 0 }
 0x277   : > { %4243 = vmatprep.mubr.msk.bf16.mxu0 %vm978_vm0, %v5503_v34  ;;  %4254 = vmatpush3.bf16.msra.mxu1 %v1361_v56 }
 0x278   : > { %4280 = vmatpush3.bf16.xpose.msra.mxu0 %v1561_v51  ;;  %4263 = vmatprep.subr.bf16.mxu1 %v5551_v50  ;;  %v1547_v11 = vpop.permute.xlu1 %1546 }
 0x279   : > { %v5560_v57 = vpop.permute.xlu0 %1445  ;;  %v1570_v24 = vsel %vm978_vm0, %v1547_v11, 0 }
 0x27d   : > { %v1543_v7 = vpop.permute.xlu0 %1542 }
 0x27e   : > { %4244 = vmatmul.mubr.msk.bf16.gmra.mrb[20].mxu0 %vm978_vm0, %v5501_v33  ;;  %4500 = vmatprep.subr.msk.bf16.mxu0 %vm978_vm0, %v1543_v7  ;;  %v1564_v17 = vsel %vm978_vm0, %v1543_v7, 0 }
 0x280   : > { %4282 = vmatpush3.bf16.xpose.msra.mxu0 %v1564_v17 }
 0x281   : > { %v1545_v60 = vpop.permute.xlu0 %1544 }
 0x282   : > { %4501 = vmatprep.subr.msk.bf16.mxu0 %vm978_vm0, %v1545_v60  ;;  %v1567_v10 = vsel %vm978_vm0, %v1545_v60, 0 }
 0x288   : > { %4284 = vmatpush3.bf16.xpose.msra.mxu0 %v1567_v10 }
 0x289   : > { %4502 = vmatprep.subr.msk.bf16.mxu0 %vm978_vm0, %v1547_v11 }
 0x290   : > { %4286 = vmatpush3.bf16.xpose.msra.mxu0 %v1570_v24 }
 0x329   : > { %v4225_v62 = vpop.f32.mrb[0].mxu1 }
 0x32a   : > { %v5580_v25 = vadd.f32 %v4225_v62, %v3956_v13  ;;  %v1037_v36 = vpop.f32.mrb[1].mxu1 }
 0x32b   : > { %v4226_v15 = vpop.f32.mrb[2].mxu1  ;;  %v5582_v20 = vadd.f32 %v3952_v35, %v1037_v36 }
 0x32c   : > { %v1040_v22 = vpop.f32.mrb[3].mxu1  ;;  %v1176_v23 = vsel %vm1169_vm1, %v5580_v25, -inf  ;;  %v5593_v38 = vadd.f32 %v4226_v15, %v3957_v21 }
 0x32d   : > { %v5586_v28 = vadd.f32 %v3953_v14, %v1040_v22  ;;  %1177 = vmax.xlane.f32.xlu0 %v1176_v23  ;;  %v1170_v39 = vsel %vm1169_vm1, %v5582_v20, -inf }
 0x32e   : > { %v1179_v54 = vsel %vm1169_vm1, %v5593_v38, -inf }
 0x32f   : > { %v1173_v63 = vsel %vm1169_vm1, %v5586_v28, -inf }
 0x330   : > { %1174 = vmax.xlane.f32.xlu1 %v1173_v63 }
 0x331   : > { %v4229_v26 = vpop.f32.mrb[4].mxu1  ;;  %1171 = vmax.xlane.f32.xlu0 %v1170_v39 }
 0x332   : > { %v1053_v31 = vpop.f32.mrb[5].mxu1  ;;  %v5600_v44 = vadd.f32 %v4229_v26, %v3964_v52 }
 0x333   : > { %v4230_v37 = vpop.f32.mrb[6].mxu1  ;;  %v5610_v0 = vadd.f32 %v3960_v16, %v1053_v31 }
 0x334   : > { %v5602_v46 = vadd.f32 %v4230_v37, %v3965_v53  ;;  %v1056_v27 = vpop.f32.mrb[7].mxu1  ;;  %v1188_v1 = vsel %vm1169_vm1, %v5600_v44, -inf }
 0x335   : > { %1180 = vmax.xlane.f32.xlu0 %v1179_v54  ;;  %v5606_v55 = vadd.f32 %v3961_v32, %v1056_v27  ;;  %v1182_v3 = vsel %vm1169_vm1, %v5610_v0, -inf }
 0x336   : > { %v1191_v59 = vsel %vm1169_vm1, %v5602_v46, -inf }
 0x337   : > { %1192 = vmax.xlane.f32.xlu1 %v1191_v59  ;;  %v1185_v2 = vsel %vm1169_vm1, %v5606_v55, -inf }
 0x339   : > { %1189 = vmax.xlane.f32.xlu0 %v1188_v1 }
 0x33b   : > { %1186 = vmax.xlane.f32.xlu1 %v1185_v2 }
 0x33d   : > { %1183 = vmax.xlane.f32.xlu0 %v1182_v3 }
 0x349   : > { %v4241_v19 = vpop.f32.mrb[16].mxu0 }
 0x34a   : > { %v5618_v47 = vadd.f32 %v4241_v19, %v3956_v13  ;;  %v1138_v43 = vpop.f32.mrb[17].mxu0 }
 0x34b   : > { %v4242_v48 = vpop.f32.mrb[18].mxu0  ;;  %v5620_v49 = vadd.f32 %v3952_v35, %v1138_v43 }
 0x34c   : > { %v5622_v61 = vadd.f32 %v4242_v48, %v3957_v21  ;;  %v1141_v4 = vpop.f32.mrb[19].mxu0  ;;  %v1200_v56 = vsel %vm1169_vm1, %v5618_v47, -inf  ;;  %v5654_v21 = vpop.permute.xlu1 %1647 }
 0x34d   : > { %1201 = vmax.xlane.f32.xlu0 %v1200_v56  ;;  %v5626_v5 = vadd.f32 %v3953_v14, %v1141_v4  ;;  %v1194_v7 = vsel %vm1169_vm1, %v5620_v49, -inf }
 0x34e   : > { %v1203_v51 = vsel %vm1169_vm1, %v5622_v61, -inf }
 0x34f   : > { %1204 = vmax.xlane.f32.xlu1 %v1203_v51  ;;  %v1197_v11 = vsel %vm1169_vm1, %v5626_v5, -inf }
 0x350   : > { %v5656_v22 = vpop.permute.xlu1 %1447 }
 0x351   : > { %v4245_v17 = vpop.f32.mrb[20].mxu0  ;;  %1195 = vmax.xlane.f32.xlu0 %v1194_v7 }
 0x352   : > { %v5632_v60 = vadd.f32 %v4245_v17, %v3964_v52  ;;  %v1154_v10 = vpop.f32.mrb[21].mxu0 }
 0x353   : > { %v4246_v24 = vpop.f32.mrb[22].mxu0  ;;  %1198 = vmax.xlane.f32.xlu1 %v1197_v11  ;;  %v5636_v8 = vadd.f32 %v3960_v16, %v1154_v10 }
 0x354   : > { %v5638_v12 = vadd.f32 %v4246_v24, %v3965_v53  ;;  %v1157_v13 = vpop.f32.mrb[23].mxu0  ;;  %v1212_v35 = vsel %vm1169_vm1, %v5632_v60, -inf }
 0x355   : > { %v5642_v62 = vadd.f32 %v3961_v32, %v1157_v13  ;;  %1213 = vmax.xlane.f32.xlu0 %v1212_v35  ;;  %v1206_v14 = vsel %vm1169_vm1, %v5636_v8, -inf }
 0x356   : > { %v1215_v36 = vsel %vm1169_vm1, %v5638_v12, -inf }
 0x357   : > { %v1209_v15 = vsel %vm1169_vm1, %v5642_v62, -inf }
 0x359   : > { %1207 = vmax.xlane.f32.xlu0 %v1206_v14 }
 0x364   : > { %1534 = vrot.lane.b32.xlu1 %v5473_v58, %s5070_s22 }
 0x36f   : > { %1532 = vrot.lane.b32.xlu0 %v5475_v40, %s5070_s22 }
 0x388   : > { %1216 = vmax.xlane.f32.xlu1 %v1215_v36 }
 0x38c   : > { %1210 = vmax.xlane.f32.xlu1 %v1209_v15 }
 0x3ba   : > { %v1178_v23 = vpop.xlane.xlu0 %1177 }
 0x3bb   : > { %v1220_v18 = vsub.f32 %v5580_v25, %v1178_v23 }
 0x3bd   : > { %v1238_v63 = vmul.f32 1.442695, %v1220_v18  ;;  %v1175_v52 = vpop.xlane.xlu1 %1174 }
 0x3be   : > { %v1172_v39 = vpop.xlane.xlu0 %1171  ;;  %v1219_v26 = vsub.f32 %v5586_v28, %v1175_v52 }
 0x3bf   : > { %4755 = vpow2.f32 %v1238_v63  ;;  %v1218_v53 = vsub.f32 %v5582_v20, %v1172_v39 }
 0x3c0   : > { %v1236_v16 = vmul.f32 1.442695, %v1219_v26 }
 0x3c1   : > { %v1234_v42 = vmul.f32 1.442695, %v1218_v53 }
 0x3c2   : > { %v1181_v31 = vpop.xlane.xlu0 %1180 }
 0x3c3   : > { %4757 = vpow2.f32 %v1234_v42  ;;  %v1221_v32 = vsub.f32 %v5593_v38, %v1181_v31 }
 0x3c4   : > { %v1193_v37 = vpop.xlane.xlu1 %1192 }
 0x3c5   : > { %v1240_v27 = vmul.f32 1.442695, %v1221_v32  ;;  %v1225_v1 = vsub.f32 %v5602_v46, %v1193_v37 }
 0x3c6   : > { %v1190_v54 = vpop.xlane.xlu0 %1189 }
 0x3c7   : > { %4759 = vpow2.f32 %v1240_v27  ;;  %v1224_v25 = vsub.f32 %v5600_v44, %v1190_v54  ;;  %v1248_v43 = vmul.f32 1.442695, %v1225_v1 }
 0x3c8   : > { %4761 = vpow2.f32 %v1236_v16  ;;  %v1187_v2 = vpop.xlane.xlu1 %1186 }
 0x3c9   : > { %v5663_v59 = vpop.eup %4755  ;;  %v1246_v20 = vmul.f32 1.442695, %v1224_v25  ;;  %v1223_v44 = vsub.f32 %v5606_v55, %v1187_v2 }
 0x3ca   : > { %v1184_v28 = vpop.xlane.xlu0 %1183  ;;  %v1272_v3 = vsel %vm1169_vm1, %v5663_v59, 0.0 }
 0x3cb   : > { %v1222_v38 = vsub.f32 %v5610_v0, %v1184_v28  ;;  %1273 = vadd.xlane.f32.xlu0 %v1272_v3  ;;  %4763 = vpow2.f32 %v1246_v20  ;;  %v1244_v56 = vmul.f32 1.442695, %v1223_v44 }
 0x3cd   : > { %v5669_v19 = vpop.eup %4757  ;;  %v1242_v48 = vmul.f32 1.442695, %v1222_v38 }
 0x3ce   : > { %v1266_v4 = vsel %vm1169_vm1, %v5669_v19, 0.0 }
 0x3cf   : > { %4765 = vpow2.f32 %v1242_v48  ;;  %1267 = vadd.xlane.f32.xlu0 %v1266_v4 }
 0x3d0   : > { %4767 = vpow2.f32 %v1248_v43 }
 0x3d1   : > { %v5674_v46 = vpop.eup %4759  ;;  %4769 = vpow2.f32 %v1244_v56 }
 0x3d2   : > { %v1275_v0 = vsel %vm1169_vm1, %v5674_v46, 0.0  ;;  %v5678_v51 = vpop.eup %4761 }
 0x3d3   : > { %1276 = vadd.xlane.f32.xlu1 %v1275_v0  ;;  %v1269_v55 = vsel %vm1169_vm1, %v5678_v51, 0.0 }
 0x3d5   : > { %v5682_v7 = vpop.eup %4763 }
 0x3d6   : > { %v1284_v35 = vsel %vm1169_vm1, %v5682_v7, 0.0 }
 0x3d7   : > { %1270 = vadd.xlane.f32.xlu1 %v1269_v55 }
 0x3d9   : > { %v5685_v11 = vpop.eup %4765 }
 0x3da   : > { %v1202_v17 = vpop.xlane.xlu0 %1201  ;;  %v1278_v14 = vsel %vm1169_vm1, %v5685_v11, 0.0  ;;  %v5692_v15 = vpop.eup %4767 }
 0x3db   : > { %v1228_v10 = vsub.f32 %v5618_v47, %v1202_v17  ;;  %1285 = vadd.xlane.f32.xlu1 %v1284_v35  ;;  %1279 = vadd.xlane.f32.xlu0 %v1278_v14  ;;  %v1287_v39 = vsel %vm1169_vm1, %v5692_v15, 0.0  ;;  %v5698_v26 = vpop.eup %4769 }
 0x3dc   : > { %v1205_v24 = vpop.xlane.xlu1 %1204  ;;  %v1281_v31 = vsel %vm1169_vm1, %v5698_v26, 0.0 }
 0x3dd   : > { %v1254_v13 = vmul.f32 1.442695, %v1228_v10  ;;  %v1229_v36 = vsub.f32 %v5622_v61, %v1205_v24 }
 0x3de   : > { %v1196_v23 = vpop.xlane.xlu0 %1195 }
 0x3df   : > { %4771 = vpow2.f32 %v1254_v13  ;;  %v1256_v18 = vmul.f32 1.442695, %v1229_v36  ;;  %v1226_v47 = vsub.f32 %v5620_v49, %v1196_v23  ;;  %1288 = vadd.xlane.f32.xlu1 %v1287_v39 }
 0x3e0   : > { %v1199_v63 = vpop.xlane.xlu1 %1198 }
 0x3e1   : > { %4773 = vpow2.f32 %v1256_v18  ;;  %v1250_v52 = vmul.f32 1.442695, %v1226_v47  ;;  %v1227_v53 = vsub.f32 %v5626_v5, %v1199_v63 }
 0x3e2   : > { %v1214_v61 = vpop.xlane.xlu0 %1213 }
 0x3e3   : > { %4775 = vpow2.f32 %v1250_v52  ;;  %v1252_v42 = vmul.f32 1.442695, %v1227_v53  ;;  %1282 = vadd.xlane.f32.xlu1 %v1281_v31  ;;  %v1232_v28 = vsub.f32 %v5632_v60, %v1214_v61 }
 0x3e4   : > { %v1535_v5 = vpop.permute.xlu1 %1534 }
 0x3e5   : > { %4777 = vpow2.f32 %v1252_v42  ;;  %v1262_v3 = vmul.f32 1.442695, %v1232_v28 }
 0x3e6   : > { %v1208_v49 = vpop.xlane.xlu0 %1207 }
 0x3e7   : > { %v1230_v38 = vsub.f32 %v5636_v8, %v1208_v49  ;;  %4779 = vpow2.f32 %v1262_v3 }
 0x3e9   : > { %v5702_v32 = vpop.eup %4771  ;;  %v1258_v44 = vmul.f32 1.442695, %v1230_v38 }
 0x3ea   : > { %v1533_v37 = vpop.permute.xlu0 %1532  ;;  %v1296_v16 = vsel %vm1169_vm1, %v5702_v32, 0.0 }
 0x3eb   : > { %v5706_v27 = vpop.eup %4773  ;;  %1297 = vadd.xlane.f32.xlu1 %v1296_v16  ;;  %4287 = vmatprep.mubr.msk.bf16.mxu0 %vm978_vm0, %v1533_v37  ;;  %4781 = vpow2.f32 %v1258_v44 }
 0x3ec   : > { %4288 = vmatmul.mubr.msk.bf16.vlgmr.msra.gmra.mrb[24].mxu0 %vm978_vm0, %v1535_v5  ;;  %v1299_v25 = vsel %vm1169_vm1, %v5706_v27, 0.0 }
 0x3ed   : > { %v5710_v54 = vpop.eup %4775 }
 0x3ee   : > { %v1290_v1 = vsel %vm1169_vm1, %v5710_v54, 0.0 }
 0x3ef   : > { %v5716_v20 = vpop.eup %4777  ;;  %1300 = vadd.xlane.f32.xlu1 %v1299_v25  ;;  %1291 = vadd.xlane.f32.xlu0 %v1290_v1 }
 0x3f0   : > { %v1293_v2 = vsel %vm1169_vm1, %v5716_v20, 0.0 }
 0x3f1   : > { %v5728_v17 = vpop.eup %4779 }
 0x3f2   : > { %v1308_v60 = vsel %vm1169_vm1, %v5728_v17, 0.0 }
 0x3f3   : > { %1294 = vadd.xlane.f32.xlu1 %v1293_v2 }
 0x3f5   : > { %v5732_v10 = vpop.eup %4781 }
 0x404   : > { %1536 = vrot.lane.b32.xlu1 %v5485_v41, %s5070_s22 }
 0x405   : > { %1649 = vrot.lane.b32.xlu0 %v5503_v34, %s5069_s24 }
 0x415   : > { %v1217_v43 = vpop.xlane.xlu1 %1216 }
 0x416   : > { %v1233_v48 = vsub.f32 %v5638_v12, %v1217_v43  ;;  %v1302_v12 = vsel %vm1169_vm1, %v5732_v10, 0.0 }
 0x418   : > { %v1264_v4 = vmul.f32 1.442695, %v1233_v48 }
 0x419   : > { %v1211_v56 = vpop.xlane.xlu1 %1210 }
 0x41a   : > { %v1231_v0 = vsub.f32 %v5642_v62, %v1211_v56  ;;  %4783 = vpow2.f32 %v1264_v4 }
 0x41c   : > { %v1260_v55 = vmul.f32 1.442695, %v1231_v0 }
 0x41e   : > { %4785 = vpow2.f32 %v1260_v55 }
 0x424   : > { %1309 = vadd.xlane.f32.xlu0 %v1308_v60  ;;  %v5734_v8 = vpop.eup %4783 }
 0x425   : > { %v1311_v13 = vsel %vm1169_vm1, %v5734_v8, 0.0 }
 0x428   : > { %v5738_v24 = vpop.eup %4785  ;;  %1303 = vadd.xlane.f32.xlu0 %v1302_v12 }
 0x429   : > { %v1305_v62 = vsel %vm1169_vm1, %v5738_v24, 0.0 }
 0x42a   : > { %1306 = vadd.xlane.f32.xlu1 %v1305_v62 }
 0x42c   : > { %1312 = vadd.xlane.f32.xlu0 %v1311_v13 }
 0x43b   : > { %1651 = vrot.lane.b32.xlu1 %v5501_v33, %s5069_s24 }
 0x43f   : > { %1639 = vrot.lane.b32.xlu1 %v5491_v29, %s5070_s22 }
 0x442   : > { %1538 = vrot.lane.b32.xlu0 %v5483_v45, %s5070_s22 }
 0x443   : > { %1643 = vrot.lane.b32.xlu1 %v5501_v33, %s5070_s22 }
 0x446   : > { %1637 = vrot.lane.b32.xlu0 %v5493_v30, %s5070_s22 }
 0x44a   : > { %1641 = vrot.lane.b32.xlu0 %v5503_v34, %s5070_s22  ;;  %s5073_s22 = smov 112  }
 0x458   : > { %v1274_v35 = vpop.xlane.xlu0 %1273 }
 0x45c   : > { %v1268_v14 = vpop.xlane.xlu0 %1267 }
 0x460   : > { %v1277_v36 = vpop.xlane.xlu1 %1276 }
 0x461   : > { %4787 = vrcp.f32 %v1277_v36 }
 0x462   : > { %4789 = vrcp.f32 %v1268_v14  ;;  %v5800_v14 = vld [vmem:[%s6912_s7 + $0x28] sm:$0xff]  }
 0x463   : > { %4791 = vrcp.f32 %v1274_v35  ;;  %v5795_v35 = vld [vmem:[%s6912_s7 + $0x20] sm:$0xff]  }
 0x464   : > { %v1271_v23 = vpop.xlane.xlu1 %1270 }
 0x465   : > { %4793 = vrcp.f32 %v1271_v23 }
 0x468   : > { %v1286_v18 = vpop.xlane.xlu1 %1285  ;;  %v1280_v63 = vpop.xlane.xlu0 %1279 }
 0x46b   : > { %v4788_v47 = vpop.eup %4787 }
 0x46c   : > { %v1289_v52 = vpop.xlane.xlu1 %1288  ;;  %v4790_v39 = vpop.eup %4789  ;;  %v1333_v42 = vmul.f32 %v4788_v47, %v5674_v46  ;;  %v3972_v47 = vunpack.c.l.bf16 %v5800_v14 }
 0x46d   : > { %v4792_v53 = vpop.eup %4791  ;;  %4795 = vrcp.f32 %v1289_v52  ;;  %v1330_v49 = vmul.f32 %v4790_v39, %v5669_v19  ;;  %v3969_v52 = vunpack.c.h.bf16 %v5795_v35 }
 0x46e   : > { %4797 = vrcp.f32 %v1280_v63  ;;  %v1332_v16 = vmul.f32 %v4792_v53, %v5663_v59 }
 0x46f   : > { %v4794_v61 = vpop.eup %4793  ;;  %4799 = vrcp.f32 %v1286_v18  ;;  %v3968_v18 = vunpack.c.l.bf16 %v5795_v35 }
 0x470   : > { %v1283_v31 = vpop.xlane.xlu1 %1282  ;;  %v1331_v37 = vmul.f32 %v4794_v61, %v5678_v51  ;;  %v1347_v25 = vpack.c.bf16 %v1333_v42, %v1332_v16  ;;  %v3973_v16 = vunpack.c.h.bf16 %v5800_v14 }
 0x471   : > { %4801 = vrcp.f32 %v1283_v31 }
 0x472   : > { %v1346_v5 = vpack.c.bf16 %v1331_v37, %v1330_v49 }
 0x474   : > { %4255 = vmatprep.mubr.msk.bf16.mxu1 %vm1169_vm1, %v1346_v5 }
 0x475   : > { %4256 = vmatmul.mubr.msk.bf16.vlgmr.msra.gmra.mrb[8].mxu1 %vm1169_vm1, %v1347_v25 }
 0x476   : > { %4264 = vmatpush3.bf16.msra.mxu1 %v5551_v50 }
 0x477   : > { %4265 = vmatprep.subr.bf16.mxu1 %v5560_v57  ;;  %v4796_v46 = vpop.eup %4795 }
 0x478   : > { %v1298_v1 = vpop.xlane.xlu1 %1297  ;;  %v4798_v2 = vpop.eup %4797  ;;  %v1337_v51 = vmul.f32 %v4796_v46, %v5692_v15 }
 0x479   : > { %v4800_v3 = vpop.eup %4799  ;;  %v1334_v38 = vmul.f32 %v4798_v2, %v5685_v11 }
 0x47a   : > { %4266 = vmatpush3.bf16.msra.mxu1 %v5560_v57  ;;  %v1336_v44 = vmul.f32 %v4800_v3, %v5682_v7 }
 0x47b   : > { %v4802_v59 = vpop.eup %4801  ;;  %4267 = vmatprep.subr.bf16.mxu1 %v5656_v22 }
 0x47c   : > { %v1301_v28 = vpop.xlane.xlu1 %1300  ;;  %v1292_v19 = vpop.xlane.xlu0 %1291  ;;  %v1335_v50 = vmul.f32 %v4802_v59, %v5698_v26  ;;  %v1349_v57 = vpack.c.bf16 %v1337_v51, %v1336_v44 }
 0x47d   : > { %4803 = vrcp.f32 %v1301_v28 }
 0x47e   : > { %4805 = vrcp.f32 %v1292_v19  ;;  %4268 = vmatpush3.bf16.msra.mxu1 %v5656_v22  ;;  %v1348_v48 = vpack.c.bf16 %v1335_v50, %v1334_v38 }
 0x47f   : > { %4807 = vrcp.f32 %v1298_v1  ;;  %4269 = vmatprep.subr.bf16.mxu1 %v5562_v6 }
 0x480   : > { %v1295_v43 = vpop.xlane.xlu1 %1294  ;;  %4259 = vmatprep.mubr.msk.bf16.mxu1 %vm1169_vm1, %v1348_v48 }
 0x481   : > { %4809 = vrcp.f32 %v1295_v43  ;;  %4260 = vmatmul.mubr.msk.bf16.gmra.mrb[12].mxu1 %vm1169_vm1, %v1349_v57 }
 0x482   : > { %4270 = vmatpush3.bf16.msra.mxu1 %v5562_v6  ;;  %v1666_v6 = vsel %vm978_vm0, %v5568_v9, 0 }
 0x483   : > { %4503 = vmatprep.subr.msk.bf16.mxu1 %vm978_vm0, %v5568_v9 }
 0x484   : > { %v1537_v15 = vpop.permute.xlu1 %1536 }
 0x485   : > { %4291 = vmatprep.mubr.msk.bf16.mxu0 %vm978_vm0, %v1537_v15 }
 0x487   : > { %v4804_v7 = vpop.eup %4803 }
 0x488   : > { %v4806_v11 = vpop.eup %4805  ;;  %v1341_v4 = vmul.f32 %v4804_v7, %v5706_v27  ;;  %v1669_v27 = vsel %vm978_vm0, %v5654_v21, 0 }
 0x489   : > { %v4808_v22 = vpop.eup %4807  ;;  %v1338_v56 = vmul.f32 %v4806_v11, %v5710_v54  ;;  %v1650_v54 = vpop.permute.xlu0 %1649 }
 0x48a   : > { %v1340_v55 = vmul.f32 %v4808_v22, %v5702_v32  ;;  %v1672_v32 = vsel %vm978_vm0, %v1650_v54, 0 }
 0x48b   : > { %v4810_v26 = vpop.eup %4809 }
 0x48c   : > { %v1339_v0 = vmul.f32 %v4810_v26, %v5716_v20  ;;  %v1351_v12 = vpack.c.bf16 %v1341_v4, %v1340_v55 }
 0x48e   : > { %v1350_v60 = vpack.c.bf16 %v1339_v0, %v1338_v56 }
 0x490   : > { %4271 = vmatprep.mubr.msk.bf16.mxu1 %vm1169_vm1, %v1350_v60 }
 0x491   : > { %4272 = vmatmul.mubr.msk.bf16.vlgmr.msra.gmra.mrb[16].mxu1 %vm1169_vm1, %v1351_v12  ;;  %v4019_v12 = vld [vmem:[%s6912_s7 + $0x30] sm:$0xff]  }
 0x492   : > { %4296 = vmatpush3.bf16.xpose.msra.mxu1 %v1666_v6  ;;  %v4020_v6 = vld [vmem:[%s6912_s7 + $0x38] sm:$0xff]  }
 0x493   : > { %4504 = vmatprep.subr.msk.bf16.mxu1 %vm978_vm0, %v5654_v21 }
 0x49a   : > { %4298 = vmatpush3.bf16.xpose.msra.mxu1 %v1669_v27  ;;  %v3976_v27 = vunpack.c.l.bf16 %v4019_v12 }
 0x49b   : > { %4505 = vmatprep.subr.msk.bf16.mxu1 %vm978_vm0, %v1650_v54  ;;  %v3980_v54 = vunpack.c.l.bf16 %v4020_v6 }
 0x4a2   : > { %4300 = vmatpush3.bf16.xpose.msra.mxu1 %v1672_v32 }
 0x4b1   : > { %v1310_v20 = vpop.xlane.xlu0 %1309 }
 0x4b5   : > { %v1304_v62 = vpop.xlane.xlu0 %1303 }
 0x4b6   : > { %4811 = vrcp.f32 %v1304_v62 }
 0x4b7   : > { %4813 = vrcp.f32 %v1310_v20  ;;  %v1307_v13 = vpop.xlane.xlu1 %1306  ;;  %v3977_v20 = vunpack.c.h.bf16 %v4019_v12 }
 0x4b8   : > { %4815 = vrcp.f32 %v1307_v13 }
 0x4b9   : > { %v1313_v9 = vpop.xlane.xlu0 %1312 }
 0x4ba   : > { %4817 = vrcp.f32 %v1313_v9  ;;  %v3981_v9 = vunpack.c.h.bf16 %v4020_v6 }
 0x4bb   : > { %v1652_v21 = vpop.permute.xlu1 %1651 }
 0x4bc   : > { %4506 = vmatprep.subr.msk.bf16.mxu1 %vm978_vm0, %v1652_v21  ;;  %v1675_v36 = vsel %vm978_vm0, %v1652_v21, 0 }
 0x4bd   : > { %4302 = vmatpush3.bf16.xpose.msra.mxu1 %v1675_v36  ;;  %v1539_v23 = vpop.permute.xlu0 %1538 }
 0x4be   : > { %4292 = vmatmul.mubr.msk.bf16.gmra.mrb[28].mxu0 %vm978_vm0, %v1539_v23 }
 0x4bf   : > { %v4289_v63 = vpop.f32.mrb[24].mxu0 }
 0x4c0   : > { %v4812_v39 = vpop.eup %4811  ;;  %v1606_v53 = vpop.f32.mrb[25].mxu0  ;;  %v5814_v37 = vadd.f32 %v4289_v63, %v3972_v47 }
 0x4c1   : > { %v4814_v61 = vpop.eup %4813  ;;  %v5810_v42 = vadd.f32 %v3968_v18, %v1606_v53  ;;  %v4290_v31 = vpop.f32.mrb[26].mxu0  ;;  %v1342_v46 = vmul.f32 %v4812_v39, %v5732_v10 }
 0x4c2   : > { %v4816_v49 = vpop.eup %4815  ;;  %v1609_v5 = vpop.f32.mrb[27].mxu0  ;;  %v1344_v59 = vmul.f32 %v4814_v61, %v5728_v17  ;;  %v5831_v38 = vadd.f32 %v4290_v31, %v3973_v16  ;;  %v1748_v10 = vsel %vm1169_vm1, %v5814_v37, -inf }
 0x4c3   : > { %v5819_v25 = vadd.f32 %v3969_v52, %v1609_v5  ;;  %v1742_v1 = vsel %vm1169_vm1, %v5810_v42, -inf  ;;  %v1343_v2 = vmul.f32 %v4816_v49, %v5738_v24  ;;  %v1638_v50 = vpop.permute.xlu0 %1637 }
 0x4c4   : > { %v4818_v28 = vpop.eup %4817  ;;  %1743 = vmax.xlane.f32.xlu0 %v1742_v1  ;;  %v1751_v17 = vsel %vm1169_vm1, %v5831_v38, -inf }
 0x4c5   : > { %v1745_v19 = vsel %vm1169_vm1, %v5819_v25, -inf  ;;  %v1352_v3 = vpack.c.bf16 %v1343_v2, %v1342_v46  ;;  %v1345_v51 = vmul.f32 %v4818_v28, %v5734_v8  ;;  %v1640_v8 = vpop.permute.xlu1 %1639 }
 0x4c6   : > { %1746 = vmax.xlane.f32.xlu1 %v1745_v19 }
 0x4c7   : > { %4275 = vmatprep.mubr.msk.bf16.mxu1 %vm1169_vm1, %v1352_v3  ;;  %v1353_v24 = vpack.c.bf16 %v1345_v51, %v1344_v59  ;;  %v1642_v43 = vpop.permute.xlu0 %1641 }
 0x4c8   : > { %1749 = vmax.xlane.f32.xlu0 %v1748_v10 }
 0x4c9   : > { %4276 = vmatmul.mubr.msk.bf16.gmra.mrb[20].mxu1 %vm1169_vm1, %v1353_v24  ;;  %v1644_v44 = vpop.permute.xlu1 %1643 }
 0x4ca   : > { %4303 = vmatprep.mubr.msk.bf16.mxu1 %vm978_vm0, %v1638_v50 }
 0x4cc   : > { %1752 = vmax.xlane.f32.xlu0 %v1751_v17 }
 0x4d1   : > { %4304 = vmatmul.mubr.msk.bf16.vlgmr.msra.gmra.mrb[24].mxu1 %vm978_vm0, %v1640_v8 }
 0x4d2   : > { %4307 = vmatprep.mubr.msk.bf16.mxu1 %vm978_vm0, %v1642_v43 }
 0x4d9   : > { %4308 = vmatmul.mubr.msk.bf16.gmra.mrb[28].mxu1 %vm978_vm0, %v1644_v44 }
 0x548   : > { %v5843_v48 = vpop.f32.mrb[8].mxu1 }
 0x549   : > { %6933 = vst [vmem:[#allocation4_spill] sm:$0xff] %v5843_v48  ;;  %v5845_v57 = vpop.f32.mrb[9].mxu1 }
 0x54a   : > { %6934 = vst [vmem:[#allocation5_spill] sm:$0xff] %v5845_v57  ;;  %v5847_v15 = vpop.f32.mrb[10].mxu1 }
 0x54b   : > { %6935 = vst [vmem:[#allocation6_spill] sm:$0xff] %v5847_v15  ;;  %v5849_v7 = vpop.f32.mrb[11].mxu1 }
 0x54c   : > { %6936 = vst [vmem:[#allocation7_spill] sm:$0xff] %v5849_v7 }
 0x551   : > { %v1744_v12 = vpop.xlane.xlu0 %1743 }
 0x554   : > { %v5851_v11 = vpop.f32.mrb[12].mxu1 }
 0x555   : > { %6937 = vst [vmem:[#allocation8_spill] sm:$0xff] %v5851_v11  ;;  %v5853_v22 = vpop.f32.mrb[13].mxu1  ;;  %v1750_v6 = vpop.xlane.xlu0 %1749 }
 0x556   : > { %6938 = vst [vmem:[#allocation9_spill] sm:$0xff] %v5853_v22  ;;  %v5855_v26 = vpop.f32.mrb[14].mxu1 }
 0x557   : > { %6939 = vst [vmem:[#allocation10_spill] sm:$0xff] %v5855_v26  ;;  %v5857_v4 = vpop.f32.mrb[15].mxu1 }
 0x558   : > { %6940 = vst [vmem:[#allocation11_spill] sm:$0xff] %v5857_v4 }
 0x564   : > { %v5859_v56 = vpop.f32.mrb[16].mxu1 }
 0x565   : > { %6941 = vst [vmem:[#allocation12_spill] sm:$0xff] %v5859_v56  ;;  %v5861_v0 = vpop.f32.mrb[17].mxu1 }
 0x566   : > { %6942 = vst [vmem:[#allocation13_spill] sm:$0xff] %v5861_v0  ;;  %v5863_v55 = vpop.f32.mrb[18].mxu1 }
 0x567   : > { %6943 = vst [vmem:[#allocation14_spill] sm:$0xff] %v5863_v55  ;;  %v5865_v60 = vpop.f32.mrb[19].mxu1 }
 0x568   : > { %6944 = vst [vmem:[#allocation15_spill] sm:$0xff] %v5865_v60 }
 0x591   : > { %v4293_v32 = vpop.f32.mrb[28].mxu0 }
 0x592   : > { %v1622_v62 = vpop.f32.mrb[29].mxu0  ;;  %v5875_v23 = vadd.f32 %v4293_v32, %v3980_v54  ;;  %v1747_v32 = vpop.xlane.xlu1 %1746 }
 0x593   : > { %v5873_v13 = vadd.f32 %v3976_v27, %v1622_v62  ;;  %v4294_v21 = vpop.f32.mrb[30].mxu0 }
 0x594   : > { %v1625_v36 = vpop.f32.mrb[31].mxu0  ;;  %v5881_v53 = vadd.f32 %v4294_v21, %v3981_v9  ;;  %v1760_v31 = vsel %vm1169_vm1, %v5875_v23, -inf }
 0x595   : > { %v5877_v63 = vadd.f32 %v3977_v20, %v1625_v36  ;;  %v1754_v39 = vsel %vm1169_vm1, %v5873_v13, -inf  ;;  %v1790_v36 = vsub.f32 %v5810_v42, %v1744_v12 }
 0x596   : > { %1755 = vmax.xlane.f32.xlu0 %v1754_v39  ;;  %v1763_v49 = vsel %vm1169_vm1, %v5881_v53, -inf }
 0x597   : > { %v1757_v61 = vsel %vm1169_vm1, %v5877_v63, -inf }
 0x598   : > { %1758 = vmax.xlane.f32.xlu1 %v1757_v61  ;;  %v1806_v61 = vmul.f32 1.442695, %v1790_v36 }
 0x59a   : > { %1761 = vmax.xlane.f32.xlu0 %v1760_v31 }
 0x59c   : > { %v5889_v5 = vpop.f32.mrb[20].mxu1  ;;  %1764 = vmax.xlane.f32.xlu1 %v1763_v49 }
 0x59d   : > { %6945 = vst [vmem:[#allocation16_spill] sm:$0xff] %v5889_v5  ;;  %v5891_v1 = vpop.f32.mrb[21].mxu1 }
 0x59e   : > { %6946 = vst [vmem:[#allocation17_spill] sm:$0xff] %v5891_v1  ;;  %v5893_v46 = vpop.f32.mrb[22].mxu1 }
 0x59f   : > { %6947 = vst [vmem:[#allocation18_spill] sm:$0xff] %v5893_v46  ;;  %v5895_v2 = vpop.f32.mrb[23].mxu1 }
 0x5a0   : > { %6948 = vst [vmem:[#allocation19_spill] sm:$0xff] %v5895_v2 }
 0x5a4   : > { %v5897_v28 = vpop.f32.mrb[24].mxu1 }
 0x5a5   : > { %v5899_v19 = vpop.f32.mrb[25].mxu1 }
 0x5a6   : > { %v5901_v3 = vpop.f32.mrb[26].mxu1 }
 0x5a7   : > { %v5903_v59 = vpop.f32.mrb[27].mxu1 }
 0x5ac   : > { %v4309_v51 = vpop.f32.mrb[28].mxu1 }
 0x5ad   : > { %v5905_v10 = vadd.f32 %v4309_v51, %v3980_v54  ;;  %1928 = vrot.lane.b32.xlu1 %v5473_v58, %s5071_s18  ;;  %v1727_v24 = vpop.f32.mrb[29].mxu1 }
 0x5ae   : > { %v5908_v50 = vadd.f32 %v3976_v27, %v1727_v24  ;;  %v4310_v17 = vpop.f32.mrb[30].mxu1  ;;  %v1753_v27 = vpop.xlane.xlu0 %1752 }
 0x5af   : > { %v5910_v8 = vadd.f32 %v4310_v17, %v3981_v9  ;;  %v1730_v43 = vpop.f32.mrb[31].mxu1  ;;  %v1793_v54 = vsub.f32 %v5831_v38, %v1753_v27  ;;  %v1792_v9 = vsub.f32 %v5814_v37, %v1750_v6 }
 0x5b0   : > { %v5912_v44 = vadd.f32 %v3977_v20, %v1730_v43  ;;  %1926 = vrot.lane.b32.xlu0 %v5475_v40, %s5071_s18  ;;  %v1791_v20 = vsub.f32 %v5819_v25, %v1747_v32  ;;  %v1778_v14 = vsel %vm1169_vm1, %v5908_v50, -inf }
 0x5b1   : > { %1932 = vrot.lane.b32.xlu1 %v5483_v45, %s5071_s18  ;;  %v1812_v62 = vmul.f32 1.442695, %v1793_v54  ;;  %v1810_v39 = vmul.f32 1.442695, %v1792_v9 }
 0x5b2   : > { %v1808_v21 = vmul.f32 1.442695, %v1791_v20 }
 0x5b3   : > { %4819 = vpow2.f32 %v1812_v62 }
 0x5b4   : > { %1930 = vrot.lane.b32.xlu0 %v5485_v41, %s5071_s18  ;;  %4821 = vpow2.f32 %v1808_v21 }
 0x5b5   : > { %2019 = vrot.lane.b32.xlu1 %v5503_v34, %s5071_s18  ;;  %4823 = vpow2.f32 %v1810_v39 }
 0x5b6   : > { %4825 = vpow2.f32 %v1806_v61 }
 0x5b8   : > { %2015 = vrot.lane.b32.xlu0 %v5493_v30, %s5071_s18 }
 0x5b9   : > { %2114 = vrot.lane.b32.xlu1 %v5473_v58, %s5072_s27 }
 0x5bc   : > { %2017 = vrot.lane.b32.xlu0 %v5491_v29, %s5071_s18 }
 0x5bd   : > { %v5929_v31 = vpop.eup %4819 }
 0x5be   : > { %v1847_v38 = vsel %vm1169_vm1, %v5929_v31, 0.0  ;;  %v5933_v49 = vpop.eup %4821 }
 0x5bf   : > { %v5935_v25 = vpop.eup %4823  ;;  %v1841_v37 = vsel %vm1169_vm1, %v5933_v49, 0.0 }
 0x5c0   : > { %2112 = vrot.lane.b32.xlu0 %v5475_v40, %s5072_s27  ;;  %v1844_v42 = vsel %vm1169_vm1, %v5935_v25, 0.0  ;;  %v5941_v51 = vpop.eup %4825 }
 0x5c1   : > { %v1838_v24 = vsel %vm1169_vm1, %v5941_v51, 0.0 }
 0x5c4   : > { %2021 = vrot.lane.b32.xlu0 %v5501_v33, %s5071_s18  ;;  %s5074_s18 = smov 48  }
 0x5dd   : > { %1848 = vadd.xlane.f32.xlu1 %v1847_v38 }
 0x5e1   : > { %1842 = vadd.xlane.f32.xlu1 %v1841_v37 }
 0x5e3   : > { %1845 = vadd.xlane.f32.xlu0 %v1844_v42 }
 0x5e7   : > { %1839 = vadd.xlane.f32.xlu0 %v1838_v24  ;;  %v5965_v24 = vadd.f32 %v3968_v18, %v5899_v19 }
 0x5e9   : > { %v1766_v18 = vsel %vm1169_vm1, %v5965_v24, -inf }
 0x623   : > { %v1756_v17 = vpop.xlane.xlu0 %1755 }
 0x624   : > { %v1794_v43 = vsub.f32 %v5873_v13, %v1756_v17 }
 0x625   : > { %v1759_v12 = vpop.xlane.xlu1 %1758 }
 0x626   : > { %v1814_v6 = vmul.f32 1.442695, %v1794_v43  ;;  %v1795_v20 = vsub.f32 %v5877_v63, %v1759_v12  ;;  %v5954_v63 = vadd.f32 %v5897_v28, %v3972_v47 }
 0x627   : > { %v1762_v27 = vpop.xlane.xlu0 %1761 }
 0x628   : > { %4827 = vpow2.f32 %v1814_v6  ;;  %v1796_v54 = vsub.f32 %v5875_v23, %v1762_v27  ;;  %v1816_v61 = vmul.f32 1.442695, %v1795_v20  ;;  %v1772_v47 = vsel %vm1169_vm1, %v5954_v63, -inf }
 0x629   : > { %v1765_v32 = vpop.xlane.xlu1 %1764  ;;  %v5987_v20 = vadd.f32 %v5901_v3, %v3973_v16 }
 0x62a   : > { %v1818_v62 = vmul.f32 1.442695, %v1796_v54  ;;  %v1797_v9 = vsub.f32 %v5881_v53, %v1765_v32 }
 0x62b   : > { %v1927_v21 = vpop.permute.xlu0 %1926  ;;  %v1775_v16 = vsel %vm1169_vm1, %v5987_v20, -inf }
 0x62c   : > { %4829 = vpow2.f32 %v1818_v62  ;;  %v1820_v36 = vmul.f32 1.442695, %v1797_v9  ;;  %4311 = vmatprep.subr.bf16.mxu1 %v1927_v21  ;;  %v1784_v62 = vsel %vm1169_vm1, %v5905_v10, -inf }
 0x62d   : > { %v1929_v39 = vpop.permute.xlu1 %1928  ;;  %4312 = vmatpush3.bf16.msra.mxu1 %v1927_v21  ;;  %v5997_v21 = vadd.f32 %v3969_v52, %v5903_v59 }
 0x62e   : > { %4831 = vpow2.f32 %v1820_v36  ;;  %4313 = vmatprep.subr.bf16.mxu1 %v1929_v39 }
 0x62f   : > { %v1931_v13 = vpop.permute.xlu0 %1930  ;;  %4833 = vpow2.f32 %v1816_v61  ;;  %v1769_v36 = vsel %vm1169_vm1, %v5997_v21, -inf }
 0x631   : > { %4314 = vmatpush3.bf16.msra.mxu1 %v1929_v39  ;;  %v1933_v23 = vpop.permute.xlu1 %1932 }
 0x632   : > { %v5949_v38 = vpop.eup %4827  ;;  %4315 = vmatprep.subr.bf16.mxu1 %v1931_v13 }
 0x633   : > { %v5956_v53 = vpop.permute.xlu0 %2015  ;;  %v1850_v37 = vsel %vm1169_vm1, %v5949_v38, 0.0 }
 0x634   : > { %1851 = vadd.xlane.f32.xlu0 %v1850_v37 }
 0x635   : > { %4316 = vmatpush3.bf16.msra.mxu1 %v1931_v13  ;;  %v2020_v12 = vpop.permute.xlu1 %2019 }
 0x636   : > { %v5960_v42 = vpop.eup %4829  ;;  %4317 = vmatprep.subr.bf16.mxu1 %v1933_v23 }
 0x637   : > { %v5967_v17 = vpop.permute.xlu0 %2017  ;;  %v1856_v28 = vsel %vm1169_vm1, %v5960_v42, 0.0 }
 0x638   : > { %v5973_v43 = vpop.eup %4831  ;;  %1773 = vmax.xlane.f32.xlu0 %v1772_v47  ;;  %1857 = vadd.xlane.f32.xlu1 %v1856_v28 }
 0x639   : > { %4318 = vmatpush3.bf16.msra.mxu1 %v1933_v23  ;;  %v1859_v19 = vsel %vm1169_vm1, %v5973_v43, 0.0  ;;  %v5980_v27 = vpop.eup %4833  ;;  %v2115_v32 = vpop.permute.xlu1 %2114 }
 0x63a   : > { %4327 = vmatprep.subr.bf16.mxu1 %v5956_v53  ;;  %v1853_v9 = vsel %vm1169_vm1, %v5980_v27, 0.0  ;;  %v2136_v3 = vsel %vm978_vm0, %v2115_v32, 0 }
 0x63b   : > { %v2113_v6 = vpop.permute.xlu0 %2112 }
 0x63c   : > { %1767 = vmax.xlane.f32.xlu0 %v1766_v18  ;;  %1860 = vadd.xlane.f32.xlu1 %v1859_v19  ;;  %v2133_v54 = vsel %vm978_vm0, %v2113_v6, 0 }
 0x63d   : > { %4507 = vmatprep.subr.msk.bf16.mxu0 %vm978_vm0, %v2113_v6  ;;  %v1787_v6 = vsel %vm1169_vm1, %v5910_v8, -inf }
 0x63e   : > { %4344 = vmatpush3.bf16.xpose.msra.mxu0 %v2133_v54 }
 0x63f   : > { %4508 = vmatprep.subr.msk.bf16.mxu0 %vm978_vm0, %v2115_v32  ;;  %v2022_v52 = vpop.permute.xlu0 %2021 }
 0x640   : > { %1785 = vmax.xlane.f32.xlu0 %v1784_v62  ;;  %1854 = vadd.xlane.f32.xlu1 %v1853_v9  ;;  %v1781_v9 = vsel %vm1169_vm1, %v5912_v44, -inf }
 0x644   : > { %1779 = vmax.xlane.f32.xlu0 %v1778_v14  ;;  %1776 = vmax.xlane.f32.xlu1 %v1775_v16 }
 0x646   : > { %4346 = vmatpush3.bf16.xpose.msra.mxu0 %v2136_v3 }
 0x648   : > { %1770 = vmax.xlane.f32.xlu1 %v1769_v36 }
 0x659   : > { %2217 = vrot.lane.b32.xlu1 %v5493_v30, %s5072_s27 }
 0x65a   : > { %2116 = vrot.lane.b32.xlu0 %v5485_v41, %s5072_s27 }
 0x65d   : > { %2118 = vrot.lane.b32.xlu1 %v5483_v45, %s5072_s27 }
 0x66a   : > { %v1849_v35 = vpop.xlane.xlu1 %1848 }
 0x66e   : > { %v1843_v59 = vpop.xlane.xlu1 %1842 }
 0x670   : > { %v1846_v39 = vpop.xlane.xlu0 %1845 }
 0x671   : > { %4835 = vrcp.f32 %v1846_v39 }
 0x672   : > { %4837 = vrcp.f32 %v1843_v59 }
 0x673   : > { %4839 = vrcp.f32 %v1849_v35 }
 0x674   : > { %v1840_v61 = vpop.xlane.xlu0 %1839 }
 0x675   : > { %4841 = vrcp.f32 %v1840_v61 }
 0x67b   : > { %v4836_v13 = vpop.eup %4835 }
 0x67c   : > { %v4838_v23 = vpop.eup %4837  ;;  %v1904_v28 = vmul.f32 %v4836_v13, %v5935_v25 }
 0x67d   : > { %v4840_v37 = vpop.eup %4839  ;;  %v1903_v19 = vmul.f32 %v4838_v23, %v5933_v49 }
 0x67e   : > { %v1905_v54 = vmul.f32 %v4840_v37, %v5929_v31 }
 0x67f   : > { %v4842_v47 = vpop.eup %4841 }
 0x680   : > { %v1902_v18 = vmul.f32 %v4842_v47, %v5941_v51  ;;  %v1919_v62 = vpack.c.bf16 %v1905_v54, %v1904_v28 }
 0x681   : > { %1788 = vmax.xlane.f32.xlu1 %v1787_v6 }
 0x682   : > { %v1918_v32 = vpack.c.bf16 %v1903_v19, %v1902_v18 }
 0x684   : > { %4319 = vmatprep.mubr.msk.bf16.mxu1 %vm1169_vm1, %v1918_v32 }
 0x685   : > { %1782 = vmax.xlane.f32.xlu1 %v1781_v9  ;;  %4320 = vmatmul.mubr.msk.bf16.vlgmr.msra.gmra.mrb[32].mxu1 %vm1169_vm1, %v1919_v62 }
 0x686   : > { %4328 = vmatpush3.bf16.msra.mxu1 %v5956_v53 }
 0x687   : > { %4329 = vmatprep.subr.bf16.mxu1 %v5967_v17 }
 0x68a   : > { %4330 = vmatpush3.bf16.msra.mxu1 %v5967_v17 }
 0x68b   : > { %4331 = vmatprep.subr.bf16.mxu1 %v2020_v12 }
 0x68e   : > { %4332 = vmatpush3.bf16.msra.mxu1 %v2020_v12 }
 0x68f   : > { %4333 = vmatprep.subr.bf16.mxu1 %v2022_v52 }
 0x692   : > { %4334 = vmatpush3.bf16.msra.mxu1 %v2022_v52 }
 0x696   : > { %2219 = vrot.lane.b32.xlu1 %v5491_v29, %s5072_s27 }
 0x6c1   : > { %v1852_v31 = vpop.xlane.xlu0 %1851 }
 0x6c5   : > { %v1858_v49 = vpop.xlane.xlu1 %1857  ;;  %v1774_v25 = vpop.xlane.xlu0 %1773 }
 0x6c6   : > { %v1800_v51 = vsub.f32 %v5954_v63, %v1774_v25 }
 0x6c8   : > { %v1826_v14 = vmul.f32 1.442695, %v1800_v51 }
 0x6c9   : > { %v1861_v16 = vpop.xlane.xlu1 %1860  ;;  %v1768_v3 = vpop.xlane.xlu0 %1767 }
 0x6ca   : > { %4843 = vpow2.f32 %v1826_v14  ;;  %v1798_v53 = vsub.f32 %v5965_v24, %v1768_v3 }
 0x6cb   : > { %4845 = vrcp.f32 %v1852_v31 }
 0x6cc   : > { %4847 = vrcp.f32 %v1861_v16  ;;  %v1822_v17 = vmul.f32 1.442695, %v1798_v53 }
 0x6cd   : > { %4849 = vrcp.f32 %v1858_v49  ;;  %v1855_v12 = vpop.xlane.xlu1 %1854  ;;  %v1786_v36 = vpop.xlane.xlu0 %1785 }
 0x6ce   : > { %4851 = vpow2.f32 %v1822_v17  ;;  %v1804_v16 = vsub.f32 %v5905_v10, %v1786_v36 }
 0x6cf   : > { %4853 = vrcp.f32 %v1855_v12 }
 0x6d0   : > { %v1834_v3 = vmul.f32 1.442695, %v1804_v16 }
 0x6d1   : > { %v1777_v35 = vpop.xlane.xlu1 %1776  ;;  %v1780_v52 = vpop.xlane.xlu0 %1779 }
 0x6d2   : > { %v1801_v59 = vsub.f32 %v5987_v20, %v1777_v35  ;;  %v1802_v53 = vsub.f32 %v5908_v50, %v1780_v52 }
 0x6d4   : > { %v6030_v39 = vpop.eup %4843  ;;  %v1828_v63 = vmul.f32 1.442695, %v1801_v59  ;;  %v1830_v17 = vmul.f32 1.442695, %v1802_v53 }
 0x6d5   : > { %v4846_v61 = vpop.eup %4845  ;;  %v1771_v13 = vpop.xlane.xlu1 %1770  ;;  %v1868_v24 = vsel %vm1169_vm1, %v6030_v39, 0.0 }
 0x6d6   : > { %v2117_v23 = vpop.permute.xlu0 %2116  ;;  %v4848_v37 = vpop.eup %4847  ;;  %4855 = vpow2.f32 %v1828_v63  ;;  %v1799_v47 = vsub.f32 %v5997_v21, %v1771_v13  ;;  %1869 = vadd.xlane.f32.xlu1 %v1868_v24  ;;  %v1906_v21 = vmul.f32 %v4846_v61, %v5949_v38 }
 0x6d7   : > { %4509 = vmatprep.subr.msk.bf16.mxu0 %vm978_vm0, %v2117_v23  ;;  %v2139_v28 = vsel %vm978_vm0, %v2117_v23, 0  ;;  %v4850_v6 = vpop.eup %4849  ;;  %v1909_v62 = vmul.f32 %v4848_v37, %v5973_v43 }
 0x6d8   : > { %4348 = vmatpush3.bf16.xpose.msra.mxu0 %v2139_v28  ;;  %v6037_v20 = vpop.eup %4851  ;;  %v1824_v18 = vmul.f32 1.442695, %v1799_v47  ;;  %v1908_v31 = vmul.f32 %v4850_v6, %v5960_v42 }
 0x6d9   : > { %v4854_v19 = vpop.eup %4853  ;;  %v6039_v54 = vpop.permute.xlu1 %2217  ;;  %v1862_v32 = vsel %vm1169_vm1, %v6037_v20, 0.0 }
 0x6da   : > { %4857 = vpow2.f32 %v1824_v18  ;;  %4511 = vmatprep.subr.msk.bf16.mxu1 %vm978_vm0, %v6039_v54  ;;  %1863 = vadd.xlane.f32.xlu0 %v1862_v32  ;;  %v1907_v9 = vmul.f32 %v4854_v19, %v5980_v27  ;;  %v1921_v51 = vpack.c.bf16 %v1909_v62, %v1908_v31 }
 0x6db   : > { %4859 = vpow2.f32 %v1834_v3 }
 0x6dc   : > { %v1920_v49 = vpack.c.bf16 %v1907_v9, %v1906_v21  ;;  %4861 = vpow2.f32 %v1830_v17 }
 0x6dd   : > { %v2119_v25 = vpop.permute.xlu1 %2118 }
 0x6de   : > { %4323 = vmatprep.mubr.msk.bf16.mxu1 %vm1169_vm1, %v1920_v49  ;;  %4510 = vmatprep.subr.msk.bf16.mxu0 %vm978_vm0, %v2119_v25  ;;  %v2142_v43 = vsel %vm978_vm0, %v2119_v25, 0 }
 0x6df   : > { %4324 = vmatmul.mubr.msk.bf16.gmra.mrb[36].mxu1 %vm1169_vm1, %v1921_v51 }
 0x6e0   : > { %4350 = vmatpush3.bf16.xpose.msra.mxu0 %v2142_v43  ;;  %v6053_v14 = vpop.eup %4855 }
 0x6e1   : > { %v1871_v38 = vsel %vm1169_vm1, %v6053_v14, 0.0 }
 0x6e2   : > { %1872 = vadd.xlane.f32.xlu1 %v1871_v38 }
 0x6e4   : > { %v6057_v27 = vpop.eup %4857 }
 0x6e5   : > { %v1865_v42 = vsel %vm1169_vm1, %v6057_v27, 0.0  ;;  %v6067_v12 = vpop.eup %4859 }
 0x6e6   : > { %1866 = vadd.xlane.f32.xlu1 %v1865_v42  ;;  %v1880_v59 = vsel %vm1169_vm1, %v6067_v12, 0.0  ;;  %v6071_v63 = vpop.eup %4861 }
 0x6e7   : > { %v1874_v10 = vsel %vm1169_vm1, %v6071_v63, 0.0 }
 0x6f0   : > { %2104 = vrot.lane.b32.xlu0 %v5475_v40, %s5073_s22 }
 0x6f7   : > { %2106 = vrot.lane.b32.xlu1 %v5473_v58, %s5073_s22 }
 0x70e   : > { %v1789_v35 = vpop.xlane.xlu1 %1788 }
 0x70f   : > { %v1805_v61 = vsub.f32 %v5910_v8, %v1789_v35  ;;  %1881 = vadd.xlane.f32.xlu0 %v1880_v59 }
 0x711   : > { %v1836_v13 = vmul.f32 1.442695, %v1805_v61  ;;  %v2238_v61 = vsel %vm978_vm0, %v6039_v54, 0 }
 0x712   : > { %v1783_v23 = vpop.xlane.xlu1 %1782 }
 0x713   : > { %4863 = vpow2.f32 %v1836_v13  ;;  %v1803_v50 = vsub.f32 %v5912_v44, %v1783_v23  ;;  %1875 = vadd.xlane.f32.xlu0 %v1874_v10 }
 0x715   : > { %v1832_v36 = vmul.f32 1.442695, %v1803_v50 }
 0x716   : > { %v2220_v32 = vpop.permute.xlu1 %2219 }
 0x717   : > { %4865 = vpow2.f32 %v1832_v36 }
 0x71d   : > { %v6077_v52 = vpop.eup %4863 }
 0x71e   : > { %v1883_v24 = vsel %vm1169_vm1, %v6077_v52, 0.0 }
 0x71f   : > { %1884 = vadd.xlane.f32.xlu0 %v1883_v24 }
 0x721   : > { %v6081_v37 = vpop.eup %4865 }
 0x722   : > { %v1877_v8 = vsel %vm1169_vm1, %v6081_v37, 0.0 }
 0x723   : > { %1878 = vadd.xlane.f32.xlu1 %v1877_v8 }
 0x734   : > { %2223 = vrot.lane.b32.xlu1 %v5501_v33, %s5072_s27 }
 0x735   : > { %2221 = vrot.lane.b32.xlu0 %v5503_v34, %s5072_s27  ;;  %s5075_s27 = smov 72  }
 0x738   : > { %2211 = vrot.lane.b32.xlu1 %v5491_v29, %s5073_s22 }
 0x739   : > { %2209 = vrot.lane.b32.xlu0 %v5493_v30, %s5073_s22 }
 0x73c   : > { %2110 = vrot.lane.b32.xlu1 %v5483_v45, %s5073_s22 }
 0x73d   : > { %2108 = vrot.lane.b32.xlu0 %v5485_v41, %s5073_s22 }
 0x740   : > { %2215 = vrot.lane.b32.xlu1 %v5501_v33, %s5073_s22 }
 0x741   : > { %2213 = vrot.lane.b32.xlu0 %v5503_v34, %s5073_s22  ;;  %s5076_s22 = smov 104  }
 0x758   : > { %v6101_v44 = vpop.f32.mrb[32].mxu1 }
 0x759   : > { %v6103_v47 = vpop.f32.mrb[33].mxu1 }
 0x75a   : > { %v6105_v28 = vpop.f32.mrb[34].mxu1 }
 0x75b   : > { %v6109_v18 = vpop.f32.mrb[35].mxu1 }
 0x763   : > { %v1870_v21 = vpop.xlane.xlu1 %1869 }
 0x767   : > { %v1864_v62 = vpop.xlane.xlu0 %1863 }
 0x76b   : > { %v2105_v9 = vpop.permute.xlu0 %2104 }
 0x76c   : > { %4351 = vmatprep.mubr.msk.bf16.mxu0 %vm978_vm0, %v2105_v9 }
 0x76f   : > { %v1873_v31 = vpop.xlane.xlu1 %1872 }
 0x770   : > { %4867 = vrcp.f32 %v1873_v31 }
 0x771   : > { %4869 = vrcp.f32 %v1864_v62 }
 0x772   : > { %4871 = vrcp.f32 %v1870_v21 }
 0x773   : > { %v1867_v49 = vpop.xlane.xlu1 %1866 }
 0x774   : > { %4873 = vrcp.f32 %v1867_v49 }
 0x777   : > { %v2107_v25 = vpop.permute.xlu1 %2106 }
 0x778   : > { %4352 = vmatmul.mubr.msk.bf16.vlgmr.msra.gmra.mrb[32].mxu0 %vm978_vm0, %v2107_v25 }
 0x77a   : > { %v4868_v51 = vpop.eup %4867 }
 0x77b   : > { %v4870_v43 = vpop.eup %4869  ;;  %v1913_v16 = vmul.f32 %v4868_v51, %v6053_v14  ;;  %v2241_v14 = vsel %vm978_vm0, %v2220_v32, 0 }
 0x77c   : > { %v4872_v38 = vpop.eup %4871  ;;  %v1910_v3 = vmul.f32 %v4870_v43, %v6037_v20 }
 0x77d   : > { %v1912_v17 = vmul.f32 %v4872_v38, %v6030_v39 }
 0x77e   : > { %v4874_v42 = vpop.eup %4873 }
 0x77f   : > { %v1911_v53 = vmul.f32 %v4874_v42, %v6057_v27  ;;  %v1923_v59 = vpack.c.bf16 %v1913_v16, %v1912_v17 }
 0x781   : > { %v1922_v35 = vpack.c.bf16 %v1911_v53, %v1910_v3 }
 0x783   : > { %4335 = vmatprep.mubr.msk.bf16.mxu1 %vm1169_vm1, %v1922_v35 }
 0x784   : > { %4336 = vmatmul.mubr.msk.bf16.vlgmr.msra.gmra.mrb[40].mxu1 %vm1169_vm1, %v1923_v59 }
 0x785   : > { %4360 = vmatpush3.bf16.xpose.msra.mxu1 %v2238_v61 }
 0x786   : > { %4512 = vmatprep.subr.msk.bf16.mxu1 %vm978_vm0, %v2220_v32 }
 0x78d   : > { %4362 = vmatpush3.bf16.xpose.msra.mxu1 %v2241_v14 }
 0x79c   : > { %v1882_v20 = vpop.xlane.xlu0 %1881 }
 0x7a0   : > { %v1876_v13 = vpop.xlane.xlu0 %1875 }
 0x7ac   : > { %v1885_v27 = vpop.xlane.xlu0 %1884 }
 0x7ad   : > { %4875 = vrcp.f32 %v1885_v27 }
 0x7ae   : > { %4877 = vrcp.f32 %v1876_v13 }
 0x7af   : > { %4879 = vrcp.f32 %v1882_v20 }
 0x7b0   : > { %v1879_v39 = vpop.xlane.xlu1 %1878  ;;  %v2222_v23 = vpop.permute.xlu0 %2221 }
 0x7b1   : > { %4881 = vrcp.f32 %v1879_v39  ;;  %4513 = vmatprep.subr.msk.bf16.mxu1 %vm978_vm0, %v2222_v23  ;;  %v2244_v10 = vsel %vm978_vm0, %v2222_v23, 0 }
 0x7b2   : > { %v6127_v54 = vpop.f32.mrb[36].mxu1  ;;  %4364 = vmatpush3.bf16.xpose.msra.mxu1 %v2244_v10 }
 0x7b3   : > { %v6129_v50 = vpop.f32.mrb[37].mxu1 }
 0x7b4   : > { %v6131_v36 = vpop.f32.mrb[38].mxu1  ;;  %v2224_v24 = vpop.permute.xlu1 %2223 }
 0x7b5   : > { %v6135_v32 = vpop.f32.mrb[39].mxu1  ;;  %v2210_v62 = vpop.permute.xlu0 %2209  ;;  %4514 = vmatprep.subr.msk.bf16.mxu1 %vm978_vm0, %v2224_v24  ;;  %v2247_v51 = vsel %vm978_vm0, %v2224_v24, 0 }
 0x7b7   : > { %v4876_v9 = vpop.eup %4875 }
 0x7b8   : > { %v2212_v31 = vpop.permute.xlu1 %2211  ;;  %v4878_v49 = vpop.eup %4877  ;;  %v1917_v42 = vmul.f32 %v4876_v9, %v6077_v52  ;;  %v6161_v52 = vld [vmem:[%s6912_s7 + $0x48] sm:$0xff]  }
 0x7b9   : > { %v2109_v25 = vpop.permute.xlu0 %2108  ;;  %v4880_v43 = vpop.eup %4879  ;;  %v1914_v3 = vmul.f32 %v4878_v49, %v6071_v63  ;;  %v6917_v14 = vunpack.c.l.bf16 %v6161_v52 }
 0x7ba   : > { %4355 = vmatprep.mubr.msk.bf16.mxu0 %vm978_vm0, %v2109_v25  ;;  %4366 = vmatpush3.bf16.xpose.msra.mxu1 %v2247_v51  ;;  %v1916_v17 = vmul.f32 %v4880_v43, %v6067_v12  ;;  %v6156_v12 = vld [vmem:[%s6912_s7 + $0x40] sm:$0xff]  }
 0x7bb   : > { %v4882_v38 = vpop.eup %4881  ;;  %v6914_v13 = vunpack.c.h.bf16 %v6156_v12 }
 0x7bc   : > { %v2111_v16 = vpop.permute.xlu1 %2110  ;;  %v1915_v53 = vmul.f32 %v4882_v38, %v6081_v37  ;;  %v1925_v59 = vpack.c.bf16 %v1917_v42, %v1916_v17  ;;  %v6916_v37 = vunpack.c.l.bf16 %v6156_v12 }
 0x7bd   : > { %4356 = vmatmul.mubr.msk.bf16.gmra.mrb[36].mxu0 %vm978_vm0, %v2111_v16  ;;  %v2214_v61 = vpop.permute.xlu0 %2213 }
 0x7be   : > { %v1924_v35 = vpack.c.bf16 %v1915_v53, %v1914_v3 }
 0x7c0   : > { %4339 = vmatprep.mubr.msk.bf16.mxu1 %vm1169_vm1, %v1924_v35  ;;  %v2216_v63 = vpop.permute.xlu1 %2215  ;;  %v4023_v35 = vld [vmem:[%s6912_s7 + $0x50] sm:$0xff]  }
 0x7c1   : > { %4340 = vmatmul.mubr.msk.bf16.gmra.mrb[44].mxu1 %vm1169_vm1, %v1925_v59  ;;  %v4024_v59 = vld [vmem:[%s6912_s7 + $0x58] sm:$0xff]  }
 0x7c2   : > { %4367 = vmatprep.mubr.msk.bf16.mxu1 %vm978_vm0, %v2210_v62  ;;  %v6915_v62 = vunpack.c.h.bf16 %v6161_v52 }
 0x7c9   : > { %4368 = vmatmul.mubr.msk.bf16.vlgmr.msra.gmra.mrb[48].mxu1 %vm978_vm0, %v2212_v31 }
 0x7ca   : > { %4371 = vmatprep.mubr.msk.bf16.mxu1 %vm978_vm0, %v2214_v61  ;;  %v3992_v61 = vunpack.c.l.bf16 %v4023_v35 }
 0x7d1   : > { %4372 = vmatmul.mubr.msk.bf16.gmra.mrb[52].mxu1 %vm978_vm0, %v2216_v63  ;;  %v3996_v63 = vunpack.c.l.bf16 %v4024_v59 }
 0x84b   : > { %v4353_v20 = vpop.f32.mrb[32].mxu0 }
 0x84c   : > { %v2178_v27 = vpop.f32.mrb[33].mxu0  ;;  %v6172_v24 = vadd.f32 %v4353_v20, %v6917_v14 }
 0x84d   : > { %v6168_v39 = vadd.f32 %v6916_v37, %v2178_v27  ;;  %v4354_v23 = vpop.f32.mrb[34].mxu0  ;;  %v3993_v27 = vunpack.c.h.bf16 %v4023_v35 }
 0x84e   : > { %v2181_v10 = vpop.f32.mrb[35].mxu0  ;;  %v6185_v25 = vadd.f32 %v4354_v23, %v6915_v62  ;;  %v2320_v51 = vsel %vm1169_vm1, %v6172_v24, -inf }
 0x84f   : > { %v6177_v9 = vadd.f32 %v6914_v13, %v2181_v10  ;;  %v2314_v31 = vsel %vm1169_vm1, %v6168_v39, -inf }
 0x850   : > { %2315 = vmax.xlane.f32.xlu0 %v2314_v31  ;;  %v2323_v38 = vsel %vm1169_vm1, %v6185_v25, -inf  ;;  %v3997_v31 = vunpack.c.h.bf16 %v4024_v59 }
 0x851   : > { %v2317_v49 = vsel %vm1169_vm1, %v6177_v9, -inf }
 0x852   : > { %2318 = vmax.xlane.f32.xlu1 %v2317_v49 }
 0x854   : > { %2321 = vmax.xlane.f32.xlu0 %v2320_v51 }
 0x857   : > { %v6189_v43 = vpop.f32.mrb[40].mxu1 }
 0x858   : > { %v6193_v42 = vpop.f32.mrb[41].mxu1  ;;  %2324 = vmax.xlane.f32.xlu0 %v2323_v38 }
 0x859   : > { %v6195_v16 = vpop.f32.mrb[42].mxu1 }
 0x85a   : > { %v6199_v53 = vpop.f32.mrb[43].mxu1 }
 0x890   : > { %v4357_v20 = vpop.f32.mrb[36].mxu0 }
 0x891   : > { %v2194_v23 = vpop.f32.mrb[37].mxu0  ;;  %v6211_v38 = vadd.f32 %v4357_v20, %v3996_v63 }
 0x892   : > { %v6209_v10 = vadd.f32 %v3992_v61, %v2194_v23  ;;  %v4358_v49 = vpop.f32.mrb[38].mxu0 }
 0x893   : > { %v2197_v51 = vpop.f32.mrb[39].mxu0  ;;  %v6221_v19 = vadd.f32 %v4358_v49, %v3997_v31  ;;  %v2332_v6 = vsel %vm1169_vm1, %v6211_v38, -inf }
 0x894   : > { %v6213_v17 = vadd.f32 %v3993_v27, %v2197_v51  ;;  %v6215_v3 = vpop.f32.mrb[44].mxu1  ;;  %v2326_v21 = vsel %vm1169_vm1, %v6209_v10, -inf }
 0x895   : > { %6949 = vst [vmem:[#allocation20_spill] sm:$0xff] %v6215_v3  ;;  %v6219_v8 = vpop.f32.mrb[45].mxu1  ;;  %2327 = vmax.xlane.f32.xlu0 %v2326_v21  ;;  %v2335_v21 = vsel %vm1169_vm1, %v6221_v19, -inf }
 0x896   : > { %6950 = vst [vmem:[#allocation21_spill] sm:$0xff] %v6219_v8  ;;  %v6223_v35 = vpop.f32.mrb[46].mxu1  ;;  %v2329_v59 = vsel %vm1169_vm1, %v6213_v17, -inf }
 0x897   : > { %6951 = vst [vmem:[#allocation22_spill] sm:$0xff] %v6223_v35  ;;  %v6229_v23 = vpop.f32.mrb[47].mxu1  ;;  %2330 = vmax.xlane.f32.xlu1 %v2329_v59 }
 0x898   : > { %6952 = vst [vmem:[#allocation23_spill] sm:$0xff] %v6229_v23 }
 0x899   : > { %2333 = vmax.xlane.f32.xlu0 %v2332_v6 }
 0x89b   : > { %2336 = vmax.xlane.f32.xlu1 %v2335_v21 }
 0x89c   : > { %v6237_v49 = vpop.f32.mrb[48].mxu1 }
 0x89d   : > { %v6239_v13 = vpop.f32.mrb[49].mxu1 }
 0x89e   : > { %v6241_v62 = vpop.f32.mrb[50].mxu1 }
 0x89f   : > { %v6243_v20 = vpop.f32.mrb[51].mxu1 }
 0x8a4   : > { %v4373_v59 = vpop.f32.mrb[52].mxu1 }
 0x8a5   : > { %v6245_v37 = vadd.f32 %v4373_v59, %v3996_v63  ;;  %v2299_v51 = vpop.f32.mrb[53].mxu1 }
 0x8a6   : > { %v6247_v14 = vadd.f32 %v3992_v61, %v2299_v51  ;;  %v4374_v1 = vpop.f32.mrb[54].mxu1 }
 0x8a7   : > { %v6249_v6 = vadd.f32 %v4374_v1, %v3997_v31  ;;  %v2302_v2 = vpop.f32.mrb[55].mxu1 }
 0x8a8   : > { %v6251_v5 = vadd.f32 %v3993_v27, %v2302_v2 }
 0x8dd   : > { %v2316_v21 = vpop.xlane.xlu0 %2315 }
 0x8de   : > { %v2362_v46 = vsub.f32 %v6168_v39, %v2316_v21 }
 0x8df   : > { %v2319_v0 = vpop.xlane.xlu1 %2318 }
 0x8e0   : > { %v2378_v60 = vmul.f32 1.442695, %v2362_v46  ;;  %v2363_v56 = vsub.f32 %v6177_v9, %v2319_v0 }
 0x8e1   : > { %v2322_v55 = vpop.xlane.xlu0 %2321 }
 0x8e2   : > { %4883 = vpow2.f32 %v2378_v60  ;;  %v2380_v63 = vmul.f32 1.442695, %v2363_v56  ;;  %v2364_v59 = vsub.f32 %v6172_v24, %v2322_v55 }
 0x8e4   : > { %4885 = vpow2.f32 %v2380_v63  ;;  %v2382_v61 = vmul.f32 1.442695, %v2364_v59 }
 0x8e5   : > { %v2325_v51 = vpop.xlane.xlu0 %2324 }
 0x8e6   : > { %4887 = vpow2.f32 %v2382_v61  ;;  %v2365_v1 = vsub.f32 %v6185_v25, %v2325_v51 }
 0x8e8   : > { %v2384_v2 = vmul.f32 1.442695, %v2365_v1 }
 0x8ea   : > { %4889 = vpow2.f32 %v2384_v2 }
 0x8ec   : > { %v6257_v27 = vpop.eup %4883 }
 0x8ed   : > { %v2410_v46 = vsel %vm1169_vm1, %v6257_v27, 0.0 }
 0x8ee   : > { %v6261_v39 = vpop.eup %4885  ;;  %2411 = vadd.xlane.f32.xlu0 %v2410_v46 }
 0x8ef   : > { %v2413_v56 = vsel %vm1169_vm1, %v6261_v39, 0.0 }
 0x8f0   : > { %v6265_v0 = vpop.eup %4887  ;;  %2414 = vadd.xlane.f32.xlu1 %v2413_v56 }
 0x8f1   : > { %v2416_v55 = vsel %vm1169_vm1, %v6265_v0, 0.0 }
 0x8f2   : > { %2417 = vadd.xlane.f32.xlu0 %v2416_v55 }
 0x8f4   : > { %v6269_v60 = vpop.eup %4889 }
 0x8f5   : > { %v2419_v24 = vsel %vm1169_vm1, %v6269_v60, 0.0 }
 0x8f6   : > { %2420 = vadd.xlane.f32.xlu1 %v2419_v24 }
 0x907   : > { %2500 = vrot.lane.b32.xlu1 %v5473_v58, %s5074_s18 }
 0x908   : > { %2498 = vrot.lane.b32.xlu0 %v5475_v40, %s5074_s18 }
 0x90b   : > { %2504 = vrot.lane.b32.xlu1 %v5483_v45, %s5074_s18 }
 0x90c   : > { %2502 = vrot.lane.b32.xlu0 %v5485_v41, %s5074_s18 }
 0x922   : > { %v2328_v9 = vpop.xlane.xlu0 %2327 }
 0x923   : > { %v2366_v25 = vsub.f32 %v6209_v10, %v2328_v9 }
 0x924   : > { %v2331_v31 = vpop.xlane.xlu1 %2330 }
 0x925   : > { %v2386_v21 = vmul.f32 1.442695, %v2366_v25  ;;  %v2367_v63 = vsub.f32 %v6213_v17, %v2331_v31  ;;  %v6953_v31 = vunpack.c.l.bf16 %v6161_v52 }
 0x926   : > { %v2334_v59 = vpop.xlane.xlu0 %2333 }
 0x927   : > { %4891 = vpow2.f32 %v2386_v21  ;;  %v2388_v61 = vmul.f32 1.442695, %v2367_v63  ;;  %v2368_v51 = vsub.f32 %v6211_v38, %v2334_v59  ;;  %v6324_v21 = vadd.f32 %v6237_v49, %v6953_v31 }
 0x928   : > { %v2337_v1 = vpop.xlane.xlu1 %2336  ;;  %v6954_v63 = vunpack.c.l.bf16 %v6156_v12 }
 0x929   : > { %4893 = vpow2.f32 %v2388_v61  ;;  %v2390_v2 = vmul.f32 1.442695, %v2368_v51  ;;  %v2369_v46 = vsub.f32 %v6221_v19, %v2337_v1  ;;  %v2344_v61 = vsel %vm1169_vm1, %v6324_v21, -inf }
 0x92a   : > { %v6329_v59 = vadd.f32 %v6954_v63, %v6239_v13  ;;  %v2356_v13 = vsel %vm1169_vm1, %v6245_v37, -inf }
 0x92b   : > { %4895 = vpow2.f32 %v2390_v2  ;;  %v2392_v56 = vmul.f32 1.442695, %v2369_v46  ;;  %v6955_v2 = vunpack.c.h.bf16 %v6161_v52 }
 0x92c   : > { %v2338_v1 = vsel %vm1169_vm1, %v6329_v59, -inf }
 0x92d   : > { %4897 = vpow2.f32 %v2392_v56  ;;  %v6338_v49 = vadd.f32 %v6241_v62, %v6955_v2 }
 0x931   : > { %v6285_v55 = vpop.eup %4891 }
 0x932   : > { %v2422_v10 = vsel %vm1169_vm1, %v6285_v55, 0.0 }
 0x933   : > { %v6289_v24 = vpop.eup %4893  ;;  %2423 = vadd.xlane.f32.xlu0 %v2422_v10  ;;  %v6956_v10 = vunpack.c.h.bf16 %v6156_v12 }
 0x934   : > { %v2425_v17 = vsel %vm1169_vm1, %v6289_v24, 0.0 }
 0x935   : > { %v6293_v38 = vpop.eup %4895  ;;  %2426 = vadd.xlane.f32.xlu1 %v2425_v17  ;;  %v6345_v17 = vadd.f32 %v6956_v10, %v6243_v20  ;;  %v2353_v10 = vsel %vm1169_vm1, %v6251_v5, -inf }
 0x936   : > { %v2428_v19 = vsel %vm1169_vm1, %v6293_v38, 0.0 }
 0x937   : > { %v6297_v9 = vpop.eup %4897  ;;  %2429 = vadd.xlane.f32.xlu0 %v2428_v19  ;;  %v2347_v19 = vsel %vm1169_vm1, %v6338_v49, -inf  ;;  %v2341_v31 = vsel %vm1169_vm1, %v6345_v17, -inf }
 0x938   : > { %v2431_v25 = vsel %vm1169_vm1, %v6297_v9, 0.0 }
 0x93b   : > { %2432 = vadd.xlane.f32.xlu0 %v2431_v25  ;;  %v2350_v25 = vsel %vm1169_vm1, %v6247_v14, -inf }
 0x946   : > { %2589 = vrot.lane.b32.xlu1 %v5491_v29, %s5074_s18 }
 0x94a   : > { %2684 = vrot.lane.b32.xlu1 %v5475_v40, %s5075_s27 }
 0x94e   : > { %2591 = vrot.lane.b32.xlu1 %v5503_v34, %s5074_s18 }
 0x951   : > { %2587 = vrot.lane.b32.xlu0 %v5493_v30, %s5074_s18 }
 0x952   : > { %2686 = vrot.lane.b32.xlu1 %v5473_v58, %s5075_s27 }
 0x955   : > { %2593 = vrot.lane.b32.xlu0 %v5501_v33, %s5074_s18  ;;  %s5077_s18 = smov 40  }
 0x956   : > { %2789 = vrot.lane.b32.xlu1 %v5493_v30, %s5075_s27 }
 0x959   : > { %2688 = vrot.lane.b32.xlu0 %v5485_v41, %s5075_s27 }
 0x95a   : > { %2690 = vrot.lane.b32.xlu1 %v5483_v45, %s5075_s27 }
 0x95e   : > { %2791 = vrot.lane.b32.xlu1 %v5491_v29, %s5075_s27 }
 0x978   : > { %2345 = vmax.xlane.f32.xlu0 %v2344_v61 }
 0x97b   : > { %v2412_v51 = vpop.xlane.xlu0 %2411 }
 0x97c   : > { %4899 = vrcp.f32 %v2412_v51  ;;  %2339 = vmax.xlane.f32.xlu0 %v2338_v1  ;;  %v2359_v51 = vsel %vm1169_vm1, %v6249_v6, -inf }
 0x97d   : > { %v2415_v46 = vpop.xlane.xlu1 %2414 }
 0x97e   : > { %4901 = vrcp.f32 %v2415_v46 }
 0x97f   : > { %v2418_v56 = vpop.xlane.xlu0 %2417 }
 0x980   : > { %2357 = vmax.xlane.f32.xlu0 %v2356_v13  ;;  %4903 = vrcp.f32 %v2418_v56 }
 0x982   : > { %2348 = vmax.xlane.f32.xlu1 %v2347_v19 }
 0x983   : > { %v2421_v52 = vpop.xlane.xlu1 %2420  ;;  %v2499_v62 = vpop.permute.xlu0 %2498 }
 0x984   : > { %4905 = vrcp.f32 %v2421_v52  ;;  %2351 = vmax.xlane.f32.xlu0 %v2350_v25  ;;  %4375 = vmatprep.subr.bf16.mxu0 %v2499_v62 }
 0x985   : > { %4376 = vmatpush3.bf16.msra.mxu0 %v2499_v62 }
 0x986   : > { %v4900_v12 = vpop.eup %4899  ;;  %2342 = vmax.xlane.f32.xlu1 %v2341_v31 }
 0x987   : > { %v2501_v20 = vpop.permute.xlu1 %2500  ;;  %v2503_v61 = vpop.permute.xlu0 %2502  ;;  %v2474_v1 = vmul.f32 %v4900_v12, %v6257_v27 }
 0x988   : > { %v4902_v63 = vpop.eup %4901  ;;  %4377 = vmatprep.subr.bf16.mxu0 %v2501_v20 }
 0x989   : > { %4378 = vmatpush3.bf16.msra.mxu0 %v2501_v20  ;;  %v2475_v2 = vmul.f32 %v4902_v63, %v6261_v39 }
 0x98a   : > { %2360 = vmax.xlane.f32.xlu1 %v2359_v51  ;;  %4379 = vmatprep.subr.bf16.mxu0 %v2503_v61  ;;  %v4904_v56 = vpop.eup %4903 }
 0x98b   : > { %v2490_v46 = vpack.c.bf16 %v2475_v2, %v2474_v1  ;;  %v2505_v13 = vpop.permute.xlu1 %2504  ;;  %v2476_v52 = vmul.f32 %v4904_v56, %v6265_v0 }
 0x98d   : > { %4380 = vmatpush3.bf16.msra.mxu0 %v2503_v61  ;;  %4383 = vmatprep.mubr.msk.bf16.mxu0 %vm1169_vm1, %v2490_v46 }
 0x98e   : > { %v4906_v19 = vpop.eup %4905  ;;  %2354 = vmax.xlane.f32.xlu1 %v2353_v10  ;;  %4381 = vmatprep.subr.bf16.mxu0 %v2505_v13 }
 0x98f   : > { %v2477_v27 = vmul.f32 %v4906_v19, %v6269_v60 }
 0x991   : > { %v2491_v62 = vpack.c.bf16 %v2477_v27, %v2476_v52  ;;  %4382 = vmatpush3.bf16.msra.mxu0 %v2505_v13 }
 0x994   : > { %4384 = vmatmul.mubr.msk.bf16.vlgmr.msra.gmra.mrb[40].mxu0 %vm1169_vm1, %v2491_v62 }
 0x99a   : > { %2676 = vrot.lane.b32.xlu0 %v5475_v40, %s5076_s22 }
 0x99f   : > { %2678 = vrot.lane.b32.xlu1 %v5473_v58, %s5076_s22 }
 0x9c0   : > { %v2424_v39 = vpop.xlane.xlu0 %2423 }
 0x9c1   : > { %4907 = vrcp.f32 %v2424_v39 }
 0x9c2   : > { %v2427_v25 = vpop.xlane.xlu1 %2426 }
 0x9c3   : > { %4909 = vrcp.f32 %v2427_v25 }
 0x9c4   : > { %v2430_v31 = vpop.xlane.xlu0 %2429 }
 0x9c5   : > { %4911 = vrcp.f32 %v2430_v31 }
 0x9c6   : > { %v2590_v12 = vpop.permute.xlu1 %2589 }
 0x9c8   : > { %v2433_v0 = vpop.xlane.xlu0 %2432 }
 0x9c9   : > { %4913 = vrcp.f32 %v2433_v0 }
 0x9ca   : > { %v2685_v60 = vpop.permute.xlu1 %2684 }
 0x9cb   : > { %v4908_v20 = vpop.eup %4907  ;;  %4515 = vmatprep.subr.msk.bf16.mxu0 %vm978_vm0, %v2685_v60  ;;  %v2705_v63 = vsel %vm978_vm0, %v2685_v60, 0 }
 0x9cc   : > { %4408 = vmatpush3.bf16.xpose.msra.mxu0 %v2705_v63  ;;  %v2588_v61 = vpop.permute.xlu0 %2587  ;;  %v2478_v2 = vmul.f32 %v4908_v20, %v6285_v55 }
 0x9cd   : > { %v4910_v51 = vpop.eup %4909  ;;  %4391 = vmatprep.subr.bf16.mxu1 %v2588_v61 }
 0x9ce   : > { %v2592_v1 = vpop.permute.xlu1 %2591  ;;  %4392 = vmatpush3.bf16.msra.mxu1 %v2588_v61  ;;  %v2479_v46 = vmul.f32 %v4910_v51, %v6289_v24 }
 0x9cf   : > { %4393 = vmatprep.subr.bf16.mxu1 %v2590_v12  ;;  %v4912_v10 = vpop.eup %4911 }
 0x9d0   : > { %v2594_v56 = vpop.permute.xlu0 %2593  ;;  %v2492_v13 = vpack.c.bf16 %v2479_v46, %v2478_v2  ;;  %v2480_v55 = vmul.f32 %v4912_v10, %v6293_v38 }
 0x9d2   : > { %v2687_v19 = vpop.permute.xlu1 %2686  ;;  %4387 = vmatprep.mubr.msk.bf16.mxu0 %vm1169_vm1, %v2492_v13  ;;  %4394 = vmatpush3.bf16.msra.mxu1 %v2590_v12 }
 0x9d3   : > { %v4914_v52 = vpop.eup %4913  ;;  %v2708_v27 = vsel %vm978_vm0, %v2687_v19, 0  ;;  %4395 = vmatprep.subr.bf16.mxu1 %v2592_v1  ;;  %4516 = vmatprep.subr.msk.bf16.mxu0 %vm978_vm0, %v2687_v19 }
 0x9d4   : > { %4410 = vmatpush3.bf16.xpose.msra.mxu0 %v2708_v27  ;;  %v2689_v62 = vpop.permute.xlu0 %2688  ;;  %v2481_v24 = vmul.f32 %v4914_v52, %v6297_v9 }
 0x9d5   : > { %4517 = vmatprep.subr.msk.bf16.mxu0 %vm978_vm0, %v2689_v62  ;;  %v2711_v31 = vsel %vm978_vm0, %v2689_v62, 0 }
 0x9d6   : > { %v6377_v39 = vpop.permute.xlu1 %2789  ;;  %4396 = vmatpush3.bf16.msra.mxu1 %v2592_v1  ;;  %v2493_v25 = vpack.c.bf16 %v2481_v24, %v2480_v55 }
 0x9d7   : > { %4397 = vmatprep.subr.bf16.mxu1 %v2594_v56 }
 0x9d8   : > { %4388 = vmatmul.mubr.msk.bf16.gmra.mrb[44].mxu0 %vm1169_vm1, %v2493_v25 }
 0x9da   : > { %4398 = vmatpush3.bf16.msra.mxu1 %v2594_v56  ;;  %v2691_v12 = vpop.permute.xlu1 %2690 }
 0x9db   : > { %4519 = vmatprep.subr.msk.bf16.mxu1 %vm978_vm0, %v6377_v39  ;;  %v2714_v38 = vsel %vm978_vm0, %v2691_v12, 0 }
 0x9dc   : > { %4412 = vmatpush3.bf16.xpose.msra.mxu0 %v2711_v31 }
 0x9dd   : > { %4518 = vmatprep.subr.msk.bf16.mxu0 %vm978_vm0, %v2691_v12 }
 0x9de   : > { %v6387_v61 = vpop.permute.xlu1 %2791 }
 0x9e4   : > { %4414 = vmatpush3.bf16.xpose.msra.mxu0 %v2714_v38 }
 0xa05   : > { %v2346_v9 = vpop.xlane.xlu0 %2345 }
 0xa06   : > { %v2372_v0 = vsub.f32 %v6324_v21, %v2346_v9 }
 0xa08   : > { %v2398_v60 = vmul.f32 1.442695, %v2372_v0 }
 0xa09   : > { %v2340_v20 = vpop.xlane.xlu0 %2339 }
 0xa0a   : > { %4915 = vpow2.f32 %v2398_v60  ;;  %v2370_v63 = vsub.f32 %v6329_v59, %v2340_v20 }
 0xa0c   : > { %v2394_v51 = vmul.f32 1.442695, %v2370_v63 }
 0xa0d   : > { %v2358_v1 = vpop.xlane.xlu0 %2357 }
 0xa0e   : > { %4917 = vpow2.f32 %v2394_v51  ;;  %v2376_v0 = vsub.f32 %v6245_v37, %v2358_v1 }
 0xa0f   : > { %v2349_v2 = vpop.xlane.xlu1 %2348 }
 0xa10   : > { %v2373_v46 = vsub.f32 %v6338_v49, %v2349_v2  ;;  %v2406_v20 = vmul.f32 1.442695, %v2376_v0 }
 0xa11   : > { %v2352_v56 = vpop.xlane.xlu0 %2351 }
 0xa12   : > { %v2400_v13 = vmul.f32 1.442695, %v2373_v46  ;;  %v2374_v63 = vsub.f32 %v6247_v14, %v2352_v56 }
 0xa13   : > { %v2343_v10 = vpop.xlane.xlu1 %2342 }
 0xa14   : > { %v6390_v19 = vpop.eup %4915  ;;  %4919 = vpow2.f32 %v2400_v13  ;;  %v2371_v21 = vsub.f32 %v6345_v17, %v2343_v10  ;;  %v2402_v51 = vmul.f32 1.442695, %v2374_v63 }
 0xa15   : > { %v2677_v52 = vpop.permute.xlu0 %2676  ;;  %v2440_v59 = vsel %vm1169_vm1, %v6390_v19, 0.0 }
 0xa16   : > { %v2396_v27 = vmul.f32 1.442695, %v2371_v21  ;;  %2441 = vadd.xlane.f32.xlu1 %v2440_v59  ;;  %4415 = vmatprep.mubr.msk.bf16.mxu0 %vm978_vm0, %v2677_v52 }
 0xa17   : > { %v2361_v62 = vpop.xlane.xlu1 %2360 }
 0xa18   : > { %v6396_v55 = vpop.eup %4917  ;;  %4921 = vpow2.f32 %v2396_v27  ;;  %v2377_v2 = vsub.f32 %v6249_v6, %v2361_v62 }
 0xa19   : > { %v2434_v49 = vsel %vm1169_vm1, %v6396_v55, 0.0 }
 0xa1a   : > { %2435 = vadd.xlane.f32.xlu1 %v2434_v49  ;;  %v2408_v46 = vmul.f32 1.442695, %v2377_v2 }
 0xa1b   : > { %v2355_v24 = vpop.xlane.xlu1 %2354 }
 0xa1c   : > { %v2375_v9 = vsub.f32 %v6251_v5, %v2355_v24 }
 0xa1e   : > { %v6400_v25 = vpop.eup %4919  ;;  %v2404_v60 = vmul.f32 1.442695, %v2375_v9 }
 0xa1f   : > { %v2679_v17 = vpop.permute.xlu1 %2678  ;;  %v2443_v31 = vsel %vm1169_vm1, %v6400_v25, 0.0 }
 0xa20   : > { %2444 = vadd.xlane.f32.xlu1 %v2443_v31  ;;  %4416 = vmatmul.mubr.msk.bf16.vlgmr.msra.gmra.mrb[48].mxu0 %vm978_vm0, %v2679_v17  ;;  %4923 = vpow2.f32 %v2404_v60 }
 0xa21   : > { %4925 = vpow2.f32 %v2406_v20 }
 0xa22   : > { %v6405_v12 = vpop.eup %4921  ;;  %4927 = vpow2.f32 %v2402_v51 }
 0xa23   : > { %v2437_v38 = vsel %vm1169_vm1, %v6405_v12, 0.0  ;;  %4929 = vpow2.f32 %v2408_v46 }
 0xa24   : > { %2438 = vadd.xlane.f32.xlu0 %v2437_v38 }
 0xa2a   : > { %v6417_v13 = vpop.eup %4923 }
 0xa2b   : > { %v2449_v10 = vsel %vm1169_vm1, %v6417_v13, 0.0  ;;  %v6421_v5 = vpop.eup %4925 }
 0xa2c   : > { %v2452_v37 = vsel %vm1169_vm1, %v6421_v5, 0.0  ;;  %v6425_v14 = vpop.eup %4927 }
 0xa2d   : > { %v2446_v6 = vsel %vm1169_vm1, %v6425_v14, 0.0  ;;  %v6429_v1 = vpop.eup %4929 }
 0xa2e   : > { %v2455_v56 = vsel %vm1169_vm1, %v6429_v1, 0.0 }
 0xa31   : > { %2680 = vrot.lane.b32.xlu1 %v5485_v41, %s5076_s22 }
 0xa3a   : > { %2793 = vrot.lane.b32.xlu0 %v5503_v34, %s5075_s27 }
 0xa55   : > { %2450 = vadd.xlane.f32.xlu1 %v2449_v10 }
 0xa59   : > { %2453 = vadd.xlane.f32.xlu0 %v2452_v37 }
 0xa5d   : > { %2447 = vadd.xlane.f32.xlu0 %v2446_v6 }
 0xa61   : > { %2456 = vadd.xlane.f32.xlu0 %v2455_v56 }
 0xa66   : > { %2795 = vrot.lane.b32.xlu1 %v5501_v33, %s5075_s27  ;;  %s5078_s27 = smov 8  }
 0xa67   : > { %v6435_v21 = vpop.f32.mrb[40].mxu0 }
 0xa68   : > { %v6437_v52 = vpop.f32.mrb[41].mxu0 }
 0xa69   : > { %v6439_v59 = vpop.f32.mrb[42].mxu0 }
 0xa6a   : > { %v6443_v62 = vpop.f32.mrb[43].mxu0  ;;  %2783 = vrot.lane.b32.xlu1 %v5491_v29, %s5076_s22 }
 0xa6e   : > { %2787 = vrot.lane.b32.xlu1 %v5501_v33, %s5076_s22 }
 0xa77   : > { %2682 = vrot.lane.b32.xlu0 %v5483_v45, %s5076_s22 }
 0xa7b   : > { %2781 = vrot.lane.b32.xlu0 %v5493_v30, %s5076_s22 }
 0xa7f   : > { %2785 = vrot.lane.b32.xlu0 %v5503_v34, %s5076_s22  ;;  %s5079_s22 = smov 16  }
 0xaa3   : > { %v2442_v24 = vpop.xlane.xlu1 %2441 }
 0xaa7   : > { %v2436_v17 = vpop.xlane.xlu1 %2435 }
 0xaab   : > { %v6457_v31 = vpop.f32.mrb[44].mxu0 }
 0xaac   : > { %v6459_v38 = vpop.f32.mrb[45].mxu0 }
 0xaad   : > { %v6461_v9 = vpop.f32.mrb[46].mxu0  ;;  %v2445_v0 = vpop.xlane.xlu1 %2444 }
 0xaae   : > { %v6465_v20 = vpop.f32.mrb[47].mxu0  ;;  %4931 = vrcp.f32 %v2445_v0 }
 0xaaf   : > { %4933 = vrcp.f32 %v2436_v17 }
 0xab0   : > { %4935 = vrcp.f32 %v2442_v24  ;;  %v2810_v24 = vsel %vm978_vm0, %v6377_v39, 0 }
 0xab1   : > { %v2681_v51 = vpop.permute.xlu1 %2680  ;;  %v2439_v2 = vpop.xlane.xlu0 %2438 }
 0xab2   : > { %4937 = vrcp.f32 %v2439_v2  ;;  %4419 = vmatprep.mubr.msk.bf16.mxu0 %vm978_vm0, %v2681_v51  ;;  %v6489_v51 = vld [vmem:[%s6912_s7 + $0x60] sm:$0xff]   ;;  %v6494_v2 = vld [vmem:[%s6912_s7 + $0x68] sm:$0xff]  }
 0xab8   : > { %v4932_v46 = vpop.eup %4931 }
 0xab9   : > { %v4934_v10 = vpop.eup %4933  ;;  %v2485_v56 = vmul.f32 %v4932_v46, %v6400_v25  ;;  %v2794_v25 = vpop.permute.xlu0 %2793  ;;  %v6918_v46 = vunpack.c.l.bf16 %v6489_v51 }
 0xaba   : > { %v4936_v37 = vpop.eup %4935  ;;  %v2482_v60 = vmul.f32 %v4934_v10, %v6396_v55  ;;  %v2813_v55 = vsel %vm978_vm0, %v6387_v61, 0 }
 0xabb   : > { %v2484_v49 = vmul.f32 %v4936_v37, %v6390_v19  ;;  %v2816_v19 = vsel %vm978_vm0, %v2794_v25, 0 }
 0xabc   : > { %v4938_v6 = vpop.eup %4937 }
 0xabd   : > { %v2483_v0 = vmul.f32 %v4938_v6, %v6405_v12  ;;  %v2495_v17 = vpack.c.bf16 %v2485_v56, %v2484_v49  ;;  %v6921_v6 = vunpack.c.l.bf16 %v6494_v2 }
 0xabf   : > { %v2494_v63 = vpack.c.bf16 %v2483_v0, %v2482_v60  ;;  %v6919_v0 = vunpack.c.h.bf16 %v6489_v51 }
 0xac1   : > { %4399 = vmatprep.mubr.msk.bf16.mxu1 %vm1169_vm1, %v2494_v63 }
 0xac2   : > { %4400 = vmatmul.mubr.msk.bf16.vlgmr.msra.gmra.mrb[56].mxu1 %vm1169_vm1, %v2495_v17 }
 0xac3   : > { %4424 = vmatpush3.bf16.xpose.msra.mxu1 %v2810_v24 }
 0xac4   : > { %4520 = vmatprep.subr.msk.bf16.mxu1 %vm978_vm0, %v6387_v61 }
 0xacb   : > { %4426 = vmatpush3.bf16.xpose.msra.mxu1 %v2813_v55 }
 0xacc   : > { %4521 = vmatprep.subr.msk.bf16.mxu1 %vm978_vm0, %v2794_v25 }
 0xad3   : > { %4428 = vmatpush3.bf16.xpose.msra.mxu1 %v2816_v19 }
 0xae2   : > { %v2451_v12 = vpop.xlane.xlu1 %2450 }
 0xae3   : > { %4939 = vrcp.f32 %v2451_v12 }
 0xae6   : > { %v2796_v49 = vpop.permute.xlu1 %2795  ;;  %v2454_v60 = vpop.xlane.xlu0 %2453 }
 0xae7   : > { %v2819_v39 = vsel %vm978_vm0, %v2796_v49, 0  ;;  %4522 = vmatprep.subr.msk.bf16.mxu1 %vm978_vm0, %v2796_v49 }
 0xae8   : > { %4430 = vmatpush3.bf16.xpose.msra.mxu1 %v2819_v39 }
 0xaea   : > { %v2448_v63 = vpop.xlane.xlu0 %2447 }
 0xaeb   : > { %4941 = vrcp.f32 %v2448_v63  ;;  %v6920_v63 = vunpack.c.h.bf16 %v6494_v2 }
 0xaec   : > { %4943 = vrcp.f32 %v2454_v60 }
 0xaed   : > { %v4940_v37 = vpop.eup %4939 }
 0xaee   : > { %v2457_v61 = vpop.xlane.xlu0 %2456  ;;  %v2487_v49 = vmul.f32 %v4940_v37, %v6417_v13 }
 0xaef   : > { %4945 = vrcp.f32 %v2457_v61 }
 0xaf2   : > { %v2683_v10 = vpop.permute.xlu0 %2682 }
 0xaf3   : > { %v4417_v56 = vpop.f32.mrb[48].mxu0  ;;  %4420 = vmatmul.mubr.msk.bf16.gmra.mrb[52].mxu0 %vm978_vm0, %v2683_v10 }
 0xaf4   : > { %v2750_v17 = vpop.f32.mrb[49].mxu0  ;;  %v2759_v39 = vadd.f32 %v4417_v56, %v6921_v6 }
 0xaf5   : > { %v4942_v24 = vpop.eup %4941  ;;  %v2751_v55 = vadd.f32 %v6918_v46, %v2750_v17  ;;  %v4418_v25 = vpop.f32.mrb[50].mxu0 }
 0xaf6   : > { %v2753_v19 = vpop.f32.mrb[51].mxu0  ;;  %v2486_v12 = vmul.f32 %v4942_v24, %v6425_v14  ;;  %v4944_v60 = vpop.eup %4943  ;;  %v2762_v37 = vadd.f32 %v4418_v25, %v6920_v63  ;;  %v2892_v56 = vsel %vm1169_vm1, %v2759_v39, -inf }
 0xaf7   : > { %v2754_v61 = vadd.f32 %v6919_v0, %v2753_v19  ;;  %v2886_v10 = vsel %vm1169_vm1, %v2751_v55, -inf  ;;  %v2488_v13 = vmul.f32 %v4944_v60, %v6421_v5  ;;  %v2782_v19 = vpop.permute.xlu0 %2781  ;;  %v4028_v60 = vld [vmem:[%s6912_s7 + $0x78] sm:$0xff]  }
 0xaf8   : > { %2887 = vmax.xlane.f32.xlu0 %v2886_v10  ;;  %v2496_v27 = vpack.c.bf16 %v2487_v49, %v2486_v12  ;;  %v4012_v22 = vunpack.c.l.bf16 %v4028_v60 }
 0xaf9   : > { %v4946_v17 = vpop.eup %4945  ;;  %v2889_v46 = vsel %vm1169_vm1, %v2754_v61, -inf }
 0xafa   : > { %2890 = vmax.xlane.f32.xlu1 %v2889_v46  ;;  %4403 = vmatprep.mubr.msk.bf16.mxu1 %vm1169_vm1, %v2496_v27  ;;  %v2489_v14 = vmul.f32 %v4946_v17, %v6429_v1  ;;  %v2895_v46 = vsel %vm1169_vm1, %v2762_v37, -inf  ;;  %v2784_v27 = vpop.permute.xlu1 %2783 }
 0xafb   : > { %v2786_v12 = vpop.permute.xlu0 %2785 }
 0xafc   : > { %2893 = vmax.xlane.f32.xlu0 %v2892_v56  ;;  %v2497_v24 = vpack.c.bf16 %v2489_v14, %v2488_v13 }
 0xafe   : > { %4404 = vmatmul.mubr.msk.bf16.gmra.mrb[60].mxu1 %vm1169_vm1, %v2497_v24  ;;  %v2788_v5 = vpop.permute.xlu1 %2787 }
 0xaff   : > { %4431 = vmatprep.mubr.msk.bf16.mxu1 %vm978_vm0, %v2782_v19 }
 0xb00   : > { %2896 = vmax.xlane.f32.xlu0 %v2895_v46 }
 0xb06   : > { %4432 = vmatmul.mubr.msk.bf16.vlgmr.msra.gmra.mrb[64].mxu1 %vm978_vm0, %v2784_v27 }
 0xb07   : > { %4435 = vmatprep.mubr.msk.bf16.mxu1 %vm978_vm0, %v2786_v12 }
 0xb0e   : > { %4436 = vmatmul.mubr.msk.bf16.gmra.mrb[68].mxu1 %vm978_vm0, %v2788_v5  ;;  %v4027_v5 = vld [vmem:[%s6912_s7 + $0x70] sm:$0xff]  }
 0xb0f   : > { %v4008_v6 = vunpack.c.l.bf16 %v4027_v5 }
 0xb85   : > { %v2888_v13 = vpop.xlane.xlu0 %2887 }
 0xb86   : > { %v2934_v24 = vsub.f32 %v2751_v55, %v2888_v13  ;;  %v4009_v55 = vunpack.c.h.bf16 %v4027_v5 }
 0xb87   : > { %v2891_v56 = vpop.xlane.xlu1 %2890 }
 0xb88   : > { %v2935_v19 = vsub.f32 %v2754_v61, %v2891_v56  ;;  %v2950_v27 = vmul.f32 1.442695, %v2934_v24 }
 0xb89   : > { %v2894_v14 = vpop.xlane.xlu0 %2893 }
 0xb8a   : > { %v2936_v12 = vsub.f32 %v2759_v39, %v2894_v14  ;;  %v2952_v0 = vmul.f32 1.442695, %v2935_v19  ;;  %4947 = vpow2.f32 %v2950_v27  ;;  %v4013_v14 = vunpack.c.h.bf16 %v4028_v60 }
 0xb8c   : > { %v2954_v17 = vmul.f32 1.442695, %v2936_v12  ;;  %4949 = vpow2.f32 %v2952_v0 }
 0xb8d   : > { %v2897_v46 = vpop.xlane.xlu0 %2896 }
 0xb8e   : > { %v2937_v63 = vsub.f32 %v2762_v37, %v2897_v46  ;;  %4951 = vpow2.f32 %v2954_v17 }
 0xb90   : > { %v2956_v61 = vmul.f32 1.442695, %v2937_v63 }
 0xb92   : > { %4953 = vpow2.f32 %v2956_v61 }
 0xb94   : > { %v6547_v63 = vpop.eup %4947 }
 0xb95   : > { %v6523_v1 = vpop.f32.mrb[56].mxu1  ;;  %v2982_v61 = vsel %vm1169_vm1, %v6547_v63, 0.0 }
 0xb96   : > { %v6525_v25 = vpop.f32.mrb[57].mxu1  ;;  %v6550_v17 = vpop.eup %4949 }
 0xb97   : > { %6957 = vst [vmem:[#allocation24_spill] sm:$0xff] %v6525_v25  ;;  %v6527_v49 = vpop.f32.mrb[58].mxu1 }
 0xb98   : > { %v6531_v10 = vpop.f32.mrb[59].mxu1 }
 0xb99   : > { %6958 = vst [vmem:[#allocation25_spill] sm:$0xff] %v6531_v10 }
 0xbc6   : > { %v4421_v4 = vpop.f32.mrb[52].mxu0 }
 0xbc7   : > { %v2766_v13 = vpop.f32.mrb[53].mxu0  ;;  %v6541_v19 = vadd.f32 %v4421_v4, %v4012_v22 }
 0xbc8   : > { %v2767_v39 = vadd.f32 %v4008_v6, %v2766_v13  ;;  %v4422_v56 = vpop.f32.mrb[54].mxu0  ;;  %v6558_v13 = vpop.eup %4951 }
 0xbc9   : > { %v2769_v24 = vpop.f32.mrb[55].mxu0  ;;  %v2778_v27 = vadd.f32 %v4422_v56, %v4013_v14  ;;  %v2904_v0 = vsel %vm1169_vm1, %v6541_v19, -inf  ;;  %v2988_v11 = vsel %vm1169_vm1, %v6558_v13, 0.0 }
 0xbca   : > { %v2770_v37 = vadd.f32 %v4009_v55, %v2769_v24  ;;  %v2898_v46 = vsel %vm1169_vm1, %v2767_v39, -inf }
 0xbcb   : > { %2899 = vmax.xlane.f32.xlu0 %v2898_v46  ;;  %v2907_v60 = vsel %vm1169_vm1, %v2778_v27, -inf }
 0xbcc   : > { %v2901_v12 = vsel %vm1169_vm1, %v2770_v37, -inf }
 0xbcd   : > { %2902 = vmax.xlane.f32.xlu1 %v2901_v12  ;;  %v2985_v12 = vsel %vm1169_vm1, %v6550_v17, 0.0 }
 0xbcf   : > { %2905 = vmax.xlane.f32.xlu0 %v2904_v0  ;;  %v6568_v0 = vpop.eup %4953 }
 0xbd1   : > { %v6552_v4 = vpop.f32.mrb[60].mxu1  ;;  %2908 = vmax.xlane.f32.xlu1 %v2907_v60 }
 0xbd2   : > { %6959 = vst [vmem:[#allocation26_spill] sm:$0xff] %v6552_v4  ;;  %v6554_v5 = vpop.f32.mrb[61].mxu1 }
 0xbd3   : > { %6960 = vst [vmem:[#allocation27_spill] sm:$0xff] %v6554_v5  ;;  %v6560_v56 = vpop.f32.mrb[62].mxu1  ;;  %2983 = vadd.xlane.f32.xlu0 %v2982_v61  ;;  %v2991_v61 = vsel %vm1169_vm1, %v6568_v0, 0.0 }
 0xbd4   : > { %6961 = vst [vmem:[#allocation28_spill] sm:$0xff] %v6560_v56  ;;  %v6564_v46 = vpop.f32.mrb[63].mxu1 }
 0xbd5   : > { %6962 = vst [vmem:[#allocation29_spill] sm:$0xff] %v6564_v46  ;;  %2986 = vadd.xlane.f32.xlu1 %v2985_v12 }
 0xbd7   : > { %2989 = vadd.xlane.f32.xlu0 %v2988_v11 }
 0xbd9   : > { %v4433_v26 = vpop.f32.mrb[64].mxu1  ;;  %2992 = vadd.xlane.f32.xlu1 %v2991_v61 }
 0xbda   : > { %v2855_v24 = vpop.f32.mrb[65].mxu1 }
 0xbdb   : > { %v4434_v4 = vpop.f32.mrb[66].mxu1 }
 0xbdc   : > { %v2858_v56 = vpop.f32.mrb[67].mxu1 }
 0xbe1   : > { %v4437_v48 = vpop.f32.mrb[68].mxu1 }
 0xbe2   : > { %v6576_v15 = vadd.f32 %v4437_v48, %v4012_v22  ;;  %v2871_v57 = vpop.f32.mrb[69].mxu1 }
 0xbe3   : > { %v6578_v7 = vadd.f32 %v4008_v6, %v2871_v57  ;;  %v4438_v60 = vpop.f32.mrb[70].mxu1 }
 0xbe4   : > { %v6580_v12 = vadd.f32 %v4438_v60, %v4013_v14  ;;  %v2874_v5 = vpop.f32.mrb[71].mxu1 }
 0xbe5   : > { %v6582_v46 = vadd.f32 %v4009_v55, %v2874_v5 }
 0xc58   : > { %v2900_v11 = vpop.xlane.xlu0 %2899 }
 0xc59   : > { %v2938_v8 = vsub.f32 %v2767_v39, %v2900_v11  ;;  %v6963_v39 = vunpack.c.l.bf16 %v6494_v2  ;;  %v6966_v11 = vunpack.c.h.bf16 %v6489_v51 }
 0xc5a   : > { %v2903_v23 = vpop.xlane.xlu1 %2902 }
 0xc5b   : > { %v2958_v3 = vmul.f32 1.442695, %v2938_v8  ;;  %v2939_v61 = vsub.f32 %v2770_v37, %v2903_v23  ;;  %v2864_v5 = vadd.f32 %v4433_v26, %v6963_v39  ;;  %v6964_v23 = vunpack.c.h.bf16 %v6494_v2 }
 0xc5c   : > { %v2906_v35 = vpop.xlane.xlu0 %2905  ;;  %v2931_v39 = vsel %vm1169_vm1, %v6580_v12, -inf }
 0xc5d   : > { %4955 = vpow2.f32 %v2958_v3  ;;  %v2960_v25 = vmul.f32 1.442695, %v2939_v61  ;;  %v2940_v55 = vsub.f32 %v6541_v19, %v2906_v35  ;;  %v6965_v35 = vunpack.c.l.bf16 %v6489_v51 }
 0xc5e   : > { %v2909_v10 = vpop.xlane.xlu1 %2908  ;;  %v2916_v26 = vsel %vm1169_vm1, %v2864_v5, -inf  ;;  %v2859_v61 = vadd.f32 %v6966_v11, %v2858_v56  ;;  %v2928_v51 = vsel %vm1169_vm1, %v6576_v15, -inf }
 0xc5f   : > { %4957 = vpow2.f32 %v2960_v25  ;;  %v2941_v22 = vsub.f32 %v2778_v27, %v2909_v10  ;;  %v2867_v25 = vadd.f32 %v4434_v4, %v6964_v23  ;;  %v2962_v37 = vmul.f32 1.442695, %v2940_v55 }
 0xc60   : > { %v2984_v48 = vpop.xlane.xlu0 %2983  ;;  %v2856_v19 = vadd.f32 %v6965_v35, %v2855_v24  ;;  %v2913_v24 = vsel %vm1169_vm1, %v2859_v61, -inf }
 0xc61   : > { %4959 = vrcp.f32 %v2984_v48  ;;  %v2964_v6 = vmul.f32 1.442695, %v2941_v22  ;;  %v2919_v48 = vsel %vm1169_vm1, %v2867_v25, -inf }
 0xc62   : > { %v2987_v57 = vpop.xlane.xlu1 %2986  ;;  %v2910_v22 = vsel %vm1169_vm1, %v2856_v19, -inf }
 0xc63   : > { %4961 = vrcp.f32 %v2987_v57 }
 0xc64   : > { %4963 = vpow2.f32 %v2964_v6 }
 0xc65   : > { %4965 = vpow2.f32 %v2962_v37 }
 0xc67   : > { %v6584_v14 = vpop.eup %4955 }
 0xc68   : > { %v2994_v8 = vsel %vm1169_vm1, %v6584_v14, 0.0 }
 0xc69   : > { %v6591_v3 = vpop.eup %4957  ;;  %2995 = vadd.xlane.f32.xlu0 %v2994_v8  ;;  %v2925_v8 = vsel %vm1169_vm1, %v6582_v46, -inf }
 0xc6a   : > { %v2997_v10 = vsel %vm1169_vm1, %v6591_v3, 0.0 }
 0xc6b   : > { %2998 = vadd.xlane.f32.xlu1 %v2997_v10  ;;  %v4960_v27 = vpop.eup %4959 }
 0xc6c   : > { %v3046_v2 = vmul.f32 %v4960_v27, %v6547_v63 }
 0xc6d   : > { %2917 = vmax.xlane.f32.xlu0 %v2916_v26  ;;  %v4962_v60 = vpop.eup %4961 }
 0xc6e   : > { %v3047_v4 = vmul.f32 %v4962_v60, %v6550_v17  ;;  %v6607_v6 = vpop.eup %4963  ;;  %v2922_v17 = vsel %vm1169_vm1, %v6578_v7, -inf }
 0xc6f   : > { %2920 = vmax.xlane.f32.xlu1 %v2919_v48  ;;  %v3003_v63 = vsel %vm1169_vm1, %v6607_v6, 0.0  ;;  %v6616_v56 = vpop.eup %4965 }
 0xc70   : > { %v3062_v57 = vpack.c.bf16 %v3047_v4, %v3046_v2  ;;  %v3000_v55 = vsel %vm1169_vm1, %v6616_v56, 0.0 }
 0xc71   : > { %2911 = vmax.xlane.f32.xlu0 %v2910_v22 }
 0xc72   : > { %4447 = vmatprep.mubr.msk.bf16.mxu0 %vm1169_vm1, %v3062_v57 }
 0xc73   : > { %2914 = vmax.xlane.f32.xlu1 %v2913_v24 }
 0xc75   : > { %2929 = vmax.xlane.f32.xlu0 %v2928_v51 }
 0xc77   : > { %3004 = vadd.xlane.f32.xlu1 %v3003_v63 }
 0xc79   : > { %2923 = vmax.xlane.f32.xlu0 %v2922_v17 }
 0xc7d   : > { %3001 = vadd.xlane.f32.xlu0 %v3000_v55 }
 0xc88   : > { %3072 = vrot.lane.b32.xlu1 %v5473_v58, %s5077_s18  ;;  %v2990_v58 = vpop.xlane.xlu0 %2989 }
 0xc93   : > { %3070 = vrot.lane.b32.xlu0 %v5475_v40, %s5077_s18  ;;  %v2993_v40 = vpop.xlane.xlu1 %2992 }
 0xc97   : > { %3074 = vrot.lane.b32.xlu0 %v5485_v41, %s5077_s18 }
 0xc9b   : > { %3076 = vrot.lane.b32.xlu0 %v5483_v45, %s5077_s18 }
 0xcac   : > { %2932 = vmax.xlane.f32.xlu1 %v2931_v39 }
 0xcb0   : > { %2926 = vmax.xlane.f32.xlu1 %v2925_v8 }
 0xcc1   : > { %3159 = vrot.lane.b32.xlu1 %v5493_v30, %s5077_s18 }
 0xcc5   : > { %3161 = vrot.lane.b32.xlu1 %v5491_v29, %s5077_s18 }
 0xcf6   : > { %v2996_v41 = vpop.xlane.xlu0 %2995 }
 0xcf8   : > { %v2999_v23 = vpop.xlane.xlu1 %2998 }
 0xcfa   : > { %v2918_v10 = vpop.xlane.xlu0 %2917 }
 0xcfb   : > { %v2944_v45 = vsub.f32 %v2864_v5, %v2918_v10 }
 0xcfc   : > { %v2921_v37 = vpop.xlane.xlu1 %2920 }
 0xcfd   : > { %v2970_v27 = vmul.f32 1.442695, %v2944_v45  ;;  %v2945_v35 = vsub.f32 %v2867_v25, %v2921_v37 }
 0xcfe   : > { %v2912_v26 = vpop.xlane.xlu0 %2911 }
 0xcff   : > { %4967 = vpow2.f32 %v2970_v27  ;;  %v2942_v60 = vsub.f32 %v2856_v19, %v2912_v26  ;;  %v2972_v48 = vmul.f32 1.442695, %v2945_v35 }
 0xd00   : > { %v2915_v11 = vpop.xlane.xlu1 %2914 }
 0xd01   : > { %v2966_v2 = vmul.f32 1.442695, %v2942_v60  ;;  %v2943_v4 = vsub.f32 %v2859_v61, %v2915_v11 }
 0xd02   : > { %v2930_v30 = vpop.xlane.xlu0 %2929 }
 0xd03   : > { %4969 = vpow2.f32 %v2966_v2  ;;  %v2948_v29 = vsub.f32 %v6576_v15, %v2930_v30  ;;  %v2968_v22 = vmul.f32 1.442695, %v2943_v4 }
 0xd04   : > { %4971 = vpow2.f32 %v2972_v48  ;;  %v3005_v19 = vpop.xlane.xlu1 %3004 }
 0xd05   : > { %v2978_v57 = vmul.f32 1.442695, %v2948_v29 }
 0xd06   : > { %v2924_v24 = vpop.xlane.xlu0 %2923 }
 0xd07   : > { %4973 = vpow2.f32 %v2978_v57  ;;  %v2946_v5 = vsub.f32 %v6578_v7, %v2924_v24 }
 0xd08   : > { %4975 = vpow2.f32 %v2968_v22  ;;  %v3073_v39 = vpop.permute.xlu1 %3072 }
 0xd09   : > { %v6638_v51 = vpop.eup %4967  ;;  %v2974_v25 = vmul.f32 1.442695, %v2946_v5 }
 0xd0a   : > { %v3002_v63 = vpop.xlane.xlu0 %3001  ;;  %v3012_v61 = vsel %vm1169_vm1, %v6638_v51, 0.0 }
 0xd0b   : > { %4977 = vpow2.f32 %v2974_v25  ;;  %3013 = vadd.xlane.f32.xlu1 %v3012_v61 }
 0xd0c   : > { %4979 = vrcp.f32 %v2993_v40 }
 0xd0d   : > { %v6642_v15 = vpop.eup %4969  ;;  %4981 = vrcp.f32 %v2999_v23 }
 0xd0e   : > { %4983 = vrcp.f32 %v2990_v58  ;;  %v3071_v17 = vpop.permute.xlu0 %3070  ;;  %v3006_v7 = vsel %vm1169_vm1, %v6642_v15, 0.0  ;;  %v6646_v55 = vpop.eup %4971 }
 0xd0f   : > { %4985 = vrcp.f32 %v2996_v41  ;;  %3007 = vadd.xlane.f32.xlu1 %v3006_v7  ;;  %4439 = vmatprep.subr.bf16.mxu0 %v3071_v17  ;;  %v3015_v40 = vsel %vm1169_vm1, %v6646_v55, 0.0 }
 0xd10   : > { %4440 = vmatpush3.bf16.msra.mxu0 %v3071_v17  ;;  %4987 = vrcp.f32 %v3002_v63 }
 0xd11   : > { %v6648_v8 = vpop.eup %4973  ;;  %4441 = vmatprep.subr.bf16.mxu0 %v3073_v39  ;;  %4989 = vrcp.f32 %v3005_v19 }
 0xd12   : > { %v3075_v10 = vpop.permute.xlu0 %3074  ;;  %v3024_v58 = vsel %vm1169_vm1, %v6648_v8, 0.0  ;;  %v6654_v23 = vpop.eup %4975 }
 0xd13   : > { %3016 = vadd.xlane.f32.xlu1 %v3015_v40  ;;  %3025 = vadd.xlane.f32.xlu0 %v3024_v58  ;;  %v3009_v37 = vsel %vm1169_vm1, %v6654_v23, 0.0  ;;  %v6969_v40 = vpack.i.bf16 %v6439_v59, %v6435_v21 }
 0xd14   : > { %4442 = vmatpush3.bf16.msra.mxu0 %v3073_v39 }
 0xd15   : > { %v6656_v41 = vpop.eup %4977  ;;  %4443 = vmatprep.subr.bf16.mxu0 %v3075_v10 }
 0xd16   : > { %v4980_v45 = vpop.eup %4979  ;;  %v3018_v27 = vsel %vm1169_vm1, %v6656_v41, 0.0  ;;  %v3077_v60 = vpop.permute.xlu0 %3076 }
 0xd17   : > { %v4982_v35 = vpop.eup %4981  ;;  %3010 = vadd.xlane.f32.xlu1 %v3009_v37  ;;  %3019 = vadd.xlane.f32.xlu0 %v3018_v27  ;;  %v3049_v48 = vmul.f32 %v4980_v45, %v6568_v0 }
 0xd18   : > { %v4984_v26 = vpop.eup %4983  ;;  %4444 = vmatpush3.bf16.msra.mxu0 %v3075_v10  ;;  %v3051_v2 = vmul.f32 %v4982_v35, %v6591_v3  ;;  %v6968_v10 = vpack.i.bf16 %v6109_v18, %v6103_v47 }
 0xd19   : > { %v4986_v11 = vpop.eup %4985  ;;  %4445 = vmatprep.subr.bf16.mxu0 %v3077_v60  ;;  %v3048_v4 = vmul.f32 %v4984_v26, %v6558_v13 }
 0xd1a   : > { %v3050_v30 = vmul.f32 %v4986_v11, %v6584_v14  ;;  %v4988_v22 = vpop.eup %4987 }
 0xd1b   : > { %v3063_v29 = vpack.c.bf16 %v3049_v48, %v3048_v4  ;;  %v4990_v24 = vpop.eup %4989  ;;  %v3052_v5 = vmul.f32 %v4988_v22, %v6616_v56 }
 0xd1c   : > { %4446 = vmatpush3.bf16.msra.mxu0 %v3077_v60  ;;  %v3064_v57 = vpack.c.bf16 %v3051_v2, %v3050_v30  ;;  %v3053_v0 = vmul.f32 %v4990_v24, %v6607_v6 }
 0xd1e   : > { %v3065_v25 = vpack.c.bf16 %v3053_v0, %v3052_v5 }
 0xd1f   : > { %4448 = vmatmul.mubr.msk.bf16.vlgmr.msra.gmra.mrb[56].mxu0 %vm1169_vm1, %v3063_v29 }
 0xd20   : > { %4451 = vmatprep.mubr.msk.bf16.mxu0 %vm1169_vm1, %v3064_v57 }
 0xd27   : > { %4452 = vmatmul.mubr.msk.bf16.gmra.mrb[60].mxu0 %vm1169_vm1, %v3065_v25 }
 0xd39   : > { %v2933_v3 = vpop.xlane.xlu1 %2932 }
 0xd3a   : > { %v2949_v13 = vsub.f32 %v6580_v12, %v2933_v3 }
 0xd3c   : > { %v2980_v19 = vmul.f32 1.442695, %v2949_v13 }
 0xd3d   : > { %v2927_v14 = vpop.xlane.xlu1 %2926 }
 0xd3e   : > { %4991 = vpow2.f32 %v2980_v19  ;;  %v2947_v63 = vsub.f32 %v6582_v46, %v2927_v14  ;;  %v6967_v46 = vpack.i.bf16 %v6105_v28, %v6101_v44 }
 0xd40   : > { %v2976_v61 = vmul.f32 1.442695, %v2947_v63 }
 0xd41   : > { %v3160_v17 = vpop.permute.xlu1 %3159 }
 0xd42   : > { %4993 = vpow2.f32 %v2976_v61  ;;  %4455 = vmatprep.subr.bf16.mxu1 %v3160_v17  ;;  %v6971_v61 = vpack.i.bf16 %v6131_v36, %v6127_v54  ;;  %v6974_v54 = vpack.i.bf16 %v6465_v20, %v6459_v38  ;;  %v6976_v36 = vpack.i.bf16 %v6199_v53, %v6193_v42  ;;  %v6979_v38 = vld [vmem:[#allocation24_spill] sm:$0xff]  ;;  %v6981_v20 = vld [vmem:[#allocation22_spill] sm:$0xff] }
 0xd43   : > { %4456 = vmatpush3.bf16.msra.mxu1 %v3160_v17 }
 0xd45   : > { %v3162_v7 = vpop.permute.xlu1 %3161 }
 0xd46   : > { %4457 = vmatprep.subr.bf16.mxu1 %v3162_v7 }
 0xd47   : > { %4458 = vmatpush3.bf16.msra.mxu1 %v3162_v7  ;;  %v6972_v7 = vpack.i.bf16 %v6135_v32, %v6129_v50  ;;  %v6975_v50 = vpack.i.bf16 %v6195_v16, %v6189_v43  ;;  %v6977_v32 = vpack.i.bf16 %v6527_v49, %v6523_v1  ;;  %v6984_v16 = vld [vmem:[#allocation23_spill] sm:$0xff] }
 0xd48   : > { %v4992_v6 = vpop.eup %4991 }
 0xd49   : > { %v3027_v56 = vsel %vm1169_vm1, %v4992_v6, 0.0 }
 0xd4a   : > { %3028 = vadd.xlane.f32.xlu0 %v3027_v56 }
 0xd4c   : > { %v4994_v39 = vpop.eup %4993 }
 0xd4d   : > { %v3021_v12 = vsel %vm1169_vm1, %v4994_v39, 0.0 }
 0xd4e   : > { %3022 = vadd.xlane.f32.xlu1 %v3021_v12 }
 0xd5f   : > { %3165 = vrot.lane.b32.xlu1 %v5501_v33, %s5077_s18  ;;  %v6970_v33 = vpack.i.bf16 %v6443_v62, %v6437_v52 }
 0xd60   : > { %3163 = vrot.lane.b32.xlu0 %v5503_v34, %s5077_s18  ;;  %v4721_v34 = vld [vmem:[%s6910_s5] sm:$0xff]   ;;  %s3945_s18 = sshll.u32 (%p5174_p6), %s3669_s16, 3 }
 0xd61   : > { %4471 = vmatprep.subr.bf16.mxu0 %v4721_v34  ;;  %s3673_s23 = scalar_lea.vmem (%p5174_p6), %s6913_s8, %s3945_s18 }
 0xd62   : > { %4472 = vmatpush3.bf16.msra.mxu0 %v4721_v34 }
 0xd63   : > { %4599 = vrot.lane.b32.xlu1 %v6967_v46, %s5078_s27  ;;  %v6973_v46 = vpack.i.bf16 %v6461_v9, %v6457_v31  ;;  %v6978_v31 = vld [vmem:[#allocation25_spill] sm:$0xff] }
 0xd64   : > { %4594 = vrot.lane.b32.xlu0 %v6968_v10, %s5078_s27  ;;  %v6980_v9 = vpack.i.bf16 %v6978_v31, %v6979_v38  ;;  %v6982_v10 = vld [vmem:[#allocation20_spill] sm:$0xff]  ;;  %v6994_v31 = vld [vmem:[#allocation9_spill] sm:$0xff] }
 0xd65   : > { %v6983_v43 = vpack.i.bf16 %v6981_v20, %v6982_v10 }
 0xd67   : > { %4609 = vrot.lane.b32.xlu1 %v6969_v40, %s5079_s22  ;;  %v6985_v40 = vld [vmem:[#allocation21_spill] sm:$0xff] }
 0xd68   : > { %4604 = vrot.lane.b32.xlu0 %v6970_v33, %s5079_s22  ;;  %v6986_v42 = vpack.i.bf16 %v6984_v16, %v6985_v40 }
 0xd98   : > { %v3014_v44 = vpop.xlane.xlu1 %3013 }
 0xd9c   : > { %v3008_v47 = vpop.xlane.xlu1 %3007 }
 0xd9d   : > { %4995 = vrcp.f32 %v3008_v47 }
 0xda0   : > { %v3017_v28 = vpop.xlane.xlu1 %3016  ;;  %v3026_v62 = vpop.xlane.xlu0 %3025 }
 0xda4   : > { %v3011_v18 = vpop.xlane.xlu1 %3010  ;;  %v3020_v37 = vpop.xlane.xlu0 %3019 }
 0xda5   : > { %4997 = vrcp.f32 %v3011_v18 }
 0xda6   : > { %4999 = vrcp.f32 %v3017_v28 }
 0xda7   : > { %v4996_v58 = vpop.eup %4995  ;;  %5001 = vrcp.f32 %v3014_v44 }
 0xda8   : > { %v3054_v59 = vmul.f32 %v4996_v58, %v6642_v15 }
 0xdaf   : > { %v4998_v21 = vpop.eup %4997 }
 0xdb0   : > { %v3055_v45 = vmul.f32 %v4998_v21, %v6654_v23  ;;  %v5000_v35 = vpop.eup %4999 }
 0xdb1   : > { %v5002_v11 = vpop.eup %5001  ;;  %v3057_v15 = vmul.f32 %v5000_v35, %v6646_v55  ;;  %v6989_v35 = vld [vmem:[#allocation6_spill] sm:$0xff] }
 0xdb2   : > { %v3066_v52 = vpack.c.bf16 %v3055_v45, %v3054_v59  ;;  %v3056_v48 = vmul.f32 %v5002_v11, %v6638_v51  ;;  %v4722_v51 = vld [vmem:[%s6910_s5 + $0x8] sm:$0xff]   ;;  %v6987_v45 = vld [vmem:[#allocation7_spill] sm:$0xff] }
 0xdb3   : > { %4473 = vmatprep.subr.bf16.mxu0 %v4722_v51 }
 0xdb4   : > { %4463 = vmatprep.mubr.msk.bf16.mxu1 %vm1169_vm1, %v3066_v52  ;;  %v3067_v2 = vpack.c.bf16 %v3057_v15, %v3056_v48  ;;  %4474 = vmatpush3.bf16.msra.mxu0 %v4722_v51 }
 0xdd7   : > { %v3029_v27 = vpop.xlane.xlu0 %3028 }
 0xdd8   : > { %5003 = vrcp.f32 %v3029_v27 }
 0xdd9   : > { %5005 = vrcp.f32 %v3020_v37 }
 0xdda   : > { %5007 = vrcp.f32 %v3026_v62  ;;  %v6988_v62 = vld [vmem:[#allocation5_spill] sm:$0xff] }
 0xddb   : > { %v3023_v26 = vpop.xlane.xlu1 %3022  ;;  %v3164_v60 = vpop.permute.xlu0 %3163 }
 0xddc   : > { %5009 = vrcp.f32 %v3023_v26  ;;  %4459 = vmatprep.subr.bf16.mxu1 %v3164_v60 }
 0xddd   : > { %4460 = vmatpush3.bf16.msra.mxu1 %v3164_v60  ;;  %v6990_v60 = vld [vmem:[#allocation4_spill] sm:$0xff] }
 0xddf   : > { %v3166_v23 = vpop.permute.xlu1 %3165  ;;  %v4595_v33 = vpop.permute.xlu0 %4594 }
 0xde0   : > { %4461 = vmatprep.subr.bf16.mxu1 %v3166_v23  ;;  %v4597_v1 = vunpack.i.h.bf16 %v4595_v33  ;;  %v4596_v49 = vunpack.i.l.bf16 %v4595_v33 }
 0xde1   : > { %4462 = vmatpush3.bf16.msra.mxu1 %v3166_v23 }
 0xde2   : > { %v5004_v4 = vpop.eup %5003  ;;  %v3441_v52 = vsel %vm978_vm0, %v6987_v45, %v4597_v1  ;;  %v3440_v37 = vsel %vm978_vm0, %v6988_v62, %v4596_v49 }
 0xde3   : > { %v5006_v30 = vpop.eup %5005  ;;  %v3061_v57 = vmul.f32 %v5004_v4, %v4992_v6  ;;  %v4600_v53 = vpop.permute.xlu1 %4599 }
 0xde4   : > { %4464 = vmatmul.mubr.msk.bf16.vlgmr.msra.gmra.mrb[72].mxu1 %vm1169_vm1, %v3067_v2  ;;  %v5008_v29 = vpop.eup %5007  ;;  %v3058_v24 = vmul.f32 %v5006_v30, %v6656_v41  ;;  %v4605_v44 = vpop.permute.xlu0 %4604  ;;  %v4602_v47 = vunpack.i.h.bf16 %v4600_v53  ;;  %v4601_v28 = vunpack.i.l.bf16 %v4600_v53 }
 0xde5   : > { %v3060_v0 = vmul.f32 %v5008_v29, %v6648_v8  ;;  %v4607_v21 = vunpack.i.h.bf16 %v4605_v44  ;;  %v4606_v59 = vunpack.i.l.bf16 %v4605_v44 }
 0xde6   : > { %v5010_v22 = vpop.eup %5009  ;;  %v3443_v26 = vsel %vm978_vm0, %v6989_v35, %v4602_v47  ;;  %v3442_v11 = vsel %vm978_vm0, %v6990_v60, %v4601_v28  ;;  %v6998_v60 = vld [vmem:[#allocation29_spill] sm:$0xff] }
 0xde7   : > { %v3059_v5 = vmul.f32 %v5010_v22, %v4994_v39  ;;  %v3069_v55 = vpack.c.bf16 %v3061_v57, %v3060_v0  ;;  %v4610_v34 = vpop.permute.xlu1 %4609  ;;  %v3457_v22 = vsel %vm3456_vm2, %v3440_v37, %v4606_v59  ;;  %v3458_v57 = vsel %vm3456_vm2, %v3441_v52, %v4607_v21  ;;  %v6995_v37 = vld [vmem:[#allocation28_spill] sm:$0xff] }
 0xde8   : > { %v4612_v18 = vunpack.i.h.bf16 %v4610_v34  ;;  %v4611_v58 = vunpack.i.l.bf16 %v4610_v34 }
 0xde9   : > { %v3068_v25 = vpack.c.bf16 %v3059_v5, %v3058_v24 }
 0xdea   : > { %v3459_v2 = vsel %vm3456_vm2, %v3442_v11, %v4611_v58  ;;  %v3460_v4 = vsel %vm3456_vm2, %v3443_v26, %v4612_v18  ;;  %v6999_v11 = vld [vmem:[#allocation27_spill] sm:$0xff] }
 0xdeb   : > { %4467 = vmatprep.mubr.msk.bf16.mxu1 %vm1169_vm1, %v3068_v25 }
 0xdec   : > { %4468 = vmatmul.mubr.msk.bf16.gmra.mrb[76].mxu1 %vm1169_vm1, %v3069_v55 }
 0xdf2   : > { %v4449_v3 = vpop.f32.mrb[56].mxu0 }
 0xdf3   : > { %v3128_v13 = vpop.f32.mrb[57].mxu0 }
 0xdf4   : > { %v4450_v19 = vpop.f32.mrb[58].mxu0 }
 0xdf5   : > { %v4618_v14 = vpack.i.bf16 %v4450_v19, %v4449_v3  ;;  %v3131_v41 = vpop.f32.mrb[59].mxu0 }
 0xdf6   : > { %v4613_v63 = vpack.i.bf16 %v3131_v41, %v3128_v13 }
 0xdf7   : > { %4619 = vrot.lane.b32.xlu1 %v4618_v14, %s5080_s21 }
 0xdf8   : > { %4614 = vrot.lane.b32.xlu0 %v4613_v63, %s5080_s21 }
 0xdfa   : > { %v4453_v8 = vpop.f32.mrb[60].mxu0 }
 0xdfb   : > { %4629 = vrot.lane.b32.xlu1 %v6971_v61, %s5078_s27  ;;  %v3144_v17 = vpop.f32.mrb[61].mxu0 }
 0xdfc   : > { %4624 = vrot.lane.b32.xlu0 %v6972_v7, %s5078_s27  ;;  %v4454_v6 = vpop.f32.mrb[62].mxu0 }
 0xdfd   : > { %v4648_v56 = vpack.i.bf16 %v4454_v6, %v4453_v8  ;;  %v3147_v39 = vpop.f32.mrb[63].mxu0 }
 0xdfe   : > { %v4643_v12 = vpack.i.bf16 %v3147_v39, %v3144_v17  ;;  %v6991_v39 = vld [vmem:[#allocation10_spill] sm:$0xff] }
 0xdff   : > { %4639 = vrot.lane.b32.xlu1 %v6973_v46, %s5079_s22  ;;  %v6992_v46 = vld [vmem:[#allocation8_spill] sm:$0xff] }
 0xe00   : > { %4634 = vrot.lane.b32.xlu0 %v6974_v54, %s5079_s22 }
 0xe03   : > { %4649 = vrot.lane.b32.xlu1 %v4648_v56, %s5080_s21 }
 0xe04   : > { %4644 = vrot.lane.b32.xlu0 %v4643_v12, %s5080_s21 }
 0xe07   : > { %4659 = vrot.lane.b32.xlu1 %v6975_v50, %s5078_s27 }
 0xe08   : > { %4654 = vrot.lane.b32.xlu0 %v6976_v36, %s5078_s27  ;;  %v6993_v36 = vld [vmem:[#allocation11_spill] sm:$0xff] }
 0xe0b   : > { %4669 = vrot.lane.b32.xlu1 %v6977_v32, %s5079_s22 }
 0xe0c   : > { %4664 = vrot.lane.b32.xlu0 %v6980_v9, %s5079_s22 }
 0xe0f   : > { %4679 = vrot.lane.b32.xlu1 %v6983_v43, %s5078_s27 }
 0xe10   : > { %4674 = vrot.lane.b32.xlu0 %v6986_v42, %s5078_s27 }
 0xe69   : > { %v4620_v27 = vpop.permute.xlu1 %4619 }
 0xe6a   : > { %v4622_v15 = vunpack.i.h.bf16 %v4620_v27  ;;  %v4621_v23 = vunpack.i.l.bf16 %v4620_v27  ;;  %v4615_v48 = vpop.permute.xlu0 %4614  ;;  %v6996_v27 = vld [vmem:[#allocation26_spill] sm:$0xff] }
 0xe6b   : > { %v4617_v30 = vunpack.i.h.bf16 %v4615_v48  ;;  %v4616_v29 = vunpack.i.l.bf16 %v4615_v48  ;;  %v6997_v35 = vpack.i.bf16 %v6995_v37, %v6996_v27  ;;  %v7007_v37 = vld [vmem:[#allocation19_spill] sm:$0xff] }
 0xe6c   : > { %v3477_v24 = vsel %vm3473_vm3, %v3460_v4, %v4622_v15  ;;  %v3476_v5 = vsel %vm3473_vm3, %v3459_v2, %v4621_v23  ;;  %v7000_v15 = vpack.i.bf16 %v6998_v60, %v6999_v11 }
 0xe6d   : > { %v3491_v0 = vpack.c.bf16 %v3477_v24, %v3476_v5  ;;  %v3474_v25 = vsel %vm3473_vm3, %v3457_v22, %v4616_v29  ;;  %v3475_v55 = vsel %vm3473_vm3, %v3458_v57, %v4617_v30  ;;  %v4630_v51 = vpop.permute.xlu1 %4629 }
 0xe6e   : > { %v3490_v3 = vpack.c.bf16 %v3475_v55, %v3474_v25  ;;  %v4625_v13 = vpop.permute.xlu0 %4624  ;;  %v4632_v19 = vunpack.i.h.bf16 %v4630_v51  ;;  %v4631_v14 = vunpack.i.l.bf16 %v4630_v51 }
 0xe6f   : > { %v4627_v63 = vunpack.i.h.bf16 %v4625_v13  ;;  %v4626_v8 = vunpack.i.l.bf16 %v4625_v13 }
 0xe70   : > { %4475 = vmatprep.mubr.msk.bf16.mxu0 %vm3521_vm4, %v3490_v3  ;;  %v3447_v12 = vsel %vm978_vm0, %v6991_v39, %v4632_v19  ;;  %v3446_v54 = vsel %vm978_vm0, %v6992_v46, %v4631_v14 }
 0xe71   : > { %v4640_v41 = vpop.permute.xlu1 %4639  ;;  %4476 = vmatmul.mubr.msk.bf16.vlgmr.msra.gmra.mrb[64].mxu0 %vm3521_vm4, %v3491_v0  ;;  %v3445_v32 = vsel %vm978_vm0, %v6993_v36, %v4627_v63  ;;  %v3444_v38 = vsel %vm978_vm0, %v6994_v31, %v4626_v8  ;;  %v7002_v8 = vld [vmem:[#allocation12_spill] sm:$0xff] }
 0xe72   : > { %v4635_v61 = vpop.permute.xlu0 %4634  ;;  %v4642_v17 = vunpack.i.h.bf16 %v4640_v41  ;;  %v4641_v7 = vunpack.i.l.bf16 %v4640_v41  ;;  %v7001_v41 = vld [vmem:[#allocation14_spill] sm:$0xff] }
 0xe73   : > { %v4637_v6 = vunpack.i.h.bf16 %v4635_v61  ;;  %v4636_v56 = vunpack.i.l.bf16 %v4635_v61 }
 0xe74   : > { %v3463_v43 = vsel %vm3456_vm2, %v3446_v54, %v4641_v7  ;;  %v3464_v16 = vsel %vm3456_vm2, %v3447_v12, %v4642_v17  ;;  %v7003_v17 = vld [vmem:[#allocation15_spill] sm:$0xff] }
 0xe75   : > { %v4650_v50 = vpop.permute.xlu1 %4649  ;;  %v3461_v53 = vsel %vm3456_vm2, %v3444_v38, %v4636_v56  ;;  %v3462_v33 = vsel %vm3456_vm2, %v3445_v32, %v4637_v6  ;;  %v7004_v56 = vld [vmem:[#allocation13_spill] sm:$0xff] }
 0xe76   : > { %v4652_v9 = vunpack.i.h.bf16 %v4650_v50  ;;  %v4651_v20 = vunpack.i.l.bf16 %v4650_v50  ;;  %v4645_v10 = vpop.permute.xlu0 %4644 }
 0xe77   : > { %v4647_v40 = vunpack.i.h.bf16 %v4645_v10  ;;  %v4646_v42 = vunpack.i.l.bf16 %v4645_v10 }
 0xe78   : > { %v3481_v34 = vsel %vm3473_vm3, %v3464_v16, %v4652_v9  ;;  %v3480_v1 = vsel %vm3473_vm3, %v3463_v43, %v4651_v20 }
 0xe79   : > { %v3493_v49 = vpack.c.bf16 %v3481_v34, %v3480_v1  ;;  %v3478_v44 = vsel %vm3473_vm3, %v3461_v53, %v4646_v42  ;;  %v3479_v47 = vsel %vm3473_vm3, %v3462_v33, %v4647_v40  ;;  %v4660_v30 = vpop.permute.xlu1 %4659 }
 0xe7a   : > { %v3492_v28 = vpack.c.bf16 %v3479_v47, %v3478_v44  ;;  %v4655_v29 = vpop.permute.xlu0 %4654  ;;  %v4662_v24 = vunpack.i.h.bf16 %v4660_v30  ;;  %v4661_v5 = vunpack.i.l.bf16 %v4660_v30 }
 0xe7b   : > { %v4657_v0 = vunpack.i.h.bf16 %v4655_v29  ;;  %v4656_v55 = vunpack.i.l.bf16 %v4655_v29 }
 0xe7c   : > { %4479 = vmatprep.mubr.msk.bf16.mxu0 %vm3521_vm4, %v3492_v28  ;;  %v3451_v63 = vsel %vm978_vm0, %v7001_v41, %v4662_v24  ;;  %v3450_v61 = vsel %vm978_vm0, %v7002_v8, %v4661_v5 }
 0xe7d   : > { %4480 = vmatmul.mubr.msk.bf16.gmra.mrb[68].mxu0 %vm3521_vm4, %v3493_v49  ;;  %v4670_v22 = vpop.permute.xlu1 %4669  ;;  %v3449_v7 = vsel %vm978_vm0, %v7003_v17, %v4657_v0  ;;  %v3448_v39 = vsel %vm978_vm0, %v7004_v56, %v4656_v55  ;;  %v3931_v55 = vld [vmem:[%s6911_s6] ss:$0 sm:$0xff] }
 0xe7e   : > { %v4665_v57 = vpop.permute.xlu0 %4664  ;;  %v4671_v51 = vunpack.i.l.bf16 %v4670_v22  ;;  %v4672_v13 = vunpack.i.h.bf16 %v4670_v22 }
 0xe7f   : > { %v4666_v19 = vunpack.i.l.bf16 %v4665_v57  ;;  %v4667_v14 = vunpack.i.h.bf16 %v4665_v57 }
 0xe80   : > { %v3467_v12 = vsel %vm3456_vm2, %v3450_v61, %v4671_v51  ;;  %v3468_v36 = vsel %vm3456_vm2, %v3451_v63, %v4672_v13 }
 0xe81   : > { %v4680_v25 = vpop.permute.xlu1 %4679  ;;  %v3465_v32 = vsel %vm3456_vm2, %v3448_v39, %v4666_v19  ;;  %v3466_v9 = vsel %vm3456_vm2, %v3449_v7, %v4667_v14 }
 0xe82   : > { %v4675_v3 = vpop.permute.xlu0 %4674  ;;  %v4682_v20 = vunpack.i.h.bf16 %v4680_v25  ;;  %v4681_v16 = vunpack.i.l.bf16 %v4680_v25 }
 0xe83   : > { %v4677_v34 = vunpack.i.h.bf16 %v4675_v3  ;;  %v4676_v1 = vunpack.i.l.bf16 %v4675_v3 }
 0xe85   : > { %v3453_v27 = vsel %vm978_vm0, %v7007_v37, %v4677_v34 }
 0xeb7   : > { %v4465_v18 = vpop.f32.mrb[72].mxu1 }
 0xeb8   : > { %v3217_v58 = vpop.f32.mrb[73].mxu1 }
 0xeb9   : > { %v4466_v21 = vpop.f32.mrb[74].mxu1 }
 0xeba   : > { %v4683_v59 = vpack.i.bf16 %v4466_v21, %v4465_v18  ;;  %v3220_v45 = vpop.f32.mrb[75].mxu1  ;;  %v7005_v21 = vld [vmem:[#allocation18_spill] sm:$0xff] }
 0xebb   : > { %v4688_v52 = vpack.i.bf16 %v3220_v45, %v3217_v58  ;;  %v7006_v45 = vld [vmem:[#allocation16_spill] sm:$0xff] }
 0xebc   : > { %4684 = vrot.lane.b32.xlu1 %v4683_v59, %s5080_s21  ;;  %v3455_v59 = vsel %vm978_vm0, %v7005_v21, %v4682_v20 }
 0xebd   : > { %4689 = vrot.lane.b32.xlu0 %v4688_v52, %s5080_s21  ;;  %v3454_v52 = vsel %vm978_vm0, %v7006_v45, %v4681_v16 }
 0xebf   : > { %v4469_v62 = vpop.f32.mrb[76].mxu1 }
 0xec0   : > { %4699 = vrot.lane.b32.xlu1 %v6997_v35, %s5079_s22  ;;  %v3233_v26 = vpop.f32.mrb[77].mxu1  ;;  %v7008_v35 = vld [vmem:[#allocation17_spill] sm:$0xff] }
 0xec1   : > { %4694 = vrot.lane.b32.xlu0 %v7000_v15, %s5079_s22  ;;  %v4470_v23 = vpop.f32.mrb[78].mxu1 }
 0xec2   : > { %v4708_v48 = vpack.i.bf16 %v4470_v23, %v4469_v62  ;;  %v3236_v2 = vpop.f32.mrb[79].mxu1 }
 0xec3   : > { %v4703_v4 = vpack.i.bf16 %v3236_v2, %v3233_v26  ;;  %v3452_v26 = vsel %vm978_vm0, %v7008_v35, %v4676_v1 }
 0xec4   : > { %4709 = vrot.lane.b32.xlu1 %v4708_v48, %s5080_s21 }
 0xec5   : > { %4704 = vrot.lane.b32.xlu0 %v4703_v4, %s5080_s21 }
 0xf2e   : > { %v4685_v6 = vpop.permute.xlu1 %4684 }
 0xf2f   : > { %v4687_v46 = vunpack.i.h.bf16 %v4685_v6  ;;  %v4686_v54 = vunpack.i.l.bf16 %v4685_v6  ;;  %v4690_v50 = vpop.permute.xlu0 %4689 }
 0xf30   : > { %v4692_v31 = vunpack.i.h.bf16 %v4690_v50  ;;  %v4691_v38 = vunpack.i.l.bf16 %v4690_v50 }
 0xf31   : > { %v3485_v10 = vsel %vm3473_vm3, %v3468_v36, %v4687_v46  ;;  %v3484_v43 = vsel %vm3473_vm3, %v3467_v12, %v4686_v54 }
 0xf32   : > { %v3495_v40 = vpack.c.bf16 %v3485_v10, %v3484_v43  ;;  %v3482_v42 = vsel %vm3473_vm3, %v3465_v32, %v4691_v38  ;;  %v3483_v53 = vsel %vm3473_vm3, %v3466_v9, %v4692_v31  ;;  %v4700_v33 = vpop.permute.xlu1 %4699 }
 0xf33   : > { %v3494_v49 = vpack.c.bf16 %v3483_v53, %v3482_v42  ;;  %v4695_v44 = vpop.permute.xlu0 %4694  ;;  %v4702_v47 = vunpack.i.h.bf16 %v4700_v33  ;;  %v4701_v28 = vunpack.i.l.bf16 %v4700_v33 }
 0xf34   : > { %v4697_v18 = vunpack.i.h.bf16 %v4695_v44  ;;  %v4696_v58 = vunpack.i.l.bf16 %v4695_v44 }
 0xf35   : > { %4483 = vmatprep.mubr.msk.bf16.mxu0 %vm3521_vm4, %v3494_v49  ;;  %v3472_v23 = vsel %vm3456_vm2, %v3455_v59, %v4702_v47  ;;  %v3471_v48 = vsel %vm3456_vm2, %v3454_v52, %v4701_v28 }
 0xf36   : > { %v4710_v62 = vpop.permute.xlu1 %4709  ;;  %4484 = vmatmul.mubr.msk.bf16.gmra.mrb[72].mxu0 %vm3521_vm4, %v3495_v40  ;;  %v3469_v30 = vsel %vm3456_vm2, %v3452_v26, %v4696_v58  ;;  %v3470_v29 = vsel %vm3456_vm2, %v3453_v27, %v4697_v18 }
 0xf37   : > { %v4712_v60 = vunpack.i.h.bf16 %v4710_v62  ;;  %v4711_v11 = vunpack.i.l.bf16 %v4710_v62  ;;  %v4705_v15 = vpop.permute.xlu0 %4704 }
 0xf38   : > { %v4707_v2 = vunpack.i.h.bf16 %v4705_v15  ;;  %v4706_v4 = vunpack.i.l.bf16 %v4705_v15 }
 0xf39   : > { %v3489_v22 = vsel %vm3473_vm3, %v3472_v23, %v4712_v60  ;;  %v3488_v57 = vsel %vm3473_vm3, %v3471_v48, %v4711_v11 }
 0xf3a   : > { %v3497_v24 = vpack.c.bf16 %v3489_v22, %v3488_v57  ;;  %v3486_v5 = vsel %vm3473_vm3, %v3469_v30, %v4706_v4  ;;  %v3487_v0 = vsel %vm3473_vm3, %v3470_v29, %v4707_v2 }
 0xf3b   : > { %v3496_v25 = vpack.c.bf16 %v3487_v0, %v3486_v5 }
 0xf3d   : > { %4487 = vmatprep.mubr.msk.bf16.mxu0 %vm3521_vm4, %v3496_v25 }
 0xf3e   : > { %4488 = vmatmul.mubr.msk.bf16.gmra.mrb[76].mxu0 %vm3521_vm4, %v3497_v24 }
 0xf44   : > { %v4477_v51 = vpop.f32.mrb[64].mxu0 }
 0xf45   : > { %v3589_v3 = vadd.f32 %v4477_v51, %v3931_v55  ;;  %v3580_v13 = vpop.f32.mrb[65].mxu0 }
 0xf46   : > { %v3581_v19 = vadd.f32 %v3931_v55, %v3580_v13  ;;  %v4478_v14 = vpop.f32.mrb[66].mxu0 }
 0xf47   : > { %3645 = vst [vmem:[%s6843_s17 + $0x10] sm:$0xff] %v3589_v3  ;;  %v3592_v41 = vadd.f32 %v4478_v14, %v3931_v55  ;;  %v3583_v63 = vpop.f32.mrb[67].mxu0 }
 0xf48   : > { %3643 = vst [vmem:[%s6843_s17] sm:$0xff] %v3581_v19  ;;  %v3584_v8 = vadd.f32 %v3931_v55, %v3583_v63 }
 0xf49   : > { %3646 = vst [vmem:[%s6843_s17 + $0x18] sm:$0xff] %v3592_v41 }
 0xf4a   : > { %3644 = vst [vmem:[%s6843_s17 + $0x8] sm:$0xff] %v3584_v8 }
 0xf4e   : > { %v3735_v44 = vld [vmem:[%s6843_s17 + $0x10] sm:$0xff] (%p5174_p6) }
 0xf4f   : > { %v3731_v1 = vld [vmem:[%s6843_s17] sm:$0xff] (%p5174_p6)  ;;  %3736 = vst [vmem:[%s3673_s23 + $0x20] sm:$0xff] (%p5174_p6), %v3735_v44 }
 0xf50   : > { %v4481_v61 = vpop.f32.mrb[68].mxu0  ;;  %v3737_v47 = vld [vmem:[%s6843_s17 + $0x18] sm:$0xff] (%p5174_p6)  ;;  %3732 = vst [vmem:[%s3673_s23] sm:$0xff] (%p5174_p6), %v3731_v1 }
 0xf51   : > { %v3605_v17 = vadd.f32 %v4481_v61, %v3931_v55  ;;  %v3596_v7 = vpop.f32.mrb[69].mxu0  ;;  %v3733_v49 = vld [vmem:[%s6843_s17 + $0x8] sm:$0xff] (%p5174_p6)  ;;  %3738 = vst [vmem:[%s3673_s23 + $0x30] sm:$0xff] (%p5174_p6), %v3737_v47 }
 0xf52   : > { %v3597_v6 = vadd.f32 %v3931_v55, %v3596_v7  ;;  %v4482_v56 = vpop.f32.mrb[70].mxu0  ;;  %3734 = vst [vmem:[%s3673_s23 + $0x10] sm:$0xff] (%p5174_p6), %v3733_v49 }
 0xf53   : > { %3649 = vst [vmem:[%s6843_s17 + $0x30] sm:$0xff] %v3605_v17  ;;  %v3608_v39 = vadd.f32 %v4482_v56, %v3931_v55  ;;  %v3599_v12 = vpop.f32.mrb[71].mxu0 }
 0xf54   : > { %3647 = vst [vmem:[%s6843_s17 + $0x20] sm:$0xff] %v3597_v6  ;;  %v3600_v46 = vadd.f32 %v3931_v55, %v3599_v12 }
 0xf55   : > { %3650 = vst [vmem:[%s6843_s17 + $0x38] sm:$0xff] %v3608_v39 }
 0xf56   : > { %3648 = vst [vmem:[%s6843_s17 + $0x28] sm:$0xff] %v3600_v46 }
 0xf5a   : > { %v3743_v58 = vld [vmem:[%s6843_s17 + $0x30] sm:$0xff] (%p5174_p6) }
 0xf5b   : > { %v3739_v28 = vld [vmem:[%s6843_s17 + $0x20] sm:$0xff] (%p5174_p6)  ;;  %3744 = vst [vmem:[%s3673_s23 + $0x60] sm:$0xff] (%p5174_p6), %v3743_v58 }
 0xf5c   : > { %v3745_v21 = vld [vmem:[%s6843_s17 + $0x38] sm:$0xff] (%p5174_p6)  ;;  %3740 = vst [vmem:[%s3673_s23 + $0x40] sm:$0xff] (%p5174_p6), %v3739_v28 }
 0xf5d   : > { %v3741_v18 = vld [vmem:[%s6843_s17 + $0x28] sm:$0xff] (%p5174_p6)  ;;  %3746 = vst [vmem:[%s3673_s23 + $0x70] sm:$0xff] (%p5174_p6), %v3745_v21 }
 0xf5e   : > { %3742 = vst [vmem:[%s3673_s23 + $0x50] sm:$0xff] (%p5174_p6), %v3741_v18 }
0x1009   : > { %v4485_v54 = vpop.f32.mrb[72].mxu0 }
0x100a   : > { %v3621_v50 = vadd.f32 %v4485_v54, %v3931_v55  ;;  %v3612_v36 = vpop.f32.mrb[73].mxu0 }
0x100b   : > { %v3613_v32 = vadd.f32 %v3931_v55, %v3612_v36  ;;  %v4486_v31 = vpop.f32.mrb[74].mxu0 }
0x100c   : > { %3653 = vst [vmem:[%s6843_s17 + $0x50] sm:$0xff] %v3621_v50  ;;  %v3624_v38 = vadd.f32 %v4486_v31, %v3931_v55  ;;  %v3615_v9 = vpop.f32.mrb[75].mxu0 }
0x100d   : > { %3651 = vst [vmem:[%s6843_s17 + $0x40] sm:$0xff] %v3613_v32  ;;  %v3616_v20 = vadd.f32 %v3931_v55, %v3615_v9 }
0x100e   : > { %3654 = vst [vmem:[%s6843_s17 + $0x58] sm:$0xff] %v3624_v38 }
0x100f   : > { %3652 = vst [vmem:[%s6843_s17 + $0x48] sm:$0xff] %v3616_v20 }
0x1011   : > { %v4489_v10 = vpop.f32.mrb[76].mxu0  ;;  %3665 = sbr.rel (!%p5174_p6) target bundleno = 4128 (0x1020), region = 94 }
0x1012   : > { %v3637_v43 = vadd.f32 %v4489_v10, %v3931_v55  ;;  %v3628_v16 = vpop.f32.mrb[77].mxu0 }
0x1013   : > { %v3629_v40 = vadd.f32 %v3931_v55, %v3628_v16  ;;  %v4490_v42 = vpop.f32.mrb[78].mxu0  ;;  %v3751_v52 = vld [vmem:[%s6843_s17 + $0x50] sm:$0xff] (%p5174_p6) }
0x1014   : > { %3657 = vst [vmem:[%s6843_s17 + $0x70] sm:$0xff] %v3637_v43  ;;  %v3640_v53 = vadd.f32 %v4490_v42, %v3931_v55  ;;  %v3631_v33 = vpop.f32.mrb[79].mxu0  ;;  %v3747_v59 = vld [vmem:[%s6843_s17 + $0x40] sm:$0xff] (%p5174_p6)  ;;  %3752 = vst [vmem:[%s3673_s23 + $0x120] sm:$0xff] (%p5174_p6), %v3751_v52 }
0x1015   : > { %3655 = vst [vmem:[%s6843_s17 + $0x60] sm:$0xff] %v3629_v40  ;;  %v3632_v34 = vadd.f32 %v3931_v55, %v3631_v33  ;;  %v3753_v62 = vld [vmem:[%s6843_s17 + $0x58] sm:$0xff] (%p5174_p6)  ;;  %3748 = vst [vmem:[%s3673_s23 + $0x100] sm:$0xff] (%p5174_p6), %v3747_v59 }
0x1016   : > { %3658 = vst [vmem:[%s6843_s17 + $0x78] sm:$0xff] %v3640_v53  ;;  %v3749_v45 = vld [vmem:[%s6843_s17 + $0x48] sm:$0xff] (%p5174_p6)  ;;  %3754 = vst [vmem:[%s3673_s23 + $0x130] sm:$0xff] (%p5174_p6), %v3753_v62 }
0x1017   : > { %3656 = vst [vmem:[%s6843_s17 + $0x68] sm:$0xff] %v3632_v34  ;;  %3750 = vst [vmem:[%s3673_s23 + $0x110] sm:$0xff] (%p5174_p6), %v3749_v45 }
0x101b   : > { %v3759_v35 = vld [vmem:[%s6843_s17 + $0x70] sm:$0xff] }
0x101c   : > { %v3755_v37 = vld [vmem:[%s6843_s17 + $0x60] sm:$0xff]  ;;  %3760 = vst [vmem:[%s3673_s23 + $0x160] sm:$0xff] %v3759_v35 }
0x101d   : > { %3756 = vst [vmem:[%s3673_s23 + $0x140] sm:$0xff] %v3755_v37  ;;  %v3761_v26 = vld [vmem:[%s6843_s17 + $0x78] sm:$0xff] }
0x101e   : > { %v3757_v27 = vld [vmem:[%s6843_s17 + $0x68] sm:$0xff]  ;;  %3762 = vst [vmem:[%s3673_s23 + $0x170] sm:$0xff] %v3761_v26 }
0x101f   : > { %3758 = vst [vmem:[%s3673_s23 + $0x150] sm:$0xff] %v3757_v27 }
0x1020 PF: > { %s18_s11 = sadd.s32 1, %s5065_s11   ;;  %s7009_s27 = smov %s5045_s28 }
0x1021   : > { %p15_p12 = scmp.ge.s32.totalorder %s18_s11, 6   ;;  %s7010_s28 = smov %s5182_s20 }
0x1022   : > { %s7011_s29 = smov %s5057_s9  ;;  %s7012_s30 = smov %s5061_s10 }
0x1023   : > { %s7013_s9 = smov %s7016_s12  ;;  %s7014_s10 = smov %s7020_s13 }
0x1024   :  { %17 = sbr.rel (!%p15_p12) target bundleno = 4 (0x4), region = 163 }

// kernel: basic_layer_forward.6
= control target key start
LH: loop header
LB: loop body
LE: loop exit
PB: predicated region body
PF: predicated region fallthrough
CT: control target
= control target key end

     0   :  { %s5277_s30 = smov 0   ;;  %s5279_s10 = smov 0   ;;  %s7091_s0 = inlined_call_operand.vmem [shape: f32[2,16,16,128], index: 0, kind: input, shape index: {}]   ;;  %s7092_s1 = inlined_call_operand.vmem [shape: f32[1,128], index: 1, kind: input, shape index: {}]   ;;  %s7093_s2 = inlined_call_operand.vmem [shape: f32[1,128], index: 2, kind: input, shape index: {}]   ;;  %s7094_s3 = inlined_call_operand.vmem [shape: bf16[128,96], index: 3, kind: input, shape index: {}]   ;;  %s7095_s4 = inlined_call_operand.vmem [shape: f32[1,96], index: 4, kind: input, shape index: {}]   ;;  %s7096_s5 = inlined_call_operand.vmem [shape: bf16[32,128], index: 5, kind: input, shape index: {}]   ;;  %s7097_s6 = inlined_call_operand.vmem [shape: f32[1,128], index: 6, kind: input, shape index: {}]   ;;  %s7098_s7 = inlined_call_operand.vmem [shape: bf16[4,64,64], index: 7, kind: input, shape index: {}]   ;;  %s7099_s8 = inlined_call_operand.vmem [shape: bf16[4,64,64], index: 8, kind: input, shape index: {}]   ;;  %s7100_s9 = inlined_call_operand.vmem [shape: f32[2,16,16,128], index: 9, kind: output, shape index: {}]  }
   0x1   :  { %s5281_s11 = smov 0   ;;  %s5283_s12 = smov 0  }
   0x2   :  { %s5285_s13 = smov 0   ;;  %s5287_s14 = smov 0  }
   0x3   :  { %s5289_s15 = smov 0  }
   0x4 LB: > { %s31_s16 = sadd.s32 1, %s5203_s13  ;;  %s34_s17 = sadd.s32 1, %s5207_s14  ;;  %s5211_s15 = sphi %s5289_s15, %s19_s15   ;;  %s5207_s14 = sphi %s5287_s14, %s7194_s14   ;;  %s5203_s13 = sphi %s5285_s13, %s7193_s13   ;;  %s5199_s12 = sphi %s5283_s12, %s7192_s12   ;;  %s5195_s11 = sphi %s5281_s11, %s7191_s11   ;;  %s5191_s10 = sphi %s5279_s10, %s7190_s10   ;;  %s5187_s30 = sphi %s5277_s30, %s7189_s30  }
   0x5   : > { %p32_p0 = scmp.ge.s32.totalorder %s31_s16, 2  ;;  %s3966_s18 = sadd.s32 4294967295, %s5211_s15  }
   0x6   : > { %p56_p1 = scmp.ne.s32.totalorder %s5191_s10, %s5187_s30  ;;  %p57_p2 = scmp.eq.s32.totalorder %s5211_s15, 0 }
   0x7   : > { %s7196_s16 = smov (%p32_p0, %s31_s16), 0  ;;  %s7198_s17 = smov (!%p32_p0, %s34_s17), %s5207_s14 }
   0x8   : > { %7114 = sst [smem:[#allocation4_spill]] %s7196_s16  ;;  %p36_p3 = scmp.ge.s32.totalorder %s7198_s17, 2 }
   0x9   : > { %p267_p4 = scmp.eq.s32.totalorder %s3966_s18, 3  ;;  %s45_s19 = ssub.s32 %s5203_s13, %s7196_s16 }
   0xa   : > { %p58_p5 = por %p57_p2, %p56_p1  ;;  %s7200_s17 = smov (%p36_p3, %s7198_s17), 0 }
   0xb   : > { %p5325_p6 = por %p267_p4, %p56_p1  ;;  %s43_s21 = ssub.s32 %s5207_s14, %s7200_s17 }
   0xc   : > { %s46_s22 = sor.u32 %s45_s19, %s43_s21  ;;  %s49_s23 = sadd.s32 1, %s5191_s10 }
   0xd   : > { %p47_p7 = scmp.eq.s32.totalorder %s46_s22, 0  ;;  %p3971_p8 = scmp.ge.s32.totalorder %s5211_s15, 4 }
   0xf   : > { %s5333_s24 = scalar_select %p47_p7, %s5191_s10, %s49_s23  }
  0x10   : > { %310 = sbr.rel (%p3971_p8) target bundleno = 37 (0x25), region = 44 }
  0x17   : > { %313 = sbr.rel (!%p58_p5) target bundleno = 37 (0x25), region = 48  ;;  %s315_s25 = sand.u32 (%p58_p5), 1, %s5191_s10  }
  0x18   : > { %s4074_s26 = sshll.u32 (%p58_p5), %s5207_s14, 4  ;;  %s3972_s27 = sshll.u32 (%p58_p5), %s315_s25, 7 }
  0x19   : > { %s321_s28 = sadd.s32 (%p58_p5), %s5203_s13, %s4074_s26  ;;  %s317_s21 = scalar_lea.vmem (%p58_p5), [#allocation2], %s3972_s27 }
  0x1a   : > { %s3975_s29 = sshll.u32 (%p58_p5), %s321_s28, 3 }
  0x1b   : > { %s5342_s19 = scalar_lea.vmem (%p58_p5), %s7091_s0, %s3975_s29 }
  0x1c   : > { %v383_v0 = vld [vmem:[%s5342_s19] sm:$0xff] (%p58_p5)  ;;  %v385_v1 = vld [vmem:[%s5342_s19 + $0x10] sm:$0xff] (%p58_p5) }
  0x1d   : > { %v387_v2 = vld [vmem:[%s5342_s19 + $0x20] sm:$0xff] (%p58_p5)  ;;  %384 = vst [vmem:[%s317_s21] sm:$0xff] (%p58_p5), %v383_v0  ;;  %386 = vst [vmem:[%s317_s21 + $0x8] sm:$0xff] (%p58_p5), %v385_v1  ;;  %v389_v3 = vld [vmem:[%s5342_s19 + $0x30] sm:$0xff] (%p58_p5) }
  0x1e   : > { %388 = vst [vmem:[%s317_s21 + $0x10] sm:$0xff] %v387_v2  ;;  %v391_v4 = vld [vmem:[%s5342_s19 + $0x40] sm:$0xff]  ;;  %v393_v5 = vld [vmem:[%s5342_s19 + $0x50] sm:$0xff]  ;;  %390 = vst [vmem:[%s317_s21 + $0x18] sm:$0xff] %v389_v3 }
  0x1f   : > { %392 = vst [vmem:[%s317_s21 + $0x20] sm:$0xff] %v391_v4  ;;  %394 = vst [vmem:[%s317_s21 + $0x28] sm:$0xff] %v393_v5  ;;  %v395_v6 = vld [vmem:[%s5342_s19 + $0x60] sm:$0xff]  ;;  %v397_v7 = vld [vmem:[%s5342_s19 + $0x70] sm:$0xff] }
  0x20   : > { %v399_v8 = vld [vmem:[%s5342_s19 + $0x100] sm:$0xff]  ;;  %396 = vst [vmem:[%s317_s21 + $0x30] sm:$0xff] %v395_v6  ;;  %398 = vst [vmem:[%s317_s21 + $0x38] sm:$0xff] %v397_v7  ;;  %v401_v9 = vld [vmem:[%s5342_s19 + $0x110] sm:$0xff] }
  0x21   : > { %400 = vst [vmem:[%s317_s21 + $0x40] sm:$0xff] %v399_v8  ;;  %v403_v10 = vld [vmem:[%s5342_s19 + $0x120] sm:$0xff]  ;;  %v405_v11 = vld [vmem:[%s5342_s19 + $0x130] sm:$0xff]  ;;  %402 = vst [vmem:[%s317_s21 + $0x48] sm:$0xff] %v401_v9 }
  0x22   : > { %404 = vst [vmem:[%s317_s21 + $0x50] sm:$0xff] %v403_v10  ;;  %406 = vst [vmem:[%s317_s21 + $0x58] sm:$0xff] %v405_v11  ;;  %v407_v12 = vld [vmem:[%s5342_s19 + $0x140] sm:$0xff]  ;;  %v409_v13 = vld [vmem:[%s5342_s19 + $0x150] sm:$0xff] }
  0x23   : > { %v411_v14 = vld [vmem:[%s5342_s19 + $0x160] sm:$0xff]  ;;  %408 = vst [vmem:[%s317_s21 + $0x60] sm:$0xff] %v407_v12  ;;  %410 = vst [vmem:[%s317_s21 + $0x68] sm:$0xff] %v409_v13  ;;  %v413_v15 = vld [vmem:[%s5342_s19 + $0x170] sm:$0xff] }
  0x24   : > { %412 = vst [vmem:[%s317_s21 + $0x70] sm:$0xff] %v411_v14  ;;  %414 = vst [vmem:[%s317_s21 + $0x78] sm:$0xff] %v413_v15 }
  0x25 PF: > { %p3976_p9 = scmp.ge.s32.totalorder %s5211_s15, 1  ;;  %p431_p10 = scmp.lt.s32.totalorder %s5211_s15, 5 }
  0x27   : > { %p432_p11 = pnand %p3976_p9, %p431_p10 }
  0x29   : > { %435 = sbr.rel (%p432_p11) target bundleno = 4130 (0x1022), region = 90 }
  0x30   : > { %s438_s16 = sand.u32 1, %s5187_s30   ;;  %v4859_v28 = vld [vmem:[%s7094_s3] sm:$0xff]   ;;  %v4860_v33 = vld [vmem:[%s7094_s3 + $0x8] sm:$0xff]   ;;  %v4861_v34 = vld [vmem:[%s7094_s3 + $0x10] sm:$0xff]   ;;  %vm1087_vm0 = vcmask 64512   ;;  %s5213_s25 = smov 96  }
  0x31   : > { %s5363_s22 = sshll.u32 %s438_s16, 7  ;;  %4329 = vmatprep.subr.bf16.mxu0 %v4859_v28  ;;  %v4862_v37 = vld [vmem:[%s7094_s3 + $0x18] sm:$0xff]   ;;  %v4863_v42 = vld [vmem:[%s7094_s3 + $0x20] sm:$0xff]   ;;  %v4864_v45 = vld [vmem:[%s7094_s3 + $0x28] sm:$0xff]   ;;  %s5214_s26 = smov 64   ;;  %vm1278_vm1 = vcmask 523264  }
  0x32   : > { %s5366_s23 = scalar_lea.vmem [#allocation2], %s5363_s22  ;;  %4330 = vmatpush3.bf16.msra.mxu0 %v4859_v28  ;;  %v4865_v46 = vld [vmem:[%s7094_s3 + $0x30] sm:$0xff]   ;;  %v4866_v49 = vld [vmem:[%s7094_s3 + $0x38] sm:$0xff]   ;;  %s5215_s27 = smov 88   ;;  %vm3565_vm2 = vcmask 130048   ;;  %vm3582_vm3 = vcmask 195584  }
  0x33   : > { %v5369_v16 = vld [vmem:[%s5366_s23 + $0x10] sm:$0xff]  ;;  %v5372_v17 = vld [vmem:[%s5366_s23] sm:$0xff]  ;;  %v5377_v18 = vld [vmem:[%s5366_s23 + $0x18] sm:$0xff]  ;;  %4331 = vmatprep.subr.bf16.mxu0 %v4860_v33  ;;  %s3979_s28 = sshll.u32 %s5199_s12, 1  ;;  %s5216_s19 = smov 120   ;;  %vm3630_vm4 = vcmask 261120  }
  0x34   : > { %513 = vadd.xlane.f32.xlu1 %v5369_v16  ;;  %509 = vadd.xlane.f32.xlu0 %v5372_v17  ;;  %v5380_v19 = vld [vmem:[%s5366_s23 + $0x8] sm:$0xff]  ;;  %v557_v21 = vmul.f32 %v5372_v17, %v5372_v17  ;;  %v560_v22 = vmul.f32 %v5377_v18, %v5377_v18  ;;  %v559_v23 = vmul.f32 %v5369_v16, %v5369_v16  ;;  %v5396_v25 = vld [vmem:[%s5366_s23 + $0x20] sm:$0xff]  ;;  %v5401_v26 = vld [vmem:[%s5366_s23 + $0x38] sm:$0xff]  ;;  %s482_s29 = sadd.s32 %s5195_s11, %s3979_s28  ;;  %s5218_s18 = smov 80  }
  0x35   : > { %v558_v20 = vmul.f32 %v5380_v19, %v5380_v19  ;;  %v5393_v24 = vld [vmem:[%s5366_s23 + $0x28] sm:$0xff]  ;;  %v5404_v27 = vld [vmem:[%s5366_s23 + $0x30] sm:$0xff]  ;;  %v561_v30 = vmul.f32 %v5396_v25, %v5396_v25  ;;  %v564_v31 = vmul.f32 %v5401_v26, %v5401_v26  ;;  %v5429_v36 = vld [vmem:[%s5366_s23 + $0x40] sm:$0xff]  ;;  %p483_p12 = scmp.lt.s32.totalorder %s482_s29, 3 }
  0x36   : > { %v562_v29 = vmul.f32 %v5393_v24, %v5393_v24  ;;  %v563_v32 = vmul.f32 %v5404_v27, %v5404_v27  ;;  %4332 = vmatpush3.bf16.msra.mxu0 %v4860_v33  ;;  %v5426_v35 = vld [vmem:[%s5366_s23 + $0x48] sm:$0xff]  ;;  %v5437_v38 = vld [vmem:[%s5366_s23 + $0x58] sm:$0xff]  ;;  %v5440_v39 = vld [vmem:[%s5366_s23 + $0x50] sm:$0xff]  ;;  %v565_v41 = vmul.f32 %v5429_v36, %v5429_v36 }
  0x37   : > { %4333 = vmatprep.subr.bf16.mxu0 %v4861_v34  ;;  %v566_v40 = vmul.f32 %v5426_v35, %v5426_v35  ;;  %v568_v43 = vmul.f32 %v5437_v38, %v5437_v38  ;;  %v567_v44 = vmul.f32 %v5440_v39, %v5440_v39  ;;  %v5462_v47 = vld [vmem:[%s5366_s23 + $0x68] sm:$0xff]  ;;  %v5465_v48 = vld [vmem:[%s5366_s23 + $0x60] sm:$0xff]  ;;  %v5473_v50 = vld [vmem:[%s5366_s23 + $0x78] sm:$0xff]  ;;  %s7202_s29 = smov (!%p483_p12, %s482_s29), 3 }
  0x38   : > { %515 = vadd.xlane.f32.xlu1 %v5377_v18  ;;  %511 = vadd.xlane.f32.xlu0 %v5380_v19  ;;  %v5476_v51 = vld [vmem:[%s5366_s23 + $0x70] sm:$0xff]  ;;  %v570_v52 = vmul.f32 %v5462_v47, %v5462_v47  ;;  %v569_v53 = vmul.f32 %v5465_v48, %v5465_v48  ;;  %v572_v54 = vmul.f32 %v5473_v50, %v5473_v50  ;;  %s4075_s23 = sshll.u32 %s7202_s29, 5  ;;  %s7029_s29 = scalar_lea.vmem [#allocation3], %s5363_s22 }
  0x39   : > { %v571_v55 = vmul.f32 %v5476_v51, %v5476_v51  ;;  %s5730_s21 = scalar_lea.vmem %s7099_s8, %s4075_s23  ;;  %s5217_s23 = smov 56  }
  0x3a   : > { %4334 = vmatpush3.bf16.msra.mxu0 %v4861_v34  ;;  %s4076_s22 = sshll.u32 (%p5325_p6), %s5199_s12, 4 }
  0x3b   : > { %4335 = vmatprep.subr.bf16.mxu0 %v4862_v37  ;;  %s3778_s20 = sadd.s32 (%p5325_p6), %s5195_s11, %s4076_s22 }
  0x3c   : > { %575 = vadd.xlane.f32.xlu1 %v558_v20  ;;  %573 = vadd.xlane.f32.xlu0 %v557_v21 }
  0x3e   : > { %4336 = vmatpush3.bf16.msra.mxu0 %v4862_v37 }
  0x3f   : > { %4337 = vmatprep.subr.bf16.mxu0 %v4863_v42 }
  0x40   : > { %579 = vadd.xlane.f32.xlu1 %v560_v22  ;;  %577 = vadd.xlane.f32.xlu0 %v559_v23 }
  0x42   : > { %4338 = vmatpush3.bf16.msra.mxu0 %v4863_v42 }
  0x43   : > { %4339 = vmatprep.subr.bf16.mxu0 %v4864_v45 }
  0x44   : > { %519 = vadd.xlane.f32.xlu1 %v5393_v24  ;;  %517 = vadd.xlane.f32.xlu0 %v5396_v25 }
  0x46   : > { %4340 = vmatpush3.bf16.msra.mxu0 %v4864_v45 }
  0x47   : > { %4341 = vmatprep.subr.bf16.mxu0 %v4865_v46 }
  0x48   : > { %523 = vadd.xlane.f32.xlu1 %v5401_v26  ;;  %521 = vadd.xlane.f32.xlu0 %v5404_v27 }
  0x4a   : > { %4342 = vmatpush3.bf16.msra.mxu0 %v4865_v46 }
  0x4b   : > { %4343 = vmatprep.subr.bf16.mxu0 %v4866_v49 }
  0x4c   : > { %583 = vadd.xlane.f32.xlu1 %v562_v29  ;;  %581 = vadd.xlane.f32.xlu0 %v561_v30 }
  0x4e   : > { %4344 = vmatpush3.bf16.msra.mxu0 %v4866_v49 }
  0x50   : > { %587 = vadd.xlane.f32.xlu1 %v564_v31  ;;  %585 = vadd.xlane.f32.xlu0 %v563_v32 }
  0x54   : > { %527 = vadd.xlane.f32.xlu1 %v5426_v35  ;;  %525 = vadd.xlane.f32.xlu0 %v5429_v36 }
  0x58   : > { %531 = vadd.xlane.f32.xlu1 %v5437_v38  ;;  %529 = vadd.xlane.f32.xlu0 %v5440_v39 }
  0x5c   : > { %591 = vadd.xlane.f32.xlu1 %v566_v40  ;;  %589 = vadd.xlane.f32.xlu0 %v565_v41 }
  0x60   : > { %595 = vadd.xlane.f32.xlu1 %v568_v43  ;;  %593 = vadd.xlane.f32.xlu0 %v567_v44 }
  0x64   : > { %535 = vadd.xlane.f32.xlu1 %v5462_v47  ;;  %533 = vadd.xlane.f32.xlu0 %v5465_v48 }
  0x68   : > { %539 = vadd.xlane.f32.xlu1 %v5473_v50  ;;  %537 = vadd.xlane.f32.xlu0 %v5476_v51 }
  0x6c   : > { %599 = vadd.xlane.f32.xlu1 %v570_v52  ;;  %597 = vadd.xlane.f32.xlu0 %v569_v53 }
  0x70   : > { %603 = vadd.xlane.f32.xlu1 %v572_v54  ;;  %601 = vadd.xlane.f32.xlu0 %v571_v55 }
  0xc1   : > { %v514_v56 = vpop.xlane.xlu1 %513  ;;  %v510_v57 = vpop.xlane.xlu0 %509 }
  0xc2   : > { %v5488_v60 = vmul.f32 0.03125, %v510_v57  ;;  %v5490_v62 = vmul.f32 0.03125, %v514_v56 }
  0xc4   : > { %v621_v2 = vmul.f32 %v5488_v60, %v5488_v60  ;;  %v623_v8 = vmul.f32 %v5490_v62, %v5490_v62 }
  0xc5   : > { %v516_v58 = vpop.xlane.xlu1 %515  ;;  %v512_v59 = vpop.xlane.xlu0 %511 }
  0xc6   : > { %v542_v61 = vmul.f32 0.03125, %v512_v59  ;;  %v5492_v63 = vmul.f32 0.03125, %v516_v58  ;;  %v5516_v58 = vld [vmem:[%s7092_s1] ss:$0 sm:$0xff] }
  0xc8   : > { %v622_v3 = vmul.f32 %v542_v61, %v542_v61  ;;  %v624_v9 = vmul.f32 %v5492_v63, %v5492_v63  ;;  %v670_v54 = vsub.f32 %v5380_v19, %v542_v61 }
  0xc9   : > { %v576_v0 = vpop.xlane.xlu1 %575  ;;  %v574_v1 = vpop.xlane.xlu0 %573 }
  0xca   : > { %v606_v4 = vmul.f32 0.03125, %v576_v0  ;;  %v605_v5 = vmul.f32 0.03125, %v574_v1  ;;  %v669_v0 = vsub.f32 %v5372_v17, %v5488_v60  ;;  %v672_v17 = vsub.f32 %v5377_v18, %v5492_v63 }
  0xcc   : > { %v638_v6 = vsub.f32 %v606_v4, %v622_v3  ;;  %v637_v7 = vsub.f32 %v605_v5, %v621_v2 }
  0xcd   : > { %v580_v10 = vpop.xlane.xlu1 %579  ;;  %v578_v11 = vpop.xlane.xlu0 %577 }
  0xce   : > { %v654_v12 = vmax.f32 %v638_v6, 0.0  ;;  %v653_v13 = vmax.f32 %v637_v7, 0.0  ;;  %v608_v14 = vmul.f32 0.03125, %v580_v10  ;;  %v607_v15 = vmul.f32 0.03125, %v578_v11 }
  0xd0   : > { %v686_v20 = vadd.f32 1e-05, %v654_v12  ;;  %v685_v21 = vadd.f32 1e-05, %v653_v13  ;;  %v640_v22 = vsub.f32 %v608_v14, %v624_v9  ;;  %v639_v23 = vsub.f32 %v607_v15, %v623_v8  ;;  %v5527_v8 = vld [vmem:[%s7093_s2] ss:$0 sm:$0xff] }
  0xd1   : > { %v520_v28 = vpop.xlane.xlu1 %519  ;;  %v518_v29 = vpop.xlane.xlu0 %517 }
  0xd2   : > { %4869 = vrsqrt.f32 %v686_v20  ;;  %v656_v30 = vmax.f32 %v640_v22, 0.0  ;;  %v655_v31 = vmax.f32 %v639_v23, 0.0  ;;  %v5500_v40 = vmul.f32 0.03125, %v520_v28 }
  0xd3   : > { %4871 = vrsqrt.f32 %v685_v21  ;;  %v5502_v41 = vmul.f32 0.03125, %v518_v29  ;;  %v671_v20 = vsub.f32 %v5369_v16, %v5490_v62 }
  0xd4   : > { %v688_v32 = vadd.f32 1e-05, %v656_v30  ;;  %v687_v33 = vadd.f32 1e-05, %v655_v31  ;;  %v626_v46 = vmul.f32 %v5500_v40, %v5500_v40 }
  0xd5   : > { %v524_v34 = vpop.xlane.xlu1 %523  ;;  %v522_v37 = vpop.xlane.xlu0 %521  ;;  %v625_v49 = vmul.f32 %v5502_v41, %v5502_v41 }
  0xd6   : > { %4873 = vrsqrt.f32 %v688_v32  ;;  %v5504_v42 = vmul.f32 0.03125, %v524_v34  ;;  %v5506_v43 = vmul.f32 0.03125, %v522_v37 }
  0xd7   : > { %4875 = vrsqrt.f32 %v687_v33 }
  0xd8   : > { %v628_v1 = vmul.f32 %v5504_v42, %v5504_v42  ;;  %v627_v2 = vmul.f32 %v5506_v43, %v5506_v43 }
  0xd9   : > { %v584_v44 = vpop.xlane.xlu1 %583  ;;  %v582_v45 = vpop.xlane.xlu0 %581 }
  0xda   : > { %v610_v52 = vmul.f32 0.03125, %v584_v44  ;;  %v609_v53 = vmul.f32 0.03125, %v582_v45 }
  0xdc   : > { %v4870_v55 = vpop.eup %4869  ;;  %v642_v56 = vsub.f32 %v610_v52, %v626_v46  ;;  %v641_v57 = vsub.f32 %v609_v53, %v625_v49 }
  0xdd   : > { %v4872_v59 = vpop.eup %4871  ;;  %v588_v3 = vpop.xlane.xlu1 %587  ;;  %v718_v61 = vmul.f32 %v4870_v55, %v670_v54 }
  0xde   : > { %v586_v19 = vpop.xlane.xlu0 %585  ;;  %v658_v4 = vmax.f32 %v642_v56, 0.0  ;;  %v657_v5 = vmax.f32 %v641_v57, 0.0  ;;  %v612_v6 = vmul.f32 0.03125, %v588_v3  ;;  %v717_v60 = vmul.f32 %v4872_v59, %v669_v0 }
  0xdf   : > { %v611_v7 = vmul.f32 0.03125, %v586_v19  ;;  %v741_v9 = vmul.f32 %v5516_v58, %v718_v61 }
  0xe0   : > { %v4874_v10 = vpop.eup %4873  ;;  %v690_v11 = vadd.f32 1e-05, %v658_v4  ;;  %v689_v12 = vadd.f32 1e-05, %v657_v5  ;;  %v644_v13 = vsub.f32 %v612_v6, %v628_v1  ;;  %v740_v23 = vmul.f32 %v5516_v58, %v717_v60 }
  0xe1   : > { %v643_v14 = vsub.f32 %v611_v7, %v627_v2  ;;  %v4876_v15 = vpop.eup %4875  ;;  %v528_v21 = vpop.xlane.xlu1 %527  ;;  %v764_v28 = vadd.f32 %v5527_v8, %v741_v9  ;;  %v720_v29 = vmul.f32 %v4874_v10, %v672_v17  ;;  %v674_v2 = vsub.f32 %v5393_v24, %v5500_v40 }
  0xe2   : > { %v526_v22 = vpop.xlane.xlu0 %525  ;;  %4877 = vrsqrt.f32 %v690_v11  ;;  %v660_v18 = vmax.f32 %v644_v13, 0.0  ;;  %v763_v30 = vadd.f32 %v5527_v8, %v740_v23  ;;  %v719_v31 = vmul.f32 %v4876_v15, %v671_v20 }
  0xe3   : > { %v659_v63 = vmax.f32 %v643_v14, 0.0  ;;  %4879 = vrsqrt.f32 %v689_v12  ;;  %v5538_v62 = vmul.f32 0.03125, %v528_v21  ;;  %v5540_v45 = vmul.f32 0.03125, %v526_v22 }
  0xe4   : > { %v692_v32 = vadd.f32 1e-05, %v660_v18  ;;  %v779_v37 = vpack.c.bf16 %v764_v28, %v763_v30  ;;  %v742_v16 = vmul.f32 %v5516_v58, %v719_v31  ;;  %v743_v46 = vmul.f32 %v5516_v58, %v720_v29 }
  0xe5   : > { %v691_v33 = vadd.f32 1e-05, %v659_v63  ;;  %v532_v34 = vpop.xlane.xlu1 %531  ;;  %v630_v57 = vmul.f32 %v5538_v62, %v5538_v62  ;;  %v629_v59 = vmul.f32 %v5540_v45, %v5540_v45  ;;  %v673_v6 = vsub.f32 %v5396_v25, %v5502_v41 }
  0xe6   : > { %v530_v44 = vpop.xlane.xlu0 %529  ;;  %4881 = vrsqrt.f32 %v692_v32  ;;  %4345 = vmatprep.mubr.bf16.mxu0 %v779_v37  ;;  %v765_v49 = vadd.f32 %v5527_v8, %v742_v16  ;;  %v5544_v52 = vmul.f32 0.03125, %v532_v34  ;;  %v766_v55 = vadd.f32 %v5527_v8, %v743_v46 }
  0xe7   : > { %4883 = vrsqrt.f32 %v691_v33  ;;  %v5546_v53 = vmul.f32 0.03125, %v530_v44  ;;  %v676_v13 = vsub.f32 %v5401_v26, %v5504_v42  ;;  %v675_v28 = vsub.f32 %v5404_v27, %v5506_v43 }
  0xe8   : > { %v780_v3 = vpack.c.bf16 %v766_v55, %v765_v49  ;;  %v632_v7 = vmul.f32 %v5544_v52, %v5544_v52 }
  0xe9   : > { %v592_v54 = vpop.xlane.xlu1 %591  ;;  %v631_v17 = vmul.f32 %v5546_v53, %v5546_v53 }
  0xea   : > { %v590_v56 = vpop.xlane.xlu0 %589  ;;  %v614_v0 = vmul.f32 0.03125, %v592_v54  ;;  %4346 = vmatmul.mubr.bf16.vlgmr.msra.gmra.mrb[0].mxu0 %v780_v3 }
  0xeb   : > { %v613_v1 = vmul.f32 0.03125, %v590_v56 }
  0xec   : > { %v4878_v19 = vpop.eup %4877  ;;  %v646_v61 = vsub.f32 %v614_v0, %v630_v57 }
  0xed   : > { %v645_v4 = vsub.f32 %v613_v1, %v629_v59  ;;  %v4880_v5 = vpop.eup %4879  ;;  %v596_v60 = vpop.xlane.xlu1 %595  ;;  %v722_v10 = vmul.f32 %v4878_v19, %v674_v2 }
  0xee   : > { %v594_v9 = vpop.xlane.xlu0 %593  ;;  %v662_v11 = vmax.f32 %v646_v61, 0.0  ;;  %v616_v40 = vmul.f32 0.03125, %v596_v60  ;;  %v721_v14 = vmul.f32 %v4880_v5, %v673_v6 }
  0xef   : > { %v661_v24 = vmax.f32 %v645_v4, 0.0  ;;  %v615_v12 = vmul.f32 0.03125, %v594_v9  ;;  %v745_v25 = vmul.f32 %v5516_v58, %v722_v10  ;;  %v678_v4 = vsub.f32 %v5426_v35, %v5538_v62 }
  0xf0   : > { %v4882_v41 = vpop.eup %4881  ;;  %v694_v15 = vadd.f32 1e-05, %v662_v11  ;;  %v648_v21 = vsub.f32 %v616_v40, %v632_v7  ;;  %v744_v29 = vmul.f32 %v5516_v58, %v721_v14  ;;  %v677_v9 = vsub.f32 %v5429_v36, %v5540_v45 }
  0xf1   : > { %v693_v20 = vadd.f32 1e-05, %v661_v24  ;;  %v647_v22 = vsub.f32 %v615_v12, %v631_v17  ;;  %v4884_v23 = vpop.eup %4883  ;;  %v536_v18 = vpop.xlane.xlu1 %535  ;;  %v768_v30 = vadd.f32 %v5527_v8, %v745_v25  ;;  %v724_v31 = vmul.f32 %v4882_v41, %v676_v13 }
  0xf2   : > { %v534_v63 = vpop.xlane.xlu0 %533  ;;  %4885 = vrsqrt.f32 %v694_v15  ;;  %v664_v26 = vmax.f32 %v648_v21, 0.0  ;;  %v767_v32 = vadd.f32 %v5527_v8, %v744_v29  ;;  %v723_v33 = vmul.f32 %v4884_v23, %v675_v28 }
  0xf3   : > { %v663_v42 = vmax.f32 %v647_v22, 0.0  ;;  %4887 = vrsqrt.f32 %v693_v20  ;;  %v5570_v43 = vmul.f32 0.03125, %v536_v18  ;;  %v5572_v49 = vmul.f32 0.03125, %v534_v63 }
  0xf4   : > { %v696_v34 = vadd.f32 1e-05, %v664_v26  ;;  %v781_v16 = vpack.c.bf16 %v768_v30, %v767_v32  ;;  %v746_v27 = vmul.f32 %v5516_v58, %v723_v33  ;;  %v747_v54 = vmul.f32 %v5516_v58, %v724_v31 }
  0xf5   : > { %v695_v37 = vadd.f32 1e-05, %v663_v42  ;;  %v540_v44 = vpop.xlane.xlu1 %539  ;;  %v634_v2 = vmul.f32 %v5570_v43, %v5570_v43  ;;  %v633_v3 = vmul.f32 %v5572_v49, %v5572_v49  ;;  %v680_v25 = vsub.f32 %v5437_v38, %v5544_v52 }
  0xf6   : > { %v538_v46 = vpop.xlane.xlu0 %537  ;;  %4889 = vrsqrt.f32 %v696_v34  ;;  %4349 = vmatprep.mubr.bf16.mxu0 %v781_v16  ;;  %v769_v55 = vadd.f32 %v5527_v8, %v746_v27  ;;  %v5576_v56 = vmul.f32 0.03125, %v540_v44  ;;  %v770_v0 = vadd.f32 %v5527_v8, %v747_v54 }
  0xf7   : > { %4891 = vrsqrt.f32 %v695_v37  ;;  %v5578_v57 = vmul.f32 0.03125, %v538_v46  ;;  %v679_v36 = vsub.f32 %v5440_v39, %v5546_v53  ;;  %v682_v44 = vsub.f32 %v5462_v47, %v5570_v43 }
  0xf8   : > { %v782_v5 = vpack.c.bf16 %v770_v0, %v769_v55  ;;  %v636_v10 = vmul.f32 %v5576_v56, %v5576_v56  ;;  %v681_v46 = vsub.f32 %v5465_v48, %v5572_v49 }
  0xf9   : > { %v600_v59 = vpop.xlane.xlu1 %599  ;;  %v635_v11 = vmul.f32 %v5578_v57, %v5578_v57 }
  0xfa   : > { %v598_v1 = vpop.xlane.xlu0 %597  ;;  %v618_v19 = vmul.f32 0.03125, %v600_v59  ;;  %4350 = vmatmul.mubr.bf16.gmra.mrb[4].mxu0 %v782_v5  ;;  %v684_v59 = vsub.f32 %v5473_v50, %v5576_v56 }
  0xfb   : > { %v617_v61 = vmul.f32 0.03125, %v598_v1 }
  0xfc   : > { %v4886_v6 = vpop.eup %4885  ;;  %v650_v7 = vsub.f32 %v618_v19, %v634_v2  ;;  %v683_v2 = vsub.f32 %v5476_v51, %v5578_v57 }
  0xfd   : > { %v649_v17 = vsub.f32 %v617_v61, %v633_v3  ;;  %v4888_v60 = vpop.eup %4887  ;;  %v604_v24 = vpop.xlane.xlu1 %603  ;;  %v726_v12 = vmul.f32 %v4886_v6, %v678_v4  ;;  %v3984_v6 = vld [vmem:[%s7095_s4] ss:$0 sm:$0xff] }
  0xfe   : > { %v602_v40 = vpop.xlane.xlu0 %601  ;;  %v666_v13 = vmax.f32 %v650_v7, 0.0  ;;  %v620_v62 = vmul.f32 0.03125, %v604_v24  ;;  %v725_v45 = vmul.f32 %v4888_v60, %v677_v9 }
  0xff   : > { %v665_v35 = vmax.f32 %v649_v17, 0.0  ;;  %v619_v14 = vmul.f32 0.03125, %v602_v40  ;;  %v749_v41 = vmul.f32 %v5516_v58, %v726_v12 }
 0x100   : > { %v4890_v15 = vpop.eup %4889  ;;  %v698_v20 = vadd.f32 1e-05, %v666_v13  ;;  %v652_v22 = vsub.f32 %v620_v62, %v636_v10  ;;  %v748_v18 = vmul.f32 %v5516_v58, %v725_v45 }
 0x101   : > { %v697_v21 = vadd.f32 1e-05, %v665_v35  ;;  %v651_v23 = vsub.f32 %v619_v14, %v635_v11  ;;  %v4892_v28 = vpop.eup %4891  ;;  %v772_v63 = vadd.f32 %v5527_v8, %v749_v41  ;;  %v728_v29 = vmul.f32 %v4890_v15, %v680_v25 }
 0x102   : > { %4893 = vrsqrt.f32 %v698_v20  ;;  %v668_v30 = vmax.f32 %v652_v22, 0.0  ;;  %v727_v52 = vmul.f32 %v4892_v28, %v679_v36  ;;  %v771_v39 = vadd.f32 %v5527_v8, %v748_v18 }
 0x103   : > { %v667_v38 = vmax.f32 %v651_v23, 0.0  ;;  %4895 = vrsqrt.f32 %v697_v21  ;;  %v751_v53 = vmul.f32 %v5516_v58, %v728_v29 }
 0x104   : > { %v700_v26 = vadd.f32 1e-05, %v668_v30  ;;  %v750_v31 = vmul.f32 %v5516_v58, %v727_v52  ;;  %v783_v32 = vpack.c.bf16 %v772_v63, %v771_v39 }
 0x105   : > { %v699_v42 = vadd.f32 1e-05, %v667_v38  ;;  %v774_v33 = vadd.f32 %v5527_v8, %v751_v53 }
 0x106   : > { %4897 = vrsqrt.f32 %v700_v26  ;;  %v773_v34 = vadd.f32 %v5527_v8, %v750_v31  ;;  %4353 = vmatprep.mubr.bf16.mxu0 %v783_v32 }
 0x107   : > { %4899 = vrsqrt.f32 %v699_v42 }
 0x108   : > { %v784_v37 = vpack.c.bf16 %v774_v33, %v773_v34 }
 0x10a   : > { %4354 = vmatmul.mubr.bf16.gmra.mrb[8].mxu0 %v784_v37 }
 0x10c   : > { %v4894_v16 = vpop.eup %4893 }
 0x10d   : > { %v4896_v27 = vpop.eup %4895  ;;  %v730_v54 = vmul.f32 %v4894_v16, %v682_v44 }
 0x10e   : > { %v729_v55 = vmul.f32 %v4896_v27, %v681_v46 }
 0x10f   : > { %v753_v0 = vmul.f32 %v5516_v58, %v730_v54 }
 0x110   : > { %v4898_v1 = vpop.eup %4897  ;;  %v752_v3 = vmul.f32 %v5516_v58, %v729_v55 }
 0x111   : > { %v4900_v19 = vpop.eup %4899  ;;  %v776_v47 = vadd.f32 %v5527_v8, %v753_v0  ;;  %v732_v43 = vmul.f32 %v4898_v1, %v684_v59 }
 0x112   : > { %v775_v48 = vadd.f32 %v5527_v8, %v752_v3  ;;  %v731_v49 = vmul.f32 %v4900_v19, %v683_v2 }
 0x113   : > { %v755_v61 = vmul.f32 %v5516_v58, %v732_v43 }
 0x114   : > { %v785_v4 = vpack.c.bf16 %v776_v47, %v775_v48  ;;  %v754_v50 = vmul.f32 %v5516_v58, %v731_v49 }
 0x115   : > { %v778_v56 = vadd.f32 %v5527_v8, %v755_v61 }
 0x116   : > { %4357 = vmatprep.mubr.bf16.mxu0 %v785_v4  ;;  %v777_v5 = vadd.f32 %v5527_v8, %v754_v50 }
 0x118   : > { %v786_v51 = vpack.c.bf16 %v778_v56, %v777_v5 }
 0x11a   : > { %4358 = vmatmul.mubr.bf16.gmra.mrb[12].mxu0 %v786_v51 }
 0x1bd   : > { %v4347_v57 = vpop.f32.mrb[0].mxu0 }
 0x1be   : > { %v892_v7 = vpop.f32.mrb[1].mxu0  ;;  %v901_v60 = vadd.f32 %v4347_v57, %v3984_v6 }
 0x1bf   : > { %v4348_v17 = vpop.f32.mrb[2].mxu0  ;;  %v893_v11 = vadd.f32 %v3984_v6, %v892_v7 }
 0x1c0   : > { %v904_v9 = vadd.f32 %v4348_v17, %v3984_v6  ;;  %v895_v10 = vpop.f32.mrb[3].mxu0 }
 0x1c1   : > { %v896_v24 = vadd.f32 %v3984_v6, %v895_v10 }
 0x1c2   : > { %v5624_v58 = vpack.c.bf16 %v904_v9, %v901_v60 }
 0x1c3   : > { %v5626_v40 = vpack.c.bf16 %v896_v24, %v893_v11 }
 0x1c4   : > { %1081 = vrot.lane.b32.xlu1 %v5624_v58, %s5213_s25 }
 0x1c5   : > { %1079 = vrot.lane.b32.xlu0 %v5626_v40, %s5213_s25  ;;  %4369 = vmatprep.mubr.msk.bf16.mxu1 %vm1087_vm0, %v5626_v40 }
 0x1cd   : > { %v4351_v8 = vpop.f32.mrb[4].mxu0 }
 0x1ce   : > { %v908_v12 = vpop.f32.mrb[5].mxu0  ;;  %v917_v35 = vadd.f32 %v4351_v8, %v3984_v6  ;;  %v4157_v8 = vld [vmem:[%s7098_s7 + $0x8] sm:$0xff]  }
 0x1cf   : > { %v4352_v13 = vpop.f32.mrb[6].mxu0  ;;  %v909_v25 = vadd.f32 %v3984_v6, %v908_v12  ;;  %v4172_v12 = vld [vmem:[%s5730_s21 + $0x8] sm:$0xff]  }
 0x1d0   : > { %v920_v62 = vadd.f32 %v4352_v13, %v3984_v6  ;;  %v911_v14 = vpop.f32.mrb[7].mxu0  ;;  %v4078_v13 = vld [vmem:[%s7098_s7] sm:$0xff]  }
 0x1d1   : > { %v912_v36 = vadd.f32 %v3984_v6, %v911_v14  ;;  %v5740_v14 = vunpack.c.l.bf16 %v4172_v12 }
 0x1d2   : > { %v5634_v45 = vpack.c.bf16 %v920_v62, %v917_v35  ;;  %v4142_v35 = vld [vmem:[%s5730_s21] sm:$0xff]   ;;  %v4083_v62 = vunpack.c.l.bf16 %v4157_v8 }
 0x1d3   : > { %v5636_v41 = vpack.c.bf16 %v912_v36, %v909_v25  ;;  %v4079_v25 = vunpack.c.l.bf16 %v4078_v13  ;;  %v5742_v36 = vunpack.c.l.bf16 %v4142_v35 }
 0x1d4   : > { %1085 = vrot.lane.b32.xlu0 %v5634_v45, %s5213_s25 }
 0x1d5   : > { %1083 = vrot.lane.b32.xlu1 %v5636_v41, %s5213_s25 }
 0x1dd   : > { %v4355_v15 = vpop.f32.mrb[8].mxu0 }
 0x1de   : > { %v924_v20 = vpop.f32.mrb[9].mxu0  ;;  %v933_v22 = vadd.f32 %v4355_v15, %v3984_v6  ;;  %v4080_v15 = vunpack.c.h.bf16 %v4078_v13 }
 0x1df   : > { %v4356_v21 = vpop.f32.mrb[10].mxu0  ;;  %v925_v18 = vadd.f32 %v3984_v6, %v924_v20  ;;  %v5744_v20 = vunpack.c.h.bf16 %v4142_v35 }
 0x1e0   : > { %v936_v23 = vadd.f32 %v4356_v21, %v3984_v6  ;;  %v927_v28 = vpop.f32.mrb[11].mxu0  ;;  %v1037_v21 = vadd.f32 %v5740_v14, %v4083_v62 }
 0x1e1   : > { %v928_v63 = vadd.f32 %v3984_v6, %v927_v28  ;;  %v1035_v28 = vadd.f32 %v5742_v36, %v4079_v25 }
 0x1e2   : > { %v5642_v29 = vpack.c.bf16 %v936_v23, %v933_v22  ;;  %v4084_v22 = vunpack.c.h.bf16 %v4157_v8  ;;  %v5747_v23 = vunpack.c.h.bf16 %v4172_v12 }
 0x1e3   : > { %v5644_v30 = vpack.c.bf16 %v928_v63, %v925_v18  ;;  %v4159_v18 = vld [vmem:[%s7098_s7 + $0x18] sm:$0xff]  }
 0x1e4   : > { %v4174_v63 = vld [vmem:[%s5730_s21 + $0x18] sm:$0xff]  }
 0x1e5   : > { %1181 = vrot.lane.b32.xlu1 %v5644_v30, %s5213_s25  ;;  %4385 = vmatprep.mubr.msk.bf16.mxu0 %vm1087_vm0, %v5644_v30 }
 0x1e9   : > { %1183 = vrot.lane.b32.xlu1 %v5642_v29, %s5213_s25 }
 0x1ed   : > { %v4359_v38 = vpop.f32.mrb[12].mxu0 }
 0x1ee   : > { %v940_v52 = vpop.f32.mrb[13].mxu0  ;;  %v949_v53 = vadd.f32 %v4359_v38, %v3984_v6 }
 0x1ef   : > { %v4360_v39 = vpop.f32.mrb[14].mxu0  ;;  %v941_v31 = vadd.f32 %v3984_v6, %v940_v52  ;;  %v1036_v52 = vadd.f32 %v5744_v20, %v4080_v15 }
 0x1f0   : > { %v952_v26 = vadd.f32 %v4360_v39, %v3984_v6  ;;  %v943_v42 = vpop.f32.mrb[15].mxu0 }
 0x1f1   : > { %v944_v32 = vadd.f32 %v3984_v6, %v943_v42 }
 0x1f2   : > { %v5652_v33 = vpack.c.bf16 %v952_v26, %v949_v53  ;;  %v1038_v26 = vadd.f32 %v5747_v23, %v4084_v22 }
 0x1f3   : > { %v5654_v34 = vpack.c.bf16 %v944_v32, %v941_v31  ;;  %v4091_v31 = vunpack.c.l.bf16 %v4159_v18  ;;  %v5758_v32 = vunpack.c.l.bf16 %v4174_v63 }
 0x1f4   : > { %1187 = vrot.lane.b32.xlu1 %v5652_v33, %s5213_s25 }
 0x1f5   : > { %1185 = vrot.lane.b32.xlu0 %v5654_v34, %s5213_s25  ;;  %s5226_s25 = smov 24  }
 0x1f8   : > { %1465 = vrot.lane.b32.xlu1 %v5624_v58, %s5214_s26 }
 0x1f9   : > { %1463 = vrot.lane.b32.xlu0 %v5626_v40, %s5214_s26 }
 0x1fc   : > { %1469 = vrot.lane.b32.xlu1 %v5634_v45, %s5214_s26 }
 0x1fd   : > { %1467 = vrot.lane.b32.xlu0 %v5636_v41, %s5214_s26 }
 0x200   : > { %1558 = vrot.lane.b32.xlu1 %v5652_v33, %s5214_s26 }
 0x201   : > { %1552 = vrot.lane.b32.xlu0 %v5644_v30, %s5214_s26 }
 0x204   : > { %1754 = vrot.lane.b32.xlu1 %v5644_v30, %s5215_s27 }
 0x205   : > { %1649 = vrot.lane.b32.xlu0 %v5626_v40, %s5215_s27 }
 0x208   : > { %1655 = vrot.lane.b32.xlu1 %v5634_v45, %s5215_s27 }
 0x209   : > { %1554 = vrot.lane.b32.xlu0 %v5642_v29, %s5214_s26 }
 0x20c   : > { %1756 = vrot.lane.b32.xlu1 %v5642_v29, %s5215_s27 }
 0x20d   : > { %1651 = vrot.lane.b32.xlu0 %v5624_v58, %s5215_s27 }
 0x210   : > { %1556 = vrot.lane.b32.xlu1 %v5654_v34, %s5214_s26 }
 0x211   : > { %1653 = vrot.lane.b32.xlu0 %v5636_v41, %s5215_s27 }
 0x236   : > { %v1082_v16 = vpop.permute.xlu1 %1081 }
 0x237   : > { %v1080_v37 = vpop.permute.xlu0 %1079  ;;  %v1104_v46 = vsel %vm1087_vm0, %v1082_v16, 0 }
 0x238   : > { %4637 = vmatprep.subr.msk.bf16.mxu1 %vm1087_vm0, %v1080_v37  ;;  %v1101_v44 = vsel %vm1087_vm0, %v1080_v37, 0 }
 0x239   : > { %4362 = vmatpush3.bf16.xpose.msra.mxu1 %v1101_v44 }
 0x23a   : > { %4638 = vmatprep.subr.msk.bf16.mxu1 %vm1087_vm0, %v1082_v16 }
 0x241   : > { %4364 = vmatpush3.bf16.xpose.msra.mxu1 %v1104_v46  ;;  %v4158_v46 = vld [vmem:[%s7098_s7 + $0x10] sm:$0xff]  }
 0x246   : > { %v1086_v55 = vpop.permute.xlu0 %1085 }
 0x247   : > { %v1084_v27 = vpop.permute.xlu1 %1083  ;;  %v1110_v59 = vsel %vm1087_vm0, %v1086_v55, 0 }
 0x248   : > { %4639 = vmatprep.subr.msk.bf16.mxu1 %vm1087_vm0, %v1084_v27  ;;  %v1107_v54 = vsel %vm1087_vm0, %v1084_v27, 0  ;;  %v4173_v27 = vld [vmem:[%s5730_s21 + $0x10] sm:$0xff]  }
 0x249   : > { %4366 = vmatpush3.bf16.xpose.msra.mxu1 %v1107_v54  ;;  %v4092_v54 = vunpack.c.h.bf16 %v4159_v18 }
 0x24a   : > { %4640 = vmatprep.subr.msk.bf16.mxu1 %vm1087_vm0, %v1086_v55  ;;  %v5768_v55 = vunpack.c.h.bf16 %v4174_v63 }
 0x251   : > { %4368 = vmatpush3.bf16.xpose.msra.mxu1 %v1110_v59 }
 0x257   : > { %v1182_v0 = vpop.permute.xlu1 %1181 }
 0x258   : > { %4641 = vmatprep.subr.msk.bf16.mxu0 %vm1087_vm0, %v1182_v0  ;;  %v1202_v1 = vsel %vm1087_vm0, %v1182_v0, 0  ;;  %4370 = vmatmul.mubr.msk.bf16.vlgmr.msra.gmra.mrb[0].mxu1 %vm1087_vm0, %v5624_v58  ;;  %v4088_v0 = vunpack.c.h.bf16 %v4158_v46 }
 0x259   : > { %4378 = vmatpush3.bf16.xpose.msra.mxu0 %v1202_v1  ;;  %4373 = vmatprep.mubr.msk.bf16.mxu1 %vm1087_vm0, %v5636_v41  ;;  %v5772_v1 = vunpack.c.h.bf16 %v4173_v27 }
 0x25b   : > { %v1184_v2 = vpop.permute.xlu1 %1183 }
 0x25c   : > { %4642 = vmatprep.subr.msk.bf16.mxu0 %vm1087_vm0, %v1184_v2  ;;  %v1205_v3 = vsel %vm1087_vm0, %v1184_v2, 0 }
 0x260   : > { %4374 = vmatmul.mubr.msk.bf16.gmra.mrb[4].mxu1 %vm1087_vm0, %v5634_v45 }
 0x261   : > { %4380 = vmatpush3.bf16.xpose.msra.mxu0 %v1205_v3  ;;  %v4087_v3 = vunpack.c.l.bf16 %v4158_v46 }
 0x266   : > { %v1188_v19 = vpop.permute.xlu1 %1187 }
 0x267   : > { %v1186_v47 = vpop.permute.xlu0 %1185  ;;  %v1211_v4 = vsel %vm1087_vm0, %v1188_v19, 0 }
 0x268   : > { %4643 = vmatprep.subr.msk.bf16.mxu0 %vm1087_vm0, %v1186_v47  ;;  %v1208_v43 = vsel %vm1087_vm0, %v1186_v47, 0 }
 0x269   : > { %4382 = vmatpush3.bf16.xpose.msra.mxu0 %v1208_v43  ;;  %v1041_v43 = vadd.f32 %v5758_v32, %v4091_v31 }
 0x26a   : > { %4644 = vmatprep.subr.msk.bf16.mxu0 %vm1087_vm0, %v1188_v19  ;;  %v1466_v49 = vpop.permute.xlu1 %1465  ;;  %v5776_v19 = vunpack.c.l.bf16 %v4173_v27 }
 0x26b   : > { %v1464_v48 = vpop.permute.xlu0 %1463 }
 0x26c   : > { %4393 = vmatprep.subr.bf16.mxu1 %v1464_v48 }
 0x26d   : > { %4394 = vmatpush3.bf16.msra.mxu1 %v1464_v48 }
 0x26e   : > { %4395 = vmatprep.subr.bf16.mxu1 %v1466_v49  ;;  %v1470_v56 = vpop.permute.xlu1 %1469 }
 0x26f   : > { %v1468_v61 = vpop.permute.xlu0 %1467 }
 0x271   : > { %4384 = vmatpush3.bf16.xpose.msra.mxu0 %v1211_v4  ;;  %4396 = vmatpush3.bf16.msra.mxu1 %v1466_v49  ;;  %v1042_v49 = vadd.f32 %v5768_v55, %v4092_v54 }
 0x272   : > { %4397 = vmatprep.subr.bf16.mxu1 %v1468_v61  ;;  %v5713_v6 = vpop.permute.xlu1 %1558 }
 0x273   : > { %v5702_v50 = vpop.permute.xlu0 %1552 }
 0x275   : > { %4398 = vmatpush3.bf16.msra.mxu1 %v1468_v61 }
 0x276   : > { %4399 = vmatprep.subr.bf16.mxu1 %v1470_v56  ;;  %v5719_v9 = vpop.permute.xlu1 %1754 }
 0x277   : > { %v1650_v5 = vpop.permute.xlu0 %1649 }
 0x278   : > { %4386 = vmatmul.mubr.msk.bf16.vlgmr.msra.gmra.mrb[16].mxu0 %vm1087_vm0, %v5642_v29  ;;  %4645 = vmatprep.subr.msk.bf16.mxu0 %vm1087_vm0, %v1650_v5  ;;  %v1670_v51 = vsel %vm1087_vm0, %v1650_v5, 0 }
 0x279   : > { %4389 = vmatprep.mubr.msk.bf16.mxu0 %vm1087_vm0, %v5654_v34  ;;  %4400 = vmatpush3.bf16.msra.mxu1 %v1470_v56  ;;  %v1040_v56 = vadd.f32 %v5772_v1, %v4088_v0 }
 0x27a   : > { %4426 = vmatpush3.bf16.xpose.msra.mxu0 %v1670_v51  ;;  %4409 = vmatprep.subr.bf16.mxu1 %v5702_v50  ;;  %v1656_v11 = vpop.permute.xlu1 %1655 }
 0x27b   : > { %v5711_v57 = vpop.permute.xlu0 %1554  ;;  %v1679_v24 = vsel %vm1087_vm0, %v1656_v11, 0 }
 0x27f   : > { %v1652_v7 = vpop.permute.xlu0 %1651 }
 0x280   : > { %4390 = vmatmul.mubr.msk.bf16.gmra.mrb[20].mxu0 %vm1087_vm0, %v5652_v33  ;;  %4646 = vmatprep.subr.msk.bf16.mxu0 %vm1087_vm0, %v1652_v7  ;;  %v1673_v17 = vsel %vm1087_vm0, %v1652_v7, 0  ;;  %v1039_v7 = vadd.f32 %v5776_v19, %v4087_v3 }
 0x282   : > { %4428 = vmatpush3.bf16.xpose.msra.mxu0 %v1673_v17 }
 0x283   : > { %v1654_v60 = vpop.permute.xlu0 %1653 }
 0x284   : > { %4647 = vmatprep.subr.msk.bf16.mxu0 %vm1087_vm0, %v1654_v60  ;;  %v1676_v10 = vsel %vm1087_vm0, %v1654_v60, 0 }
 0x28a   : > { %4430 = vmatpush3.bf16.xpose.msra.mxu0 %v1676_v10 }
 0x28b   : > { %4648 = vmatprep.subr.msk.bf16.mxu0 %vm1087_vm0, %v1656_v11 }
 0x292   : > { %4432 = vmatpush3.bf16.xpose.msra.mxu0 %v1679_v24 }
 0x32b   : > { %v4371_v38 = vpop.f32.mrb[0].mxu1 }
 0x32c   : > { %v5755_v39 = vadd.f32 %v4371_v38, %v1037_v21  ;;  %v1146_v53 = vpop.f32.mrb[1].mxu1 }
 0x32d   : > { %v4372_v42 = vpop.f32.mrb[2].mxu1  ;;  %v5760_v37 = vadd.f32 %v1146_v53, %v1035_v28 }
 0x32e   : > { %v1149_v44 = vpop.f32.mrb[3].mxu1  ;;  %v1285_v16 = vsel %vm1278_vm1, %v5755_v39, -inf  ;;  %v5778_v47 = vadd.f32 %v4372_v42, %v1038_v26 }
 0x32f   : > { %v5770_v59 = vadd.f32 %v1149_v44, %v1036_v52  ;;  %1286 = vmax.xlane.f32.xlu0 %v1285_v16  ;;  %v1279_v48 = vsel %vm1278_vm1, %v5760_v37, -inf }
 0x330   : > { %v1288_v10 = vsel %vm1278_vm1, %v5778_v47, -inf }
 0x331   : > { %v1282_v2 = vsel %vm1278_vm1, %v5770_v59, -inf }
 0x332   : > { %1283 = vmax.xlane.f32.xlu1 %v1282_v2 }
 0x333   : > { %v4375_v61 = vpop.f32.mrb[4].mxu1  ;;  %1280 = vmax.xlane.f32.xlu0 %v1279_v48 }
 0x334   : > { %v1162_v4 = vpop.f32.mrb[5].mxu1  ;;  %v5785_v51 = vadd.f32 %v4375_v61, %v1041_v43 }
 0x335   : > { %v4376_v5 = vpop.f32.mrb[6].mxu1  ;;  %v5796_v8 = vadd.f32 %v1162_v4, %v1039_v7 }
 0x336   : > { %v5788_v17 = vadd.f32 %v4376_v5, %v1042_v49  ;;  %v1165_v60 = vpop.f32.mrb[7].mxu1  ;;  %v1297_v12 = vsel %vm1278_vm1, %v5785_v51, -inf }
 0x337   : > { %1289 = vmax.xlane.f32.xlu0 %v1288_v10  ;;  %v5792_v11 = vadd.f32 %v1165_v60, %v1040_v56  ;;  %v1291_v35 = vsel %vm1278_vm1, %v5796_v8, -inf }
 0x338   : > { %v1300_v24 = vsel %vm1278_vm1, %v5788_v17, -inf }
 0x339   : > { %1301 = vmax.xlane.f32.xlu1 %v1300_v24  ;;  %v1294_v13 = vsel %vm1278_vm1, %v5792_v11, -inf }
 0x33b   : > { %1298 = vmax.xlane.f32.xlu0 %v1297_v12 }
 0x33d   : > { %1295 = vmax.xlane.f32.xlu1 %v1294_v13 }
 0x33f   : > { %1292 = vmax.xlane.f32.xlu0 %v1291_v35 }
 0x34b   : > { %v4387_v62 = vpop.f32.mrb[16].mxu0 }
 0x34c   : > { %v5804_v25 = vadd.f32 %v4387_v62, %v1037_v21  ;;  %v1247_v15 = vpop.f32.mrb[17].mxu0 }
 0x34d   : > { %v4388_v22 = vpop.f32.mrb[18].mxu0  ;;  %v5806_v18 = vadd.f32 %v1247_v15, %v1035_v28 }
 0x34e   : > { %v5808_v63 = vadd.f32 %v4388_v22, %v1038_v26  ;;  %v1250_v38 = vpop.f32.mrb[19].mxu0  ;;  %v1309_v53 = vsel %vm1278_vm1, %v5804_v25, -inf }
 0x34f   : > { %1310 = vmax.xlane.f32.xlu0 %v1309_v53  ;;  %v5812_v42 = vadd.f32 %v1250_v38, %v1036_v52  ;;  %v1303_v21 = vsel %vm1278_vm1, %v5806_v18, -inf }
 0x350   : > { %v1312_v31 = vsel %vm1278_vm1, %v5808_v63, -inf }
 0x351   : > { %1313 = vmax.xlane.f32.xlu1 %v1312_v31  ;;  %v1306_v16 = vsel %vm1278_vm1, %v5812_v42, -inf }
 0x353   : > { %v4391_v44 = vpop.f32.mrb[20].mxu0  ;;  %1304 = vmax.xlane.f32.xlu0 %v1303_v21 }
 0x354   : > { %v5818_v28 = vadd.f32 %v4391_v44, %v1041_v43  ;;  %v1263_v26 = vpop.f32.mrb[21].mxu0 }
 0x355   : > { %v4392_v46 = vpop.f32.mrb[22].mxu0  ;;  %1307 = vmax.xlane.f32.xlu1 %v1306_v16  ;;  %v5822_v27 = vadd.f32 %v1263_v26, %v1039_v7 }
 0x356   : > { %v5824_v52 = vadd.f32 %v4392_v46, %v1042_v49  ;;  %v1266_v54 = vpop.f32.mrb[23].mxu0  ;;  %v1321_v0 = vsel %vm1278_vm1, %v5818_v28, -inf  ;;  %v5840_v49 = vpop.permute.xlu1 %1756 }
 0x357   : > { %v5828_v2 = vadd.f32 %v1266_v54, %v1040_v56  ;;  %1322 = vmax.xlane.f32.xlu0 %v1321_v0  ;;  %v1315_v3 = vsel %vm1278_vm1, %v5822_v27, -inf }
 0x358   : > { %v1324_v43 = vsel %vm1278_vm1, %v5824_v52, -inf }
 0x359   : > { %v1318_v48 = vsel %vm1278_vm1, %v5828_v2, -inf }
 0x35a   : > { %v5842_v61 = vpop.permute.xlu1 %1556 }
 0x35b   : > { %1316 = vmax.xlane.f32.xlu0 %v1315_v3 }
 0x366   : > { %1643 = vrot.lane.b32.xlu1 %v5624_v58, %s5216_s19 }
 0x371   : > { %1641 = vrot.lane.b32.xlu0 %v5626_v40, %s5216_s19 }
 0x38a   : > { %1325 = vmax.xlane.f32.xlu1 %v1324_v43 }
 0x38e   : > { %1319 = vmax.xlane.f32.xlu1 %v1318_v48 }
 0x3bc   : > { %v1287_v4 = vpop.xlane.xlu0 %1286 }
 0x3bd   : > { %v1329_v56 = vsub.f32 %v5755_v39, %v1287_v4 }
 0x3bf   : > { %v1347_v5 = vmul.f32 1.442695, %v1329_v56  ;;  %v1284_v7 = vpop.xlane.xlu1 %1283 }
 0x3c0   : > { %v1281_v60 = vpop.xlane.xlu0 %1280  ;;  %v1328_v24 = vsub.f32 %v5770_v59, %v1284_v7 }
 0x3c1   : > { %4901 = vpow2.f32 %v1347_v5  ;;  %v1327_v10 = vsub.f32 %v5760_v37, %v1281_v60 }
 0x3c2   : > { %v1345_v15 = vmul.f32 1.442695, %v1328_v24 }
 0x3c3   : > { %v1343_v12 = vmul.f32 1.442695, %v1327_v10 }
 0x3c4   : > { %v1290_v13 = vpop.xlane.xlu0 %1289 }
 0x3c5   : > { %4903 = vpow2.f32 %v1343_v12  ;;  %v1330_v35 = vsub.f32 %v5778_v47, %v1290_v13 }
 0x3c6   : > { %v1302_v62 = vpop.xlane.xlu1 %1301 }
 0x3c7   : > { %v1349_v22 = vmul.f32 1.442695, %v1330_v35  ;;  %v1334_v31 = vsub.f32 %v5788_v17, %v1302_v62 }
 0x3c8   : > { %v1299_v38 = vpop.xlane.xlu0 %1298 }
 0x3c9   : > { %4905 = vpow2.f32 %v1349_v22  ;;  %v1333_v39 = vsub.f32 %v5785_v51, %v1299_v38  ;;  %v1357_v16 = vmul.f32 1.442695, %v1334_v31 }
 0x3ca   : > { %4907 = vpow2.f32 %v1345_v15  ;;  %v1296_v21 = vpop.xlane.xlu1 %1295 }
 0x3cb   : > { %v5849_v53 = vpop.eup %4901  ;;  %v1355_v37 = vmul.f32 1.442695, %v1333_v39  ;;  %v1332_v51 = vsub.f32 %v5792_v11, %v1296_v21 }
 0x3cc   : > { %v1293_v59 = vpop.xlane.xlu0 %1292  ;;  %v1381_v44 = vsel %vm1278_vm1, %v5849_v53, 0.0 }
 0x3cd   : > { %v1331_v47 = vsub.f32 %v5796_v8, %v1293_v59  ;;  %1382 = vadd.xlane.f32.xlu0 %v1381_v44  ;;  %4909 = vpow2.f32 %v1355_v37  ;;  %v1353_v0 = vmul.f32 1.442695, %v1332_v51 }
 0x3cf   : > { %v5855_v26 = vpop.eup %4903  ;;  %v1351_v46 = vmul.f32 1.442695, %v1331_v47 }
 0x3d0   : > { %v1375_v54 = vsel %vm1278_vm1, %v5855_v26, 0.0 }
 0x3d1   : > { %4911 = vpow2.f32 %v1351_v46  ;;  %1376 = vadd.xlane.f32.xlu0 %v1375_v54 }
 0x3d2   : > { %4913 = vpow2.f32 %v1357_v16 }
 0x3d3   : > { %v5860_v17 = vpop.eup %4905  ;;  %4915 = vpow2.f32 %v1353_v0 }
 0x3d4   : > { %v1384_v8 = vsel %vm1278_vm1, %v5860_v17, 0.0  ;;  %v5864_v3 = vpop.eup %4907 }
 0x3d5   : > { %1385 = vadd.xlane.f32.xlu1 %v1384_v8  ;;  %v1378_v11 = vsel %vm1278_vm1, %v5864_v3, 0.0 }
 0x3d7   : > { %v5868_v43 = vpop.eup %4909 }
 0x3d8   : > { %v1393_v60 = vsel %vm1278_vm1, %v5868_v43, 0.0 }
 0x3d9   : > { %1379 = vadd.xlane.f32.xlu1 %v1378_v11 }
 0x3db   : > { %v5871_v56 = vpop.eup %4911 }
 0x3dc   : > { %v1311_v48 = vpop.xlane.xlu0 %1310  ;;  %v1387_v10 = vsel %vm1278_vm1, %v5871_v56, 0.0  ;;  %v5878_v12 = vpop.eup %4913 }
 0x3dd   : > { %v1337_v4 = vsub.f32 %v5804_v25, %v1311_v48  ;;  %1394 = vadd.xlane.f32.xlu1 %v1393_v60  ;;  %1388 = vadd.xlane.f32.xlu0 %v1387_v10  ;;  %v1396_v22 = vsel %vm1278_vm1, %v5878_v12, 0.0  ;;  %v5884_v39 = vpop.eup %4915 }
 0x3de   : > { %v1314_v5 = vpop.xlane.xlu1 %1313  ;;  %v1390_v37 = vsel %vm1278_vm1, %v5884_v39, 0.0 }
 0x3df   : > { %v1363_v7 = vmul.f32 1.442695, %v1337_v4  ;;  %v1338_v24 = vsub.f32 %v5808_v63, %v1314_v5 }
 0x3e0   : > { %v1305_v13 = vpop.xlane.xlu0 %1304 }
 0x3e1   : > { %4917 = vpow2.f32 %v1363_v7  ;;  %v1365_v35 = vmul.f32 1.442695, %v1338_v24  ;;  %v1335_v25 = vsub.f32 %v5806_v18, %v1305_v13  ;;  %1397 = vadd.xlane.f32.xlu1 %v1396_v22 }
 0x3e2   : > { %v1308_v62 = vpop.xlane.xlu1 %1307 }
 0x3e3   : > { %4919 = vpow2.f32 %v1365_v35  ;;  %v1359_v15 = vmul.f32 1.442695, %v1335_v25  ;;  %v1336_v38 = vsub.f32 %v5812_v42, %v1308_v62 }
 0x3e4   : > { %v1323_v63 = vpop.xlane.xlu0 %1322 }
 0x3e5   : > { %4921 = vpow2.f32 %v1359_v15  ;;  %v1361_v31 = vmul.f32 1.442695, %v1336_v38  ;;  %1391 = vadd.xlane.f32.xlu1 %v1390_v37  ;;  %v1341_v8 = vsub.f32 %v5818_v28, %v1323_v63 }
 0x3e6   : > { %v1644_v42 = vpop.permute.xlu1 %1643 }
 0x3e7   : > { %4923 = vpow2.f32 %v1361_v31  ;;  %v1371_v11 = vmul.f32 1.442695, %v1341_v8 }
 0x3e8   : > { %v1317_v18 = vpop.xlane.xlu0 %1316 }
 0x3e9   : > { %v1339_v48 = vsub.f32 %v5822_v27, %v1317_v18  ;;  %4925 = vpow2.f32 %v1371_v11 }
 0x3eb   : > { %v5888_v21 = vpop.eup %4917  ;;  %v1367_v5 = vmul.f32 1.442695, %v1339_v48 }
 0x3ec   : > { %v1642_v59 = vpop.permute.xlu0 %1641  ;;  %v1405_v44 = vsel %vm1278_vm1, %v5888_v21, 0.0 }
 0x3ed   : > { %v5892_v47 = vpop.eup %4919  ;;  %1406 = vadd.xlane.f32.xlu1 %v1405_v44  ;;  %4433 = vmatprep.mubr.msk.bf16.mxu0 %vm1087_vm0, %v1642_v59  ;;  %4927 = vpow2.f32 %v1367_v5 }
 0x3ee   : > { %4434 = vmatmul.mubr.msk.bf16.vlgmr.msra.gmra.mrb[24].mxu0 %vm1087_vm0, %v1644_v42  ;;  %v1408_v51 = vsel %vm1278_vm1, %v5892_v47, 0.0 }
 0x3ef   : > { %v5896_v16 = vpop.eup %4921 }
 0x3f0   : > { %v1399_v46 = vsel %vm1278_vm1, %v5896_v16, 0.0 }
 0x3f1   : > { %v5902_v54 = vpop.eup %4923  ;;  %1409 = vadd.xlane.f32.xlu1 %v1408_v51  ;;  %1400 = vadd.xlane.f32.xlu0 %v1399_v46 }
 0x3f2   : > { %v1402_v0 = vsel %vm1278_vm1, %v5902_v54, 0.0 }
 0x3f3   : > { %v5914_v35 = vpop.eup %4925 }
 0x3f4   : > { %v1417_v28 = vsel %vm1278_vm1, %v5914_v35, 0.0 }
 0x3f5   : > { %1403 = vadd.xlane.f32.xlu1 %v1402_v0 }
 0x3f7   : > { %v5918_v25 = vpop.eup %4927 }
 0x406   : > { %1645 = vrot.lane.b32.xlu1 %v5636_v41, %s5216_s19 }
 0x407   : > { %1758 = vrot.lane.b32.xlu0 %v5654_v34, %s5215_s27 }
 0x417   : > { %v1326_v4 = vpop.xlane.xlu1 %1325 }
 0x418   : > { %v1342_v7 = vsub.f32 %v5824_v52, %v1326_v4  ;;  %v1411_v52 = vsel %vm1278_vm1, %v5918_v25, 0.0 }
 0x41a   : > { %v1373_v60 = vmul.f32 1.442695, %v1342_v7 }
 0x41b   : > { %v1320_v10 = vpop.xlane.xlu1 %1319 }
 0x41c   : > { %v1340_v24 = vsub.f32 %v5828_v2, %v1320_v10  ;;  %4929 = vpow2.f32 %v1373_v60 }
 0x41e   : > { %v1369_v13 = vmul.f32 1.442695, %v1340_v24 }
 0x420   : > { %4931 = vpow2.f32 %v1369_v13 }
 0x426   : > { %1418 = vadd.xlane.f32.xlu0 %v1417_v28  ;;  %v5920_v27 = vpop.eup %4929 }
 0x427   : > { %v1420_v15 = vsel %vm1278_vm1, %v5920_v27, 0.0 }
 0x42a   : > { %v5924_v62 = vpop.eup %4931  ;;  %1412 = vadd.xlane.f32.xlu0 %v1411_v52 }
 0x42b   : > { %v1414_v2 = vsel %vm1278_vm1, %v5924_v62, 0.0 }
 0x42c   : > { %1415 = vadd.xlane.f32.xlu1 %v1414_v2 }
 0x42e   : > { %1421 = vadd.xlane.f32.xlu0 %v1420_v15 }
 0x43d   : > { %1760 = vrot.lane.b32.xlu1 %v5652_v33, %s5215_s27 }
 0x441   : > { %1748 = vrot.lane.b32.xlu1 %v5642_v29, %s5216_s19 }
 0x444   : > { %1647 = vrot.lane.b32.xlu0 %v5634_v45, %s5216_s19 }
 0x445   : > { %1752 = vrot.lane.b32.xlu1 %v5652_v33, %s5216_s19 }
 0x448   : > { %1746 = vrot.lane.b32.xlu0 %v5644_v30, %s5216_s19 }
 0x44c   : > { %1750 = vrot.lane.b32.xlu0 %v5654_v34, %s5216_s19  ;;  %s5219_s19 = smov 112  }
 0x45a   : > { %v1383_v22 = vpop.xlane.xlu0 %1382 }
 0x45e   : > { %v1377_v38 = vpop.xlane.xlu0 %1376 }
 0x462   : > { %v1386_v63 = vpop.xlane.xlu1 %1385 }
 0x463   : > { %4933 = vrcp.f32 %v1386_v63 }
 0x464   : > { %4935 = vrcp.f32 %v1377_v38 }
 0x465   : > { %4937 = vrcp.f32 %v1383_v22 }
 0x466   : > { %v1380_v31 = vpop.xlane.xlu1 %1379 }
 0x467   : > { %4939 = vrcp.f32 %v1380_v31 }
 0x46a   : > { %v1395_v37 = vpop.xlane.xlu1 %1394  ;;  %v1389_v59 = vpop.xlane.xlu0 %1388 }
 0x46d   : > { %v4934_v18 = vpop.eup %4933 }
 0x46e   : > { %v1398_v44 = vpop.xlane.xlu1 %1397  ;;  %v4936_v42 = vpop.eup %4935  ;;  %v1442_v0 = vmul.f32 %v4934_v18, %v5860_v17 }
 0x46f   : > { %v4938_v51 = vpop.eup %4937  ;;  %4941 = vrcp.f32 %v1398_v44  ;;  %v1439_v11 = vmul.f32 %v4936_v42, %v5855_v26 }
 0x470   : > { %4943 = vrcp.f32 %v1389_v59  ;;  %v1441_v4 = vmul.f32 %v4938_v51, %v5849_v53 }
 0x471   : > { %v4940_v46 = vpop.eup %4939  ;;  %4945 = vrcp.f32 %v1395_v37 }
 0x472   : > { %v1392_v8 = vpop.xlane.xlu1 %1391  ;;  %v1440_v48 = vmul.f32 %v4940_v46, %v5864_v3  ;;  %v1456_v7 = vpack.c.bf16 %v1442_v0, %v1441_v4 }
 0x473   : > { %4947 = vrcp.f32 %v1392_v8 }
 0x474   : > { %v1455_v5 = vpack.c.bf16 %v1440_v48, %v1439_v11 }
 0x476   : > { %4401 = vmatprep.mubr.msk.bf16.mxu1 %vm1278_vm1, %v1455_v5 }
 0x477   : > { %4402 = vmatmul.mubr.msk.bf16.vlgmr.msra.gmra.mrb[8].mxu1 %vm1278_vm1, %v1456_v7 }
 0x478   : > { %4410 = vmatpush3.bf16.msra.mxu1 %v5702_v50 }
 0x479   : > { %4411 = vmatprep.subr.bf16.mxu1 %v5711_v57  ;;  %v4942_v17 = vpop.eup %4941 }
 0x47a   : > { %v1407_v60 = vpop.xlane.xlu1 %1406  ;;  %v4944_v10 = vpop.eup %4943  ;;  %v1446_v3 = vmul.f32 %v4942_v17, %v5878_v12 }
 0x47b   : > { %v4946_v13 = vpop.eup %4945  ;;  %v1443_v28 = vmul.f32 %v4944_v10, %v5871_v56 }
 0x47c   : > { %4412 = vmatpush3.bf16.msra.mxu1 %v5711_v57  ;;  %v1445_v2 = vmul.f32 %v4946_v13, %v5868_v43 }
 0x47d   : > { %v4948_v53 = vpop.eup %4947  ;;  %4413 = vmatprep.subr.bf16.mxu1 %v5842_v61 }
 0x47e   : > { %v1410_v24 = vpop.xlane.xlu1 %1409  ;;  %v1401_v26 = vpop.xlane.xlu0 %1400  ;;  %v1444_v50 = vmul.f32 %v4948_v53, %v5884_v39  ;;  %v1458_v57 = vpack.c.bf16 %v1446_v3, %v1445_v2 }
 0x47f   : > { %4949 = vrcp.f32 %v1410_v24 }
 0x480   : > { %4951 = vrcp.f32 %v1401_v26  ;;  %4414 = vmatpush3.bf16.msra.mxu1 %v5842_v61  ;;  %v1457_v15 = vpack.c.bf16 %v1444_v50, %v1443_v28 }
 0x481   : > { %4953 = vrcp.f32 %v1407_v60  ;;  %4415 = vmatprep.subr.bf16.mxu1 %v5713_v6 }
 0x482   : > { %v1404_v52 = vpop.xlane.xlu1 %1403  ;;  %4405 = vmatprep.mubr.msk.bf16.mxu1 %vm1278_vm1, %v1457_v15 }
 0x483   : > { %4955 = vrcp.f32 %v1404_v52  ;;  %4406 = vmatmul.mubr.msk.bf16.gmra.mrb[12].mxu1 %vm1278_vm1, %v1458_v57 }
 0x484   : > { %4416 = vmatpush3.bf16.msra.mxu1 %v5713_v6  ;;  %v1775_v6 = vsel %vm1087_vm0, %v5719_v9, 0 }
 0x485   : > { %4649 = vmatprep.subr.msk.bf16.mxu1 %vm1087_vm0, %v5719_v9  ;;  %v4160_v9 = vld [vmem:[%s7098_s7 + $0x20] sm:$0xff]  }
 0x486   : > { %v1646_v12 = vpop.permute.xlu1 %1645  ;;  %v4095_v51 = vunpack.c.l.bf16 %v4160_v9  ;;  %v4096_v8 = vunpack.c.h.bf16 %v4160_v9 }
 0x487   : > { %4437 = vmatprep.mubr.msk.bf16.mxu0 %vm1087_vm0, %v1646_v12 }
 0x488   : > { %v5987_v4 = vadd.f32 %v5742_v36, %v4095_v51  ;;  %v5994_v17 = vadd.f32 %v5744_v20, %v4096_v8 }
 0x489   : > { %v4950_v43 = vpop.eup %4949 }
 0x48a   : > { %v4952_v56 = vpop.eup %4951  ;;  %v1450_v22 = vmul.f32 %v4950_v43, %v5892_v47  ;;  %v1778_v47 = vsel %vm1087_vm0, %v5840_v49, 0 }
 0x48b   : > { %v4954_v61 = vpop.eup %4953  ;;  %v1447_v38 = vmul.f32 %v4952_v56, %v5896_v16  ;;  %v1759_v16 = vpop.permute.xlu0 %1758 }
 0x48c   : > { %v1449_v31 = vmul.f32 %v4954_v61, %v5888_v21  ;;  %v1781_v21 = vsel %vm1087_vm0, %v1759_v16, 0 }
 0x48d   : > { %v4956_v39 = vpop.eup %4955 }
 0x48e   : > { %v1448_v63 = vmul.f32 %v4956_v39, %v5902_v54  ;;  %v1460_v18 = vpack.c.bf16 %v1450_v22, %v1449_v31 }
 0x490   : > { %v1459_v37 = vpack.c.bf16 %v1448_v63, %v1447_v38 }
 0x492   : > { %4417 = vmatprep.mubr.msk.bf16.mxu1 %vm1278_vm1, %v1459_v37 }
 0x493   : > { %4418 = vmatmul.mubr.msk.bf16.vlgmr.msra.gmra.mrb[16].mxu1 %vm1278_vm1, %v1460_v18 }
 0x494   : > { %4442 = vmatpush3.bf16.xpose.msra.mxu1 %v1775_v6 }
 0x495   : > { %4650 = vmatprep.subr.msk.bf16.mxu1 %vm1087_vm0, %v5840_v49  ;;  %v4161_v49 = vld [vmem:[%s7098_s7 + $0x28] sm:$0xff]  }
 0x496   : > { %v4099_v46 = vunpack.c.l.bf16 %v4161_v49  ;;  %v4100_v7 = vunpack.c.h.bf16 %v4161_v49 }
 0x498   : > { %v5991_v5 = vadd.f32 %v5740_v14, %v4099_v46  ;;  %v6003_v50 = vadd.f32 %v5747_v23, %v4100_v7  ;;  %v4162_v46 = vld [vmem:[%s7098_s7 + $0x30] sm:$0xff]  }
 0x499   : > { %v4103_v8 = vunpack.c.l.bf16 %v4162_v46 }
 0x49b   : > { %v1047_v7 = vadd.f32 %v5776_v19, %v4103_v8 }
 0x49c   : > { %4444 = vmatpush3.bf16.xpose.msra.mxu1 %v1778_v47 }
 0x49d   : > { %4651 = vmatprep.subr.msk.bf16.mxu1 %vm1087_vm0, %v1759_v16 }
 0x4a4   : > { %4446 = vmatpush3.bf16.xpose.msra.mxu1 %v1781_v21 }
 0x4b3   : > { %v1419_v54 = vpop.xlane.xlu0 %1418 }
 0x4b7   : > { %v1413_v59 = vpop.xlane.xlu0 %1412 }
 0x4b8   : > { %4957 = vrcp.f32 %v1413_v59 }
 0x4b9   : > { %4959 = vrcp.f32 %v1419_v54  ;;  %v1416_v44 = vpop.xlane.xlu1 %1415 }
 0x4ba   : > { %4961 = vrcp.f32 %v1416_v44 }
 0x4bb   : > { %v1422_v42 = vpop.xlane.xlu0 %1421 }
 0x4bc   : > { %4963 = vrcp.f32 %v1422_v42 }
 0x4bd   : > { %v1761_v0 = vpop.permute.xlu1 %1760 }
 0x4be   : > { %4652 = vmatprep.subr.msk.bf16.mxu1 %vm1087_vm0, %v1761_v0  ;;  %v1784_v11 = vsel %vm1087_vm0, %v1761_v0, 0  ;;  %v4163_v0 = vld [vmem:[%s7098_s7 + $0x38] sm:$0xff]  }
 0x4bf   : > { %4448 = vmatpush3.bf16.xpose.msra.mxu1 %v1784_v11  ;;  %v1648_v48 = vpop.permute.xlu0 %1647  ;;  %v4107_v11 = vunpack.c.l.bf16 %v4163_v0 }
 0x4c0   : > { %4438 = vmatmul.mubr.msk.bf16.gmra.mrb[28].mxu0 %vm1087_vm0, %v1648_v48  ;;  %v4104_v48 = vunpack.c.h.bf16 %v4162_v46 }
 0x4c1   : > { %v4435_v60 = vpop.f32.mrb[24].mxu0 }
 0x4c2   : > { %v4958_v10 = vpop.eup %4957  ;;  %v1715_v24 = vpop.f32.mrb[25].mxu0  ;;  %v6000_v28 = vadd.f32 %v4435_v60, %v5991_v5  ;;  %v4108_v60 = vunpack.c.h.bf16 %v4163_v0 }
 0x4c3   : > { %v4960_v26 = vpop.eup %4959  ;;  %v5997_v13 = vadd.f32 %v1715_v24, %v5987_v4  ;;  %v4436_v53 = vpop.f32.mrb[26].mxu0  ;;  %v1451_v57 = vmul.f32 %v4958_v10, %v5918_v25  ;;  %v1049_v10 = vadd.f32 %v5758_v32, %v4107_v11 }
 0x4c4   : > { %v4962_v3 = vpop.eup %4961  ;;  %v1718_v52 = vpop.f32.mrb[27].mxu0  ;;  %v1453_v39 = vmul.f32 %v4960_v26, %v5914_v35  ;;  %v6017_v38 = vadd.f32 %v4436_v53, %v6003_v50  ;;  %v1857_v25 = vsel %vm1278_vm1, %v6000_v28, -inf  ;;  %v1048_v26 = vadd.f32 %v5772_v1, %v4104_v48 }
 0x4c5   : > { %v6006_v2 = vadd.f32 %v1718_v52, %v5994_v17  ;;  %v1851_v15 = vsel %vm1278_vm1, %v5997_v13, -inf  ;;  %v1452_v12 = vmul.f32 %v4962_v3, %v5924_v62  ;;  %v1747_v63 = vpop.permute.xlu0 %1746  ;;  %v1050_v52 = vadd.f32 %v5768_v55, %v4108_v60 }
 0x4c6   : > { %v4964_v43 = vpop.eup %4963  ;;  %1852 = vmax.xlane.f32.xlu0 %v1851_v15  ;;  %v1860_v35 = vsel %vm1278_vm1, %v6017_v38, -inf }
 0x4c7   : > { %v1854_v56 = vsel %vm1278_vm1, %v6006_v2, -inf  ;;  %v1461_v61 = vpack.c.bf16 %v1452_v12, %v1451_v57  ;;  %v1454_v22 = vmul.f32 %v4964_v43, %v5920_v27  ;;  %v1749_v27 = vpop.permute.xlu1 %1748 }
 0x4c8   : > { %1855 = vmax.xlane.f32.xlu1 %v1854_v56 }
 0x4c9   : > { %4421 = vmatprep.mubr.msk.bf16.mxu1 %vm1278_vm1, %v1461_v61  ;;  %v1462_v62 = vpack.c.bf16 %v1454_v22, %v1453_v39  ;;  %v1751_v31 = vpop.permute.xlu0 %1750 }
 0x4ca   : > { %1858 = vmax.xlane.f32.xlu0 %v1857_v25 }
 0x4cb   : > { %4422 = vmatmul.mubr.msk.bf16.gmra.mrb[20].mxu1 %vm1278_vm1, %v1462_v62  ;;  %v1753_v37 = vpop.permute.xlu1 %1752 }
 0x4cc   : > { %4449 = vmatprep.mubr.msk.bf16.mxu1 %vm1087_vm0, %v1747_v63 }
 0x4ce   : > { %1861 = vmax.xlane.f32.xlu0 %v1860_v35 }
 0x4d3   : > { %4450 = vmatmul.mubr.msk.bf16.vlgmr.msra.gmra.mrb[24].mxu1 %vm1087_vm0, %v1749_v27 }
 0x4d4   : > { %4453 = vmatprep.mubr.msk.bf16.mxu1 %vm1087_vm0, %v1751_v31 }
 0x4db   : > { %4454 = vmatmul.mubr.msk.bf16.gmra.mrb[28].mxu1 %vm1087_vm0, %v1753_v37 }
 0x54a   : > { %v6029_v18 = vpop.f32.mrb[8].mxu1 }
 0x54b   : > { %7116 = vst [vmem:[#allocation5_spill] sm:$0xff] %v6029_v18  ;;  %v6031_v6 = vpop.f32.mrb[9].mxu1 }
 0x54c   : > { %7117 = vst [vmem:[#allocation6_spill] sm:$0xff] %v6031_v6  ;;  %v6033_v47 = vpop.f32.mrb[10].mxu1 }
 0x54d   : > { %7118 = vst [vmem:[#allocation7_spill] sm:$0xff] %v6033_v47  ;;  %v6035_v16 = vpop.f32.mrb[11].mxu1 }
 0x54e   : > { %7119 = vst [vmem:[#allocation8_spill] sm:$0xff] %v6035_v16 }
 0x556   : > { %v6037_v21 = vpop.f32.mrb[12].mxu1 }
 0x557   : > { %7120 = vst [vmem:[#allocation9_spill] sm:$0xff] %v6037_v21  ;;  %v6039_v54 = vpop.f32.mrb[13].mxu1 }
 0x558   : > { %7121 = vst [vmem:[#allocation10_spill] sm:$0xff] %v6039_v54  ;;  %v6041_v59 = vpop.f32.mrb[14].mxu1 }
 0x559   : > { %7122 = vst [vmem:[#allocation11_spill] sm:$0xff] %v6041_v59  ;;  %v6043_v9 = vpop.f32.mrb[15].mxu1 }
 0x55a   : > { %7123 = vst [vmem:[#allocation12_spill] sm:$0xff] %v6043_v9 }
 0x566   : > { %v6045_v44 = vpop.f32.mrb[16].mxu1 }
 0x567   : > { %7124 = vst [vmem:[#allocation13_spill] sm:$0xff] %v6045_v44  ;;  %v6047_v49 = vpop.f32.mrb[17].mxu1 }
 0x568   : > { %7125 = vst [vmem:[#allocation14_spill] sm:$0xff] %v6047_v49  ;;  %v6049_v42 = vpop.f32.mrb[18].mxu1 }
 0x569   : > { %7126 = vst [vmem:[#allocation15_spill] sm:$0xff] %v6049_v42  ;;  %v6051_v51 = vpop.f32.mrb[19].mxu1 }
 0x56a   : > { %7127 = vst [vmem:[#allocation16_spill] sm:$0xff] %v6051_v51 }
 0x593   : > { %v4439_v24 = vpop.f32.mrb[28].mxu0 }
 0x594   : > { %v1731_v53 = vpop.f32.mrb[29].mxu0  ;;  %v6065_v12 = vadd.f32 %v4439_v24, %v1049_v10 }
 0x595   : > { %v6062_v3 = vadd.f32 %v1731_v53, %v1047_v7  ;;  %v4440_v15 = vpop.f32.mrb[30].mxu0 }
 0x596   : > { %v1734_v57 = vpop.f32.mrb[31].mxu0  ;;  %v6071_v61 = vadd.f32 %v4440_v15, %v1050_v52  ;;  %v1869_v22 = vsel %vm1278_vm1, %v6065_v12, -inf }
 0x597   : > { %v6067_v43 = vadd.f32 %v1734_v57, %v1048_v26  ;;  %v1863_v56 = vsel %vm1278_vm1, %v6062_v3, -inf }
 0x598   : > { %1864 = vmax.xlane.f32.xlu0 %v1863_v56  ;;  %v1872_v25 = vsel %vm1278_vm1, %v6071_v61, -inf  ;;  %v1856_v56 = vpop.xlane.xlu1 %1855 }
 0x599   : > { %v1866_v39 = vsel %vm1278_vm1, %v6067_v43, -inf }
 0x59a   : > { %1867 = vmax.xlane.f32.xlu1 %v1866_v39  ;;  %v1900_v39 = vsub.f32 %v6006_v2, %v1856_v56 }
 0x59c   : > { %1870 = vmax.xlane.f32.xlu0 %v1869_v22 }
 0x59e   : > { %v6079_v62 = vpop.f32.mrb[20].mxu1  ;;  %1873 = vmax.xlane.f32.xlu1 %v1872_v25 }
 0x59f   : > { %7128 = vst [vmem:[#allocation17_spill] sm:$0xff] %v6079_v62  ;;  %v6081_v63 = vpop.f32.mrb[21].mxu1 }
 0x5a0   : > { %7129 = vst [vmem:[#allocation18_spill] sm:$0xff] %v6081_v63  ;;  %v6083_v35 = vpop.f32.mrb[22].mxu1 }
 0x5a1   : > { %7130 = vst [vmem:[#allocation19_spill] sm:$0xff] %v6083_v35  ;;  %v6085_v27 = vpop.f32.mrb[23].mxu1 }
 0x5a2   : > { %7131 = vst [vmem:[#allocation20_spill] sm:$0xff] %v6085_v27 }
 0x5a6   : > { %v6087_v31 = vpop.f32.mrb[24].mxu1 }
 0x5a7   : > { %v6089_v37 = vpop.f32.mrb[25].mxu1 }
 0x5a8   : > { %v6091_v46 = vpop.f32.mrb[26].mxu1 }
 0x5a9   : > { %v6093_v0 = vpop.f32.mrb[27].mxu1 }
 0x5ae   : > { %v4455_v8 = vpop.f32.mrb[28].mxu1 }
 0x5af   : > { %v6095_v11 = vadd.f32 %v4455_v8, %v1049_v10  ;;  %2037 = vrot.lane.b32.xlu1 %v5624_v58, %s5217_s23  ;;  %v1836_v48 = vpop.f32.mrb[29].mxu1  ;;  %v1853_v10 = vpop.xlane.xlu0 %1852  ;;  %v1917_v8 = vmul.f32 1.442695, %v1900_v39 }
 0x5b0   : > { %v6098_v60 = vadd.f32 %v1836_v48, %v1047_v7  ;;  %v4456_v24 = vpop.f32.mrb[30].mxu1  ;;  %v1899_v48 = vsub.f32 %v5997_v13, %v1853_v10 }
 0x5b1   : > { %v6100_v53 = vadd.f32 %v4456_v24, %v1050_v52  ;;  %v1839_v15 = vpop.f32.mrb[31].mxu1 }
 0x5b2   : > { %v6102_v57 = vadd.f32 %v1839_v15, %v1048_v26  ;;  %2035 = vrot.lane.b32.xlu0 %v5626_v40, %s5217_s23  ;;  %v1915_v15 = vmul.f32 1.442695, %v1899_v48 }
 0x5b3   : > { %2041 = vrot.lane.b32.xlu1 %v5634_v45, %s5217_s23  ;;  %v1859_v7 = vpop.xlane.xlu0 %1858 }
 0x5b4   : > { %v1901_v25 = vsub.f32 %v6000_v28, %v1859_v7 }
 0x5b6   : > { %2039 = vrot.lane.b32.xlu0 %v5636_v41, %s5217_s23  ;;  %v1919_v24 = vmul.f32 1.442695, %v1901_v25 }
 0x5b7   : > { %2128 = vrot.lane.b32.xlu1 %v5654_v34, %s5217_s23  ;;  %v1862_v26 = vpop.xlane.xlu0 %1861 }
 0x5b8   : > { %v1902_v52 = vsub.f32 %v6017_v38, %v1862_v26 }
 0x5ba   : > { %2124 = vrot.lane.b32.xlu0 %v5644_v30, %s5217_s23  ;;  %v1921_v22 = vmul.f32 1.442695, %v1902_v52 }
 0x5bb   : > { %2223 = vrot.lane.b32.xlu1 %v5624_v58, %s5218_s18 }
 0x5bc   : > { %4965 = vpow2.f32 %v1921_v22 }
 0x5bd   : > { %4967 = vpow2.f32 %v1917_v8 }
 0x5be   : > { %2126 = vrot.lane.b32.xlu0 %v5642_v29, %s5217_s23  ;;  %4969 = vpow2.f32 %v1919_v24 }
 0x5bf   : > { %4971 = vpow2.f32 %v1915_v15 }
 0x5c2   : > { %2221 = vrot.lane.b32.xlu0 %v5626_v40, %s5218_s18 }
 0x5c6   : > { %2130 = vrot.lane.b32.xlu0 %v5652_v33, %s5217_s23  ;;  %v6119_v63 = vpop.eup %4965  ;;  %s5220_s23 = smov 48  }
 0x5c7   : > { %v1956_v38 = vsel %vm1278_vm1, %v6119_v63, 0.0  ;;  %v6123_v26 = vpop.eup %4967 }
 0x5c8   : > { %v6125_v2 = vpop.eup %4969  ;;  %v1950_v28 = vsel %vm1278_vm1, %v6123_v26, 0.0 }
 0x5c9   : > { %v1953_v13 = vsel %vm1278_vm1, %v6125_v2, 0.0  ;;  %v6131_v10 = vpop.eup %4971 }
 0x5ca   : > { %v1947_v7 = vsel %vm1278_vm1, %v6131_v10, 0.0 }
 0x5df   : > { %1957 = vadd.xlane.f32.xlu1 %v1956_v38 }
 0x5e3   : > { %1951 = vadd.xlane.f32.xlu1 %v1950_v28 }
 0x5e5   : > { %1954 = vadd.xlane.f32.xlu0 %v1953_v13 }
 0x5e9   : > { %1948 = vadd.xlane.f32.xlu0 %v1947_v7 }
 0x625   : > { %v1865_v52 = vpop.xlane.xlu0 %1864 }
 0x626   : > { %v1903_v56 = vsub.f32 %v6062_v3, %v1865_v52 }
 0x627   : > { %v1868_v39 = vpop.xlane.xlu1 %1867 }
 0x628   : > { %v1923_v22 = vmul.f32 1.442695, %v1903_v56  ;;  %v1904_v24 = vsub.f32 %v6067_v43, %v1868_v39  ;;  %v6143_v43 = vadd.f32 %v6087_v31, %v5991_v5 }
 0x629   : > { %v1871_v25 = vpop.xlane.xlu0 %1870 }
 0x62a   : > { %4973 = vpow2.f32 %v1923_v22  ;;  %v1905_v8 = vsub.f32 %v6065_v12, %v1871_v25  ;;  %v1925_v27 = vmul.f32 1.442695, %v1904_v24  ;;  %v6153_v22 = vadd.f32 %v6089_v37, %v5987_v4 }
 0x62b   : > { %v1874_v48 = vpop.xlane.xlu1 %1873  ;;  %v1881_v5 = vsel %vm1278_vm1, %v6143_v43, -inf }
 0x62c   : > { %v1927_v15 = vmul.f32 1.442695, %v1905_v8  ;;  %v1906_v38 = vsub.f32 %v6071_v61, %v1874_v48  ;;  %v1875_v4 = vsel %vm1278_vm1, %v6153_v22, -inf }
 0x62d   : > { %v2036_v28 = vpop.permute.xlu0 %2035 }
 0x62e   : > { %4975 = vpow2.f32 %v1927_v15  ;;  %v1929_v13 = vmul.f32 1.442695, %v1906_v38  ;;  %4457 = vmatprep.subr.bf16.mxu1 %v2036_v28 }
 0x62f   : > { %v2038_v7 = vpop.permute.xlu1 %2037  ;;  %4458 = vmatpush3.bf16.msra.mxu1 %v2036_v28  ;;  %v6174_v28 = vadd.f32 %v6091_v46, %v6003_v50 }
 0x630   : > { %4977 = vpow2.f32 %v1929_v13  ;;  %4459 = vmatprep.subr.bf16.mxu1 %v2038_v7  ;;  %v1893_v13 = vsel %vm1278_vm1, %v6095_v11, -inf }
 0x631   : > { %v2040_v3 = vpop.permute.xlu0 %2039  ;;  %4979 = vpow2.f32 %v1925_v27  ;;  %v1884_v50 = vsel %vm1278_vm1, %v6174_v28, -inf }
 0x633   : > { %4460 = vmatpush3.bf16.msra.mxu1 %v2038_v7  ;;  %v2042_v12 = vpop.permute.xlu1 %2041 }
 0x634   : > { %v6139_v52 = vpop.eup %4973  ;;  %4461 = vmatprep.subr.bf16.mxu1 %v2040_v3 }
 0x635   : > { %v6145_v61 = vpop.permute.xlu0 %2124  ;;  %v1959_v56 = vsel %vm1278_vm1, %v6139_v52, 0.0 }
 0x636   : > { %1960 = vadd.xlane.f32.xlu0 %v1959_v56 }
 0x637   : > { %4462 = vmatpush3.bf16.msra.mxu1 %v2040_v3  ;;  %v2129_v8 = vpop.permute.xlu1 %2128  ;;  %v6183_v3 = vadd.f32 %v6093_v0, %v5994_v17 }
 0x638   : > { %v6149_v39 = vpop.eup %4975  ;;  %4463 = vmatprep.subr.bf16.mxu1 %v2042_v12 }
 0x639   : > { %v6155_v27 = vpop.permute.xlu0 %2126  ;;  %v1965_v31 = vsel %vm1278_vm1, %v6149_v39, 0.0  ;;  %v1878_v56 = vsel %vm1278_vm1, %v6183_v3, -inf }
 0x63a   : > { %v6161_v25 = vpop.eup %4977  ;;  %1882 = vmax.xlane.f32.xlu0 %v1881_v5  ;;  %1966 = vadd.xlane.f32.xlu1 %v1965_v31 }
 0x63b   : > { %4464 = vmatpush3.bf16.msra.mxu1 %v2042_v12  ;;  %v1968_v37 = vsel %vm1278_vm1, %v6161_v25, 0.0  ;;  %v6168_v24 = vpop.eup %4979  ;;  %v2224_v38 = vpop.permute.xlu1 %2223  ;;  %v1887_v12 = vsel %vm1278_vm1, %v6098_v60, -inf }
 0x63c   : > { %4473 = vmatprep.subr.bf16.mxu1 %v6145_v61  ;;  %v1962_v7 = vsel %vm1278_vm1, %v6168_v24, 0.0  ;;  %v2245_v46 = vsel %vm1087_vm0, %v2224_v38, 0 }
 0x63d   : > { %v2222_v48 = vpop.permute.xlu0 %2221 }
 0x63e   : > { %1876 = vmax.xlane.f32.xlu0 %v1875_v4  ;;  %1969 = vadd.xlane.f32.xlu1 %v1968_v37  ;;  %v2242_v15 = vsel %vm1087_vm0, %v2222_v48, 0 }
 0x63f   : > { %4653 = vmatprep.subr.msk.bf16.mxu0 %vm1087_vm0, %v2222_v48 }
 0x640   : > { %4490 = vmatpush3.bf16.xpose.msra.mxu0 %v2242_v15 }
 0x641   : > { %4654 = vmatprep.subr.msk.bf16.mxu0 %vm1087_vm0, %v2224_v38  ;;  %v2131_v0 = vpop.permute.xlu0 %2130 }
 0x642   : > { %1894 = vmax.xlane.f32.xlu0 %v1893_v13  ;;  %1963 = vadd.xlane.f32.xlu1 %v1962_v7  ;;  %v1896_v7 = vsel %vm1278_vm1, %v6100_v53, -inf }
 0x646   : > { %1888 = vmax.xlane.f32.xlu0 %v1887_v12  ;;  %1885 = vmax.xlane.f32.xlu1 %v1884_v50 }
 0x648   : > { %4492 = vmatpush3.bf16.xpose.msra.mxu0 %v2245_v46 }
 0x64a   : > { %1879 = vmax.xlane.f32.xlu1 %v1878_v56 }
 0x65b   : > { %2326 = vrot.lane.b32.xlu1 %v5644_v30, %s5218_s18 }
 0x65c   : > { %2225 = vrot.lane.b32.xlu0 %v5636_v41, %s5218_s18 }
 0x65f   : > { %2227 = vrot.lane.b32.xlu1 %v5634_v45, %s5218_s18 }
 0x66c   : > { %v1958_v17 = vpop.xlane.xlu1 %1957 }
 0x670   : > { %v1952_v5 = vpop.xlane.xlu1 %1951 }
 0x672   : > { %v1955_v31 = vpop.xlane.xlu0 %1954 }
 0x673   : > { %4981 = vrcp.f32 %v1955_v31 }
 0x674   : > { %4983 = vrcp.f32 %v1952_v5  ;;  %v1890_v5 = vsel %vm1278_vm1, %v6102_v57, -inf }
 0x675   : > { %4985 = vrcp.f32 %v1958_v17 }
 0x676   : > { %v1949_v48 = vpop.xlane.xlu0 %1948 }
 0x677   : > { %4987 = vrcp.f32 %v1949_v48 }
 0x67d   : > { %v4982_v4 = vpop.eup %4981 }
 0x67e   : > { %v4984_v37 = vpop.eup %4983  ;;  %v2013_v13 = vmul.f32 %v4982_v4, %v6125_v2 }
 0x67f   : > { %v4986_v15 = vpop.eup %4985  ;;  %v2012_v50 = vmul.f32 %v4984_v37, %v6123_v26 }
 0x680   : > { %v2014_v46 = vmul.f32 %v4986_v15, %v6119_v63 }
 0x681   : > { %v4988_v38 = vpop.eup %4987 }
 0x682   : > { %v2011_v12 = vmul.f32 %v4988_v38, %v6131_v10  ;;  %v2028_v17 = vpack.c.bf16 %v2014_v46, %v2013_v13 }
 0x683   : > { %1897 = vmax.xlane.f32.xlu1 %v1896_v7 }
 0x684   : > { %v2027_v56 = vpack.c.bf16 %v2012_v50, %v2011_v12 }
 0x686   : > { %4465 = vmatprep.mubr.msk.bf16.mxu1 %vm1278_vm1, %v2027_v56 }
 0x687   : > { %1891 = vmax.xlane.f32.xlu1 %v1890_v5  ;;  %4466 = vmatmul.mubr.msk.bf16.vlgmr.msra.gmra.mrb[32].mxu1 %vm1278_vm1, %v2028_v17 }
 0x688   : > { %4474 = vmatpush3.bf16.msra.mxu1 %v6145_v61 }
 0x689   : > { %4475 = vmatprep.subr.bf16.mxu1 %v6155_v27 }
 0x68c   : > { %4476 = vmatpush3.bf16.msra.mxu1 %v6155_v27 }
 0x68d   : > { %4477 = vmatprep.subr.bf16.mxu1 %v2129_v8 }
 0x690   : > { %4478 = vmatpush3.bf16.msra.mxu1 %v2129_v8 }
 0x691   : > { %4479 = vmatprep.subr.bf16.mxu1 %v2131_v0 }
 0x694   : > { %4480 = vmatpush3.bf16.msra.mxu1 %v2131_v0 }
 0x698   : > { %2328 = vrot.lane.b32.xlu1 %v5642_v29, %s5218_s18 }
 0x6c3   : > { %v1961_v63 = vpop.xlane.xlu0 %1960 }
 0x6c7   : > { %v1967_v26 = vpop.xlane.xlu1 %1966  ;;  %v1883_v2 = vpop.xlane.xlu0 %1882 }
 0x6c8   : > { %v1909_v10 = vsub.f32 %v6143_v43, %v1883_v2 }
 0x6ca   : > { %v1935_v31 = vmul.f32 1.442695, %v1909_v10 }
 0x6cb   : > { %v1970_v48 = vpop.xlane.xlu1 %1969  ;;  %v1877_v4 = vpop.xlane.xlu0 %1876 }
 0x6cc   : > { %4989 = vpow2.f32 %v1935_v31  ;;  %v1907_v61 = vsub.f32 %v6153_v22, %v1877_v4 }
 0x6cd   : > { %4991 = vrcp.f32 %v1961_v63 }
 0x6ce   : > { %4993 = vrcp.f32 %v1970_v48  ;;  %v1931_v27 = vmul.f32 1.442695, %v1907_v61 }
 0x6cf   : > { %4995 = vrcp.f32 %v1967_v26  ;;  %v1964_v8 = vpop.xlane.xlu1 %1963  ;;  %v1895_v0 = vpop.xlane.xlu0 %1894 }
 0x6d0   : > { %4997 = vpow2.f32 %v1931_v27 }
 0x6d1   : > { %4999 = vrcp.f32 %v1964_v8 }
 0x6d3   : > { %v1886_v37 = vpop.xlane.xlu1 %1885  ;;  %v1889_v15 = vpop.xlane.xlu0 %1888 }
 0x6d4   : > { %v1910_v38 = vsub.f32 %v6174_v28, %v1886_v37 }
 0x6d6   : > { %v6216_v13 = vpop.eup %4989  ;;  %v1937_v43 = vmul.f32 1.442695, %v1910_v38  ;;  %v1913_v38 = vsub.f32 %v6095_v11, %v1895_v0 }
 0x6d7   : > { %v4992_v7 = vpop.eup %4991  ;;  %v1880_v12 = vpop.xlane.xlu1 %1879  ;;  %v1977_v22 = vsel %vm1278_vm1, %v6216_v13, 0.0 }
 0x6d8   : > { %v2226_v50 = vpop.permute.xlu0 %2225  ;;  %v4994_v46 = vpop.eup %4993  ;;  %5001 = vpow2.f32 %v1937_v43  ;;  %v1908_v56 = vsub.f32 %v6183_v3, %v1880_v12  ;;  %1978 = vadd.xlane.f32.xlu1 %v1977_v22  ;;  %v2015_v3 = vmul.f32 %v4992_v7, %v6139_v52  ;;  %v1943_v43 = vmul.f32 1.442695, %v1913_v38 }
 0x6d9   : > { %4655 = vmatprep.subr.msk.bf16.mxu0 %vm1087_vm0, %v2226_v50  ;;  %v2248_v17 = vsel %vm1087_vm0, %v2226_v50, 0  ;;  %v4996_v5 = vpop.eup %4995  ;;  %v2018_v31 = vmul.f32 %v4994_v46, %v6161_v25  ;;  %v1911_v7 = vsub.f32 %v6098_v60, %v1889_v15 }
 0x6da   : > { %4494 = vmatpush3.bf16.xpose.msra.mxu0 %v2248_v17  ;;  %v6223_v28 = vpop.eup %4997  ;;  %v1933_v63 = vmul.f32 1.442695, %v1908_v56  ;;  %v2017_v4 = vmul.f32 %v4996_v5, %v6149_v39 }
 0x6db   : > { %v5000_v26 = vpop.eup %4999  ;;  %v6225_v2 = vpop.permute.xlu1 %2326  ;;  %v1971_v10 = vsel %vm1278_vm1, %v6223_v28, 0.0  ;;  %v1939_v12 = vmul.f32 1.442695, %v1911_v7 }
 0x6dc   : > { %5003 = vpow2.f32 %v1933_v63  ;;  %4657 = vmatprep.subr.msk.bf16.mxu1 %vm1087_vm0, %v6225_v2  ;;  %1972 = vadd.xlane.f32.xlu0 %v1971_v10  ;;  %v2016_v48 = vmul.f32 %v5000_v26, %v6168_v24  ;;  %v2030_v8 = vpack.c.bf16 %v2018_v31, %v2017_v4 }
 0x6dd   : > { %5005 = vpow2.f32 %v1943_v43 }
 0x6de   : > { %v2029_v61 = vpack.c.bf16 %v2016_v48, %v2015_v3  ;;  %5007 = vpow2.f32 %v1939_v12 }
 0x6df   : > { %v2228_v27 = vpop.permute.xlu1 %2227 }
 0x6e0   : > { %4469 = vmatprep.mubr.msk.bf16.mxu1 %vm1278_vm1, %v2029_v61  ;;  %4656 = vmatprep.subr.msk.bf16.mxu0 %vm1087_vm0, %v2228_v27  ;;  %v2251_v25 = vsel %vm1087_vm0, %v2228_v27, 0 }
 0x6e1   : > { %4470 = vmatmul.mubr.msk.bf16.gmra.mrb[36].mxu1 %vm1278_vm1, %v2030_v8 }
 0x6e2   : > { %4496 = vmatpush3.bf16.xpose.msra.mxu0 %v2251_v25  ;;  %v6239_v37 = vpop.eup %5001 }
 0x6e3   : > { %v1980_v52 = vsel %vm1278_vm1, %v6239_v37, 0.0 }
 0x6e4   : > { %1981 = vadd.xlane.f32.xlu1 %v1980_v52 }
 0x6e6   : > { %v6243_v24 = vpop.eup %5003 }
 0x6e7   : > { %v1974_v39 = vsel %vm1278_vm1, %v6243_v24, 0.0  ;;  %v6253_v50 = vpop.eup %5005 }
 0x6e8   : > { %1975 = vadd.xlane.f32.xlu1 %v1974_v39  ;;  %v1989_v46 = vsel %vm1278_vm1, %v6253_v50, 0.0  ;;  %v6257_v56 = vpop.eup %5007 }
 0x6e9   : > { %v1983_v11 = vsel %vm1278_vm1, %v6257_v56, 0.0 }
 0x6f2   : > { %2213 = vrot.lane.b32.xlu0 %v5626_v40, %s5219_s19 }
 0x6f9   : > { %2215 = vrot.lane.b32.xlu1 %v5624_v58, %s5219_s19 }
 0x710   : > { %v1898_v22 = vpop.xlane.xlu1 %1897 }
 0x711   : > { %v1914_v17 = vsub.f32 %v6100_v53, %v1898_v22  ;;  %1990 = vadd.xlane.f32.xlu0 %v1989_v46 }
 0x713   : > { %v1945_v5 = vmul.f32 1.442695, %v1914_v17 }
 0x714   : > { %v1892_v63 = vpop.xlane.xlu1 %1891 }
 0x715   : > { %5009 = vpow2.f32 %v1945_v5  ;;  %v1912_v60 = vsub.f32 %v6102_v57, %v1892_v63  ;;  %1984 = vadd.xlane.f32.xlu0 %v1983_v11 }
 0x717   : > { %v1941_v0 = vmul.f32 1.442695, %v1912_v60 }
 0x718   : > { %v2329_v27 = vpop.permute.xlu1 %2328 }
 0x719   : > { %5011 = vpow2.f32 %v1941_v0 }
 0x71f   : > { %v6263_v15 = vpop.eup %5009 }
 0x720   : > { %v1992_v26 = vsel %vm1278_vm1, %v6263_v15, 0.0 }
 0x721   : > { %1993 = vadd.xlane.f32.xlu0 %v1992_v26  ;;  %v2347_v26 = vsel %vm1087_vm0, %v6225_v2, 0 }
 0x723   : > { %v6267_v10 = vpop.eup %5011 }
 0x724   : > { %v1986_v53 = vsel %vm1278_vm1, %v6267_v10, 0.0 }
 0x725   : > { %1987 = vadd.xlane.f32.xlu1 %v1986_v53 }
 0x736   : > { %2332 = vrot.lane.b32.xlu1 %v5652_v33, %s5218_s18 }
 0x737   : > { %2330 = vrot.lane.b32.xlu0 %v5654_v34, %s5218_s18  ;;  %s5221_s18 = smov 72  }
 0x73a   : > { %2320 = vrot.lane.b32.xlu1 %v5642_v29, %s5219_s19 }
 0x73b   : > { %2318 = vrot.lane.b32.xlu0 %v5644_v30, %s5219_s19 }
 0x73e   : > { %2219 = vrot.lane.b32.xlu1 %v5634_v45, %s5219_s19 }
 0x73f   : > { %2217 = vrot.lane.b32.xlu0 %v5636_v41, %s5219_s19 }
 0x742   : > { %2324 = vrot.lane.b32.xlu1 %v5652_v33, %s5219_s19 }
 0x743   : > { %2322 = vrot.lane.b32.xlu0 %v5654_v34, %s5219_s19  ;;  %s5222_s19 = smov 104  }
 0x75a   : > { %v6287_v57 = vpop.f32.mrb[32].mxu1 }
 0x75b   : > { %v6289_v31 = vpop.f32.mrb[33].mxu1 }
 0x75c   : > { %v6291_v3 = vpop.f32.mrb[34].mxu1 }
 0x75d   : > { %v6295_v4 = vpop.f32.mrb[35].mxu1 }
 0x765   : > { %v1979_v25 = vpop.xlane.xlu1 %1978 }
 0x769   : > { %v1973_v8 = vpop.xlane.xlu0 %1972 }
 0x76d   : > { %v2214_v52 = vpop.permute.xlu0 %2213 }
 0x76e   : > { %4497 = vmatprep.mubr.msk.bf16.mxu0 %vm1087_vm0, %v2214_v52 }
 0x771   : > { %v1982_v39 = vpop.xlane.xlu1 %1981 }
 0x772   : > { %5013 = vrcp.f32 %v1982_v39 }
 0x773   : > { %5015 = vrcp.f32 %v1973_v8 }
 0x774   : > { %5017 = vrcp.f32 %v1979_v25 }
 0x775   : > { %v1976_v38 = vpop.xlane.xlu1 %1975 }
 0x776   : > { %5019 = vrcp.f32 %v1976_v38 }
 0x779   : > { %v2216_v43 = vpop.permute.xlu1 %2215 }
 0x77a   : > { %4498 = vmatmul.mubr.msk.bf16.vlgmr.msra.gmra.mrb[32].mxu0 %vm1087_vm0, %v2216_v43 }
 0x77c   : > { %v5014_v7 = vpop.eup %5013 }
 0x77d   : > { %v5016_v12 = vpop.eup %5015  ;;  %v2022_v17 = vmul.f32 %v5014_v7, %v6239_v37  ;;  %v2350_v37 = vsel %vm1087_vm0, %v2329_v27, 0 }
 0x77e   : > { %v5018_v22 = vpop.eup %5017  ;;  %v2019_v5 = vmul.f32 %v5016_v12, %v6223_v28 }
 0x77f   : > { %v2021_v11 = vmul.f32 %v5018_v22, %v6216_v13 }
 0x780   : > { %v5020_v46 = vpop.eup %5019 }
 0x781   : > { %v2020_v63 = vmul.f32 %v5020_v46, %v6243_v24  ;;  %v2032_v0 = vpack.c.bf16 %v2022_v17, %v2021_v11 }
 0x783   : > { %v2031_v60 = vpack.c.bf16 %v2020_v63, %v2019_v5 }
 0x785   : > { %4481 = vmatprep.mubr.msk.bf16.mxu1 %vm1278_vm1, %v2031_v60 }
 0x786   : > { %4482 = vmatmul.mubr.msk.bf16.vlgmr.msra.gmra.mrb[40].mxu1 %vm1278_vm1, %v2032_v0 }
 0x787   : > { %4506 = vmatpush3.bf16.xpose.msra.mxu1 %v2347_v26 }
 0x788   : > { %4658 = vmatprep.subr.msk.bf16.mxu1 %vm1087_vm0, %v2329_v27 }
 0x78f   : > { %4508 = vmatpush3.bf16.xpose.msra.mxu1 %v2350_v37 }
 0x79e   : > { %v1991_v28 = vpop.xlane.xlu0 %1990 }
 0x7a2   : > { %v1985_v53 = vpop.xlane.xlu0 %1984 }
 0x7ae   : > { %v1994_v24 = vpop.xlane.xlu0 %1993 }
 0x7af   : > { %5021 = vrcp.f32 %v1994_v24 }
 0x7b0   : > { %5023 = vrcp.f32 %v1985_v53 }
 0x7b1   : > { %5025 = vrcp.f32 %v1991_v28 }
 0x7b2   : > { %v1988_v13 = vpop.xlane.xlu1 %1987  ;;  %v2331_v8 = vpop.permute.xlu0 %2330 }
 0x7b3   : > { %5027 = vrcp.f32 %v1988_v13  ;;  %4659 = vmatprep.subr.msk.bf16.mxu1 %vm1087_vm0, %v2331_v8  ;;  %v2353_v25 = vsel %vm1087_vm0, %v2331_v8, 0 }
 0x7b4   : > { %v6313_v2 = vpop.f32.mrb[36].mxu1  ;;  %4510 = vmatpush3.bf16.xpose.msra.mxu1 %v2353_v25 }
 0x7b5   : > { %v6315_v52 = vpop.f32.mrb[37].mxu1 }
 0x7b6   : > { %v6317_v27 = vpop.f32.mrb[38].mxu1  ;;  %v2333_v39 = vpop.permute.xlu1 %2332 }
 0x7b7   : > { %v6321_v43 = vpop.f32.mrb[39].mxu1  ;;  %v2319_v7 = vpop.permute.xlu0 %2318  ;;  %4660 = vmatprep.subr.msk.bf16.mxu1 %vm1087_vm0, %v2333_v39  ;;  %v2356_v63 = vsel %vm1087_vm0, %v2333_v39, 0 }
 0x7b9   : > { %v5022_v22 = vpop.eup %5021 }
 0x7ba   : > { %v2321_v46 = vpop.permute.xlu1 %2320  ;;  %v5024_v17 = vpop.eup %5023  ;;  %v2026_v0 = vmul.f32 %v5022_v22, %v6263_v15  ;;  %v4165_v15 = vld [vmem:[%s7098_s7 + $0x48] sm:$0xff]  }
 0x7bb   : > { %v2218_v5 = vpop.permute.xlu0 %2217  ;;  %v5026_v11 = vpop.eup %5025  ;;  %v2023_v37 = vmul.f32 %v5024_v17, %v6257_v56  ;;  %v4115_v25 = vunpack.c.l.bf16 %v4165_v15  ;;  %v4116_v17 = vunpack.c.h.bf16 %v4165_v15 }
 0x7bc   : > { %4501 = vmatprep.mubr.msk.bf16.mxu0 %vm1087_vm0, %v2218_v5  ;;  %4512 = vmatpush3.bf16.xpose.msra.mxu1 %v2356_v63  ;;  %v2025_v53 = vmul.f32 %v5026_v11, %v6253_v50  ;;  %v4164_v50 = vld [vmem:[%s7098_s7 + $0x40] sm:$0xff]  }
 0x7bd   : > { %v5028_v60 = vpop.eup %5027  ;;  %v4112_v39 = vunpack.c.h.bf16 %v4164_v50  ;;  %v6349_v22 = vadd.f32 %v5740_v14, %v4115_v25 }
 0x7be   : > { %v2220_v26 = vpop.permute.xlu1 %2219  ;;  %v2024_v28 = vmul.f32 %v5028_v60, %v6267_v10  ;;  %v2034_v13 = vpack.c.bf16 %v2026_v0, %v2025_v53  ;;  %v4111_v10 = vunpack.c.l.bf16 %v4164_v50 }
 0x7bf   : > { %4502 = vmatmul.mubr.msk.bf16.gmra.mrb[36].mxu0 %vm1087_vm0, %v2220_v26  ;;  %v2323_v8 = vpop.permute.xlu0 %2322  ;;  %v6352_v5 = vadd.f32 %v5744_v20, %v4112_v39 }
 0x7c0   : > { %v2033_v24 = vpack.c.bf16 %v2024_v28, %v2023_v37  ;;  %v6361_v37 = vadd.f32 %v5747_v23, %v4116_v17  ;;  %v4166_v17 = vld [vmem:[%s7098_s7 + $0x50] sm:$0xff]  }
 0x7c2   : > { %4485 = vmatprep.mubr.msk.bf16.mxu1 %vm1278_vm1, %v2033_v24  ;;  %v2325_v56 = vpop.permute.xlu1 %2324 }
 0x7c3   : > { %4486 = vmatmul.mubr.msk.bf16.gmra.mrb[44].mxu1 %vm1278_vm1, %v2034_v13 }
 0x7c4   : > { %4513 = vmatprep.mubr.msk.bf16.mxu1 %vm1087_vm0, %v2319_v7  ;;  %v6346_v7 = vadd.f32 %v5742_v36, %v4111_v10 }
 0x7cb   : > { %4514 = vmatmul.mubr.msk.bf16.vlgmr.msra.gmra.mrb[48].mxu1 %vm1087_vm0, %v2321_v46 }
 0x7cc   : > { %4517 = vmatprep.mubr.msk.bf16.mxu1 %vm1087_vm0, %v2323_v8 }
 0x7d3   : > { %4518 = vmatmul.mubr.msk.bf16.gmra.mrb[52].mxu1 %vm1087_vm0, %v2325_v56 }
 0x84d   : > { %v4499_v46 = vpop.f32.mrb[32].mxu0 }
 0x84e   : > { %v2287_v63 = vpop.f32.mrb[33].mxu0  ;;  %v6358_v26 = vadd.f32 %v4499_v46, %v6349_v22 }
 0x84f   : > { %v6355_v11 = vadd.f32 %v2287_v63, %v6346_v7  ;;  %v4500_v60 = vpop.f32.mrb[34].mxu0  ;;  %v4167_v63 = vld [vmem:[%s7098_s7 + $0x58] sm:$0xff]  }
 0x850   : > { %v2290_v0 = vpop.f32.mrb[35].mxu0  ;;  %v6371_v13 = vadd.f32 %v4500_v60, %v6361_v37  ;;  %v2429_v8 = vsel %vm1278_vm1, %v6358_v26, -inf  ;;  %v4119_v60 = vunpack.c.l.bf16 %v4166_v17 }
 0x851   : > { %v6364_v28 = vadd.f32 %v2290_v0, %v6352_v5  ;;  %v2423_v53 = vsel %vm1278_vm1, %v6355_v11, -inf  ;;  %v4123_v0 = vunpack.c.l.bf16 %v4167_v63 }
 0x852   : > { %2424 = vmax.xlane.f32.xlu0 %v2423_v53  ;;  %v2432_v50 = vsel %vm1278_vm1, %v6371_v13, -inf  ;;  %v4120_v53 = vunpack.c.h.bf16 %v4166_v17 }
 0x853   : > { %v2426_v24 = vsel %vm1278_vm1, %v6364_v28, -inf }
 0x854   : > { %2427 = vmax.xlane.f32.xlu1 %v2426_v24  ;;  %v1055_v24 = vadd.f32 %v5776_v19, %v4119_v60  ;;  %v1056_v12 = vadd.f32 %v5772_v1, %v4120_v53 }
 0x856   : > { %2430 = vmax.xlane.f32.xlu0 %v2429_v8  ;;  %v4124_v8 = vunpack.c.h.bf16 %v4167_v63 }
 0x858   : > { %v1058_v61 = vadd.f32 %v5768_v55, %v4124_v8 }
 0x859   : > { %v6375_v56 = vpop.f32.mrb[40].mxu1 }
 0x85a   : > { %v6379_v15 = vpop.f32.mrb[41].mxu1  ;;  %2433 = vmax.xlane.f32.xlu0 %v2432_v50  ;;  %v1057_v50 = vadd.f32 %v5758_v32, %v4123_v0 }
 0x85b   : > { %v6381_v10 = vpop.f32.mrb[42].mxu1 }
 0x85c   : > { %v6385_v39 = vpop.f32.mrb[43].mxu1 }
 0x892   : > { %v4503_v25 = vpop.f32.mrb[36].mxu0 }
 0x893   : > { %v2303_v46 = vpop.f32.mrb[37].mxu0  ;;  %v6401_v35 = vadd.f32 %v4503_v25, %v1057_v50 }
 0x894   : > { %v6398_v38 = vadd.f32 %v2303_v46, %v1055_v24  ;;  %v4504_v48 = vpop.f32.mrb[38].mxu0 }
 0x895   : > { %v2306_v62 = vpop.f32.mrb[39].mxu0  ;;  %v6411_v0 = vadd.f32 %v4504_v48, %v1058_v61  ;;  %v2441_v51 = vsel %vm1278_vm1, %v6401_v35, -inf }
 0x896   : > { %v6403_v49 = vadd.f32 %v2306_v62, %v1056_v12  ;;  %v6405_v17 = vpop.f32.mrb[44].mxu1  ;;  %v2435_v63 = vsel %vm1278_vm1, %v6398_v38, -inf }
 0x897   : > { %7132 = vst [vmem:[#allocation21_spill] sm:$0xff] %v6405_v17  ;;  %v6409_v60 = vpop.f32.mrb[45].mxu1  ;;  %2436 = vmax.xlane.f32.xlu0 %v2435_v63  ;;  %v2444_v48 = vsel %vm1278_vm1, %v6411_v0, -inf }
 0x898   : > { %7133 = vst [vmem:[#allocation22_spill] sm:$0xff] %v6409_v60  ;;  %v6413_v46 = vpop.f32.mrb[46].mxu1  ;;  %v2438_v53 = vsel %vm1278_vm1, %v6403_v49, -inf }
 0x899   : > { %7134 = vst [vmem:[#allocation23_spill] sm:$0xff] %v6413_v46  ;;  %v6419_v62 = vpop.f32.mrb[47].mxu1  ;;  %2439 = vmax.xlane.f32.xlu1 %v2438_v53 }
 0x89a   : > { %7135 = vst [vmem:[#allocation24_spill] sm:$0xff] %v6419_v62 }
 0x89b   : > { %2442 = vmax.xlane.f32.xlu0 %v2441_v51 }
 0x89d   : > { %2445 = vmax.xlane.f32.xlu1 %v2444_v48 }
 0x89e   : > { %v6427_v63 = vpop.f32.mrb[48].mxu1 }
 0x89f   : > { %v6429_v44 = vpop.f32.mrb[49].mxu1 }
 0x8a0   : > { %v6431_v42 = vpop.f32.mrb[50].mxu1 }
 0x8a1   : > { %v6433_v25 = vpop.f32.mrb[51].mxu1 }
 0x8a6   : > { %v4519_v53 = vpop.f32.mrb[52].mxu1 }
 0x8a7   : > { %v6435_v54 = vadd.f32 %v4519_v53, %v1057_v50  ;;  %v2408_v8 = vpop.f32.mrb[53].mxu1 }
 0x8a8   : > { %v6437_v9 = vadd.f32 %v2408_v8, %v1055_v24  ;;  %v4520_v21 = vpop.f32.mrb[54].mxu1 }
 0x8a9   : > { %v6439_v51 = vadd.f32 %v4520_v21, %v1058_v61  ;;  %v2411_v59 = vpop.f32.mrb[55].mxu1 }
 0x8aa   : > { %v6441_v18 = vadd.f32 %v2411_v59, %v1056_v12 }
 0x8df   : > { %v2425_v48 = vpop.xlane.xlu0 %2424 }
 0x8e0   : > { %v2471_v47 = vsub.f32 %v6355_v11, %v2425_v48 }
 0x8e1   : > { %v2428_v6 = vpop.xlane.xlu1 %2427 }
 0x8e2   : > { %v2487_v16 = vmul.f32 1.442695, %v2471_v47  ;;  %v2472_v60 = vsub.f32 %v6364_v28, %v2428_v6 }
 0x8e3   : > { %v2431_v62 = vpop.xlane.xlu0 %2430 }
 0x8e4   : > { %5029 = vpow2.f32 %v2487_v16  ;;  %v2489_v50 = vmul.f32 1.442695, %v2472_v60  ;;  %v2473_v53 = vsub.f32 %v6358_v26, %v2431_v62 }
 0x8e6   : > { %5031 = vpow2.f32 %v2489_v50  ;;  %v2491_v24 = vmul.f32 1.442695, %v2473_v53 }
 0x8e7   : > { %v2434_v8 = vpop.xlane.xlu0 %2433 }
 0x8e8   : > { %5033 = vpow2.f32 %v2491_v24  ;;  %v2474_v21 = vsub.f32 %v6371_v13, %v2434_v8 }
 0x8ea   : > { %v2493_v59 = vmul.f32 1.442695, %v2474_v21 }
 0x8ec   : > { %5035 = vpow2.f32 %v2493_v59 }
 0x8ee   : > { %v6447_v61 = vpop.eup %5029 }
 0x8ef   : > { %v2519_v47 = vsel %vm1278_vm1, %v6447_v61, 0.0 }
 0x8f0   : > { %v6451_v12 = vpop.eup %5031  ;;  %2520 = vadd.xlane.f32.xlu0 %v2519_v47 }
 0x8f1   : > { %v2522_v6 = vsel %vm1278_vm1, %v6451_v12, 0.0 }
 0x8f2   : > { %v6455_v16 = vpop.eup %5033  ;;  %2523 = vadd.xlane.f32.xlu1 %v2522_v6 }
 0x8f3   : > { %v2525_v11 = vsel %vm1278_vm1, %v6455_v16, 0.0 }
 0x8f4   : > { %2526 = vadd.xlane.f32.xlu0 %v2525_v11 }
 0x8f6   : > { %v6459_v26 = vpop.eup %5035 }
 0x8f7   : > { %v2528_v28 = vsel %vm1278_vm1, %v6459_v26, 0.0 }
 0x8f8   : > { %2529 = vadd.xlane.f32.xlu1 %v2528_v28 }
 0x909   : > { %2609 = vrot.lane.b32.xlu1 %v5624_v58, %s5220_s23 }
 0x90a   : > { %2607 = vrot.lane.b32.xlu0 %v5626_v40, %s5220_s23 }
 0x90d   : > { %2613 = vrot.lane.b32.xlu1 %v5634_v45, %s5220_s23 }
 0x90e   : > { %2611 = vrot.lane.b32.xlu0 %v5636_v41, %s5220_s23 }
 0x924   : > { %v2437_v13 = vpop.xlane.xlu0 %2436 }
 0x925   : > { %v2475_v60 = vsub.f32 %v6398_v38, %v2437_v13 }
 0x926   : > { %v2440_v62 = vpop.xlane.xlu1 %2439 }
 0x927   : > { %v2495_v48 = vmul.f32 1.442695, %v2475_v60  ;;  %v2476_v50 = vsub.f32 %v6403_v49, %v2440_v62  ;;  %v6513_v62 = vadd.f32 %v6427_v63, %v6349_v22 }
 0x928   : > { %v2443_v53 = vpop.xlane.xlu0 %2442 }
 0x929   : > { %5037 = vpow2.f32 %v2495_v48  ;;  %v2497_v24 = vmul.f32 1.442695, %v2476_v50  ;;  %v2477_v8 = vsub.f32 %v6401_v35, %v2443_v53  ;;  %v6517_v48 = vadd.f32 %v6429_v44, %v6346_v7 }
 0x92a   : > { %v2446_v21 = vpop.xlane.xlu1 %2445  ;;  %v2453_v50 = vsel %vm1278_vm1, %v6513_v62, -inf  ;;  %v2465_v44 = vsel %vm1278_vm1, %v6435_v54, -inf  ;;  %v6531_v7 = vadd.f32 %v6433_v25, %v6352_v5 }
 0x92b   : > { %5039 = vpow2.f32 %v2497_v24  ;;  %v2499_v59 = vmul.f32 1.442695, %v2477_v8  ;;  %v2478_v47 = vsub.f32 %v6411_v0, %v2446_v21  ;;  %v2447_v24 = vsel %vm1278_vm1, %v6517_v48, -inf }
 0x92c   : > { %v6525_v8 = vadd.f32 %v6431_v42, %v6361_v37  ;;  %v2459_v42 = vsel %vm1278_vm1, %v6437_v9, -inf  ;;  %v2450_v37 = vsel %vm1278_vm1, %v6531_v7, -inf }
 0x92d   : > { %5041 = vpow2.f32 %v2499_v59  ;;  %v2501_v6 = vmul.f32 1.442695, %v2478_v47 }
 0x92e   : > { %v2456_v21 = vsel %vm1278_vm1, %v6525_v8, -inf }
 0x92f   : > { %5043 = vpow2.f32 %v2501_v6 }
 0x933   : > { %v6475_v11 = vpop.eup %5037 }
 0x934   : > { %v2531_v38 = vsel %vm1278_vm1, %v6475_v11, 0.0 }
 0x935   : > { %v6479_v28 = vpop.eup %5039  ;;  %2532 = vadd.xlane.f32.xlu0 %v2531_v38 }
 0x936   : > { %v2534_v49 = vsel %vm1278_vm1, %v6479_v28, 0.0 }
 0x937   : > { %v6483_v35 = vpop.eup %5041  ;;  %2535 = vadd.xlane.f32.xlu1 %v2534_v49  ;;  %v2468_v49 = vsel %vm1278_vm1, %v6439_v51, -inf }
 0x938   : > { %v2537_v0 = vsel %vm1278_vm1, %v6483_v35, 0.0 }
 0x939   : > { %v6487_v13 = vpop.eup %5043  ;;  %2538 = vadd.xlane.f32.xlu0 %v2537_v0 }
 0x93a   : > { %v2540_v60 = vsel %vm1278_vm1, %v6487_v13, 0.0 }
 0x93d   : > { %2541 = vadd.xlane.f32.xlu0 %v2540_v60 }
 0x948   : > { %2698 = vrot.lane.b32.xlu1 %v5642_v29, %s5220_s23 }
 0x94c   : > { %2793 = vrot.lane.b32.xlu1 %v5626_v40, %s5221_s18 }
 0x950   : > { %2700 = vrot.lane.b32.xlu1 %v5654_v34, %s5220_s23 }
 0x953   : > { %2696 = vrot.lane.b32.xlu0 %v5644_v30, %s5220_s23 }
 0x954   : > { %2795 = vrot.lane.b32.xlu1 %v5624_v58, %s5221_s18 }
 0x957   : > { %2702 = vrot.lane.b32.xlu0 %v5652_v33, %s5220_s23  ;;  %s5223_s23 = smov 40  }
 0x958   : > { %2898 = vrot.lane.b32.xlu1 %v5644_v30, %s5221_s18 }
 0x95b   : > { %2797 = vrot.lane.b32.xlu0 %v5636_v41, %s5221_s18 }
 0x95c   : > { %2799 = vrot.lane.b32.xlu1 %v5634_v45, %s5221_s18 }
 0x960   : > { %2900 = vrot.lane.b32.xlu1 %v5642_v29, %s5221_s18 }
 0x97a   : > { %2454 = vmax.xlane.f32.xlu0 %v2453_v50 }
 0x97d   : > { %v2521_v53 = vpop.xlane.xlu0 %2520 }
 0x97e   : > { %5045 = vrcp.f32 %v2521_v53  ;;  %2448 = vmax.xlane.f32.xlu0 %v2447_v24 }
 0x97f   : > { %v2524_v22 = vpop.xlane.xlu1 %2523 }
 0x980   : > { %5047 = vrcp.f32 %v2524_v22  ;;  %v2462_v22 = vsel %vm1278_vm1, %v6441_v18, -inf }
 0x981   : > { %v2527_v63 = vpop.xlane.xlu0 %2526 }
 0x982   : > { %2466 = vmax.xlane.f32.xlu0 %v2465_v44  ;;  %5049 = vrcp.f32 %v2527_v63 }
 0x984   : > { %2457 = vmax.xlane.f32.xlu1 %v2456_v21 }
 0x985   : > { %v2530_v59 = vpop.xlane.xlu1 %2529  ;;  %v2608_v47 = vpop.permute.xlu0 %2607 }
 0x986   : > { %5051 = vrcp.f32 %v2530_v59  ;;  %2460 = vmax.xlane.f32.xlu0 %v2459_v42  ;;  %4521 = vmatprep.subr.bf16.mxu0 %v2608_v47 }
 0x987   : > { %4522 = vmatpush3.bf16.msra.mxu0 %v2608_v47 }
 0x988   : > { %v5046_v6 = vpop.eup %5045  ;;  %2451 = vmax.xlane.f32.xlu1 %v2450_v37 }
 0x989   : > { %v2610_v5 = vpop.permute.xlu1 %2609  ;;  %v2612_v38 = vpop.permute.xlu0 %2611  ;;  %v2583_v0 = vmul.f32 %v5046_v6, %v6447_v61 }
 0x98a   : > { %v5048_v25 = vpop.eup %5047  ;;  %4523 = vmatprep.subr.bf16.mxu0 %v2610_v5 }
 0x98b   : > { %4524 = vmatpush3.bf16.msra.mxu0 %v2610_v5  ;;  %v2584_v60 = vmul.f32 %v5048_v25, %v6451_v12 }
 0x98c   : > { %2469 = vmax.xlane.f32.xlu1 %v2468_v49  ;;  %4525 = vmatprep.subr.bf16.mxu0 %v2612_v38  ;;  %v5050_v53 = vpop.eup %5049 }
 0x98d   : > { %v2599_v50 = vpack.c.bf16 %v2584_v60, %v2583_v0  ;;  %v2614_v24 = vpop.permute.xlu1 %2613  ;;  %v2585_v44 = vmul.f32 %v5050_v53, %v6455_v16 }
 0x98f   : > { %4526 = vmatpush3.bf16.msra.mxu0 %v2612_v38  ;;  %4529 = vmatprep.mubr.msk.bf16.mxu0 %vm1278_vm1, %v2599_v50 }
 0x990   : > { %v5052_v63 = vpop.eup %5051  ;;  %2463 = vmax.xlane.f32.xlu1 %v2462_v22  ;;  %4527 = vmatprep.subr.bf16.mxu0 %v2614_v24 }
 0x991   : > { %v2586_v61 = vmul.f32 %v5052_v63, %v6459_v26 }
 0x993   : > { %v2600_v21 = vpack.c.bf16 %v2586_v61, %v2585_v44  ;;  %4528 = vmatpush3.bf16.msra.mxu0 %v2614_v24 }
 0x996   : > { %4530 = vmatmul.mubr.msk.bf16.vlgmr.msra.gmra.mrb[40].mxu0 %vm1278_vm1, %v2600_v21 }
 0x99c   : > { %2785 = vrot.lane.b32.xlu0 %v5626_v40, %s5222_s19 }
 0x9a1   : > { %2787 = vrot.lane.b32.xlu1 %v5624_v58, %s5222_s19 }
 0x9c2   : > { %v2533_v12 = vpop.xlane.xlu0 %2532 }
 0x9c3   : > { %5053 = vrcp.f32 %v2533_v12 }
 0x9c4   : > { %v2536_v59 = vpop.xlane.xlu1 %2535 }
 0x9c5   : > { %5055 = vrcp.f32 %v2536_v59 }
 0x9c6   : > { %v2539_v47 = vpop.xlane.xlu0 %2538 }
 0x9c7   : > { %5057 = vrcp.f32 %v2539_v47 }
 0x9c8   : > { %v2699_v42 = vpop.permute.xlu1 %2698 }
 0x9ca   : > { %v2542_v16 = vpop.xlane.xlu0 %2541 }
 0x9cb   : > { %5059 = vrcp.f32 %v2542_v16 }
 0x9cc   : > { %v2794_v26 = vpop.permute.xlu1 %2793 }
 0x9cd   : > { %v5054_v37 = vpop.eup %5053  ;;  %4661 = vmatprep.subr.msk.bf16.mxu0 %vm1087_vm0, %v2794_v26  ;;  %v2814_v6 = vsel %vm1087_vm0, %v2794_v26, 0 }
 0x9ce   : > { %4554 = vmatpush3.bf16.xpose.msra.mxu0 %v2814_v6  ;;  %v2697_v5 = vpop.permute.xlu0 %2696  ;;  %v2587_v49 = vmul.f32 %v5054_v37, %v6475_v11 }
 0x9cf   : > { %v5056_v25 = vpop.eup %5055  ;;  %4537 = vmatprep.subr.bf16.mxu1 %v2697_v5 }
 0x9d0   : > { %v2701_v38 = vpop.permute.xlu1 %2700  ;;  %4538 = vmatpush3.bf16.msra.mxu1 %v2697_v5  ;;  %v2588_v0 = vmul.f32 %v5056_v25, %v6479_v28 }
 0x9d1   : > { %4539 = vmatprep.subr.bf16.mxu1 %v2699_v42  ;;  %v5058_v53 = vpop.eup %5057 }
 0x9d2   : > { %v2703_v60 = vpop.permute.xlu0 %2702  ;;  %v2601_v50 = vpack.c.bf16 %v2588_v0, %v2587_v49  ;;  %v2589_v11 = vmul.f32 %v5058_v53, %v6483_v35 }
 0x9d4   : > { %v2796_v24 = vpop.permute.xlu1 %2795  ;;  %4533 = vmatprep.mubr.msk.bf16.mxu0 %vm1278_vm1, %v2601_v50  ;;  %4540 = vmatpush3.bf16.msra.mxu1 %v2699_v42 }
 0x9d5   : > { %v5060_v22 = vpop.eup %5059  ;;  %v2817_v63 = vsel %vm1087_vm0, %v2796_v24, 0  ;;  %4541 = vmatprep.subr.bf16.mxu1 %v2701_v38  ;;  %4662 = vmatprep.subr.msk.bf16.mxu0 %vm1087_vm0, %v2796_v24 }
 0x9d6   : > { %4556 = vmatpush3.bf16.xpose.msra.mxu0 %v2817_v63  ;;  %v2798_v44 = vpop.permute.xlu0 %2797  ;;  %v2590_v28 = vmul.f32 %v5060_v22, %v6487_v13 }
 0x9d7   : > { %4663 = vmatprep.subr.msk.bf16.mxu0 %vm1087_vm0, %v2798_v44  ;;  %v2820_v12 = vsel %vm1087_vm0, %v2798_v44, 0 }
 0x9d8   : > { %v6563_v61 = vpop.permute.xlu1 %2898  ;;  %4542 = vmatpush3.bf16.msra.mxu1 %v2701_v38  ;;  %v2602_v21 = vpack.c.bf16 %v2590_v28, %v2589_v11 }
 0x9d9   : > { %4543 = vmatprep.subr.bf16.mxu1 %v2703_v60 }
 0x9da   : > { %4534 = vmatmul.mubr.msk.bf16.gmra.mrb[44].mxu0 %vm1278_vm1, %v2602_v21 }
 0x9dc   : > { %4544 = vmatpush3.bf16.msra.mxu1 %v2703_v60  ;;  %v2800_v59 = vpop.permute.xlu1 %2799 }
 0x9dd   : > { %4665 = vmatprep.subr.msk.bf16.mxu1 %vm1087_vm0, %v6563_v61  ;;  %v2823_v35 = vsel %vm1087_vm0, %v2800_v59, 0 }
 0x9de   : > { %4558 = vmatpush3.bf16.xpose.msra.mxu0 %v2820_v12 }
 0x9df   : > { %4664 = vmatprep.subr.msk.bf16.mxu0 %vm1087_vm0, %v2800_v59 }
 0x9e0   : > { %v6573_v37 = vpop.permute.xlu1 %2900 }
 0x9e6   : > { %4560 = vmatpush3.bf16.xpose.msra.mxu0 %v2823_v35 }
 0xa07   : > { %v2455_v13 = vpop.xlane.xlu0 %2454 }
 0xa08   : > { %v2481_v47 = vsub.f32 %v6513_v62, %v2455_v13 }
 0xa0a   : > { %v2507_v42 = vmul.f32 1.442695, %v2481_v47 }
 0xa0b   : > { %v2449_v16 = vpop.xlane.xlu0 %2448 }
 0xa0c   : > { %5061 = vpow2.f32 %v2507_v42  ;;  %v2479_v26 = vsub.f32 %v6517_v48, %v2449_v16 }
 0xa0e   : > { %v2503_v6 = vmul.f32 1.442695, %v2479_v26 }
 0xa0f   : > { %v2467_v5 = vpop.xlane.xlu0 %2466 }
 0xa10   : > { %5063 = vpow2.f32 %v2503_v6  ;;  %v2485_v35 = vsub.f32 %v6435_v54, %v2467_v5 }
 0xa11   : > { %v2458_v25 = vpop.xlane.xlu1 %2457 }
 0xa12   : > { %v2482_v38 = vsub.f32 %v6525_v8, %v2458_v25  ;;  %v2515_v47 = vmul.f32 1.442695, %v2485_v35 }
 0xa13   : > { %v2461_v49 = vpop.xlane.xlu0 %2460 }
 0xa14   : > { %v2509_v0 = vmul.f32 1.442695, %v2482_v38  ;;  %v2483_v42 = vsub.f32 %v6437_v9, %v2461_v49 }
 0xa15   : > { %v2452_v60 = vpop.xlane.xlu1 %2451 }
 0xa16   : > { %v6576_v50 = vpop.eup %5061  ;;  %5065 = vpow2.f32 %v2509_v0  ;;  %v2480_v62 = vsub.f32 %v6531_v7, %v2452_v60  ;;  %v2511_v16 = vmul.f32 1.442695, %v2483_v42 }
 0xa17   : > { %v2786_v53 = vpop.permute.xlu0 %2785  ;;  %v2549_v48 = vsel %vm1278_vm1, %v6576_v50, 0.0 }
 0xa18   : > { %v2505_v24 = vmul.f32 1.442695, %v2480_v62  ;;  %2550 = vadd.xlane.f32.xlu1 %v2549_v48  ;;  %4561 = vmatprep.mubr.msk.bf16.mxu0 %vm1087_vm0, %v2786_v53 }
 0xa19   : > { %v2470_v22 = vpop.xlane.xlu1 %2469 }
 0xa1a   : > { %v6582_v63 = vpop.eup %5063  ;;  %5067 = vpow2.f32 %v2505_v24  ;;  %v2486_v26 = vsub.f32 %v6439_v51, %v2470_v22 }
 0xa1b   : > { %v2543_v8 = vsel %vm1278_vm1, %v6582_v63, 0.0 }
 0xa1c   : > { %2544 = vadd.xlane.f32.xlu1 %v2543_v8  ;;  %v2517_v6 = vmul.f32 1.442695, %v2486_v26 }
 0xa1d   : > { %v2464_v44 = vpop.xlane.xlu1 %2463 }
 0xa1e   : > { %v2484_v59 = vsub.f32 %v6441_v18, %v2464_v44 }
 0xa20   : > { %v6586_v11 = vpop.eup %5065  ;;  %v2513_v13 = vmul.f32 1.442695, %v2484_v59 }
 0xa21   : > { %v2788_v7 = vpop.permute.xlu1 %2787  ;;  %v2552_v28 = vsel %vm1278_vm1, %v6586_v11, 0.0 }
 0xa22   : > { %2553 = vadd.xlane.f32.xlu1 %v2552_v28  ;;  %4562 = vmatmul.mubr.msk.bf16.vlgmr.msra.gmra.mrb[48].mxu0 %vm1087_vm0, %v2788_v7  ;;  %5069 = vpow2.f32 %v2513_v13 }
 0xa23   : > { %5071 = vpow2.f32 %v2515_v47 }
 0xa24   : > { %v6591_v21 = vpop.eup %5067  ;;  %5073 = vpow2.f32 %v2511_v16 }
 0xa25   : > { %v2546_v12 = vsel %vm1278_vm1, %v6591_v21, 0.0  ;;  %5075 = vpow2.f32 %v2517_v6 }
 0xa26   : > { %2547 = vadd.xlane.f32.xlu0 %v2546_v12 }
 0xa2c   : > { %v6603_v25 = vpop.eup %5069 }
 0xa2d   : > { %v2558_v38 = vsel %vm1278_vm1, %v6603_v25, 0.0  ;;  %v6607_v18 = vpop.eup %5071 }
 0xa2e   : > { %v2561_v54 = vsel %vm1278_vm1, %v6607_v18, 0.0  ;;  %v6611_v9 = vpop.eup %5073 }
 0xa2f   : > { %v2555_v51 = vsel %vm1278_vm1, %v6611_v9, 0.0  ;;  %v6615_v5 = vpop.eup %5075 }
 0xa30   : > { %v2564_v49 = vsel %vm1278_vm1, %v6615_v5, 0.0 }
 0xa33   : > { %2789 = vrot.lane.b32.xlu1 %v5636_v41, %s5222_s19 }
 0xa3c   : > { %2902 = vrot.lane.b32.xlu0 %v5654_v34, %s5221_s18 }
 0xa57   : > { %2559 = vadd.xlane.f32.xlu1 %v2558_v38 }
 0xa5b   : > { %2562 = vadd.xlane.f32.xlu0 %v2561_v54 }
 0xa5f   : > { %2556 = vadd.xlane.f32.xlu0 %v2555_v51 }
 0xa63   : > { %2565 = vadd.xlane.f32.xlu0 %v2564_v49 }
 0xa68   : > { %2904 = vrot.lane.b32.xlu1 %v5652_v33, %s5221_s18  ;;  %s5224_s18 = smov 8  }
 0xa69   : > { %v6621_v0 = vpop.f32.mrb[40].mxu0 }
 0xa6a   : > { %v6623_v60 = vpop.f32.mrb[41].mxu0 }
 0xa6b   : > { %v6625_v62 = vpop.f32.mrb[42].mxu0 }
 0xa6c   : > { %v6629_v48 = vpop.f32.mrb[43].mxu0  ;;  %2892 = vrot.lane.b32.xlu1 %v5642_v29, %s5222_s19 }
 0xa70   : > { %2896 = vrot.lane.b32.xlu1 %v5652_v33, %s5222_s19 }
 0xa79   : > { %2791 = vrot.lane.b32.xlu0 %v5634_v45, %s5222_s19 }
 0xa7d   : > { %2890 = vrot.lane.b32.xlu0 %v5644_v30, %s5222_s19 }
 0xa81   : > { %2894 = vrot.lane.b32.xlu0 %v5654_v34, %s5222_s19  ;;  %s5225_s19 = smov 16  }
 0xaa5   : > { %v2551_v22 = vpop.xlane.xlu1 %2550 }
 0xaa9   : > { %v2545_v8 = vpop.xlane.xlu1 %2544 }
 0xaad   : > { %v6643_v44 = vpop.f32.mrb[44].mxu0 }
 0xaae   : > { %v6645_v7 = vpop.f32.mrb[45].mxu0 }
 0xaaf   : > { %v6647_v28 = vpop.f32.mrb[46].mxu0  ;;  %v2554_v12 = vpop.xlane.xlu1 %2553 }
 0xab0   : > { %v6651_v35 = vpop.f32.mrb[47].mxu0  ;;  %5077 = vrcp.f32 %v2554_v12 }
 0xab1   : > { %5079 = vrcp.f32 %v2545_v8 }
 0xab2   : > { %5081 = vrcp.f32 %v2551_v22  ;;  %v2919_v22 = vsel %vm1087_vm0, %v6563_v61, 0 }
 0xab3   : > { %v2790_v47 = vpop.permute.xlu1 %2789  ;;  %v2548_v42 = vpop.xlane.xlu0 %2547 }
 0xab4   : > { %5083 = vrcp.f32 %v2548_v42  ;;  %4565 = vmatprep.mubr.msk.bf16.mxu0 %vm1087_vm0, %v2790_v47 }
 0xaba   : > { %v5078_v16 = vpop.eup %5077 }
 0xabb   : > { %v5080_v26 = vpop.eup %5079  ;;  %v2594_v54 = vmul.f32 %v5078_v16, %v6586_v11  ;;  %v2903_v11 = vpop.permute.xlu0 %2902  ;;  %v4169_v16 = vld [vmem:[%s7098_s7 + $0x68] sm:$0xff]  }
 0xabc   : > { %v5082_v6 = vpop.eup %5081  ;;  %v2591_v51 = vmul.f32 %v5080_v26, %v6582_v63  ;;  %v2922_v63 = vsel %vm1087_vm0, %v6573_v37, 0 }
 0xabd   : > { %v2593_v12 = vmul.f32 %v5082_v6, %v6576_v50  ;;  %v2925_v50 = vsel %vm1087_vm0, %v2903_v11, 0 }
 0xabe   : > { %v5084_v38 = vpop.eup %5083 }
 0xabf   : > { %v2592_v49 = vmul.f32 %v5084_v38, %v6591_v21  ;;  %v2604_v8 = vpack.c.bf16 %v2594_v54, %v2593_v12  ;;  %v4131_v38 = vunpack.c.l.bf16 %v4169_v16 }
 0xac1   : > { %v2603_v13 = vpack.c.bf16 %v2592_v49, %v2591_v51 }
 0xac3   : > { %4545 = vmatprep.mubr.msk.bf16.mxu1 %vm1278_vm1, %v2603_v13 }
 0xac4   : > { %4546 = vmatmul.mubr.msk.bf16.vlgmr.msra.gmra.mrb[56].mxu1 %vm1278_vm1, %v2604_v8  ;;  %v6682_v8 = vadd.f32 %v5740_v14, %v4131_v38 }
 0xac5   : > { %4570 = vmatpush3.bf16.xpose.msra.mxu1 %v2919_v22 }
 0xac6   : > { %4666 = vmatprep.subr.msk.bf16.mxu1 %vm1087_vm0, %v6573_v37  ;;  %v4168_v37 = vld [vmem:[%s7098_s7 + $0x60] sm:$0xff]  }
 0xac7   : > { %v4127_v26 = vunpack.c.l.bf16 %v4168_v37  ;;  %v4128_v54 = vunpack.c.h.bf16 %v4168_v37 }
 0xac9   : > { %v6679_v51 = vadd.f32 %v5742_v36, %v4127_v26 }
 0xacd   : > { %4572 = vmatpush3.bf16.xpose.msra.mxu1 %v2922_v63  ;;  %v4132_v63 = vunpack.c.h.bf16 %v4169_v16 }
 0xace   : > { %4667 = vmatprep.subr.msk.bf16.mxu1 %vm1087_vm0, %v2903_v11  ;;  %v6686_v11 = vadd.f32 %v5744_v20, %v4128_v54 }
 0xacf   : > { %v6693_v26 = vadd.f32 %v5747_v23, %v4132_v63 }
 0xad5   : > { %4574 = vmatpush3.bf16.xpose.msra.mxu1 %v2925_v50 }
 0xae4   : > { %v2560_v21 = vpop.xlane.xlu1 %2559 }
 0xae5   : > { %5085 = vrcp.f32 %v2560_v21 }
 0xae8   : > { %v2905_v13 = vpop.permute.xlu1 %2904  ;;  %v2563_v47 = vpop.xlane.xlu0 %2562 }
 0xae9   : > { %v2928_v61 = vsel %vm1087_vm0, %v2905_v13, 0  ;;  %4668 = vmatprep.subr.msk.bf16.mxu1 %vm1087_vm0, %v2905_v13 }
 0xaea   : > { %4576 = vmatpush3.bf16.xpose.msra.mxu1 %v2928_v61 }
 0xaec   : > { %v2557_v42 = vpop.xlane.xlu0 %2556 }
 0xaed   : > { %5087 = vrcp.f32 %v2557_v42 }
 0xaee   : > { %5089 = vrcp.f32 %v2563_v47 }
 0xaef   : > { %v5086_v12 = vpop.eup %5085 }
 0xaf0   : > { %v2566_v6 = vpop.xlane.xlu0 %2565  ;;  %v2596_v42 = vmul.f32 %v5086_v12, %v6603_v25 }
 0xaf1   : > { %5091 = vrcp.f32 %v2566_v6 }
 0xaf4   : > { %v2792_v49 = vpop.permute.xlu0 %2791 }
 0xaf5   : > { %v4563_v22 = vpop.f32.mrb[48].mxu0  ;;  %4566 = vmatmul.mubr.msk.bf16.gmra.mrb[52].mxu0 %vm1087_vm0, %v2792_v49 }
 0xaf6   : > { %v2859_v50 = vpop.f32.mrb[49].mxu0  ;;  %v2868_v14 = vadd.f32 %v4563_v22, %v6682_v8 }
 0xaf7   : > { %v5088_v21 = vpop.eup %5087  ;;  %v2860_v13 = vadd.f32 %v2859_v50, %v6679_v51  ;;  %v4564_v47 = vpop.f32.mrb[50].mxu0 }
 0xaf8   : > { %v2862_v61 = vpop.f32.mrb[51].mxu0  ;;  %v2595_v36 = vmul.f32 %v5088_v21, %v6611_v9  ;;  %v5090_v37 = vpop.eup %5089  ;;  %v2871_v49 = vadd.f32 %v4564_v47, %v6693_v26  ;;  %v3001_v23 = vsel %vm1278_vm1, %v2868_v14, -inf }
 0xaf9   : > { %v2863_v16 = vadd.f32 %v2862_v61, %v6686_v11  ;;  %v2995_v20 = vsel %vm1278_vm1, %v2860_v13, -inf  ;;  %v2597_v25 = vmul.f32 %v5090_v37, %v6607_v18  ;;  %v2891_v22 = vpop.permute.xlu0 %2890  ;;  %v2893_v50 = vpop.permute.xlu1 %2892 }
 0xafa   : > { %2996 = vmax.xlane.f32.xlu0 %v2995_v20  ;;  %v2605_v6 = vpack.c.bf16 %v2596_v42, %v2595_v36  ;;  %v3004_v63 = vsel %vm1278_vm1, %v2871_v49, -inf }
 0xafb   : > { %v5092_v38 = vpop.eup %5091  ;;  %v2998_v54 = vsel %vm1278_vm1, %v2863_v16, -inf }
 0xafc   : > { %2999 = vmax.xlane.f32.xlu1 %v2998_v54  ;;  %4549 = vmatprep.mubr.msk.bf16.mxu1 %vm1278_vm1, %v2605_v6  ;;  %v2598_v9 = vmul.f32 %v5092_v38, %v6615_v5 }
 0xafd   : > { %v2895_v21 = vpop.permute.xlu0 %2894  ;;  %v2897_v18 = vpop.permute.xlu1 %2896 }
 0xafe   : > { %3002 = vmax.xlane.f32.xlu0 %v3001_v23  ;;  %v2606_v12 = vpack.c.bf16 %v2598_v9, %v2597_v25  ;;  %v4170_v25 = vld [vmem:[%s7098_s7 + $0x70] sm:$0xff]   ;;  %v4171_v23 = vld [vmem:[%s7098_s7 + $0x78] sm:$0xff]  }
 0xb00   : > { %4550 = vmatmul.mubr.msk.bf16.gmra.mrb[60].mxu1 %vm1278_vm1, %v2606_v12 }
 0xb01   : > { %4577 = vmatprep.mubr.msk.bf16.mxu1 %vm1087_vm0, %v2891_v22  ;;  %v4135_v22 = vunpack.c.l.bf16 %v4170_v25 }
 0xb02   : > { %3005 = vmax.xlane.f32.xlu0 %v3004_v63 }
 0xb03   : > { %v1063_v59 = vadd.f32 %v5776_v19, %v4135_v22 }
 0xb08   : > { %4578 = vmatmul.mubr.msk.bf16.vlgmr.msra.gmra.mrb[64].mxu1 %vm1087_vm0, %v2893_v50 }
 0xb09   : > { %4581 = vmatprep.mubr.msk.bf16.mxu1 %vm1087_vm0, %v2895_v21  ;;  %v4139_v21 = vunpack.c.l.bf16 %v4171_v23 }
 0xb0b   : > { %v1065_v24 = vadd.f32 %v5758_v32, %v4139_v21 }
 0xb10   : > { %4582 = vmatmul.mubr.msk.bf16.gmra.mrb[68].mxu1 %vm1087_vm0, %v2897_v18  ;;  %v4136_v18 = vunpack.c.h.bf16 %v4170_v25 }
 0xb87   : > { %v2997_v20 = vpop.xlane.xlu0 %2996 }
 0xb88   : > { %v3043_v54 = vsub.f32 %v2860_v13, %v2997_v20  ;;  %v4140_v13 = vunpack.c.h.bf16 %v4171_v23 }
 0xb89   : > { %v3000_v38 = vpop.xlane.xlu1 %2999 }
 0xb8a   : > { %v3044_v9 = vsub.f32 %v2863_v16, %v3000_v38  ;;  %v3059_v63 = vmul.f32 1.442695, %v3043_v54  ;;  %v1064_v38 = vadd.f32 %v5772_v1, %v4136_v18 }
 0xb8b   : > { %v3003_v6 = vpop.xlane.xlu0 %3002 }
 0xb8c   : > { %v3045_v50 = vsub.f32 %v2868_v14, %v3003_v6  ;;  %v3061_v37 = vmul.f32 1.442695, %v3044_v9  ;;  %5093 = vpow2.f32 %v3059_v63  ;;  %v1066_v14 = vadd.f32 %v5768_v55, %v4140_v13 }
 0xb8e   : > { %v3063_v20 = vmul.f32 1.442695, %v3045_v50  ;;  %5095 = vpow2.f32 %v3061_v37 }
 0xb8f   : > { %v3006_v12 = vpop.xlane.xlu0 %3005 }
 0xb90   : > { %v3046_v36 = vsub.f32 %v2871_v49, %v3006_v12  ;;  %5097 = vpow2.f32 %v3063_v20 }
 0xb92   : > { %v3065_v53 = vmul.f32 1.442695, %v3046_v36 }
 0xb94   : > { %5099 = vpow2.f32 %v3065_v53 }
 0xb97   : > { %v6709_v5 = vpop.f32.mrb[56].mxu1 }
 0xb98   : > { %7136 = vst [vmem:[#allocation25_spill] sm:$0xff] %v6709_v5  ;;  %v6711_v47 = vpop.f32.mrb[57].mxu1 }
 0xb99   : > { %7137 = vst [vmem:[#allocation26_spill] sm:$0xff] %v6711_v47  ;;  %v6713_v61 = vpop.f32.mrb[58].mxu1 }
 0xb9a   : > { %7138 = vst [vmem:[#allocation27_spill] sm:$0xff] %v6713_v61  ;;  %v6717_v42 = vpop.f32.mrb[59].mxu1 }
 0xb9b   : > { %7139 = vst [vmem:[#allocation28_spill] sm:$0xff] %v6717_v42 }
 0xbc8   : > { %v4567_v16 = vpop.f32.mrb[52].mxu0 }
 0xbc9   : > { %v2875_v17 = vpop.f32.mrb[53].mxu0  ;;  %v6731_v49 = vadd.f32 %v4567_v16, %v1065_v24 }
 0xbca   : > { %v2876_v46 = vadd.f32 %v2875_v17, %v1063_v59  ;;  %v4568_v6 = vpop.f32.mrb[54].mxu0  ;;  %v6737_v17 = vpop.eup %5093 }
 0xbcb   : > { %v2878_v54 = vpop.f32.mrb[55].mxu0  ;;  %v2887_v32 = vadd.f32 %v4568_v6, %v1066_v14  ;;  %v3013_v1 = vsel %vm1278_vm1, %v6731_v49, -inf  ;;  %v6740_v36 = vpop.eup %5095  ;;  %v3091_v53 = vsel %vm1278_vm1, %v6737_v17, 0.0 }
 0xbcc   : > { %v2879_v19 = vadd.f32 %v2878_v54, %v1064_v38  ;;  %v3007_v25 = vsel %vm1278_vm1, %v2876_v46, -inf  ;;  %v6748_v12 = vpop.eup %5097  ;;  %v3094_v21 = vsel %vm1278_vm1, %v6740_v36, 0.0 }
 0xbcd   : > { %3008 = vmax.xlane.f32.xlu0 %v3007_v25  ;;  %v3016_v55 = vsel %vm1278_vm1, %v2887_v32, -inf  ;;  %v6758_v18 = vpop.eup %5099  ;;  %v3097_v20 = vsel %vm1278_vm1, %v6748_v12, 0.0 }
 0xbce   : > { %v3010_v9 = vsel %vm1278_vm1, %v2879_v19, -inf  ;;  %v3100_v16 = vsel %vm1278_vm1, %v6758_v18, 0.0 }
 0xbcf   : > { %3011 = vmax.xlane.f32.xlu1 %v3010_v9 }
 0xbd1   : > { %3014 = vmax.xlane.f32.xlu0 %v3013_v1 }
 0xbd3   : > { %v6742_v37 = vpop.f32.mrb[60].mxu1  ;;  %3017 = vmax.xlane.f32.xlu1 %v3016_v55 }
 0xbd4   : > { %7140 = vst [vmem:[#allocation29_spill] sm:$0xff] %v6742_v37  ;;  %v6744_v23 = vpop.f32.mrb[61].mxu1 }
 0xbd5   : > { %7141 = vst [vmem:[#allocation30_spill] sm:$0xff] %v6744_v23  ;;  %v6750_v22 = vpop.f32.mrb[62].mxu1  ;;  %3092 = vadd.xlane.f32.xlu0 %v3091_v53 }
 0xbd6   : > { %7142 = vst [vmem:[#allocation31_spill] sm:$0xff] %v6750_v22  ;;  %v6754_v50 = vpop.f32.mrb[63].mxu1 }
 0xbd7   : > { %7143 = vst [vmem:[#allocation32_spill] sm:$0xff] %v6754_v50  ;;  %3095 = vadd.xlane.f32.xlu1 %v3094_v21 }
 0xbd9   : > { %3098 = vadd.xlane.f32.xlu0 %v3097_v20 }
 0xbdb   : > { %v4579_v6 = vpop.f32.mrb[64].mxu1  ;;  %3101 = vadd.xlane.f32.xlu1 %v3100_v16 }
 0xbdc   : > { %v2964_v54 = vpop.f32.mrb[65].mxu1 }
 0xbdd   : > { %v4580_v25 = vpop.f32.mrb[66].mxu1 }
 0xbde   : > { %v2967_v9 = vpop.f32.mrb[67].mxu1 }
 0xbe3   : > { %v4583_v1 = vpop.f32.mrb[68].mxu1 }
 0xbe4   : > { %v6766_v55 = vadd.f32 %v4583_v1, %v1065_v24  ;;  %v2980_v53 = vpop.f32.mrb[69].mxu1 }
 0xbe5   : > { %v6768_v63 = vadd.f32 %v2980_v53, %v1063_v59  ;;  %v4584_v13 = vpop.f32.mrb[70].mxu1 }
 0xbe6   : > { %v6770_v21 = vadd.f32 %v4584_v13, %v1066_v14  ;;  %v2983_v23 = vpop.f32.mrb[71].mxu1 }
 0xbe7   : > { %v6772_v50 = vadd.f32 %v2983_v23, %v1064_v38  ;;  %v2965_v23 = vadd.f32 %v2964_v54, %v6679_v51 }
 0xc5a   : > { %v3009_v20 = vpop.xlane.xlu0 %3008 }
 0xc5b   : > { %v3047_v37 = vsub.f32 %v2876_v46, %v3009_v20  ;;  %v2973_v46 = vadd.f32 %v4579_v6, %v6682_v8 }
 0xc5c   : > { %v3012_v22 = vpop.xlane.xlu1 %3011 }
 0xc5d   : > { %v3067_v47 = vmul.f32 1.442695, %v3047_v37  ;;  %v3048_v16 = vsub.f32 %v2879_v19, %v3012_v22 }
 0xc5e   : > { %v3015_v42 = vpop.xlane.xlu0 %3014 }
 0xc5f   : > { %5101 = vpow2.f32 %v3067_v47  ;;  %v3069_v5 = vmul.f32 1.442695, %v3048_v16  ;;  %v3049_v38 = vsub.f32 %v6731_v49, %v3015_v42  ;;  %v3025_v42 = vsel %vm1278_vm1, %v2973_v46, -inf }
 0xc60   : > { %v3018_v61 = vpop.xlane.xlu1 %3017  ;;  %v2968_v49 = vadd.f32 %v2967_v9, %v6686_v11  ;;  %v3037_v11 = vsel %vm1278_vm1, %v6766_v55, -inf  ;;  %v3040_v16 = vsel %vm1278_vm1, %v6770_v21, -inf }
 0xc61   : > { %5103 = vpow2.f32 %v3069_v5  ;;  %v3050_v1 = vsub.f32 %v2887_v32, %v3018_v61  ;;  %v2976_v5 = vadd.f32 %v4580_v25, %v6693_v26  ;;  %v3071_v61 = vmul.f32 1.442695, %v3049_v38 }
 0xc62   : > { %v3093_v24 = vpop.xlane.xlu0 %3092  ;;  %v3019_v25 = vsel %vm1278_vm1, %v2965_v23, -inf  ;;  %v3022_v51 = vsel %vm1278_vm1, %v2968_v49, -inf }
 0xc63   : > { %5105 = vrcp.f32 %v3093_v24  ;;  %v3073_v14 = vmul.f32 1.442695, %v3050_v1  ;;  %v3028_v22 = vsel %vm1278_vm1, %v2976_v5, -inf  ;;  %v3034_v24 = vsel %vm1278_vm1, %v6772_v50, -inf }
 0xc64   : > { %v3096_v59 = vpop.xlane.xlu1 %3095 }
 0xc65   : > { %5107 = vrcp.f32 %v3096_v59 }
 0xc66   : > { %5109 = vpow2.f32 %v3073_v14 }
 0xc67   : > { %5111 = vpow2.f32 %v3071_v61 }
 0xc69   : > { %v6774_v13 = vpop.eup %5101 }
 0xc6a   : > { %v3103_v19 = vsel %vm1278_vm1, %v6774_v13, 0.0 }
 0xc6b   : > { %v6780_v37 = vpop.eup %5103  ;;  %3104 = vadd.xlane.f32.xlu0 %v3103_v19 }
 0xc6c   : > { %v3106_v47 = vsel %vm1278_vm1, %v6780_v37, 0.0 }
 0xc6d   : > { %3107 = vadd.xlane.f32.xlu1 %v3106_v47  ;;  %v5106_v32 = vpop.eup %5105 }
 0xc6e   : > { %v3155_v26 = vmul.f32 %v5106_v32, %v6737_v17 }
 0xc6f   : > { %3026 = vmax.xlane.f32.xlu0 %v3025_v42  ;;  %v5108_v8 = vpop.eup %5107 }
 0xc70   : > { %v3156_v6 = vmul.f32 %v5108_v8, %v6740_v36  ;;  %v6793_v54 = vpop.eup %5109  ;;  %v3031_v36 = vsel %vm1278_vm1, %v6768_v63, -inf }
 0xc71   : > { %3029 = vmax.xlane.f32.xlu1 %v3028_v22  ;;  %v3112_v17 = vsel %vm1278_vm1, %v6793_v54, 0.0  ;;  %v6802_v9 = vpop.eup %5111 }
 0xc72   : > { %v3171_v53 = vpack.c.bf16 %v3156_v6, %v3155_v26  ;;  %v3109_v20 = vsel %vm1278_vm1, %v6802_v9, 0.0 }
 0xc73   : > { %3020 = vmax.xlane.f32.xlu0 %v3019_v25 }
 0xc74   : > { %4593 = vmatprep.mubr.msk.bf16.mxu0 %vm1278_vm1, %v3171_v53 }
 0xc75   : > { %3023 = vmax.xlane.f32.xlu1 %v3022_v51 }
 0xc77   : > { %3038 = vmax.xlane.f32.xlu0 %v3037_v11 }
 0xc79   : > { %3113 = vadd.xlane.f32.xlu1 %v3112_v17 }
 0xc7b   : > { %3032 = vmax.xlane.f32.xlu0 %v3031_v36 }
 0xc7f   : > { %3110 = vadd.xlane.f32.xlu0 %v3109_v20 }
 0xc8a   : > { %3181 = vrot.lane.b32.xlu1 %v5624_v58, %s5223_s23  ;;  %v3099_v58 = vpop.xlane.xlu0 %3098 }
 0xc95   : > { %3179 = vrot.lane.b32.xlu0 %v5626_v40, %s5223_s23  ;;  %v3102_v40 = vpop.xlane.xlu1 %3101 }
 0xc99   : > { %3183 = vrot.lane.b32.xlu0 %v5636_v41, %s5223_s23 }
 0xc9d   : > { %3185 = vrot.lane.b32.xlu0 %v5634_v45, %s5223_s23 }
 0xcae   : > { %3041 = vmax.xlane.f32.xlu1 %v3040_v16 }
 0xcb2   : > { %3035 = vmax.xlane.f32.xlu1 %v3034_v24 }
 0xcc3   : > { %3268 = vrot.lane.b32.xlu1 %v5644_v30, %s5223_s23 }
 0xcc7   : > { %3270 = vrot.lane.b32.xlu1 %v5642_v29, %s5223_s23 }
 0xcf8   : > { %v3105_v41 = vpop.xlane.xlu0 %3104 }
 0xcfa   : > { %v3108_v1 = vpop.xlane.xlu1 %3107 }
 0xcfc   : > { %v3027_v59 = vpop.xlane.xlu0 %3026 }
 0xcfd   : > { %v3053_v45 = vsub.f32 %v2973_v46, %v3027_v59 }
 0xcfe   : > { %v3030_v14 = vpop.xlane.xlu1 %3029 }
 0xcff   : > { %v3079_v38 = vmul.f32 1.442695, %v3053_v45  ;;  %v3054_v19 = vsub.f32 %v2976_v5, %v3030_v14 }
 0xd00   : > { %v3021_v47 = vpop.xlane.xlu0 %3020 }
 0xd01   : > { %5113 = vpow2.f32 %v3079_v38  ;;  %v3051_v61 = vsub.f32 %v2965_v23, %v3021_v47  ;;  %v3081_v42 = vmul.f32 1.442695, %v3054_v19 }
 0xd02   : > { %v3024_v32 = vpop.xlane.xlu1 %3023 }
 0xd03   : > { %v3075_v8 = vmul.f32 1.442695, %v3051_v61  ;;  %v3052_v22 = vsub.f32 %v2968_v49, %v3024_v32 }
 0xd04   : > { %v3039_v30 = vpop.xlane.xlu0 %3038 }
 0xd05   : > { %5115 = vpow2.f32 %v3075_v8  ;;  %v3057_v29 = vsub.f32 %v6766_v55, %v3039_v30  ;;  %v3077_v26 = vmul.f32 1.442695, %v3052_v22 }
 0xd06   : > { %5117 = vpow2.f32 %v3081_v42  ;;  %v3114_v23 = vpop.xlane.xlu1 %3113 }
 0xd07   : > { %v3087_v6 = vmul.f32 1.442695, %v3057_v29 }
 0xd08   : > { %v3033_v25 = vpop.xlane.xlu0 %3032 }
 0xd09   : > { %5119 = vpow2.f32 %v3087_v6  ;;  %v3055_v46 = vsub.f32 %v6768_v63, %v3033_v25 }
 0xd0a   : > { %5121 = vpow2.f32 %v3077_v26  ;;  %v3182_v36 = vpop.permute.xlu1 %3181 }
 0xd0b   : > { %v6824_v53 = vpop.eup %5113  ;;  %v3083_v5 = vmul.f32 1.442695, %v3055_v46 }
 0xd0c   : > { %v3111_v51 = vpop.xlane.xlu0 %3110  ;;  %v3121_v49 = vsel %vm1278_vm1, %v6824_v53, 0.0 }
 0xd0d   : > { %5123 = vpow2.f32 %v3083_v5  ;;  %3122 = vadd.xlane.f32.xlu1 %v3121_v49 }
 0xd0e   : > { %5125 = vrcp.f32 %v3102_v40 }
 0xd0f   : > { %v6828_v55 = vpop.eup %5115  ;;  %5127 = vrcp.f32 %v3108_v1 }
 0xd10   : > { %5129 = vrcp.f32 %v3099_v58  ;;  %v3180_v11 = vpop.permute.xlu0 %3179  ;;  %v3115_v63 = vsel %vm1278_vm1, %v6828_v55, 0.0  ;;  %v6832_v17 = vpop.eup %5117 }
 0xd11   : > { %5131 = vrcp.f32 %v3105_v41  ;;  %3116 = vadd.xlane.f32.xlu1 %v3115_v63  ;;  %4585 = vmatprep.subr.bf16.mxu0 %v3180_v11  ;;  %v3124_v24 = vsel %vm1278_vm1, %v6832_v17, 0.0  ;;  %v7145_v63 = vpack.i.bf16 %v6295_v4, %v6289_v31 }
 0xd12   : > { %4586 = vmatpush3.bf16.msra.mxu0 %v3180_v11  ;;  %5133 = vrcp.f32 %v3111_v51 }
 0xd13   : > { %v6834_v20 = vpop.eup %5119  ;;  %4587 = vmatprep.subr.bf16.mxu0 %v3182_v36  ;;  %5135 = vrcp.f32 %v3114_v23 }
 0xd14   : > { %v3184_v16 = vpop.permute.xlu0 %3183  ;;  %v3133_v58 = vsel %vm1278_vm1, %v6834_v20, 0.0  ;;  %v6840_v40 = vpop.eup %5121 }
 0xd15   : > { %3125 = vadd.xlane.f32.xlu1 %v3124_v24  ;;  %3134 = vadd.xlane.f32.xlu0 %v3133_v58  ;;  %v3118_v59 = vsel %vm1278_vm1, %v6840_v40, 0.0 }
 0xd16   : > { %4588 = vmatpush3.bf16.msra.mxu0 %v3182_v36  ;;  %v7146_v36 = vpack.i.bf16 %v6625_v62, %v6621_v0 }
 0xd17   : > { %v6842_v41 = vpop.eup %5123  ;;  %4589 = vmatprep.subr.bf16.mxu0 %v3184_v16 }
 0xd18   : > { %v5126_v1 = vpop.eup %5125  ;;  %v3127_v45 = vsel %vm1278_vm1, %v6842_v41, 0.0  ;;  %v3186_v19 = vpop.permute.xlu0 %3185 }
 0xd19   : > { %v5128_v14 = vpop.eup %5127  ;;  %3119 = vadd.xlane.f32.xlu1 %v3118_v59  ;;  %3128 = vadd.xlane.f32.xlu0 %v3127_v45  ;;  %v3158_v61 = vmul.f32 %v5126_v1, %v6758_v18 }
 0xd1a   : > { %v5130_v38 = vpop.eup %5129  ;;  %4590 = vmatpush3.bf16.msra.mxu0 %v3184_v16  ;;  %v3160_v32 = vmul.f32 %v5128_v14, %v6780_v37 }
 0xd1b   : > { %v5132_v47 = vpop.eup %5131  ;;  %4591 = vmatprep.subr.bf16.mxu0 %v3186_v19  ;;  %v3157_v42 = vmul.f32 %v5130_v38, %v6748_v12 }
 0xd1c   : > { %v3159_v8 = vmul.f32 %v5132_v47, %v6774_v13  ;;  %v5134_v30 = vpop.eup %5133 }
 0xd1d   : > { %v3172_v22 = vpack.c.bf16 %v3158_v61, %v3157_v42  ;;  %v5136_v26 = vpop.eup %5135  ;;  %v3161_v6 = vmul.f32 %v5134_v30, %v6802_v9 }
 0xd1e   : > { %4592 = vmatpush3.bf16.msra.mxu0 %v3186_v19  ;;  %v3173_v29 = vpack.c.bf16 %v3160_v32, %v3159_v8  ;;  %v3162_v18 = vmul.f32 %v5136_v26, %v6793_v54 }
 0xd20   : > { %v3174_v25 = vpack.c.bf16 %v3162_v18, %v3161_v6 }
 0xd21   : > { %4594 = vmatmul.mubr.msk.bf16.vlgmr.msra.gmra.mrb[56].mxu0 %vm1278_vm1, %v3172_v22 }
 0xd22   : > { %4597 = vmatprep.mubr.msk.bf16.mxu0 %vm1278_vm1, %v3173_v29 }
 0xd29   : > { %4598 = vmatmul.mubr.msk.bf16.gmra.mrb[60].mxu0 %vm1278_vm1, %v3174_v25 }
 0xd3b   : > { %v3042_v37 = vpop.xlane.xlu1 %3041 }
 0xd3c   : > { %v3058_v12 = vsub.f32 %v6770_v21, %v3042_v37 }
 0xd3e   : > { %v3089_v46 = vmul.f32 1.442695, %v3058_v12 }
 0xd3f   : > { %v3036_v13 = vpop.xlane.xlu1 %3035 }
 0xd40   : > { %5137 = vpow2.f32 %v3089_v46  ;;  %v3056_v5 = vsub.f32 %v6772_v50, %v3036_v13  ;;  %v7144_v50 = vpack.i.bf16 %v6291_v3, %v6287_v57  ;;  %v7148_v13 = vpack.i.bf16 %v6317_v27, %v6313_v2 }
 0xd41   : > { %v7151_v2 = vpack.i.bf16 %v6651_v35, %v6645_v7  ;;  %v7153_v27 = vpack.i.bf16 %v6385_v39, %v6379_v15  ;;  %v7157_v7 = vld [vmem:[#allocation28_spill] sm:$0xff]  ;;  %v7158_v35 = vld [vmem:[#allocation26_spill] sm:$0xff] }
 0xd42   : > { %v3085_v23 = vmul.f32 1.442695, %v3056_v5 }
 0xd43   : > { %v3269_v51 = vpop.permute.xlu1 %3268 }
 0xd44   : > { %5139 = vpow2.f32 %v3085_v23  ;;  %4601 = vmatprep.subr.bf16.mxu1 %v3269_v51  ;;  %v7149_v23 = vpack.i.bf16 %v6321_v43, %v6315_v52  ;;  %v7152_v52 = vpack.i.bf16 %v6381_v10, %v6375_v56  ;;  %v7154_v43 = vld [vmem:[#allocation27_spill] sm:$0xff]  ;;  %v7163_v10 = vld [vmem:[#allocation24_spill] sm:$0xff] }
 0xd45   : > { %4602 = vmatpush3.bf16.msra.mxu1 %v3269_v51 }
 0xd47   : > { %v3271_v49 = vpop.permute.xlu1 %3270 }
 0xd48   : > { %4603 = vmatprep.subr.bf16.mxu1 %v3271_v49 }
 0xd49   : > { %4604 = vmatpush3.bf16.msra.mxu1 %v3271_v49 }
 0xd4a   : > { %v5138_v54 = vpop.eup %5137 }
 0xd4b   : > { %v3136_v9 = vsel %vm1278_vm1, %v5138_v54, 0.0 }
 0xd4c   : > { %3137 = vadd.xlane.f32.xlu0 %v3136_v9 }
 0xd4e   : > { %v5140_v11 = vpop.eup %5139 }
 0xd4f   : > { %v3130_v21 = vsel %vm1278_vm1, %v5140_v11, 0.0 }
 0xd50   : > { %3131 = vadd.xlane.f32.xlu1 %v3130_v21  ;;  %v7159_v21 = vpack.i.bf16 %v7157_v7, %v7158_v35  ;;  %v7173_v7 = vld [vmem:[#allocation10_spill] sm:$0xff] }
 0xd61   : > { %3274 = vrot.lane.b32.xlu1 %v5652_v33, %s5223_s23  ;;  %v7147_v33 = vpack.i.bf16 %v6629_v48, %v6623_v60 }
 0xd62   : > { %3272 = vrot.lane.b32.xlu0 %v5654_v34, %s5223_s23  ;;  %v4867_v34 = vld [vmem:[%s7096_s5] sm:$0xff]   ;;  %s4071_s23 = sshll.u32 (%p5325_p6), %s3778_s20, 3 }
 0xd63   : > { %4617 = vmatprep.subr.bf16.mxu0 %v4867_v34  ;;  %s3782_s27 = scalar_lea.vmem (%p5325_p6), %s7100_s9, %s4071_s23 }
 0xd64   : > { %4618 = vmatpush3.bf16.msra.mxu0 %v4867_v34 }
 0xd65   : > { %4745 = vrot.lane.b32.xlu1 %v7144_v50, %s5224_s18  ;;  %v7160_v50 = vld [vmem:[#allocation23_spill] sm:$0xff] }
 0xd66   : > { %4740 = vrot.lane.b32.xlu0 %v7145_v63, %s5224_s18  ;;  %v7161_v63 = vld [vmem:[#allocation21_spill] sm:$0xff] }
 0xd67   : > { %v7162_v56 = vpack.i.bf16 %v7160_v50, %v7161_v63 }
 0xd69   : > { %4755 = vrot.lane.b32.xlu1 %v7146_v36, %s5225_s19  ;;  %v7164_v36 = vld [vmem:[#allocation22_spill] sm:$0xff] }
 0xd6a   : > { %4750 = vrot.lane.b32.xlu0 %v7147_v33, %s5225_s19  ;;  %v7165_v15 = vpack.i.bf16 %v7163_v10, %v7164_v36 }
 0xd9a   : > { %v3123_v57 = vpop.xlane.xlu1 %3122 }
 0xd9e   : > { %v3117_v31 = vpop.xlane.xlu1 %3116 }
 0xd9f   : > { %5141 = vrcp.f32 %v3117_v31 }
 0xda2   : > { %v3126_v3 = vpop.xlane.xlu1 %3125  ;;  %v3135_v48 = vpop.xlane.xlu0 %3134 }
 0xda6   : > { %v3120_v4 = vpop.xlane.xlu1 %3119  ;;  %v3129_v58 = vpop.xlane.xlu0 %3128 }
 0xda7   : > { %5143 = vrcp.f32 %v3120_v4 }
 0xda8   : > { %5145 = vrcp.f32 %v3126_v3 }
 0xda9   : > { %v5142_v16 = vpop.eup %5141  ;;  %5147 = vrcp.f32 %v3123_v57 }
 0xdaa   : > { %v3163_v62 = vmul.f32 %v5142_v16, %v6828_v55 }
 0xdb1   : > { %v5144_v0 = vpop.eup %5143 }
 0xdb2   : > { %v3164_v24 = vmul.f32 %v5144_v0, %v6840_v40  ;;  %v5146_v59 = vpop.eup %5145 }
 0xdb3   : > { %v5148_v38 = vpop.eup %5147  ;;  %v3166_v55 = vmul.f32 %v5146_v59, %v6832_v17 }
 0xdb4   : > { %v3175_v60 = vpack.c.bf16 %v3164_v24, %v3163_v62  ;;  %v3165_v19 = vmul.f32 %v5148_v38, %v6824_v53  ;;  %v4868_v53 = vld [vmem:[%s7096_s5 + $0x8] sm:$0xff]  }
 0xdb5   : > { %4619 = vmatprep.subr.bf16.mxu0 %v4868_v53 }
 0xdb6   : > { %4609 = vmatprep.mubr.msk.bf16.mxu1 %vm1278_vm1, %v3175_v60  ;;  %v3176_v47 = vpack.c.bf16 %v3166_v55, %v3165_v19  ;;  %4620 = vmatpush3.bf16.msra.mxu0 %v4868_v53  ;;  %v7169_v55 = vld [vmem:[#allocation5_spill] sm:$0xff] }
 0xdd9   : > { %v3138_v1 = vpop.xlane.xlu0 %3137 }
 0xdda   : > { %5149 = vrcp.f32 %v3138_v1  ;;  %v7167_v1 = vld [vmem:[#allocation6_spill] sm:$0xff] }
 0xddb   : > { %5151 = vrcp.f32 %v3129_v58 }
 0xddc   : > { %5153 = vrcp.f32 %v3135_v48  ;;  %v7166_v48 = vld [vmem:[#allocation8_spill] sm:$0xff] }
 0xddd   : > { %v3132_v45 = vpop.xlane.xlu1 %3131  ;;  %v3273_v14 = vpop.permute.xlu0 %3272 }
 0xdde   : > { %5155 = vrcp.f32 %v3132_v45  ;;  %4605 = vmatprep.subr.bf16.mxu1 %v3273_v14 }
 0xddf   : > { %4606 = vmatpush3.bf16.msra.mxu1 %v3273_v14  ;;  %v7168_v14 = vld [vmem:[#allocation7_spill] sm:$0xff] }
 0xde1   : > { %v3275_v40 = vpop.permute.xlu1 %3274  ;;  %v4741_v33 = vpop.permute.xlu0 %4740 }
 0xde2   : > { %4607 = vmatprep.subr.bf16.mxu1 %v3275_v40  ;;  %v4743_v57 = vunpack.i.h.bf16 %v4741_v33  ;;  %v4742_v31 = vunpack.i.l.bf16 %v4741_v33 }
 0xde3   : > { %4608 = vmatpush3.bf16.msra.mxu1 %v3275_v40 }
 0xde4   : > { %v5150_v61 = vpop.eup %5149  ;;  %v3550_v58 = vsel %vm1087_vm0, %v7166_v48, %v4743_v57  ;;  %v3549_v59 = vsel %vm1087_vm0, %v7167_v1, %v4742_v31 }
 0xde5   : > { %v5152_v32 = vpop.eup %5151  ;;  %v3170_v22 = vmul.f32 %v5150_v61, %v5138_v54  ;;  %v4746_v39 = vpop.permute.xlu1 %4745 }
 0xde6   : > { %4610 = vmatmul.mubr.msk.bf16.vlgmr.msra.gmra.mrb[72].mxu1 %vm1278_vm1, %v3176_v47  ;;  %v5154_v42 = vpop.eup %5153  ;;  %v3167_v30 = vmul.f32 %v5152_v32, %v6842_v41  ;;  %v4751_v3 = vpop.permute.xlu0 %4750  ;;  %v4748_v4 = vunpack.i.h.bf16 %v4746_v39  ;;  %v4747_v16 = vunpack.i.l.bf16 %v4746_v39 }
 0xde7   : > { %v3169_v26 = vmul.f32 %v5154_v42, %v6834_v20  ;;  %v4753_v24 = vunpack.i.h.bf16 %v4751_v3  ;;  %v4752_v60 = vunpack.i.l.bf16 %v4751_v3 }
 0xde8   : > { %v5156_v8 = vpop.eup %5155  ;;  %v3552_v38 = vsel %vm1087_vm0, %v7168_v14, %v4748_v4  ;;  %v3551_v40 = vsel %vm1087_vm0, %v7169_v55, %v4747_v16  ;;  %v7177_v55 = vld [vmem:[#allocation32_spill] sm:$0xff] }
 0xde9   : > { %v3168_v29 = vmul.f32 %v5156_v8, %v5140_v11  ;;  %v3178_v17 = vpack.c.bf16 %v3170_v22, %v3169_v26  ;;  %v7150_v11 = vpack.i.bf16 %v6647_v28, %v6643_v44  ;;  %v7155_v44 = vld [vmem:[#allocation25_spill] sm:$0xff]  ;;  %v4756_v34 = vpop.permute.xlu1 %4755 }
 0xdea   : > { %v7156_v28 = vpack.i.bf16 %v7154_v43, %v7155_v44  ;;  %v4758_v0 = vunpack.i.h.bf16 %v4756_v34  ;;  %v4757_v62 = vunpack.i.l.bf16 %v4756_v34  ;;  %v7172_v44 = vld [vmem:[#allocation12_spill] sm:$0xff] }
 0xdeb   : > { %v3177_v6 = vpack.c.bf16 %v3168_v29, %v3167_v30  ;;  %v3566_v30 = vsel %vm3565_vm2, %v3549_v59, %v4752_v60  ;;  %v3567_v29 = vsel %vm3565_vm2, %v3550_v58, %v4753_v24  ;;  %v7174_v59 = vld [vmem:[#allocation31_spill] sm:$0xff] }
 0xdec   : > { %v3568_v32 = vsel %vm3565_vm2, %v3551_v40, %v4757_v62  ;;  %v3569_v42 = vsel %vm3565_vm2, %v3552_v38, %v4758_v0  ;;  %v7178_v40 = vld [vmem:[#allocation30_spill] sm:$0xff] }
 0xded   : > { %4613 = vmatprep.mubr.msk.bf16.mxu1 %vm1278_vm1, %v3177_v6 }
 0xdee   : > { %4614 = vmatmul.mubr.msk.bf16.gmra.mrb[76].mxu1 %vm1278_vm1, %v3178_v17 }
 0xdf4   : > { %v4595_v18 = vpop.f32.mrb[56].mxu0 }
 0xdf5   : > { %v3237_v25 = vpop.f32.mrb[57].mxu0 }
 0xdf6   : > { %v4596_v37 = vpop.f32.mrb[58].mxu0 }
 0xdf7   : > { %v4764_v12 = vpack.i.bf16 %v4596_v37, %v4595_v18  ;;  %v3240_v41 = vpop.f32.mrb[59].mxu0 }
 0xdf8   : > { %v4759_v46 = vpack.i.bf16 %v3240_v41, %v3237_v25 }
 0xdf9   : > { %4765 = vrot.lane.b32.xlu1 %v4764_v12, %s5226_s25 }
 0xdfa   : > { %4760 = vrot.lane.b32.xlu0 %v4759_v46, %s5226_s25 }
 0xdfc   : > { %v4599_v20 = vpop.f32.mrb[60].mxu0 }
 0xdfd   : > { %4775 = vrot.lane.b32.xlu1 %v7148_v13, %s5224_s18  ;;  %v3253_v5 = vpop.f32.mrb[61].mxu0 }
 0xdfe   : > { %4770 = vrot.lane.b32.xlu0 %v7149_v23, %s5224_s18  ;;  %v4600_v51 = vpop.f32.mrb[62].mxu0 }
 0xdff   : > { %v4794_v49 = vpack.i.bf16 %v4600_v51, %v4599_v20  ;;  %v3256_v54 = vpop.f32.mrb[63].mxu0 }
 0xe00   : > { %v4789_v9 = vpack.i.bf16 %v3256_v54, %v3253_v5 }
 0xe01   : > { %4785 = vrot.lane.b32.xlu1 %v7150_v11, %s5225_s19  ;;  %v7170_v11 = vld [vmem:[#allocation11_spill] sm:$0xff] }
 0xe02   : > { %4780 = vrot.lane.b32.xlu0 %v7151_v2, %s5225_s19 }
 0xe05   : > { %4795 = vrot.lane.b32.xlu1 %v4794_v49, %s5226_s25 }
 0xe06   : > { %4790 = vrot.lane.b32.xlu0 %v4789_v9, %s5226_s25 }
 0xe09   : > { %4805 = vrot.lane.b32.xlu1 %v7152_v52, %s5224_s18  ;;  %v7171_v52 = vld [vmem:[#allocation9_spill] sm:$0xff] }
 0xe0a   : > { %4800 = vrot.lane.b32.xlu0 %v7153_v27, %s5224_s18 }
 0xe0d   : > { %4815 = vrot.lane.b32.xlu1 %v7156_v28, %s5225_s19 }
 0xe0e   : > { %4810 = vrot.lane.b32.xlu0 %v7159_v21, %s5225_s19 }
 0xe11   : > { %4825 = vrot.lane.b32.xlu1 %v7162_v56, %s5224_s18 }
 0xe12   : > { %4820 = vrot.lane.b32.xlu0 %v7165_v15, %s5224_s18 }
 0xe6b   : > { %v4766_v45 = vpop.permute.xlu1 %4765 }
 0xe6c   : > { %v4768_v19 = vunpack.i.h.bf16 %v4766_v45  ;;  %v4767_v47 = vunpack.i.l.bf16 %v4766_v45  ;;  %v4761_v61 = vpop.permute.xlu0 %4760  ;;  %v7175_v45 = vld [vmem:[#allocation29_spill] sm:$0xff] }
 0xe6d   : > { %v4763_v8 = vunpack.i.h.bf16 %v4761_v61  ;;  %v4762_v22 = vunpack.i.l.bf16 %v4761_v61  ;;  %v7176_v14 = vpack.i.bf16 %v7174_v59, %v7175_v45  ;;  %v7186_v59 = vld [vmem:[#allocation20_spill] sm:$0xff] }
 0xe6e   : > { %v3586_v26 = vsel %vm3582_vm3, %v3569_v42, %v4768_v19  ;;  %v3585_v6 = vsel %vm3582_vm3, %v3568_v32, %v4767_v47  ;;  %v7179_v19 = vpack.i.bf16 %v7177_v55, %v7178_v40 }
 0xe6f   : > { %v3600_v17 = vpack.c.bf16 %v3586_v26, %v3585_v6  ;;  %v3583_v53 = vsel %vm3582_vm3, %v3566_v30, %v4762_v22  ;;  %v3584_v18 = vsel %vm3582_vm3, %v3567_v29, %v4763_v8  ;;  %v4776_v25 = vpop.permute.xlu1 %4775 }
 0xe70   : > { %v3599_v37 = vpack.c.bf16 %v3584_v18, %v3583_v53  ;;  %v4771_v12 = vpop.permute.xlu0 %4770  ;;  %v4778_v41 = vunpack.i.h.bf16 %v4776_v25  ;;  %v4777_v46 = vunpack.i.l.bf16 %v4776_v25 }
 0xe71   : > { %v4773_v13 = vunpack.i.h.bf16 %v4771_v12  ;;  %v4772_v5 = vunpack.i.l.bf16 %v4771_v12 }
 0xe72   : > { %4621 = vmatprep.mubr.msk.bf16.mxu0 %vm3630_vm4, %v3599_v37  ;;  %v3556_v2 = vsel %vm1087_vm0, %v7170_v11, %v4778_v41  ;;  %v3555_v27 = vsel %vm1087_vm0, %v7171_v52, %v4777_v46 }
 0xe73   : > { %v4786_v20 = vpop.permute.xlu1 %4785  ;;  %4622 = vmatmul.mubr.msk.bf16.vlgmr.msra.gmra.mrb[64].mxu0 %vm3630_vm4, %v3600_v17  ;;  %v3554_v28 = vsel %vm1087_vm0, %v7172_v44, %v4773_v13  ;;  %v3553_v35 = vsel %vm1087_vm0, %v7173_v7, %v4772_v5  ;;  %v7181_v5 = vld [vmem:[#allocation13_spill] sm:$0xff] }
 0xe74   : > { %v4781_v23 = vpop.permute.xlu0 %4780  ;;  %v4788_v51 = vunpack.i.h.bf16 %v4786_v20  ;;  %v4787_v49 = vunpack.i.l.bf16 %v4786_v20  ;;  %v7180_v20 = vld [vmem:[#allocation15_spill] sm:$0xff] }
 0xe75   : > { %v4783_v54 = vunpack.i.h.bf16 %v4781_v23  ;;  %v4782_v9 = vunpack.i.l.bf16 %v4781_v23 }
 0xe76   : > { %v3572_v56 = vsel %vm3565_vm2, %v3555_v27, %v4787_v49  ;;  %v3573_v10 = vsel %vm3565_vm2, %v3556_v2, %v4788_v51  ;;  %v7182_v51 = vld [vmem:[#allocation16_spill] sm:$0xff] }
 0xe77   : > { %v4796_v43 = vpop.permute.xlu1 %4795  ;;  %v3570_v39 = vsel %vm3565_vm2, %v3553_v35, %v4782_v9  ;;  %v3571_v33 = vsel %vm3565_vm2, %v3554_v28, %v4783_v54  ;;  %v7183_v9 = vld [vmem:[#allocation14_spill] sm:$0xff] }
 0xe78   : > { %v4798_v21 = vunpack.i.h.bf16 %v4796_v43  ;;  %v4797_v50 = vunpack.i.l.bf16 %v4796_v43  ;;  %v4791_v63 = vpop.permute.xlu0 %4790 }
 0xe79   : > { %v4793_v36 = vunpack.i.h.bf16 %v4791_v63  ;;  %v4792_v15 = vunpack.i.l.bf16 %v4791_v63 }
 0xe7a   : > { %v3590_v34 = vsel %vm3582_vm3, %v3573_v10, %v4798_v21  ;;  %v3589_v57 = vsel %vm3582_vm3, %v3572_v56, %v4797_v50 }
 0xe7b   : > { %v3602_v31 = vpack.c.bf16 %v3590_v34, %v3589_v57  ;;  %v3587_v3 = vsel %vm3582_vm3, %v3570_v39, %v4792_v15  ;;  %v3588_v4 = vsel %vm3582_vm3, %v3571_v33, %v4793_v36  ;;  %v4806_v8 = vpop.permute.xlu1 %4805 }
 0xe7c   : > { %v3601_v16 = vpack.c.bf16 %v3588_v4, %v3587_v3  ;;  %v4801_v22 = vpop.permute.xlu0 %4800  ;;  %v4808_v26 = vunpack.i.h.bf16 %v4806_v8  ;;  %v4807_v6 = vunpack.i.l.bf16 %v4806_v8 }
 0xe7d   : > { %v4803_v17 = vunpack.i.h.bf16 %v4801_v22  ;;  %v4802_v18 = vunpack.i.l.bf16 %v4801_v22 }
 0xe7e   : > { %4625 = vmatprep.mubr.msk.bf16.mxu0 %vm3630_vm4, %v3601_v16  ;;  %v3560_v13 = vsel %vm1087_vm0, %v7180_v20, %v4808_v26  ;;  %v3559_v23 = vsel %vm1087_vm0, %v7181_v5, %v4807_v6 }
 0xe7f   : > { %4626 = vmatmul.mubr.msk.bf16.gmra.mrb[68].mxu0 %vm3630_vm4, %v3602_v31  ;;  %v4816_v30 = vpop.permute.xlu1 %4815  ;;  %v3558_v49 = vsel %vm1087_vm0, %v7182_v51, %v4803_v17  ;;  %v3557_v11 = vsel %vm1087_vm0, %v7183_v9, %v4802_v18  ;;  %v4057_v18 = vld [vmem:[%s7097_s6] ss:$0 sm:$0xff] }
 0xe80   : > { %v4811_v29 = vpop.permute.xlu0 %4810  ;;  %v4817_v25 = vunpack.i.l.bf16 %v4816_v30  ;;  %v4818_v12 = vunpack.i.h.bf16 %v4816_v30 }
 0xe81   : > { %v4812_v41 = vunpack.i.l.bf16 %v4811_v29  ;;  %v4813_v46 = vunpack.i.h.bf16 %v4811_v29 }
 0xe82   : > { %v3576_v2 = vsel %vm3565_vm2, %v3559_v23, %v4817_v25  ;;  %v3577_v44 = vsel %vm3565_vm2, %v3560_v13, %v4818_v12 }
 0xe83   : > { %v4826_v53 = vpop.permute.xlu1 %4825  ;;  %v3574_v28 = vsel %vm3565_vm2, %v3557_v11, %v4812_v41  ;;  %v3575_v21 = vsel %vm3565_vm2, %v3558_v49, %v4813_v46 }
 0xe84   : > { %v4821_v37 = vpop.permute.xlu0 %4820  ;;  %v4828_v50 = vunpack.i.h.bf16 %v4826_v53  ;;  %v4827_v10 = vunpack.i.l.bf16 %v4826_v53 }
 0xe85   : > { %v4823_v34 = vunpack.i.h.bf16 %v4821_v37  ;;  %v4822_v57 = vunpack.i.l.bf16 %v4821_v37 }
 0xe87   : > { %v3562_v45 = vsel %vm1087_vm0, %v7186_v59, %v4823_v34 }
 0xeb9   : > { %v4611_v0 = vpop.f32.mrb[72].mxu1 }
 0xeba   : > { %v3326_v62 = vpop.f32.mrb[73].mxu1 }
 0xebb   : > { %v4612_v24 = vpop.f32.mrb[74].mxu1 }
 0xebc   : > { %v4829_v60 = vpack.i.bf16 %v4612_v24, %v4611_v0  ;;  %v3329_v48 = vpop.f32.mrb[75].mxu1  ;;  %v7184_v24 = vld [vmem:[#allocation19_spill] sm:$0xff] }
 0xebd   : > { %v4834_v58 = vpack.i.bf16 %v3329_v48, %v3326_v62  ;;  %v7185_v48 = vld [vmem:[#allocation17_spill] sm:$0xff] }
 0xebe   : > { %4830 = vrot.lane.b32.xlu1 %v4829_v60, %s5226_s25  ;;  %v3564_v60 = vsel %vm1087_vm0, %v7184_v24, %v4828_v50 }
 0xebf   : > { %4835 = vrot.lane.b32.xlu0 %v4834_v58, %s5226_s25  ;;  %v3563_v58 = vsel %vm1087_vm0, %v7185_v48, %v4827_v10 }
 0xec1   : > { %v4615_v1 = vpop.f32.mrb[76].mxu1 }
 0xec2   : > { %4845 = vrot.lane.b32.xlu1 %v7176_v14, %s5225_s19  ;;  %v3342_v38 = vpop.f32.mrb[77].mxu1  ;;  %v7187_v14 = vld [vmem:[#allocation18_spill] sm:$0xff] }
 0xec3   : > { %4840 = vrot.lane.b32.xlu0 %v7179_v19, %s5225_s19  ;;  %v4616_v47 = vpop.f32.mrb[78].mxu1 }
 0xec4   : > { %v4854_v61 = vpack.i.bf16 %v4616_v47, %v4615_v1  ;;  %v3345_v32 = vpop.f32.mrb[79].mxu1 }
 0xec5   : > { %v4849_v42 = vpack.i.bf16 %v3345_v32, %v3342_v38  ;;  %v3561_v38 = vsel %vm1087_vm0, %v7187_v14, %v4822_v57 }
 0xec6   : > { %4855 = vrot.lane.b32.xlu1 %v4854_v61, %s5226_s25 }
 0xec7   : > { %4850 = vrot.lane.b32.xlu0 %v4849_v42, %s5226_s25 }
 0xf30   : > { %v4831_v54 = vpop.permute.xlu1 %4830 }
 0xf31   : > { %v4833_v52 = vunpack.i.h.bf16 %v4831_v54  ;;  %v4832_v27 = vunpack.i.l.bf16 %v4831_v54  ;;  %v4836_v43 = vpop.permute.xlu0 %4835 }
 0xf32   : > { %v4838_v7 = vunpack.i.h.bf16 %v4836_v43  ;;  %v4837_v35 = vunpack.i.l.bf16 %v4836_v43 }
 0xf33   : > { %v3594_v63 = vsel %vm3582_vm3, %v3577_v44, %v4833_v52  ;;  %v3593_v56 = vsel %vm3582_vm3, %v3576_v2, %v4832_v27 }
 0xf34   : > { %v3604_v36 = vpack.c.bf16 %v3594_v63, %v3593_v56  ;;  %v3591_v15 = vsel %vm3582_vm3, %v3574_v28, %v4837_v35  ;;  %v3592_v39 = vsel %vm3582_vm3, %v3575_v21, %v4838_v7  ;;  %v4846_v33 = vpop.permute.xlu1 %4845 }
 0xf35   : > { %v3603_v31 = vpack.c.bf16 %v3592_v39, %v3591_v15  ;;  %v4841_v3 = vpop.permute.xlu0 %4840  ;;  %v4848_v4 = vunpack.i.h.bf16 %v4846_v33  ;;  %v4847_v16 = vunpack.i.l.bf16 %v4846_v33 }
 0xf36   : > { %v4843_v0 = vunpack.i.h.bf16 %v4841_v3  ;;  %v4842_v62 = vunpack.i.l.bf16 %v4841_v3 }
 0xf37   : > { %4629 = vmatprep.mubr.msk.bf16.mxu0 %vm3630_vm4, %v3603_v31  ;;  %v3581_v47 = vsel %vm3565_vm2, %v3564_v60, %v4848_v4  ;;  %v3580_v61 = vsel %vm3565_vm2, %v3563_v58, %v4847_v16 }
 0xf38   : > { %v4856_v1 = vpop.permute.xlu1 %4855  ;;  %4630 = vmatmul.mubr.msk.bf16.gmra.mrb[72].mxu0 %vm3630_vm4, %v3604_v36  ;;  %v3578_v8 = vsel %vm3565_vm2, %v3561_v38, %v4842_v62  ;;  %v3579_v22 = vsel %vm3565_vm2, %v3562_v45, %v4843_v0 }
 0xf39   : > { %v4858_v55 = vunpack.i.h.bf16 %v4856_v1  ;;  %v4857_v40 = vunpack.i.l.bf16 %v4856_v1  ;;  %v4851_v19 = vpop.permute.xlu0 %4850 }
 0xf3a   : > { %v4853_v32 = vunpack.i.h.bf16 %v4851_v19  ;;  %v4852_v42 = vunpack.i.l.bf16 %v4851_v19 }
 0xf3b   : > { %v3598_v30 = vsel %vm3582_vm3, %v3581_v47, %v4858_v55  ;;  %v3597_v29 = vsel %vm3582_vm3, %v3580_v61, %v4857_v40 }
 0xf3c   : > { %v3606_v26 = vpack.c.bf16 %v3598_v30, %v3597_v29  ;;  %v3595_v6 = vsel %vm3582_vm3, %v3578_v8, %v4852_v42  ;;  %v3596_v17 = vsel %vm3582_vm3, %v3579_v22, %v4853_v32 }
 0xf3d   : > { %v3605_v53 = vpack.c.bf16 %v3596_v17, %v3595_v6 }
 0xf3f   : > { %4633 = vmatprep.mubr.msk.bf16.mxu0 %vm3630_vm4, %v3605_v53 }
 0xf40   : > { %4634 = vmatmul.mubr.msk.bf16.gmra.mrb[76].mxu0 %vm3630_vm4, %v3606_v26 }
 0xf46   : > { %v4623_v25 = vpop.f32.mrb[64].mxu0 }
 0xf47   : > { %v3698_v37 = vadd.f32 %v4623_v25, %v4057_v18  ;;  %v3689_v12 = vpop.f32.mrb[65].mxu0 }
 0xf48   : > { %v3690_v41 = vadd.f32 %v4057_v18, %v3689_v12  ;;  %v4624_v46 = vpop.f32.mrb[66].mxu0 }
 0xf49   : > { %3754 = vst [vmem:[%s7029_s29 + $0x10] sm:$0xff] %v3698_v37  ;;  %v3701_v20 = vadd.f32 %v4624_v46, %v4057_v18  ;;  %v3692_v13 = vpop.f32.mrb[67].mxu0 }
 0xf4a   : > { %3752 = vst [vmem:[%s7029_s29] sm:$0xff] %v3690_v41  ;;  %v3693_v5 = vadd.f32 %v4057_v18, %v3692_v13 }
 0xf4b   : > { %3755 = vst [vmem:[%s7029_s29 + $0x18] sm:$0xff] %v3701_v20 }
 0xf4c   : > { %3753 = vst [vmem:[%s7029_s29 + $0x8] sm:$0xff] %v3693_v5 }
 0xf50   : > { %v3844_v3 = vld [vmem:[%s7029_s29 + $0x10] sm:$0xff] (%p5325_p6) }
 0xf51   : > { %v3840_v57 = vld [vmem:[%s7029_s29] sm:$0xff] (%p5325_p6)  ;;  %3845 = vst [vmem:[%s3782_s27 + $0x20] sm:$0xff] (%p5325_p6), %v3844_v3 }
 0xf52   : > { %v4627_v23 = vpop.f32.mrb[68].mxu0  ;;  %v3846_v4 = vld [vmem:[%s7029_s29 + $0x18] sm:$0xff] (%p5325_p6)  ;;  %3841 = vst [vmem:[%s3782_s27] sm:$0xff] (%p5325_p6), %v3840_v57 }
 0xf53   : > { %v3714_v51 = vadd.f32 %v4627_v23, %v4057_v18  ;;  %v3705_v49 = vpop.f32.mrb[69].mxu0  ;;  %v3842_v31 = vld [vmem:[%s7029_s29 + $0x8] sm:$0xff] (%p5325_p6)  ;;  %3847 = vst [vmem:[%s3782_s27 + $0x30] sm:$0xff] (%p5325_p6), %v3846_v4 }
 0xf54   : > { %v3706_v54 = vadd.f32 %v4057_v18, %v3705_v49  ;;  %v4628_v9 = vpop.f32.mrb[70].mxu0  ;;  %3843 = vst [vmem:[%s3782_s27 + $0x10] sm:$0xff] (%p5325_p6), %v3842_v31 }
 0xf55   : > { %3758 = vst [vmem:[%s7029_s29 + $0x30] sm:$0xff] %v3714_v51  ;;  %v3717_v11 = vadd.f32 %v4628_v9, %v4057_v18  ;;  %v3708_v2 = vpop.f32.mrb[71].mxu0 }
 0xf56   : > { %3756 = vst [vmem:[%s7029_s29 + $0x20] sm:$0xff] %v3706_v54  ;;  %v3709_v52 = vadd.f32 %v4057_v18, %v3708_v2 }
 0xf57   : > { %3759 = vst [vmem:[%s7029_s29 + $0x38] sm:$0xff] %v3717_v11 }
 0xf58   : > { %3757 = vst [vmem:[%s7029_s29 + $0x28] sm:$0xff] %v3709_v52 }
 0xf5c   : > { %v3852_v62 = vld [vmem:[%s7029_s29 + $0x30] sm:$0xff] (%p5325_p6) }
 0xf5d   : > { %v3848_v16 = vld [vmem:[%s7029_s29 + $0x20] sm:$0xff] (%p5325_p6)  ;;  %3853 = vst [vmem:[%s3782_s27 + $0x60] sm:$0xff] (%p5325_p6), %v3852_v62 }
 0xf5e   : > { %v3854_v24 = vld [vmem:[%s7029_s29 + $0x38] sm:$0xff] (%p5325_p6)  ;;  %3849 = vst [vmem:[%s3782_s27 + $0x40] sm:$0xff] (%p5325_p6), %v3848_v16 }
 0xf5f   : > { %v3850_v0 = vld [vmem:[%s7029_s29 + $0x28] sm:$0xff] (%p5325_p6)  ;;  %3855 = vst [vmem:[%s3782_s27 + $0x70] sm:$0xff] (%p5325_p6), %v3854_v24 }
 0xf60   : > { %3851 = vst [vmem:[%s3782_s27 + $0x50] sm:$0xff] (%p5325_p6), %v3850_v0 }
0x100b   : > { %v4631_v27 = vpop.f32.mrb[72].mxu0 }
0x100c   : > { %v3730_v43 = vadd.f32 %v4631_v27, %v4057_v18  ;;  %v3721_v44 = vpop.f32.mrb[73].mxu0 }
0x100d   : > { %v3722_v28 = vadd.f32 %v4057_v18, %v3721_v44  ;;  %v4632_v7 = vpop.f32.mrb[74].mxu0 }
0x100e   : > { %3762 = vst [vmem:[%s7029_s29 + $0x50] sm:$0xff] %v3730_v43  ;;  %v3733_v35 = vadd.f32 %v4632_v7, %v4057_v18  ;;  %v3724_v21 = vpop.f32.mrb[75].mxu0 }
0x100f   : > { %3760 = vst [vmem:[%s7029_s29 + $0x40] sm:$0xff] %v3722_v28  ;;  %v3725_v50 = vadd.f32 %v4057_v18, %v3724_v21 }
0x1010   : > { %3763 = vst [vmem:[%s7029_s29 + $0x58] sm:$0xff] %v3733_v35 }
0x1011   : > { %3761 = vst [vmem:[%s7029_s29 + $0x48] sm:$0xff] %v3725_v50 }
0x1013   : > { %v4635_v63 = vpop.f32.mrb[76].mxu0  ;;  %3774 = sbr.rel (!%p5325_p6) target bundleno = 4130 (0x1022), region = 98 }
0x1014   : > { %v3746_v56 = vadd.f32 %v4635_v63, %v4057_v18  ;;  %v3737_v10 = vpop.f32.mrb[77].mxu0 }
0x1015   : > { %v3738_v36 = vadd.f32 %v4057_v18, %v3737_v10  ;;  %v4636_v15 = vpop.f32.mrb[78].mxu0  ;;  %v3860_v58 = vld [vmem:[%s7029_s29 + $0x50] sm:$0xff] (%p5325_p6) }
0x1016   : > { %3766 = vst [vmem:[%s7029_s29 + $0x70] sm:$0xff] %v3746_v56  ;;  %v3749_v39 = vadd.f32 %v4636_v15, %v4057_v18  ;;  %v3740_v33 = vpop.f32.mrb[79].mxu0  ;;  %v3856_v60 = vld [vmem:[%s7029_s29 + $0x40] sm:$0xff] (%p5325_p6)  ;;  %3861 = vst [vmem:[%s3782_s27 + $0x120] sm:$0xff] (%p5325_p6), %v3860_v58 }
0x1017   : > { %3764 = vst [vmem:[%s7029_s29 + $0x60] sm:$0xff] %v3738_v36  ;;  %v3741_v34 = vadd.f32 %v4057_v18, %v3740_v33  ;;  %v3862_v1 = vld [vmem:[%s7029_s29 + $0x58] sm:$0xff] (%p5325_p6)  ;;  %3857 = vst [vmem:[%s3782_s27 + $0x100] sm:$0xff] (%p5325_p6), %v3856_v60 }
0x1018   : > { %3767 = vst [vmem:[%s7029_s29 + $0x78] sm:$0xff] %v3749_v39  ;;  %v3858_v48 = vld [vmem:[%s7029_s29 + $0x48] sm:$0xff] (%p5325_p6)  ;;  %3863 = vst [vmem:[%s3782_s27 + $0x130] sm:$0xff] (%p5325_p6), %v3862_v1 }
0x1019   : > { %3765 = vst [vmem:[%s7029_s29 + $0x68] sm:$0xff] %v3741_v34  ;;  %3859 = vst [vmem:[%s3782_s27 + $0x110] sm:$0xff] (%p5325_p6), %v3858_v48 }
0x101d   : > { %v3868_v14 = vld [vmem:[%s7029_s29 + $0x70] sm:$0xff] }
0x101e   : > { %v3864_v59 = vld [vmem:[%s7029_s29 + $0x60] sm:$0xff]  ;;  %3869 = vst [vmem:[%s3782_s27 + $0x160] sm:$0xff] %v3868_v14 }
0x101f   : > { %3865 = vst [vmem:[%s3782_s27 + $0x140] sm:$0xff] %v3864_v59  ;;  %v3870_v38 = vld [vmem:[%s7029_s29 + $0x78] sm:$0xff] }
0x1020   : > { %v3866_v45 = vld [vmem:[%s7029_s29 + $0x68] sm:$0xff]  ;;  %3871 = vst [vmem:[%s3782_s27 + $0x170] sm:$0xff] %v3870_v38 }
0x1021   : > { %3867 = vst [vmem:[%s3782_s27 + $0x150] sm:$0xff] %v3866_v45 }
0x1022 PF: > { %s19_s15 = sadd.s32 1, %s5211_s15   ;;  %s7188_s21 = sld [smem:[#allocation4_spill]] }
0x1023   : > { %p16_p13 = scmp.ge.s32.totalorder %s19_s15, 6   ;;  %s7189_s30 = smov %s5191_s10 }
0x1024   : > { %s7190_s10 = smov %s5333_s24  ;;  %s7191_s11 = smov %s5203_s13 }
0x1025   : > { %s7192_s12 = smov %s5207_s14  ;;  %s7194_s14 = smov %s7200_s17 }
0x1026   :  { %18 = sbr.rel (!%p16_p13) target bundleno = 4 (0x4), region = 170 }
0x1028   : > { %s7193_s13 = smov %s7188_s21 }

</bundles_post_ra>
